<compile_context>
chip_gen: v6e
topology: v6e:2x2x1
jax: 0.10.0
libtpu: 0.0.40
codegen_flags: <defaults>
</compile_context>

<pallas_src>
import functools

import jax
import jax.numpy as jnp
import numpy as np
from jax import lax
from jax.experimental import pallas as pl
from jax.experimental.pallas import tpu as pltpu

EPS = 1e-5
LANE = 128


def _round_up(x, m):
    return (x + m - 1) // m * m


def _cdiv(a, b):
    return (a + b - 1) // b


def _vmem_limit_bytes():
    """Per-generation scoped-VMEM limit: ~3/4 of physical VMEM, capped at 100 MiB.
    (v5e/v6e 128 MiB -> 96 MiB, v7x 64 MiB -> 48 MiB). v7x-safe fallback if the query fails."""
    cap = 64 * 1024 * 1024
    try:
        cap = int(getattr(pltpu.get_tpu_info(), "vmem_capacity_bytes", cap))
    except Exception:
        pass
    return int(min(100 * 1024 * 1024, max(32 * 1024 * 1024, cap * 3 // 4)))


def _scale_shift(stats_ref, g_ref, b_ref, inv_m):
    """Fold global batch stats (sum / sumsq rows) + affine params into y = x*scale + shift."""
    mean = stats_ref[0:1, :] * inv_m
    var = jnp.maximum(stats_ref[1:2, :] * inv_m - mean * mean, 0.0)   # one-pass E[x^2]-mean^2
    scale = g_ref[...] * lax.rsqrt(var + EPS)                         # rsqrt -> EUP slot (free)
    shift = b_ref[...] - mean * scale
    return scale, shift


def _masked_rows(v, total_rows, block_rows, need_mask):
    """Zero rows beyond the valid extent of a ragged last tile (stats only; matmul rows are
    independent and OOB output writes are dropped, so only the reductions need masking)."""
    if not need_mask:
        return v
    valid = total_rows - pl.program_id(0) * block_rows
    rid = lax.broadcasted_iota(jnp.int32, v.shape, 0)
    return jnp.where(rid < valid, v, 0.0)


def _store_partial_stats(s_ref, v):
    """Write this tile's (sum, sumsq) partial rows. No accumulator / no pl.when init, so the
    grid axis stays 'parallel' and shards across v7x's two TensorCores."""
    s_ref[0:1, 0:1, :] = jnp.sum(v, axis=0, keepdims=True).reshape(1, 1, -1)
    s_ref[0:1, 1:2, :] = jnp.sum(v * v, axis=0, keepdims=True).reshape(1, 1, -1)


# ---------------- pass A: per-channel partial sum / sum-of-squares of x (BN1 stats) ----------
def _stats_kernel(x_ref, s_ref, *, total_rows, block_rows, need_mask):
    x = _masked_rows(x_ref[...], total_rows, block_rows, need_mask)
    _store_partial_stats(s_ref, x)


# -------- pass B: BN1 + ReLU + 1x1 conv ; emit partial BN2 stats of the result --------
def _conv1_kernel(x_ref, s1_ref, g1_ref, b1_ref, w1_ref, h_ref, s2_ref, *,
                  inv_m, total_rows, block_rows, need_mask):
    scale, shift = _scale_shift(s1_ref, g1_ref, b1_ref, inv_m)
    a = jnp.maximum(x_ref[...] * scale + shift, 0.0)
    h = jnp.dot(a.astype(jnp.bfloat16), w1_ref[...],
                preferred_element_type=jnp.float32)                 # (t, CBP) f32
    h_ref[...] = h.astype(h_ref.dtype)                              # bf16 store: half HBM bytes
    _store_partial_stats(s2_ref, _masked_rows(h, total_rows, block_rows, need_mask))


# -------- pass C: BN2 + ReLU + 3x3 conv (bf16 im2col, one matmul) ; partial BN3 stats --------
def _conv3_kernel(h1_ref, s2_ref, g2_ref, b2_ref, w2_ref, h2_ref, s3_ref, pad_ref,
                  *, inv_m, G, H, W, CBP):
    scale, shift = _scale_shift(s2_ref, g2_ref, b2_ref, inv_m)
    a = jnp.maximum(h1_ref[...].astype(jnp.float32) * scale + shift, 0.0)   # (G*H*W, CBP)

    # Zero ONLY the 1-pixel border each step: the interior is fully overwritten below, and a
    # program_id==0-gated full clear would be unsafe on a core-sharded ("parallel") grid.
    zrow = jnp.zeros((G, 1, W + 2, CBP), pad_ref.dtype)
    zcol = jnp.zeros((G, H + 2, 1, CBP), pad_ref.dtype)
    pad_ref[:, 0:1, :, :] = zrow
    pad_ref[:, H + 1:H + 2, :, :] = zrow
    pad_ref[:, :, 0:1, :] = zcol
    pad_ref[:, :, W + 1:W + 2, :] = zcol
    pad_ref[:, 1:H + 1, 1:W + 1, :] = a.reshape(G, H, W, CBP).astype(pad_ref.dtype)

    # bf16 im2col: 9 shifted (G, H, W, CBP) views -> (G*H*W, 9*CBP) -> ONE MXU matmul.
    # TODO(synk): on v7x (MRB in-place accumulate) 9 accumulating dots would avoid this buffer;
    #             on v5e, if MXU-bound at tiny Cb, pack the true 9*Cb channels before padding.
    taps = [pad_ref[:, ky:ky + H, kx:kx + W, :] for ky in range(3) for kx in range(3)]
    im2col = jnp.concatenate(taps, axis=-1).reshape(G * H * W, 9 * CBP)
    h2 = jnp.dot(im2col, w2_ref[...], preferred_element_type=jnp.float32)   # (G*H*W, CBP) f32
    h2_ref[...] = h2.astype(h2_ref.dtype)                                   # bf16 store
    _store_partial_stats(s3_ref, h2)


# -------- pass D: BN3 + ReLU + 1x1 conv + residual add --------
def _conv_out_kernel(h2_ref, x_ref, s3_ref, g3_ref, b3_ref, w3_ref, o_ref, *, inv_m):
    scale, shift = _scale_shift(s3_ref, g3_ref, b3_ref, inv_m)
    a = jnp.maximum(h2_ref[...].astype(jnp.float32) * scale + shift, 0.0)
    y = jnp.dot(a.astype(jnp.bfloat16), w3_ref[...], preferred_element_type=jnp.float32)
    o_ref[...] = y + x_ref[...]


def basic_block(x_nhwc, params, *, tm=1024):
    N, H, W, Cin = x_nhwc.shape
    Cb = params["w1"].shape[1]
    Cout = params["w3"].shape[1]
    assert Cout == Cin, "residual add requires in_planes == out_planes (stride == 1)"

    CP = _round_up(Cin, LANE)     # padded input/output channels (lane-dense)
    CBP = _round_up(Cb, LANE)     # padded bottleneck channels
    HW = H * W
    M = N * HW
    inv_m = 1.0 / M

    # ---- boundary layout plumbing: lane-dense 128-padded channels, bf16 weights ----
    x_flat = jnp.pad(x_nhwc.reshape(M, Cin).astype(jnp.float32), ((0, 0), (0, CP - Cin)))

    def pad_w(w, r, c):
        return jnp.pad(w, ((0, r - w.shape[0]), (0, c - w.shape[1]))).astype(jnp.bfloat16)

    w1p = pad_w(params["w1"], CP, CBP)                                   # (CP, CBP)
    w3p = pad_w(params["w3"], CBP, CP)                                   # (CBP, CP)
    w2 = params["w2"].reshape(3, 3, Cb, Cb)
    w2p = jnp.zeros((3, 3, CBP, CBP), jnp.float32).at[:, :, :Cb, :Cb].set(w2)
    w2p = w2p.reshape(9 * CBP, CBP).astype(jnp.bfloat16)                 # (9*CBP, CBP)

    def pad_v(v, c, fill):
        return jnp.pad(v, ((0, 0), (0, c - v.shape[1])),
                       constant_values=fill).astype(jnp.float32)

    g1 = pad_v(params["g1"], CP, 1.0);  b1 = pad_v(params["b1"], CP, 0.0)
    g2 = pad_v(params["g2"], CBP, 1.0); b2 = pad_v(params["b2"], CBP, 0.0)
    g3 = pad_v(params["g3"], CBP, 1.0); b3 = pad_v(params["b3"], CBP, 0.0)

    vmem_limit = _vmem_limit_bytes()
    cp_par = pltpu.CompilerParams(dimension_semantics=("parallel",),
                                  vmem_limit_bytes=vmem_limit)

    # ---- M-row tiles: multiple of 16, VMEM-budget capped; full extent if M is small ----
    def pick_rows(target, bytes_per_row):
        cap = max(16, (vmem_limit // 3 // max(bytes_per_row, 1)) // 16 * 16)
        t = max(16, min(target, cap) // 16 * 16)
        return M if M <= t else t

    t_a = pick_rows(max(4 * tm, tm), 2 * CP * 4)                         # pass A: x only
    t = pick_rows(tm, 2 * (2 * CP * 4 + 2 * CBP * 2))                    # passes B / D
    grid_a, mask_a = _cdiv(M, t_a), (M % t_a != 0)
    grid_m, mask_m = _cdiv(M, t), (M % t != 0)

    # ---- pass-C image group: >=512-row MXU calls, capped by VMEM; G must divide N ----
    def pick_group():
        def footprint(g):
            rows = g * HW
            return (rows * 9 * CBP * 2                       # bf16 im2col temp
                    + g * (H + 2) * (W + 2) * CBP * 2        # bf16 pad scratch
                    + 4 * rows * CBP * 2                     # double-buffered h1/h2 blocks
                    + 2 * rows * CBP * 4)                    # f32 activation / matmul temps
        best = 1
        for g in range(1, N + 1):
            if N % g:
                continue
            if footprint(g) > vmem_limit // 2:
                break
            best = g
            if g * HW >= 512:
                break
        return best

    G = pick_group()
    if (G * HW) % 16 and G != N:
        G = N          # full-extent block is always layout-legal (odd spatial sizes)
    grid_c = N // G

    def rep(shape):    # grid-invariant operand (weights / stats / gamma / beta)
        return pl.BlockSpec(shape, lambda i: (0, 0))

    def stats_spec(c):  # per-tile partial stats block
        return pl.BlockSpec((1, 2, c), lambda i: (i, 0, 0))

    row_x_a = pl.BlockSpec((t_a, CP), lambda i: (i, 0))
    row_x = pl.BlockSpec((t, CP), lambda i: (i, 0))
    row_h = pl.BlockSpec((t, CBP), lambda i: (i, 0))
    img_h = pl.BlockSpec((G * HW, CBP), lambda n: (n, 0))

    # ---------------- pass A: partial BN1 stats ----------------
    p1 = pl.pallas_call(
        functools.partial(_stats_kernel, total_rows=M, block_rows=t_a, need_mask=mask_a),
        grid=(grid_a,),
        in_specs=[row_x_a],
        out_specs=stats_spec(CP),
        out_shape=jax.ShapeDtypeStruct((grid_a, 2, CP), jnp.float32),
        compiler_params=cp_par,
        cost_estimate=pl.CostEstimate(flops=int(3 * M * CP), transcendentals=0,
                                      bytes_accessed=int(4 * M * CP)),
    )(x_flat)
    stats1 = jnp.sum(p1, axis=0)

    # ---------------- pass B: BN1 + ReLU + 1x1 conv, partial BN2 stats ----------------
    h1, p2 = pl.pallas_call(
        functools.partial(_conv1_kernel, inv_m=inv_m, total_rows=M, block_rows=t,
                          need_mask=mask_m),
        grid=(grid_m,),
        in_specs=[row_x, rep((2, CP)), rep((1, CP)), rep((1, CP)), rep((CP, CBP))],
        out_specs=(row_h, stats_spec(CBP)),
        out_shape=(jax.ShapeDtypeStruct((M, CBP), jnp.bfloat16),
                   jax.ShapeDtypeStruct((grid_m, 2, CBP), jnp.float32)),
        compiler_params=cp_par,
        cost_estimate=pl.CostEstimate(flops=int(2 * M * CP * CBP), transcendentals=0,
                                      bytes_accessed=int(4 * M * CP + 2 * M * CBP + 2 * CP * CBP)),
    )(x_flat, stats1, g1, b1, w1p)
    stats2 = jnp.sum(p2, axis=0)

    # ---------------- pass C: BN2 + ReLU + 3x3 conv over G-image groups ----------------
    h2, p3 = pl.pallas_call(
        functools.partial(_conv3_kernel, inv_m=inv_m, G=G, H=H, W=W, CBP=CBP),
        grid=(grid_c,),
        in_specs=[img_h, rep((2, CBP)), rep((1, CBP)), rep((1, CBP)), rep((9 * CBP, CBP))],
        out_specs=(img_h, stats_spec(CBP)),
        out_shape=(jax.ShapeDtypeStruct((M, CBP), jnp.bfloat16),
                   jax.ShapeDtypeStruct((grid_c, 2, CBP), jnp.float32)),
        scratch_shapes=[pltpu.VMEM((G, H + 2, W + 2, CBP), jnp.bfloat16)],
        compiler_params=cp_par,
        cost_estimate=pl.CostEstimate(flops=int(2 * M * 9 * CBP * CBP), transcendentals=0,
                                      bytes_accessed=int(4 * M * CBP + 2 * 9 * CBP * CBP)),
    )(h1, stats2, g2, b2, w2p)
    stats3 = jnp.sum(p3, axis=0)

    # ---------------- pass D: BN3 + ReLU + 1x1 conv + residual ----------------
    out_flat = pl.pallas_call(
        functools.partial(_conv_out_kernel, inv_m=inv_m),
        grid=(grid_m,),
        in_specs=[row_h, row_x, rep((2, CBP)), rep((1, CBP)), rep((1, CBP)), rep((CBP, CP))],
        out_specs=pl.BlockSpec((t, CP), lambda i: (i, 0)),
        out_shape=jax.ShapeDtypeStruct((M, CP), jnp.float32),
        compiler_params=cp_par,
        cost_estimate=pl.CostEstimate(flops=int(2 * M * CBP * CP), transcendentals=0,
                                      bytes_accessed=int(8 * M * CP + 2 * M * CBP + 2 * CBP * CP)),
    )(h2, x_flat, stats3, g3, b3, w3p)

    return out_flat.reshape(N, H, W, CP)[..., :Cin]


def reference(x_nhwc, p):
    """Pure-JAX f32 reference (training-mode BN, biased variance) to validate the kernels."""
    def bn_relu(x, g, b):
        mean = jnp.mean(x, axis=(0, 1, 2), keepdims=True)
        var = jnp.mean((x - mean) ** 2, axis=(0, 1, 2), keepdims=True)
        return jnp.maximum((x - mean) / jnp.sqrt(var + EPS) * g + b, 0.0)

    Cb = p["w1"].shape[1]
    h = bn_relu(x_nhwc, p["g1"][0], p["b1"][0])
    h = jnp.einsum("nhwc,cd->nhwd", h, p["w1"])
    h = bn_relu(h, p["g2"][0], p["b2"][0])
    w2_hwio = p["w2"].reshape(3, 3, Cb, Cb)
    h = lax.conv_general_dilated(h, w2_hwio, (1, 1), "SAME",
                                 dimension_numbers=("NHWC", "HWIO", "NHWC"))
    h = bn_relu(h, p["g3"][0], p["b3"][0])
    h = jnp.einsum("nhwc,cd->nhwd", h, p["w3"])
    return h + x_nhwc


if __name__ == "__main__":
    key = jax.random.PRNGKey(0)
    N, H, W = 2, 16, 16
    in_planes = out_planes = 16          # residual add requires in_planes == out_planes, stride 1
    Cb = out_planes // 4                 # expansion = 4

    k = jax.random.split(key, 4)
    x_nchw = jax.random.normal(k[0], (N, in_planes, H, W), jnp.float32)   # PyTorch NCHW input
    x_nhwc = jnp.transpose(x_nchw, (0, 2, 3, 1))

    params = dict(
        # conv weights (deterministic synthetic init), stored as IO / (KH*KW, I, O)
        w1=0.1 * jax.random.normal(k[1], (in_planes, Cb), jnp.float32),
        w2=0.1 * jax.random.normal(k[2], (9, Cb, Cb), jnp.float32),
        w3=0.1 * jax.random.normal(k[3], (Cb, out_planes), jnp.float32),
        # BatchNorm affine params at PyTorch default init (gamma=1, beta=0)
        g1=jnp.ones((1, in_planes), jnp.float32), b1=jnp.zeros((1, in_planes), jnp.float32),
        g2=jnp.ones((1, Cb), jnp.float32),        b2=jnp.zeros((1, Cb), jnp.float32),
        g3=jnp.ones((1, Cb), jnp.float32),        b3=jnp.zeros((1, Cb), jnp.float32),
    )

    # tm=128 -> 4 grid steps over M = 512 at demo size (use the 1024 default for real shapes).
    fn = jax.jit(functools.partial(basic_block, tm=128))
    out = jax.block_until_ready(fn(x_nhwc, params))

    ref = reference(x_nhwc, params)
    err = float(np.max(np.abs(np.asarray(out) - np.asarray(ref))))
    # bf16 MXU operands + bf16-stored intermediates (f32 accumulation / f32 residual path)
    # => relaxed tolerance vs the pure-f32 reference.
    assert np.allclose(np.asarray(out), np.asarray(ref), atol=5e-2, rtol=5e-2), \
        f"mismatch vs reference (max abs err {err:.4g})"

    out_nchw = jnp.transpose(out, (0, 3, 1, 2))   # back to PyTorch NCHW convention
    print("KERNEL_OK")
</pallas_src>

<mosaic_0001>
module attributes {stable_mosaic.version = 11 : i64} {
  func.func @_stats_kernel(%arg0: i32, %arg1: memref<512x128xf32, #tpu.memory_space<vmem>>, %arg2: memref<1x2x128xf32, #tpu.memory_space<vmem>>) attributes {dimension_semantics = [#tpu.dimension_semantics<parallel>], iteration_bounds = array<i64: 1>, scalar_prefetch = 0 : i64, scratch_operands = 0 : i64, tpu.core_type = #tpu.core_type<tc>, window_params = [{transform_indices = @transform_0, window_bounds = array<i64: 512, 128>}, {transform_indices = @transform_1, window_bounds = array<i64: 1, 2, 128>}]} {
    %c0 = arith.constant 0 : index
    %c0_0 = arith.constant 0 : index
    %0 = vector.load %arg1[%c0, %c0_0] : memref<512x128xf32, #tpu.memory_space<vmem>>, vector<512x128xf32>
    %cst = arith.constant dense<0.000000e+00> : vector<128xf32>
    %1 = vector.multi_reduction <add>, %0, %cst [0] : vector<512x128xf32> to vector<128xf32>
    %2 = vector.shape_cast %1 : vector<128xf32> to vector<1x128xf32>
    %3 = vector.shape_cast %2 : vector<1x128xf32> to vector<1x1x128xf32>
    %c0_1 = arith.constant 0 : index
    %c0_2 = arith.constant 0 : index
    %c0_3 = arith.constant 0 : index
    %4 = vector.load %arg2[%c0_1, %c0_2, %c0_3] : memref<1x2x128xf32, #tpu.memory_space<vmem>>, vector<1x1x128xf32>
    tpu.vector_store %arg2[%c0_1, %c0_2, %c0_3], %3 {strides = array<i32>} : memref<1x2x128xf32, #tpu.memory_space<vmem>>, vector<1x1x128xf32>,
    %5 = arith.mulf %0, %0 : vector<512x128xf32>
    %cst_4 = arith.constant dense<0.000000e+00> : vector<128xf32>
    %6 = vector.multi_reduction <add>, %5, %cst_4 [0] : vector<512x128xf32> to vector<128xf32>
    %7 = vector.shape_cast %6 : vector<128xf32> to vector<1x128xf32>
    %8 = vector.shape_cast %7 : vector<1x128xf32> to vector<1x1x128xf32>
    %c0_5 = arith.constant 0 : index
    %c1 = arith.constant 1 : index
    %c0_6 = arith.constant 0 : index
    %9 = vector.load %arg2[%c0_5, %c1, %c0_6] : memref<1x2x128xf32, #tpu.memory_space<vmem>>, vector<1x1x128xf32>
    tpu.vector_store %arg2[%c0_5, %c1, %c0_6], %8 {strides = array<i32>} : memref<1x2x128xf32, #tpu.memory_space<vmem>>, vector<1x1x128xf32>,
    return
  }
  func.func @transform_0(%arg0: i32) -> (i32, i32) {
    %c0_i32 = arith.constant 0 : i32
    %c0_i32_0 = arith.constant 0 : i32
    return %arg0, %c0_i32 : i32, i32
  }
  func.func @transform_1(%arg0: i32) -> (i32, i32, i32) {
    %c0_i32 = arith.constant 0 : i32
    %c0_i32_0 = arith.constant 0 : i32
    %c0_i32_1 = arith.constant 0 : i32
    return %arg0, %c0_i32, %c0_i32_0 : i32, i32, i32
  }
}

module attributes {stable_mosaic.version = 11 : i64} {
  func.func @_conv1_kernel(%arg0: i32, %arg1: memref<128x128xf32, #tpu.memory_space<vmem>>, %arg2: memref<2x128xf32, #tpu.memory_space<vmem>>, %arg3: memref<1x128xf32, #tpu.memory_space<vmem>>, %arg4: memref<1x128xf32, #tpu.memory_space<vmem>>, %arg5: memref<128x128xbf16, #tpu.memory_space<vmem>>, %arg6: memref<128x128xbf16, #tpu.memory_space<vmem>>, %arg7: memref<1x2x128xf32, #tpu.memory_space<vmem>>) attributes {dimension_semantics = [#tpu.dimension_semantics<parallel>], iteration_bounds = array<i64: 4>, scalar_prefetch = 0 : i64, scratch_operands = 0 : i64, tpu.core_type = #tpu.core_type<tc>, window_params = [{transform_indices = @transform_0, window_bounds = array<i64: 128, 128>}, {pipeline_mode = #tpu.pipeline_mode<synchronous>, transform_indices = @transform_1, window_bounds = array<i64: 2, 128>}, {pipeline_mode = #tpu.pipeline_mode<synchronous>, transform_indices = @transform_2, window_bounds = array<i64: 1, 128>}, {pipeline_mode = #tpu.pipeline_mode<synchronous>, transform_indices = @transform_3, window_bounds = array<i64: 1, 128>}, {pipeline_mode = #tpu.pipeline_mode<synchronous>, transform_indices = @transform_4, window_bounds = array<i64: 128, 128>}, {transform_indices = @transform_5, window_bounds = array<i64: 128, 128>}, {transform_indices = @transform_6, window_bounds = array<i64: 1, 2, 128>}]} {
    %c0 = arith.constant 0 : index
    %c0_0 = arith.constant 0 : index
    %0 = vector.load %arg2[%c0, %c0_0] : memref<2x128xf32, #tpu.memory_space<vmem>>, vector<1x128xf32>
    %cst = arith.constant 0.001953125 : f32
    %1 = vector.broadcast %cst : f32 to vector<1x128xf32>
    %2 = arith.mulf %0, %1 : vector<1x128xf32>
    %c1 = arith.constant 1 : index
    %c0_1 = arith.constant 0 : index
    %3 = vector.load %arg2[%c1, %c0_1] : memref<2x128xf32, #tpu.memory_space<vmem>>, vector<1x128xf32>
    %cst_2 = arith.constant 0.001953125 : f32
    %4 = vector.broadcast %cst_2 : f32 to vector<1x128xf32>
    %5 = arith.mulf %3, %4 : vector<1x128xf32>
    %6 = arith.mulf %2, %2 : vector<1x128xf32>
    %7 = arith.subf %5, %6 : vector<1x128xf32>
    %cst_3 = arith.constant 0.000000e+00 : f32
    %8 = vector.broadcast %cst_3 : f32 to vector<1x128xf32>
    %9 = arith.maximumf %7, %8 : vector<1x128xf32>
    %c0_4 = arith.constant 0 : index
    %c0_5 = arith.constant 0 : index
    %10 = vector.load %arg3[%c0_4, %c0_5] : memref<1x128xf32, #tpu.memory_space<vmem>>, vector<1x128xf32>
    %cst_6 = arith.constant 9.99999974E-6 : f32
    %11 = vector.broadcast %cst_6 : f32 to vector<1x128xf32>
    %12 = arith.addf %9, %11 : vector<1x128xf32>
    %13 = math.rsqrt %12 : vector<1x128xf32>
    %14 = arith.mulf %10, %13 : vector<1x128xf32>
    %c0_7 = arith.constant 0 : index
    %c0_8 = arith.constant 0 : index
    %15 = vector.load %arg4[%c0_7, %c0_8] : memref<1x128xf32, #tpu.memory_space<vmem>>, vector<1x128xf32>
    %16 = arith.mulf %2, %14 : vector<1x128xf32>
    %17 = arith.subf %15, %16 : vector<1x128xf32>
    %c0_9 = arith.constant 0 : index
    %c0_10 = arith.constant 0 : index
    %18 = vector.load %arg1[%c0_9, %c0_10] : memref<128x128xf32, #tpu.memory_space<vmem>>, vector<128x128xf32>
    %19 = vector.broadcast %14 : vector<1x128xf32> to vector<128x128xf32>
    %20 = arith.mulf %18, %19 : vector<128x128xf32>
    %21 = vector.broadcast %17 : vector<1x128xf32> to vector<128x128xf32>
    %22 = arith.addf %20, %21 : vector<128x128xf32>
    %cst_11 = arith.constant 0.000000e+00 : f32
    %23 = vector.broadcast %cst_11 : f32 to vector<128x128xf32>
    %24 = arith.maximumf %22, %23 : vector<128x128xf32>
    %25 = arith.truncf %24 : vector<128x128xf32> to vector<128x128xbf16>
    %c0_12 = arith.constant 0 : index
    %c0_13 = arith.constant 0 : index
    %26 = vector.load %arg5[%c0_12, %c0_13] : memref<128x128xbf16, #tpu.memory_space<vmem>>, vector<128x128xbf16>
    %cst_14 = arith.constant dense<0.000000e+00> : vector<128x128xf32>
    %27 = tpu.matmul %25, %26, %cst_14 {dimension_numbers = #tpu.dot_dimension_numbers<[1], [0], [0], [1], [0, 0, 1, 1], [], []>} : vector<128x128xbf16>, vector<128x128xbf16>, vector<128x128xf32> -> vector<128x128xf32>
    %28 = arith.truncf %27 : vector<128x128xf32> to vector<128x128xbf16>
    %c0_15 = arith.constant 0 : index
    %c0_16 = arith.constant 0 : index
    %29 = vector.load %arg6[%c0_15, %c0_16] : memref<128x128xbf16, #tpu.memory_space<vmem>>, vector<128x128xbf16>
    tpu.vector_store %arg6[%c0_15, %c0_16], %28 {strides = array<i32>} : memref<128x128xbf16, #tpu.memory_space<vmem>>, vector<128x128xbf16>,
    %cst_17 = arith.constant dense<0.000000e+00> : vector<128xf32>
    %30 = vector.multi_reduction <add>, %27, %cst_17 [0] : vector<128x128xf32> to vector<128xf32>
    %31 = vector.shape_cast %30 : vector<128xf32> to vector<1x128xf32>
    %32 = vector.shape_cast %31 : vector<1x128xf32> to vector<1x1x128xf32>
    %c0_18 = arith.constant 0 : index
    %c0_19 = arith.constant 0 : index
    %c0_20 = arith.constant 0 : index
    %33 = vector.load %arg7[%c0_18, %c0_19, %c0_20] : memref<1x2x128xf32, #tpu.memory_space<vmem>>, vector<1x1x128xf32>
    tpu.vector_store %arg7[%c0_18, %c0_19, %c0_20], %32 {strides = array<i32>} : memref<1x2x128xf32, #tpu.memory_space<vmem>>, vector<1x1x128xf32>,
    %34 = arith.mulf %27, %27 : vector<128x128xf32>
    %cst_21 = arith.constant dense<0.000000e+00> : vector<128xf32>
    %35 = vector.multi_reduction <add>, %34, %cst_21 [0] : vector<128x128xf32> to vector<128xf32>
    %36 = vector.shape_cast %35 : vector<128xf32> to vector<1x128xf32>
    %37 = vector.shape_cast %36 : vector<1x128xf32> to vector<1x1x128xf32>
    %c0_22 = arith.constant 0 : index
    %c1_23 = arith.constant 1 : index
    %c0_24 = arith.constant 0 : index
    %38 = vector.load %arg7[%c0_22, %c1_23, %c0_24] : memref<1x2x128xf32, #tpu.memory_space<vmem>>, vector<1x1x128xf32>
    tpu.vector_store %arg7[%c0_22, %c1_23, %c0_24], %37 {strides = array<i32>} : memref<1x2x128xf32, #tpu.memory_space<vmem>>, vector<1x1x128xf32>,
    return
  }
  func.func @transform_0(%arg0: i32) -> (i32, i32) {
    %c0_i32 = arith.constant 0 : i32
    %c0_i32_0 = arith.constant 0 : i32
    return %arg0, %c0_i32 : i32, i32
  }
  func.func @transform_1(%arg0: i32) -> (i32, i32) {
    %c0_i32 = arith.constant 0 : i32
    %c0_i32_0 = arith.constant 0 : i32
    %c0_i32_1 = arith.constant 0 : i32
    return %c0_i32, %c0_i32_0 : i32, i32
  }
  func.func @transform_2(%arg0: i32) -> (i32, i32) {
    %c0_i32 = arith.constant 0 : i32
    %c0_i32_0 = arith.constant 0 : i32
    %c0_i32_1 = arith.constant 0 : i32
    return %c0_i32, %c0_i32_0 : i32, i32
  }
  func.func @transform_3(%arg0: i32) -> (i32, i32) {
    %c0_i32 = arith.constant 0 : i32
    %c0_i32_0 = arith.constant 0 : i32
    %c0_i32_1 = arith.constant 0 : i32
    return %c0_i32, %c0_i32_0 : i32, i32
  }
  func.func @transform_4(%arg0: i32) -> (i32, i32) {
    %c0_i32 = arith.constant 0 : i32
    %c0_i32_0 = arith.constant 0 : i32
    %c0_i32_1 = arith.constant 0 : i32
    return %c0_i32, %c0_i32_0 : i32, i32
  }
  func.func @transform_5(%arg0: i32) -> (i32, i32) {
    %c0_i32 = arith.constant 0 : i32
    %c0_i32_0 = arith.constant 0 : i32
    return %arg0, %c0_i32 : i32, i32
  }
  func.func @transform_6(%arg0: i32) -> (i32, i32, i32) {
    %c0_i32 = arith.constant 0 : i32
    %c0_i32_0 = arith.constant 0 : i32
    %c0_i32_1 = arith.constant 0 : i32
    return %arg0, %c0_i32, %c0_i32_0 : i32, i32, i32
  }
}

module attributes {stable_mosaic.version = 11 : i64} {
  func.func @_conv3_kernel(%arg0: i32, %arg1: memref<512x128xbf16, #tpu.memory_space<vmem>>, %arg2: memref<2x128xf32, #tpu.memory_space<vmem>>, %arg3: memref<1x128xf32, #tpu.memory_space<vmem>>, %arg4: memref<1x128xf32, #tpu.memory_space<vmem>>, %arg5: memref<1152x128xbf16, #tpu.memory_space<vmem>>, %arg6: memref<512x128xbf16, #tpu.memory_space<vmem>>, %arg7: memref<1x2x128xf32, #tpu.memory_space<vmem>>, %arg8: memref<2x18x18x128xbf16, #tpu.memory_space<vmem>>) attributes {dimension_semantics = [#tpu.dimension_semantics<parallel>], iteration_bounds = array<i64: 1>, scalar_prefetch = 0 : i64, scratch_operands = 1 : i64, tpu.core_type = #tpu.core_type<tc>, window_params = [{transform_indices = @transform_0, window_bounds = array<i64: 512, 128>}, {pipeline_mode = #tpu.pipeline_mode<synchronous>, transform_indices = @transform_1, window_bounds = array<i64: 2, 128>}, {pipeline_mode = #tpu.pipeline_mode<synchronous>, transform_indices = @transform_2, window_bounds = array<i64: 1, 128>}, {pipeline_mode = #tpu.pipeline_mode<synchronous>, transform_indices = @transform_3, window_bounds = array<i64: 1, 128>}, {pipeline_mode = #tpu.pipeline_mode<synchronous>, transform_indices = @transform_4, window_bounds = array<i64: 1152, 128>}, {transform_indices = @transform_5, window_bounds = array<i64: 512, 128>}, {transform_indices = @transform_6, window_bounds = array<i64: 1, 2, 128>}]} {
    %c0 = arith.constant 0 : index
    %c0_0 = arith.constant 0 : index
    %0 = vector.load %arg2[%c0, %c0_0] : memref<2x128xf32, #tpu.memory_space<vmem>>, vector<1x128xf32>
    %cst = arith.constant 0.001953125 : f32
    %1 = vector.broadcast %cst : f32 to vector<1x128xf32>
    %2 = arith.mulf %0, %1 : vector<1x128xf32>
    %c1 = arith.constant 1 : index
    %c0_1 = arith.constant 0 : index
    %3 = vector.load %arg2[%c1, %c0_1] : memref<2x128xf32, #tpu.memory_space<vmem>>, vector<1x128xf32>
    %cst_2 = arith.constant 0.001953125 : f32
    %4 = vector.broadcast %cst_2 : f32 to vector<1x128xf32>
    %5 = arith.mulf %3, %4 : vector<1x128xf32>
    %6 = arith.mulf %2, %2 : vector<1x128xf32>
    %7 = arith.subf %5, %6 : vector<1x128xf32>
    %cst_3 = arith.constant 0.000000e+00 : f32
    %8 = vector.broadcast %cst_3 : f32 to vector<1x128xf32>
    %9 = arith.maximumf %7, %8 : vector<1x128xf32>
    %c0_4 = arith.constant 0 : index
    %c0_5 = arith.constant 0 : index
    %10 = vector.load %arg3[%c0_4, %c0_5] : memref<1x128xf32, #tpu.memory_space<vmem>>, vector<1x128xf32>
    %cst_6 = arith.constant 9.99999974E-6 : f32
    %11 = vector.broadcast %cst_6 : f32 to vector<1x128xf32>
    %12 = arith.addf %9, %11 : vector<1x128xf32>
    %13 = math.rsqrt %12 : vector<1x128xf32>
    %14 = arith.mulf %10, %13 : vector<1x128xf32>
    %c0_7 = arith.constant 0 : index
    %c0_8 = arith.constant 0 : index
    %15 = vector.load %arg4[%c0_7, %c0_8] : memref<1x128xf32, #tpu.memory_space<vmem>>, vector<1x128xf32>
    %16 = arith.mulf %2, %14 : vector<1x128xf32>
    %17 = arith.subf %15, %16 : vector<1x128xf32>
    %c0_9 = arith.constant 0 : index
    %c0_10 = arith.constant 0 : index
    %18 = vector.load %arg1[%c0_9, %c0_10] : memref<512x128xbf16, #tpu.memory_space<vmem>>, vector<512x128xbf16>
    %19 = arith.extf %18 : vector<512x128xbf16> to vector<512x128xf32>
    %20 = vector.broadcast %14 : vector<1x128xf32> to vector<512x128xf32>
    %21 = arith.mulf %19, %20 : vector<512x128xf32>
    %22 = vector.broadcast %17 : vector<1x128xf32> to vector<512x128xf32>
    %23 = arith.addf %21, %22 : vector<512x128xf32>
    %cst_11 = arith.constant 0.000000e+00 : f32
    %24 = vector.broadcast %cst_11 : f32 to vector<512x128xf32>
    %25 = arith.maximumf %23, %24 : vector<512x128xf32>
    %cst_12 = arith.constant 0.000000e+00 : bf16
    %26 = vector.broadcast %cst_12 : bf16 to vector<2x1x18x128xbf16>
    %cst_13 = arith.constant 0.000000e+00 : bf16
    %27 = vector.broadcast %cst_13 : bf16 to vector<2x18x1x128xbf16>
    %c0_14 = arith.constant 0 : index
    %c0_15 = arith.constant 0 : index
    %c0_16 = arith.constant 0 : index
    %c0_17 = arith.constant 0 : index
    %28 = vector.load %arg8[%c0_14, %c0_15, %c0_16, %c0_17] : memref<2x18x18x128xbf16, #tpu.memory_space<vmem>>, vector<2x1x18x128xbf16>
    tpu.vector_store %arg8[%c0_14, %c0_15, %c0_16, %c0_17], %26 {strides = array<i32>} : memref<2x18x18x128xbf16, #tpu.memory_space<vmem>>, vector<2x1x18x128xbf16>,
    %c0_18 = arith.constant 0 : index
    %c17 = arith.constant 17 : index
    %c0_19 = arith.constant 0 : index
    %c0_20 = arith.constant 0 : index
    %29 = vector.load %arg8[%c0_18, %c17, %c0_19, %c0_20] : memref<2x18x18x128xbf16, #tpu.memory_space<vmem>>, vector<2x1x18x128xbf16>
    tpu.vector_store %arg8[%c0_18, %c17, %c0_19, %c0_20], %26 {strides = array<i32>} : memref<2x18x18x128xbf16, #tpu.memory_space<vmem>>, vector<2x1x18x128xbf16>,
    %c0_21 = arith.constant 0 : index
    %c0_22 = arith.constant 0 : index
    %c0_23 = arith.constant 0 : index
    %c0_24 = arith.constant 0 : index
    %30 = vector.load %arg8[%c0_21, %c0_22, %c0_23, %c0_24] : memref<2x18x18x128xbf16, #tpu.memory_space<vmem>>, vector<2x18x1x128xbf16>
    tpu.vector_store %arg8[%c0_21, %c0_22, %c0_23, %c0_24], %27 {strides = array<i32>} : memref<2x18x18x128xbf16, #tpu.memory_space<vmem>>, vector<2x18x1x128xbf16>,
    %c0_25 = arith.constant 0 : index
    %c0_26 = arith.constant 0 : index
    %c17_27 = arith.constant 17 : index
    %c0_28 = arith.constant 0 : index
    %31 = vector.load %arg8[%c0_25, %c0_26, %c17_27, %c0_28] : memref<2x18x18x128xbf16, #tpu.memory_space<vmem>>, vector<2x18x1x128xbf16>
    tpu.vector_store %arg8[%c0_25, %c0_26, %c17_27, %c0_28], %27 {strides = array<i32>} : memref<2x18x18x128xbf16, #tpu.memory_space<vmem>>, vector<2x18x1x128xbf16>,
    %32 = vector.shape_cast %25 : vector<512x128xf32> to vector<2x16x16x128xf32>
    %33 = arith.truncf %32 : vector<2x16x16x128xf32> to vector<2x16x16x128xbf16>
    %c0_29 = arith.constant 0 : index
    %c1_30 = arith.constant 1 : index
    %c1_31 = arith.constant 1 : index
    %c0_32 = arith.constant 0 : index
    %34 = vector.load %arg8[%c0_29, %c1_30, %c1_31, %c0_32] : memref<2x18x18x128xbf16, #tpu.memory_space<vmem>>, vector<2x16x16x128xbf16>
    tpu.vector_store %arg8[%c0_29, %c1_30, %c1_31, %c0_32], %33 {strides = array<i32>} : memref<2x18x18x128xbf16, #tpu.memory_space<vmem>>, vector<2x16x16x128xbf16>,
    %c0_33 = arith.constant 0 : index
    %c0_34 = arith.constant 0 : index
    %c0_35 = arith.constant 0 : index
    %c0_36 = arith.constant 0 : index
    %35 = vector.load %arg8[%c0_33, %c0_34, %c0_35, %c0_36] : memref<2x18x18x128xbf16, #tpu.memory_space<vmem>>, vector<2x16x16x128xbf16>
    %c0_37 = arith.constant 0 : index
    %c0_38 = arith.constant 0 : index
    %c1_39 = arith.constant 1 : index
    %c0_40 = arith.constant 0 : index
    %36 = vector.load %arg8[%c0_37, %c0_38, %c1_39, %c0_40] : memref<2x18x18x128xbf16, #tpu.memory_space<vmem>>, vector<2x16x16x128xbf16>
    %c0_41 = arith.constant 0 : index
    %c0_42 = arith.constant 0 : index
    %c2 = arith.constant 2 : index
    %c0_43 = arith.constant 0 : index
    %37 = vector.load %arg8[%c0_41, %c0_42, %c2, %c0_43] : memref<2x18x18x128xbf16, #tpu.memory_space<vmem>>, vector<2x16x16x128xbf16>
    %c0_44 = arith.constant 0 : index
    %c1_45 = arith.constant 1 : index
    %c0_46 = arith.constant 0 : index
    %c0_47 = arith.constant 0 : index
    %38 = vector.load %arg8[%c0_44, %c1_45, %c0_46, %c0_47] : memref<2x18x18x128xbf16, #tpu.memory_space<vmem>>, vector<2x16x16x128xbf16>
    %c0_48 = arith.constant 0 : index
    %c1_49 = arith.constant 1 : index
    %c1_50 = arith.constant 1 : index
    %c0_51 = arith.constant 0 : index
    %39 = vector.load %arg8[%c0_48, %c1_49, %c1_50, %c0_51] : memref<2x18x18x128xbf16, #tpu.memory_space<vmem>>, vector<2x16x16x128xbf16>
    %c0_52 = arith.constant 0 : index
    %c1_53 = arith.constant 1 : index
    %c2_54 = arith.constant 2 : index
    %c0_55 = arith.constant 0 : index
    %40 = vector.load %arg8[%c0_52, %c1_53, %c2_54, %c0_55] : memref<2x18x18x128xbf16, #tpu.memory_space<vmem>>, vector<2x16x16x128xbf16>
    %c0_56 = arith.constant 0 : index
    %c2_57 = arith.constant 2 : index
    %c0_58 = arith.constant 0 : index
    %c0_59 = arith.constant 0 : index
    %41 = vector.load %arg8[%c0_56, %c2_57, %c0_58, %c0_59] : memref<2x18x18x128xbf16, #tpu.memory_space<vmem>>, vector<2x16x16x128xbf16>
    %c0_60 = arith.constant 0 : index
    %c2_61 = arith.constant 2 : index
    %c1_62 = arith.constant 1 : index
    %c0_63 = arith.constant 0 : index
    %42 = vector.load %arg8[%c0_60, %c2_61, %c1_62, %c0_63] : memref<2x18x18x128xbf16, #tpu.memory_space<vmem>>, vector<2x16x16x128xbf16>
    %c0_64 = arith.constant 0 : index
    %c2_65 = arith.constant 2 : index
    %c2_66 = arith.constant 2 : index
    %c0_67 = arith.constant 0 : index
    %43 = vector.load %arg8[%c0_64, %c2_65, %c2_66, %c0_67] : memref<2x18x18x128xbf16, #tpu.memory_space<vmem>>, vector<2x16x16x128xbf16>
    %44 = tpu.concatenate %35, %36, %37, %38, %39, %40, %41, %42, %43 in 3 : vector<2x16x16x128xbf16>, vector<2x16x16x128xbf16>, vector<2x16x16x128xbf16>, vector<2x16x16x128xbf16>, vector<2x16x16x128xbf16>, vector<2x16x16x128xbf16>, vector<2x16x16x128xbf16>, vector<2x16x16x128xbf16>, vector<2x16x16x128xbf16> -> vector<2x16x16x1152xbf16>
    %45 = vector.shape_cast %44 : vector<2x16x16x1152xbf16> to vector<512x1152xbf16>
    %c0_68 = arith.constant 0 : index
    %c0_69 = arith.constant 0 : index
    %46 = vector.load %arg5[%c0_68, %c0_69] : memref<1152x128xbf16, #tpu.memory_space<vmem>>, vector<1152x128xbf16>
    %cst_70 = arith.constant dense<0.000000e+00> : vector<512x128xf32>
    %47 = tpu.matmul %45, %46, %cst_70 {dimension_numbers = #tpu.dot_dimension_numbers<[1], [0], [0], [1], [0, 0, 1, 1], [], []>} : vector<512x1152xbf16>, vector<1152x128xbf16>, vector<512x128xf32> -> vector<512x128xf32>
    %48 = arith.truncf %47 : vector<512x128xf32> to vector<512x128xbf16>
    %c0_71 = arith.constant 0 : index
    %c0_72 = arith.constant 0 : index
    %49 = vector.load %arg6[%c0_71, %c0_72] : memref<512x128xbf16, #tpu.memory_space<vmem>>, vector<512x128xbf16>
    tpu.vector_store %arg6[%c0_71, %c0_72], %48 {strides = array<i32>} : memref<512x128xbf16, #tpu.memory_space<vmem>>, vector<512x128xbf16>,
    %cst_73 = arith.constant dense<0.000000e+00> : vector<128xf32>
    %50 = vector.multi_reduction <add>, %47, %cst_73 [0] : vector<512x128xf32> to vector<128xf32>
    %51 = vector.shape_cast %50 : vector<128xf32> to vector<1x128xf32>
    %52 = vector.shape_cast %51 : vector<1x128xf32> to vector<1x1x128xf32>
    %c0_74 = arith.constant 0 : index
    %c0_75 = arith.constant 0 : index
    %c0_76 = arith.constant 0 : index
    %53 = vector.load %arg7[%c0_74, %c0_75, %c0_76] : memref<1x2x128xf32, #tpu.memory_space<vmem>>, vector<1x1x128xf32>
    tpu.vector_store %arg7[%c0_74, %c0_75, %c0_76], %52 {strides = array<i32>} : memref<1x2x128xf32, #tpu.memory_space<vmem>>, vector<1x1x128xf32>,
    %54 = arith.mulf %47, %47 : vector<512x128xf32>
    %cst_77 = arith.constant dense<0.000000e+00> : vector<128xf32>
    %55 = vector.multi_reduction <add>, %54, %cst_77 [0] : vector<512x128xf32> to vector<128xf32>
    %56 = vector.shape_cast %55 : vector<128xf32> to vector<1x128xf32>
    %57 = vector.shape_cast %56 : vector<1x128xf32> to vector<1x1x128xf32>
    %c0_78 = arith.constant 0 : index
    %c1_79 = arith.constant 1 : index
    %c0_80 = arith.constant 0 : index
    %58 = vector.load %arg7[%c0_78, %c1_79, %c0_80] : memref<1x2x128xf32, #tpu.memory_space<vmem>>, vector<1x1x128xf32>
    tpu.vector_store %arg7[%c0_78, %c1_79, %c0_80], %57 {strides = array<i32>} : memref<1x2x128xf32, #tpu.memory_space<vmem>>, vector<1x1x128xf32>,
    return
  }
  func.func @transform_0(%arg0: i32) -> (i32, i32) {
    %c0_i32 = arith.constant 0 : i32
    %c0_i32_0 = arith.constant 0 : i32
    return %arg0, %c0_i32 : i32, i32
  }
  func.func @transform_1(%arg0: i32) -> (i32, i32) {
    %c0_i32 = arith.constant 0 : i32
    %c0_i32_0 = arith.constant 0 : i32
    %c0_i32_1 = arith.constant 0 : i32
    return %c0_i32, %c0_i32_0 : i32, i32
  }
  func.func @transform_2(%arg0: i32) -> (i32, i32) {
    %c0_i32 = arith.constant 0 : i32
    %c0_i32_0 = arith.constant 0 : i32
    %c0_i32_1 = arith.constant 0 : i32
    return %c0_i32, %c0_i32_0 : i32, i32
  }
  func.func @transform_3(%arg0: i32) -> (i32, i32) {
    %c0_i32 = arith.constant 0 : i32
    %c0_i32_0 = arith.constant 0 : i32
    %c0_i32_1 = arith.constant 0 : i32
    return %c0_i32, %c0_i32_0 : i32, i32
  }
  func.func @transform_4(%arg0: i32) -> (i32, i32) {
    %c0_i32 = arith.constant 0 : i32
    %c0_i32_0 = arith.constant 0 : i32
    %c0_i32_1 = arith.constant 0 : i32
    return %c0_i32, %c0_i32_0 : i32, i32
  }
  func.func @transform_5(%arg0: i32) -> (i32, i32) {
    %c0_i32 = arith.constant 0 : i32
    %c0_i32_0 = arith.constant 0 : i32
    return %arg0, %c0_i32 : i32, i32
  }
  func.func @transform_6(%arg0: i32) -> (i32, i32, i32) {
    %c0_i32 = arith.constant 0 : i32
    %c0_i32_0 = arith.constant 0 : i32
    %c0_i32_1 = arith.constant 0 : i32
    return %arg0, %c0_i32, %c0_i32_0 : i32, i32, i32
  }
}

module attributes {stable_mosaic.version = 11 : i64} {
  func.func @_conv_out_kernel(%arg0: i32, %arg1: memref<128x128xbf16, #tpu.memory_space<vmem>>, %arg2: memref<128x128xf32, #tpu.memory_space<vmem>>, %arg3: memref<2x128xf32, #tpu.memory_space<vmem>>, %arg4: memref<1x128xf32, #tpu.memory_space<vmem>>, %arg5: memref<1x128xf32, #tpu.memory_space<vmem>>, %arg6: memref<128x128xbf16, #tpu.memory_space<vmem>>, %arg7: memref<128x128xf32, #tpu.memory_space<vmem>>) attributes {dimension_semantics = [#tpu.dimension_semantics<parallel>], iteration_bounds = array<i64: 4>, scalar_prefetch = 0 : i64, scratch_operands = 0 : i64, tpu.core_type = #tpu.core_type<tc>, window_params = [{transform_indices = @transform_0, window_bounds = array<i64: 128, 128>}, {transform_indices = @transform_1, window_bounds = array<i64: 128, 128>}, {pipeline_mode = #tpu.pipeline_mode<synchronous>, transform_indices = @transform_2, window_bounds = array<i64: 2, 128>}, {pipeline_mode = #tpu.pipeline_mode<synchronous>, transform_indices = @transform_3, window_bounds = array<i64: 1, 128>}, {pipeline_mode = #tpu.pipeline_mode<synchronous>, transform_indices = @transform_4, window_bounds = array<i64: 1, 128>}, {pipeline_mode = #tpu.pipeline_mode<synchronous>, transform_indices = @transform_5, window_bounds = array<i64: 128, 128>}, {transform_indices = @transform_6, window_bounds = array<i64: 128, 128>}]} {
    %c0 = arith.constant 0 : index
    %c0_0 = arith.constant 0 : index
    %0 = vector.load %arg3[%c0, %c0_0] : memref<2x128xf32, #tpu.memory_space<vmem>>, vector<1x128xf32>
    %cst = arith.constant 0.001953125 : f32
    %1 = vector.broadcast %cst : f32 to vector<1x128xf32>
    %2 = arith.mulf %0, %1 : vector<1x128xf32>
    %c1 = arith.constant 1 : index
    %c0_1 = arith.constant 0 : index
    %3 = vector.load %arg3[%c1, %c0_1] : memref<2x128xf32, #tpu.memory_space<vmem>>, vector<1x128xf32>
    %cst_2 = arith.constant 0.001953125 : f32
    %4 = vector.broadcast %cst_2 : f32 to vector<1x128xf32>
    %5 = arith.mulf %3, %4 : vector<1x128xf32>
    %6 = arith.mulf %2, %2 : vector<1x128xf32>
    %7 = arith.subf %5, %6 : vector<1x128xf32>
    %cst_3 = arith.constant 0.000000e+00 : f32
    %8 = vector.broadcast %cst_3 : f32 to vector<1x128xf32>
    %9 = arith.maximumf %7, %8 : vector<1x128xf32>
    %c0_4 = arith.constant 0 : index
    %c0_5 = arith.constant 0 : index
    %10 = vector.load %arg4[%c0_4, %c0_5] : memref<1x128xf32, #tpu.memory_space<vmem>>, vector<1x128xf32>
    %cst_6 = arith.constant 9.99999974E-6 : f32
    %11 = vector.broadcast %cst_6 : f32 to vector<1x128xf32>
    %12 = arith.addf %9, %11 : vector<1x128xf32>
    %13 = math.rsqrt %12 : vector<1x128xf32>
    %14 = arith.mulf %10, %13 : vector<1x128xf32>
    %c0_7 = arith.constant 0 : index
    %c0_8 = arith.constant 0 : index
    %15 = vector.load %arg5[%c0_7, %c0_8] : memref<1x128xf32, #tpu.memory_space<vmem>>, vector<1x128xf32>
    %16 = arith.mulf %2, %14 : vector<1x128xf32>
    %17 = arith.subf %15, %16 : vector<1x128xf32>
    %c0_9 = arith.constant 0 : index
    %c0_10 = arith.constant 0 : index
    %18 = vector.load %arg1[%c0_9, %c0_10] : memref<128x128xbf16, #tpu.memory_space<vmem>>, vector<128x128xbf16>
    %19 = arith.extf %18 : vector<128x128xbf16> to vector<128x128xf32>
    %20 = vector.broadcast %14 : vector<1x128xf32> to vector<128x128xf32>
    %21 = arith.mulf %19, %20 : vector<128x128xf32>
    %22 = vector.broadcast %17 : vector<1x128xf32> to vector<128x128xf32>
    %23 = arith.addf %21, %22 : vector<128x128xf32>
    %cst_11 = arith.constant 0.000000e+00 : f32
    %24 = vector.broadcast %cst_11 : f32 to vector<128x128xf32>
    %25 = arith.maximumf %23, %24 : vector<128x128xf32>
    %26 = arith.truncf %25 : vector<128x128xf32> to vector<128x128xbf16>
    %c0_12 = arith.constant 0 : index
    %c0_13 = arith.constant 0 : index
    %27 = vector.load %arg6[%c0_12, %c0_13] : memref<128x128xbf16, #tpu.memory_space<vmem>>, vector<128x128xbf16>
    %cst_14 = arith.constant dense<0.000000e+00> : vector<128x128xf32>
    %28 = tpu.matmul %26, %27, %cst_14 {dimension_numbers = #tpu.dot_dimension_numbers<[1], [0], [0], [1], [0, 0, 1, 1], [], []>} : vector<128x128xbf16>, vector<128x128xbf16>, vector<128x128xf32> -> vector<128x128xf32>
    %c0_15 = arith.constant 0 : index
    %c0_16 = arith.constant 0 : index
    %29 = vector.load %arg2[%c0_15, %c0_16] : memref<128x128xf32, #tpu.memory_space<vmem>>, vector<128x128xf32>
    %30 = arith.addf %28, %29 : vector<128x128xf32>
    %c0_17 = arith.constant 0 : index
    %c0_18 = arith.constant 0 : index
    %31 = vector.load %arg7[%c0_17, %c0_18] : memref<128x128xf32, #tpu.memory_space<vmem>>, vector<128x128xf32>
    tpu.vector_store %arg7[%c0_17, %c0_18], %30 {strides = array<i32>} : memref<128x128xf32, #tpu.memory_space<vmem>>, vector<128x128xf32>,
    return
  }
  func.func @transform_0(%arg0: i32) -> (i32, i32) {
    %c0_i32 = arith.constant 0 : i32
    %c0_i32_0 = arith.constant 0 : i32
    return %arg0, %c0_i32 : i32, i32
  }
  func.func @transform_1(%arg0: i32) -> (i32, i32) {
    %c0_i32 = arith.constant 0 : i32
    %c0_i32_0 = arith.constant 0 : i32
    return %arg0, %c0_i32 : i32, i32
  }
  func.func @transform_2(%arg0: i32) -> (i32, i32) {
    %c0_i32 = arith.constant 0 : i32
    %c0_i32_0 = arith.constant 0 : i32
    %c0_i32_1 = arith.constant 0 : i32
    return %c0_i32, %c0_i32_0 : i32, i32
  }
  func.func @transform_3(%arg0: i32) -> (i32, i32) {
    %c0_i32 = arith.constant 0 : i32
    %c0_i32_0 = arith.constant 0 : i32
    %c0_i32_1 = arith.constant 0 : i32
    return %c0_i32, %c0_i32_0 : i32, i32
  }
  func.func @transform_4(%arg0: i32) -> (i32, i32) {
    %c0_i32 = arith.constant 0 : i32
    %c0_i32_0 = arith.constant 0 : i32
    %c0_i32_1 = arith.constant 0 : i32
    return %c0_i32, %c0_i32_0 : i32, i32
  }
  func.func @transform_5(%arg0: i32) -> (i32, i32) {
    %c0_i32 = arith.constant 0 : i32
    %c0_i32_0 = arith.constant 0 : i32
    %c0_i32_1 = arith.constant 0 : i32
    return %c0_i32, %c0_i32_0 : i32, i32
  }
  func.func @transform_6(%arg0: i32) -> (i32, i32) {
    %c0_i32 = arith.constant 0 : i32
    %c0_i32_0 = arith.constant 0 : i32
    return %arg0, %c0_i32 : i32, i32
  }
}

</mosaic_0001>

<bundles_post_ra>
// kernel: basic_block.4
= control target key start
LH: loop header
LB: loop body
LE: loop exit
PB: predicated region body
PF: predicated region fallthrough
CT: control target
= control target key end

     0   :  { %s488_s0 = inlined_call_operand.vmem [shape: f32[512,128], index: 0, kind: input, shape index: {}]   ;;  %s489_s1 = inlined_call_operand.vmem [shape: f32[1,2,128], index: 1, kind: output, shape index: {}]  }
   0x1   :  { %v8_v0 = vld [vmem:[%s488_s0] sm:$0xff]  ;;  %v9_v1 = vld [vmem:[%s488_s0 + $0x8] sm:$0xff]  ;;  %v10_v2 = vld [vmem:[%s488_s0 + $0x10] sm:$0xff] }
   0x2   :  { %v11_v3 = vld [vmem:[%s488_s0 + $0x18] sm:$0xff]  ;;  %v72_v4 = vadd.f32 %v9_v1, %v8_v0  ;;  %v142_v5 = vmul.f32 %v8_v0, %v8_v0  ;;  %v143_v6 = vmul.f32 %v9_v1, %v9_v1  ;;  %v144_v7 = vmul.f32 %v10_v2, %v10_v2  ;;  %v12_v8 = vld [vmem:[%s488_s0 + $0x20] sm:$0xff]  ;;  %v13_v12 = vld [vmem:[%s488_s0 + $0x28] sm:$0xff] }
   0x3   :  { %v145_v10 = vmul.f32 %v11_v3, %v11_v3  ;;  %v146_v14 = vmul.f32 %v12_v8, %v12_v8  ;;  %v14_v16 = vld [vmem:[%s488_s0 + $0x30] sm:$0xff]  ;;  %v147_v18 = vmul.f32 %v13_v12, %v13_v12  ;;  %v15_v20 = vld [vmem:[%s488_s0 + $0x38] sm:$0xff]  ;;  %v16_v24 = vld [vmem:[%s488_s0 + $0x40] sm:$0xff] }
   0x4   :  { %v73_v9 = vadd.f32 %v72_v4, %v10_v2  ;;  %v206_v11 = vadd.f32 %v143_v6, %v142_v5  ;;  %v148_v22 = vmul.f32 %v14_v16, %v14_v16  ;;  %v149_v26 = vmul.f32 %v15_v20, %v15_v20  ;;  %v17_v28 = vld [vmem:[%s488_s0 + $0x48] sm:$0xff]  ;;  %v18_v32 = vld [vmem:[%s488_s0 + $0x50] sm:$0xff]  ;;  %v19_v36 = vld [vmem:[%s488_s0 + $0x58] sm:$0xff] }
   0x5   :  { %v150_v30 = vmul.f32 %v16_v24, %v16_v24  ;;  %v151_v34 = vmul.f32 %v17_v28, %v17_v28  ;;  %v152_v38 = vmul.f32 %v18_v32, %v18_v32  ;;  %v20_v40 = vld [vmem:[%s488_s0 + $0x60] sm:$0xff]  ;;  %v153_v42 = vmul.f32 %v19_v36, %v19_v36  ;;  %v21_v44 = vld [vmem:[%s488_s0 + $0x68] sm:$0xff]  ;;  %v22_v48 = vld [vmem:[%s488_s0 + $0x70] sm:$0xff] }
   0x6   :  { %v74_v13 = vadd.f32 %v73_v9, %v11_v3  ;;  %v207_v15 = vadd.f32 %v206_v11, %v144_v7  ;;  %v154_v46 = vmul.f32 %v20_v40, %v20_v40  ;;  %v155_v50 = vmul.f32 %v21_v44, %v21_v44  ;;  %v23_v52 = vld [vmem:[%s488_s0 + $0x78] sm:$0xff]  ;;  %v24_v56 = vld [vmem:[%s488_s0 + $0x80] sm:$0xff]  ;;  %v25_v60 = vld [vmem:[%s488_s0 + $0x88] sm:$0xff] }
   0x7   :  { %v156_v54 = vmul.f32 %v22_v48, %v22_v48  ;;  %v157_v58 = vmul.f32 %v23_v52, %v23_v52  ;;  %v158_v62 = vmul.f32 %v24_v56, %v24_v56  ;;  %v26_v0 = vld [vmem:[%s488_s0 + $0x90] sm:$0xff]  ;;  %v159_v2 = vmul.f32 %v25_v60, %v25_v60  ;;  %v27_v4 = vld [vmem:[%s488_s0 + $0x98] sm:$0xff] }
   0x8   :  { %v75_v17 = vadd.f32 %v74_v13, %v12_v8  ;;  %v208_v19 = vadd.f32 %v207_v15, %v145_v10  ;;  %v160_v6 = vmul.f32 %v26_v0, %v26_v0  ;;  %v28_v8 = vld [vmem:[%s488_s0 + $0xa0] sm:$0xff]  ;;  %v161_v10 = vmul.f32 %v27_v4, %v27_v4 }
   0xa   :  { %v76_v21 = vadd.f32 %v75_v17, %v13_v12  ;;  %v209_v23 = vadd.f32 %v208_v19, %v146_v14  ;;  %v29_v12 = vld [vmem:[%s488_s0 + $0xa8] sm:$0xff]  ;;  %v162_v14 = vmul.f32 %v28_v8, %v28_v8 }
   0xc   :  { %v77_v25 = vadd.f32 %v76_v21, %v14_v16  ;;  %v210_v27 = vadd.f32 %v209_v23, %v147_v18  ;;  %v30_v16 = vld [vmem:[%s488_s0 + $0xb0] sm:$0xff]  ;;  %v163_v18 = vmul.f32 %v29_v12, %v29_v12 }
   0xe   :  { %v78_v29 = vadd.f32 %v77_v25, %v15_v20  ;;  %v211_v31 = vadd.f32 %v210_v27, %v148_v22  ;;  %v31_v20 = vld [vmem:[%s488_s0 + $0xb8] sm:$0xff]  ;;  %v164_v22 = vmul.f32 %v30_v16, %v30_v16 }
  0x10   :  { %v79_v33 = vadd.f32 %v78_v29, %v16_v24  ;;  %v212_v35 = vadd.f32 %v211_v31, %v149_v26  ;;  %v32_v24 = vld [vmem:[%s488_s0 + $0xc0] sm:$0xff]  ;;  %v165_v26 = vmul.f32 %v31_v20, %v31_v20 }
  0x12   :  { %v80_v37 = vadd.f32 %v79_v33, %v17_v28  ;;  %v213_v39 = vadd.f32 %v212_v35, %v150_v30  ;;  %v33_v28 = vld [vmem:[%s488_s0 + $0xc8] sm:$0xff]  ;;  %v166_v30 = vmul.f32 %v32_v24, %v32_v24 }
  0x14   :  { %v81_v41 = vadd.f32 %v80_v37, %v18_v32  ;;  %v214_v43 = vadd.f32 %v213_v39, %v151_v34  ;;  %v34_v32 = vld [vmem:[%s488_s0 + $0xd0] sm:$0xff]  ;;  %v167_v34 = vmul.f32 %v33_v28, %v33_v28 }
  0x16   :  { %v82_v45 = vadd.f32 %v81_v41, %v19_v36  ;;  %v215_v47 = vadd.f32 %v214_v43, %v152_v38  ;;  %v35_v36 = vld [vmem:[%s488_s0 + $0xd8] sm:$0xff]  ;;  %v168_v38 = vmul.f32 %v34_v32, %v34_v32 }
  0x18   :  { %v83_v49 = vadd.f32 %v82_v45, %v20_v40  ;;  %v216_v51 = vadd.f32 %v215_v47, %v153_v42  ;;  %v36_v40 = vld [vmem:[%s488_s0 + $0xe0] sm:$0xff]  ;;  %v169_v42 = vmul.f32 %v35_v36, %v35_v36 }
  0x1a   :  { %v84_v53 = vadd.f32 %v83_v49, %v21_v44  ;;  %v217_v55 = vadd.f32 %v216_v51, %v154_v46  ;;  %v37_v44 = vld [vmem:[%s488_s0 + $0xe8] sm:$0xff]  ;;  %v170_v46 = vmul.f32 %v36_v40, %v36_v40 }
  0x1c   :  { %v85_v57 = vadd.f32 %v84_v53, %v22_v48  ;;  %v218_v59 = vadd.f32 %v217_v55, %v155_v50  ;;  %v38_v48 = vld [vmem:[%s488_s0 + $0xf0] sm:$0xff]  ;;  %v171_v50 = vmul.f32 %v37_v44, %v37_v44 }
  0x1e   :  { %v86_v61 = vadd.f32 %v85_v57, %v23_v52  ;;  %v219_v63 = vadd.f32 %v218_v59, %v156_v54  ;;  %v39_v52 = vld [vmem:[%s488_s0 + $0xf8] sm:$0xff]  ;;  %v172_v54 = vmul.f32 %v38_v48, %v38_v48 }
  0x20   :  { %v87_v1 = vadd.f32 %v86_v61, %v24_v56  ;;  %v220_v3 = vadd.f32 %v219_v63, %v157_v58  ;;  %v40_v56 = vld [vmem:[%s488_s0 + $0x100] sm:$0xff]  ;;  %v173_v58 = vmul.f32 %v39_v52, %v39_v52 }
  0x22   :  { %v88_v5 = vadd.f32 %v87_v1, %v25_v60  ;;  %v221_v7 = vadd.f32 %v220_v3, %v158_v62  ;;  %v41_v60 = vld [vmem:[%s488_s0 + $0x108] sm:$0xff]  ;;  %v174_v62 = vmul.f32 %v40_v56, %v40_v56 }
  0x24   :  { %v89_v9 = vadd.f32 %v88_v5, %v26_v0  ;;  %v222_v11 = vadd.f32 %v221_v7, %v159_v2  ;;  %v42_v0 = vld [vmem:[%s488_s0 + $0x110] sm:$0xff]  ;;  %v175_v2 = vmul.f32 %v41_v60, %v41_v60 }
  0x26   :  { %v90_v13 = vadd.f32 %v89_v9, %v27_v4  ;;  %v223_v15 = vadd.f32 %v222_v11, %v160_v6  ;;  %v43_v4 = vld [vmem:[%s488_s0 + $0x118] sm:$0xff]  ;;  %v176_v6 = vmul.f32 %v42_v0, %v42_v0 }
  0x28   :  { %v91_v17 = vadd.f32 %v90_v13, %v28_v8  ;;  %v224_v19 = vadd.f32 %v223_v15, %v161_v10  ;;  %v44_v8 = vld [vmem:[%s488_s0 + $0x120] sm:$0xff]  ;;  %v177_v10 = vmul.f32 %v43_v4, %v43_v4 }
  0x2a   :  { %v92_v21 = vadd.f32 %v91_v17, %v29_v12  ;;  %v225_v23 = vadd.f32 %v224_v19, %v162_v14  ;;  %v45_v12 = vld [vmem:[%s488_s0 + $0x128] sm:$0xff]  ;;  %v178_v14 = vmul.f32 %v44_v8, %v44_v8 }
  0x2c   :  { %v93_v25 = vadd.f32 %v92_v21, %v30_v16  ;;  %v226_v27 = vadd.f32 %v225_v23, %v163_v18  ;;  %v46_v16 = vld [vmem:[%s488_s0 + $0x130] sm:$0xff]  ;;  %v179_v18 = vmul.f32 %v45_v12, %v45_v12 }
  0x2e   :  { %v94_v29 = vadd.f32 %v93_v25, %v31_v20  ;;  %v227_v31 = vadd.f32 %v226_v27, %v164_v22  ;;  %v47_v20 = vld [vmem:[%s488_s0 + $0x138] sm:$0xff]  ;;  %v180_v22 = vmul.f32 %v46_v16, %v46_v16 }
  0x30   :  { %v95_v33 = vadd.f32 %v94_v29, %v32_v24  ;;  %v228_v35 = vadd.f32 %v227_v31, %v165_v26  ;;  %v48_v24 = vld [vmem:[%s488_s0 + $0x140] sm:$0xff]  ;;  %v181_v26 = vmul.f32 %v47_v20, %v47_v20 }
  0x32   :  { %v96_v37 = vadd.f32 %v95_v33, %v33_v28  ;;  %v229_v39 = vadd.f32 %v228_v35, %v166_v30  ;;  %v49_v28 = vld [vmem:[%s488_s0 + $0x148] sm:$0xff]  ;;  %v182_v30 = vmul.f32 %v48_v24, %v48_v24 }
  0x34   :  { %v97_v41 = vadd.f32 %v96_v37, %v34_v32  ;;  %v230_v43 = vadd.f32 %v229_v39, %v167_v34  ;;  %v50_v32 = vld [vmem:[%s488_s0 + $0x150] sm:$0xff]  ;;  %v183_v34 = vmul.f32 %v49_v28, %v49_v28 }
  0x36   :  { %v98_v45 = vadd.f32 %v97_v41, %v35_v36  ;;  %v231_v47 = vadd.f32 %v230_v43, %v168_v38  ;;  %v51_v36 = vld [vmem:[%s488_s0 + $0x158] sm:$0xff]  ;;  %v184_v38 = vmul.f32 %v50_v32, %v50_v32 }
  0x38   :  { %v99_v49 = vadd.f32 %v98_v45, %v36_v40  ;;  %v232_v51 = vadd.f32 %v231_v47, %v169_v42  ;;  %v52_v40 = vld [vmem:[%s488_s0 + $0x160] sm:$0xff]  ;;  %v185_v42 = vmul.f32 %v51_v36, %v51_v36 }
  0x3a   :  { %v100_v53 = vadd.f32 %v99_v49, %v37_v44  ;;  %v233_v55 = vadd.f32 %v232_v51, %v170_v46  ;;  %v53_v44 = vld [vmem:[%s488_s0 + $0x168] sm:$0xff]  ;;  %v186_v46 = vmul.f32 %v52_v40, %v52_v40 }
  0x3c   :  { %v101_v57 = vadd.f32 %v100_v53, %v38_v48  ;;  %v234_v59 = vadd.f32 %v233_v55, %v171_v50  ;;  %v54_v48 = vld [vmem:[%s488_s0 + $0x170] sm:$0xff]  ;;  %v187_v50 = vmul.f32 %v53_v44, %v53_v44 }
  0x3e   :  { %v102_v61 = vadd.f32 %v101_v57, %v39_v52  ;;  %v235_v63 = vadd.f32 %v234_v59, %v172_v54  ;;  %v55_v52 = vld [vmem:[%s488_s0 + $0x178] sm:$0xff]  ;;  %v188_v54 = vmul.f32 %v54_v48, %v54_v48 }
  0x40   :  { %v103_v1 = vadd.f32 %v102_v61, %v40_v56  ;;  %v236_v3 = vadd.f32 %v235_v63, %v173_v58  ;;  %v56_v56 = vld [vmem:[%s488_s0 + $0x180] sm:$0xff]  ;;  %v189_v58 = vmul.f32 %v55_v52, %v55_v52 }
  0x42   :  { %v104_v5 = vadd.f32 %v103_v1, %v41_v60  ;;  %v237_v7 = vadd.f32 %v236_v3, %v174_v62  ;;  %v57_v60 = vld [vmem:[%s488_s0 + $0x188] sm:$0xff]  ;;  %v190_v62 = vmul.f32 %v56_v56, %v56_v56 }
  0x44   :  { %v105_v9 = vadd.f32 %v104_v5, %v42_v0  ;;  %v238_v11 = vadd.f32 %v237_v7, %v175_v2  ;;  %v58_v0 = vld [vmem:[%s488_s0 + $0x190] sm:$0xff]  ;;  %v191_v2 = vmul.f32 %v57_v60, %v57_v60 }
  0x46   :  { %v106_v13 = vadd.f32 %v105_v9, %v43_v4  ;;  %v239_v15 = vadd.f32 %v238_v11, %v176_v6  ;;  %v59_v4 = vld [vmem:[%s488_s0 + $0x198] sm:$0xff]  ;;  %v192_v6 = vmul.f32 %v58_v0, %v58_v0 }
  0x48   :  { %v107_v17 = vadd.f32 %v106_v13, %v44_v8  ;;  %v240_v19 = vadd.f32 %v239_v15, %v177_v10  ;;  %v60_v8 = vld [vmem:[%s488_s0 + $0x1a0] sm:$0xff]  ;;  %v193_v10 = vmul.f32 %v59_v4, %v59_v4 }
  0x4a   :  { %v108_v21 = vadd.f32 %v107_v17, %v45_v12  ;;  %v241_v23 = vadd.f32 %v240_v19, %v178_v14  ;;  %v61_v12 = vld [vmem:[%s488_s0 + $0x1a8] sm:$0xff]  ;;  %v194_v14 = vmul.f32 %v60_v8, %v60_v8 }
  0x4c   :  { %v109_v25 = vadd.f32 %v108_v21, %v46_v16  ;;  %v242_v27 = vadd.f32 %v241_v23, %v179_v18  ;;  %v62_v16 = vld [vmem:[%s488_s0 + $0x1b0] sm:$0xff]  ;;  %v195_v18 = vmul.f32 %v61_v12, %v61_v12 }
  0x4e   :  { %v110_v29 = vadd.f32 %v109_v25, %v47_v20  ;;  %v243_v31 = vadd.f32 %v242_v27, %v180_v22  ;;  %v63_v20 = vld [vmem:[%s488_s0 + $0x1b8] sm:$0xff]  ;;  %v196_v22 = vmul.f32 %v62_v16, %v62_v16 }
  0x50   :  { %v111_v33 = vadd.f32 %v110_v29, %v48_v24  ;;  %v244_v35 = vadd.f32 %v243_v31, %v181_v26  ;;  %v64_v24 = vld [vmem:[%s488_s0 + $0x1c0] sm:$0xff]  ;;  %v197_v26 = vmul.f32 %v63_v20, %v63_v20 }
  0x52   :  { %v112_v37 = vadd.f32 %v111_v33, %v49_v28  ;;  %v245_v39 = vadd.f32 %v244_v35, %v182_v30  ;;  %v65_v28 = vld [vmem:[%s488_s0 + $0x1c8] sm:$0xff]  ;;  %v198_v30 = vmul.f32 %v64_v24, %v64_v24 }
  0x54   :  { %v113_v41 = vadd.f32 %v112_v37, %v50_v32  ;;  %v246_v43 = vadd.f32 %v245_v39, %v183_v34  ;;  %v66_v32 = vld [vmem:[%s488_s0 + $0x1d0] sm:$0xff]  ;;  %v199_v34 = vmul.f32 %v65_v28, %v65_v28 }
  0x56   :  { %v114_v45 = vadd.f32 %v113_v41, %v51_v36  ;;  %v247_v47 = vadd.f32 %v246_v43, %v184_v38  ;;  %v67_v36 = vld [vmem:[%s488_s0 + $0x1d8] sm:$0xff]  ;;  %v200_v38 = vmul.f32 %v66_v32, %v66_v32 }
  0x58   :  { %v115_v49 = vadd.f32 %v114_v45, %v52_v40  ;;  %v248_v51 = vadd.f32 %v247_v47, %v185_v42  ;;  %v68_v40 = vld [vmem:[%s488_s0 + $0x1e0] sm:$0xff]  ;;  %v201_v42 = vmul.f32 %v67_v36, %v67_v36 }
  0x5a   :  { %v116_v53 = vadd.f32 %v115_v49, %v53_v44  ;;  %v249_v55 = vadd.f32 %v248_v51, %v186_v46  ;;  %v69_v44 = vld [vmem:[%s488_s0 + $0x1e8] sm:$0xff]  ;;  %v202_v46 = vmul.f32 %v68_v40, %v68_v40 }
  0x5c   :  { %v117_v57 = vadd.f32 %v116_v53, %v54_v48  ;;  %v250_v59 = vadd.f32 %v249_v55, %v187_v50  ;;  %v70_v48 = vld [vmem:[%s488_s0 + $0x1f0] sm:$0xff]  ;;  %v203_v50 = vmul.f32 %v69_v44, %v69_v44 }
  0x5e   :  { %v118_v61 = vadd.f32 %v117_v57, %v55_v52  ;;  %v251_v63 = vadd.f32 %v250_v59, %v188_v54  ;;  %v71_v52 = vld [vmem:[%s488_s0 + $0x1f8] sm:$0xff]  ;;  %v204_v54 = vmul.f32 %v70_v48, %v70_v48 }
  0x5f   :  { %v205_v57 = vmul.f32 %v71_v52, %v71_v52 }
  0x60   :  { %v119_v1 = vadd.f32 %v118_v61, %v56_v56  ;;  %v252_v3 = vadd.f32 %v251_v63, %v189_v58 }
  0x62   :  { %v120_v5 = vadd.f32 %v119_v1, %v57_v60  ;;  %v253_v7 = vadd.f32 %v252_v3, %v190_v62 }
  0x64   :  { %v121_v9 = vadd.f32 %v120_v5, %v58_v0  ;;  %v254_v11 = vadd.f32 %v253_v7, %v191_v2 }
  0x66   :  { %v122_v13 = vadd.f32 %v121_v9, %v59_v4  ;;  %v255_v15 = vadd.f32 %v254_v11, %v192_v6 }
  0x68   :  { %v123_v17 = vadd.f32 %v122_v13, %v60_v8  ;;  %v256_v19 = vadd.f32 %v255_v15, %v193_v10 }
  0x6a   :  { %v124_v21 = vadd.f32 %v123_v17, %v61_v12  ;;  %v257_v23 = vadd.f32 %v256_v19, %v194_v14 }
  0x6c   :  { %v125_v25 = vadd.f32 %v124_v21, %v62_v16  ;;  %v258_v27 = vadd.f32 %v257_v23, %v195_v18 }
  0x6e   :  { %v126_v29 = vadd.f32 %v125_v25, %v63_v20  ;;  %v259_v31 = vadd.f32 %v258_v27, %v196_v22 }
  0x70   :  { %v127_v33 = vadd.f32 %v126_v29, %v64_v24  ;;  %v260_v35 = vadd.f32 %v259_v31, %v197_v26 }
  0x72   :  { %v128_v37 = vadd.f32 %v127_v33, %v65_v28  ;;  %v261_v39 = vadd.f32 %v260_v35, %v198_v30 }
  0x74   :  { %v129_v41 = vadd.f32 %v128_v37, %v66_v32  ;;  %v262_v43 = vadd.f32 %v261_v39, %v199_v34 }
  0x76   :  { %v130_v45 = vadd.f32 %v129_v41, %v67_v36  ;;  %v263_v47 = vadd.f32 %v262_v43, %v200_v38 }
  0x78   :  { %v131_v49 = vadd.f32 %v130_v45, %v68_v40  ;;  %v264_v51 = vadd.f32 %v263_v47, %v201_v42 }
  0x7a   :  { %v132_v53 = vadd.f32 %v131_v49, %v69_v44  ;;  %v265_v55 = vadd.f32 %v264_v51, %v202_v46 }
  0x7c   :  { %v133_v56 = vadd.f32 %v132_v53, %v70_v48  ;;  %v266_v58 = vadd.f32 %v265_v55, %v203_v50 }
  0x7e   :  { %v134_v59 = vadd.f32 %v133_v56, %v71_v52  ;;  %v267_v60 = vadd.f32 %v266_v58, %v204_v54 }
  0x80   :  { %v135_v61 = vrot.slane %v134_v59, 4  ;;  %v268_v62 = vadd.f32 %v267_v60, %v205_v57 }
  0x82   :  { %v136_v63 = vadd.f32 %v135_v61, %v134_v59  ;;  %v269_v0 = vrot.slane %v268_v62, 4 }
  0x84   :  { %v137_v1 = vrot.slane %v136_v63, 2  ;;  %v270_v2 = vadd.f32 %v269_v0, %v268_v62 }
  0x86   :  { %v138_v3 = vadd.f32 %v137_v1, %v136_v63  ;;  %v271_v4 = vrot.slane %v270_v2, 2 }
  0x88   :  { %v139_v5 = vrot.slane %v138_v3, 1  ;;  %v272_v6 = vadd.f32 %v271_v4, %v270_v2 }
  0x8a   :  { %v140_v7 = vadd.f32 %v139_v5, %v138_v3  ;;  %v273_v8 = vrot.slane %v272_v6, 1 }
  0x8c   :  { %141 = vst [vmem:[%s489_s1] sm:$0x1] %v140_v7  ;;  %v274_v9 = vadd.f32 %v273_v8, %v272_v6 }
  0x8e   :  { %275 = vst [vmem:[%s489_s1 + $0x1] sm:$0x1] %v274_v9 }

// kernel: basic_block.5
= control target key start
LH: loop header
LB: loop body
LE: loop exit
PB: predicated region body
PF: predicated region fallthrough
CT: control target
= control target key end

     0   :  { %s977_s21 = smov 0   ;;  %s1070_s0 = inlined_call_operand.vmem [shape: f32[512,128], index: 0, kind: input, shape index: {}]   ;;  %s1071_s1 = inlined_call_operand.vmem [shape: f32[2,128], index: 1, kind: input, shape index: {}]   ;;  %s1072_s2 = inlined_call_operand.vmem [shape: f32[1,128], index: 2, kind: input, shape index: {}]   ;;  %s1073_s3 = inlined_call_operand.vmem [shape: f32[1,128], index: 3, kind: input, shape index: {}]   ;;  %s1074_s4 = inlined_call_operand.vmem [shape: bf16[128,128], index: 4, kind: input, shape index: {}]   ;;  %s1075_s5 = inlined_call_operand.vmem [shape: bf16[512,128], index: 5, kind: output, shape index: {0}]   ;;  %s1076_s6 = inlined_call_operand.vmem [shape: f32[4,2,128], index: 6, kind: output, shape index: {1}]  }
   0x1 LB: > { %s983_s22 = sadd.s32 4294967295, %s940_s21   ;;  %p757_p0 = scmp.ge.s32.totalorder %s940_s21, 1  ;;  %s940_s21 = sphi %s977_s21, %s17_s21  }
   0x2   : > { %p216_p1 = scmp.lt.s32.totalorder %s940_s21, 5 }
   0x4   : > { %p217_p2 = pnand %p757_p0, %p216_p1 }
   0x5   : > { %s758_s15 = sshll.u32 (!%p217_p2), %s983_s22, 4  ;;  %p262_p4 = scmp.lt.s32.totalorder (!%p217_p2), %s983_s22, 3 }
   0x6   : > { %220 = sbr.rel (%p217_p2) target bundleno = 297 (0x129), region = 40  ;;  %p251_p3 = scmp.lt.s32.totalorder (!%p217_p2), %s758_s15, 63 }
   0xb   : > { %v924_v0 = vld [vmem:[%s1074_s4 + $0x38] sm:$0xff]   ;;  %v925_v1 = vld [vmem:[%s1074_s4 + $0x30] sm:$0xff]   ;;  %v926_v2 = vld [vmem:[%s1074_s4 + $0x28] sm:$0xff]   ;;  %s1078_s15 = smov (!%p251_p3, %s758_s15), 63  ;;  %v298_v15 = vlaneseq  ;;  %s1080_s22 = smov (!%p262_p4, %s983_s22), 3 }
   0xc   : > { %868 = vmatprep.subr.bf16.mxu0 %v924_v0  ;;  %900 = vmatprep.subr.bf16.mxu1 %v924_v0  ;;  %v927_v3 = vld [vmem:[%s1074_s4 + $0x20] sm:$0xff]   ;;  %v928_v9 = vld [vmem:[%s1074_s4 + $0x18] sm:$0xff]   ;;  %v929_v12 = vld [vmem:[%s1074_s4 + $0x10] sm:$0xff]   ;;  %s759_s20 = sshll.u32 %s1078_s15, 3  ;;  %s761_s30 = sshll.u32 %s1078_s15, 2 }
   0xd   : > { %869 = vmatpush3.bf16.msra.mxu0 %v924_v0  ;;  %908 = vmatpush3.bf16.msra.mxu1 %v924_v0  ;;  %v267_v4 = vld [vmem:[%s1071_s1] sm:$0x1]  ;;  %v269_v5 = vld [vmem:[%s1071_s1 + $0x1] sm:$0x1]  ;;  %v930_v14 = vld [vmem:[%s1074_s4 + $0x8] sm:$0xff]   ;;  %v299_v17 = vshrl.u32 %v298_v15, 7  ;;  %s1024_s25 = scalar_lea.vmem %s1070_s0, %s759_s20  ;;  %s1052_s9 = scalar_lea.vmem %s1075_s5, %s761_s30 }
   0xe   : > { %870 = vmatprep.subr.bf16.mxu0 %v925_v1  ;;  %901 = vmatprep.subr.bf16.mxu1 %v925_v1  ;;  %v268_v6 = vmul.f32 0.001953125, %v267_v4  ;;  %v270_v7 = vmul.f32 0.001953125, %v269_v5  ;;  %v931_v16 = vld [vmem:[%s1074_s4] sm:$0xff]   ;;  %v282_v24 = vld [vmem:[%s1024_s25 + $0x8] sm:$0xff]  ;;  %v283_v25 = vld [vmem:[%s1024_s25 + $0x10] sm:$0xff]  ;;  %s762_s10 = sshll.u32 %s1080_s22, 1 }
   0xf   : > { %v274_v18 = vld [vmem:[%s1072_s2] sm:$0x1]  ;;  %v300_v19 = vsub.s32 0, %v299_v17  ;;  %v284_v26 = vld [vmem:[%s1024_s25 + $0x18] sm:$0xff]  ;;  %v286_v30 = vld [vmem:[%s1024_s25 + $0x28] sm:$0xff]  ;;  %s265_s13 = scalar_lea.vmem %s1076_s6, %s762_s10 }
  0x10   : > { %v271_v8 = vmul.f32 %v268_v6, %v268_v6  ;;  %v278_v22 = vld [vmem:[%s1073_s3] sm:$0x1]  ;;  %v287_v31 = vld [vmem:[%s1024_s25 + $0x30] sm:$0xff]  ;;  %v288_v32 = vld [vmem:[%s1024_s25 + $0x38] sm:$0xff] }
  0x11   : > { %871 = vmatpush3.bf16.msra.mxu0 %v925_v1  ;;  %909 = vmatpush3.bf16.msra.mxu1 %v925_v1  ;;  %v281_v23 = vld [vmem:[%s1024_s25] sm:$0xff]  ;;  %v290_v34 = vld [vmem:[%s1024_s25 + $0x48] sm:$0xff]  ;;  %v291_v35 = vld [vmem:[%s1024_s25 + $0x50] sm:$0xff] }
  0x12   : > { %872 = vmatprep.subr.bf16.mxu0 %v926_v2  ;;  %902 = vmatprep.subr.bf16.mxu1 %v926_v2  ;;  %v272_v10 = vsub.f32 %v270_v7, %v271_v8  ;;  %v285_v27 = vld [vmem:[%s1024_s25 + $0x20] sm:$0xff]  ;;  %v292_v40 = vld [vmem:[%s1024_s25 + $0x58] sm:$0xff]  ;;  %v294_v42 = vld [vmem:[%s1024_s25 + $0x68] sm:$0xff] }
  0x13   : > { %v289_v33 = vld [vmem:[%s1024_s25 + $0x40] sm:$0xff] }
  0x14   : > { %v273_v11 = vmax.f32 %v272_v10, 0.0  ;;  %v293_v41 = vld [vmem:[%s1024_s25 + $0x60] sm:$0xff]  ;;  %v295_v10 = vld [vmem:[%s1024_s25 + $0x70] sm:$0xff] }
  0x15   : > { %873 = vmatpush3.bf16.msra.mxu0 %v926_v2  ;;  %910 = vmatpush3.bf16.msra.mxu1 %v926_v2 }
  0x16   : > { %874 = vmatprep.subr.bf16.mxu0 %v927_v3  ;;  %903 = vmatprep.subr.bf16.mxu1 %v927_v3  ;;  %v275_v13 = vadd.f32 1e-05, %v273_v11  ;;  %v296_v11 = vld [vmem:[%s1024_s25 + $0x78] sm:$0xff] }
  0x18   : > { %932 = vrsqrt.f32 %v275_v13 }
  0x19   : > { %875 = vmatpush3.bf16.msra.mxu0 %v927_v3  ;;  %911 = vmatpush3.bf16.msra.mxu1 %v927_v3 }
  0x1a   : > { %876 = vmatprep.subr.bf16.mxu0 %v928_v9  ;;  %904 = vmatprep.subr.bf16.mxu1 %v928_v9 }
  0x1d   : > { %877 = vmatpush3.bf16.msra.mxu0 %v928_v9  ;;  %912 = vmatpush3.bf16.msra.mxu1 %v928_v9 }
  0x1e   : > { %878 = vmatprep.subr.bf16.mxu0 %v929_v12  ;;  %905 = vmatprep.subr.bf16.mxu1 %v929_v12 }
  0x21   : > { %879 = vmatpush3.bf16.msra.mxu0 %v929_v12  ;;  %913 = vmatpush3.bf16.msra.mxu1 %v929_v12 }
  0x22   : > { %880 = vmatprep.subr.bf16.mxu0 %v930_v14  ;;  %906 = vmatprep.subr.bf16.mxu1 %v930_v14 }
  0x25   : > { %881 = vmatpush3.bf16.msra.mxu0 %v930_v14  ;;  %914 = vmatpush3.bf16.msra.mxu1 %v930_v14  ;;  %v933_v20 = vpop.eup %932 }
  0x26   : > { %882 = vmatprep.subr.bf16.mxu0 %v931_v16  ;;  %907 = vmatprep.subr.bf16.mxu1 %v931_v16  ;;  %v277_v21 = vmul.f32 %v933_v20, %v274_v18 }
  0x28   : > { %v279_v28 = vmul.f32 %v277_v21, %v268_v6  ;;  %v301_v29 = vrot.slane %v277_v21, %v300_v19 }
  0x29   : > { %883 = vmatpush3.bf16.msra.mxu0 %v931_v16  ;;  %915 = vmatpush3.bf16.msra.mxu1 %v931_v16 }
  0x2a   : > { %v280_v36 = vsub.f32 %v278_v22, %v279_v28  ;;  %v303_v37 = vmul.f32 %v301_v29, %v281_v23  ;;  %v304_v38 = vmul.f32 %v301_v29, %v282_v24  ;;  %v305_v39 = vmul.f32 %v301_v29, %v283_v25 }
  0x2b   : > { %v306_v43 = vmul.f32 %v301_v29, %v284_v26  ;;  %v307_v44 = vmul.f32 %v301_v29, %v285_v27  ;;  %v308_v45 = vmul.f32 %v301_v29, %v286_v30  ;;  %v309_v46 = vmul.f32 %v301_v29, %v287_v31 }
  0x2c   : > { %v323_v47 = vrot.slane %v280_v36, %v300_v19  ;;  %v310_v48 = vmul.f32 %v301_v29, %v288_v32  ;;  %v311_v49 = vmul.f32 %v301_v29, %v289_v33  ;;  %v312_v50 = vmul.f32 %v301_v29, %v290_v34 }
  0x2d   : > { %v313_v51 = vmul.f32 %v301_v29, %v291_v35  ;;  %v314_v52 = vmul.f32 %v301_v29, %v292_v40  ;;  %v315_v53 = vmul.f32 %v301_v29, %v293_v41  ;;  %v316_v54 = vmul.f32 %v301_v29, %v294_v42 }
  0x2e   : > { %v325_v55 = vadd.f32 %v323_v47, %v303_v37  ;;  %v326_v56 = vadd.f32 %v323_v47, %v304_v38  ;;  %v327_v57 = vadd.f32 %v323_v47, %v305_v39  ;;  %v328_v58 = vadd.f32 %v323_v47, %v306_v43 }
  0x2f   : > { %v329_v59 = vadd.f32 %v323_v47, %v307_v44  ;;  %v330_v60 = vadd.f32 %v323_v47, %v308_v45  ;;  %v331_v61 = vadd.f32 %v323_v47, %v309_v46  ;;  %v332_v62 = vadd.f32 %v323_v47, %v310_v48 }
  0x30   : > { %v341_v63 = vmax.f32 %v325_v55, 0.0  ;;  %v342_v0 = vmax.f32 %v326_v56, 0.0  ;;  %v343_v1 = vmax.f32 %v327_v57, 0.0  ;;  %v344_v2 = vmax.f32 %v328_v58, 0.0 }
  0x31   : > { %v345_v3 = vmax.f32 %v329_v59, 0.0  ;;  %v346_v4 = vmax.f32 %v330_v60, 0.0  ;;  %v347_v5 = vmax.f32 %v331_v61, 0.0  ;;  %v333_v8 = vadd.f32 %v323_v47, %v311_v49 }
  0x32   : > { %v357_v6 = vpack.c.bf16 %v342_v0, %v341_v63  ;;  %v358_v7 = vpack.c.bf16 %v344_v2, %v343_v1  ;;  %v334_v9 = vadd.f32 %v323_v47, %v312_v50  ;;  %v348_v13 = vmax.f32 %v332_v62, 0.0 }
  0x33   : > { %v359_v12 = vpack.c.bf16 %v346_v4, %v345_v3  ;;  %v335_v14 = vadd.f32 %v323_v47, %v313_v51  ;;  %v336_v15 = vadd.f32 %v323_v47, %v314_v52  ;;  %v349_v16 = vmax.f32 %v333_v8, 0.0 }
  0x34   : > { %884 = vmatprep.mubr.bf16.mxu0 %v357_v6  ;;  %v350_v17 = vmax.f32 %v334_v9, 0.0  ;;  %v337_v18 = vadd.f32 %v323_v47, %v315_v53  ;;  %v338_v19 = vadd.f32 %v323_v47, %v316_v54  ;;  %v317_v22 = vmul.f32 %v301_v29, %v295_v10 }
  0x35   : > { %885 = vmatmul.mubr.bf16.vlgmr.msra.gmra.mxu0 %v358_v7  ;;  %v351_v20 = vmax.f32 %v335_v14, 0.0  ;;  %v352_v21 = vmax.f32 %v336_v15, 0.0  ;;  %v318_v23 = vmul.f32 %v301_v29, %v296_v11  ;;  %v360_v32 = vpack.c.bf16 %v348_v13, %v347_v5 }
  0x36   : > { %888 = vmatprep.mubr.bf16.mxu0 %v359_v12  ;;  %v361_v24 = vpack.c.bf16 %v350_v17, %v349_v16  ;;  %v353_v25 = vmax.f32 %v337_v18, 0.0  ;;  %v354_v26 = vmax.f32 %v338_v19, 0.0  ;;  %v339_v28 = vadd.f32 %v323_v47, %v317_v22 }
  0x37   : > { %v362_v27 = vpack.c.bf16 %v352_v21, %v351_v20  ;;  %v340_v30 = vadd.f32 %v323_v47, %v318_v23 }
  0x38   : > { %892 = vmatprep.mubr.bf16.mxu1 %v361_v24  ;;  %v363_v31 = vpack.c.bf16 %v354_v26, %v353_v25  ;;  %v355_v33 = vmax.f32 %v339_v28, 0.0 }
  0x39   : > { %893 = vmatmul.mubr.bf16.vlgmr.msra.gmra.mxu1 %v362_v27  ;;  %v356_v34 = vmax.f32 %v340_v30, 0.0 }
  0x3a   : > { %896 = vmatprep.mubr.bf16.mxu1 %v363_v31 }
  0x3b   : > { %v364_v35 = vpack.c.bf16 %v356_v34, %v355_v33 }
  0x3d   : > { %889 = vmatmul.mubr.bf16.gmra.mxu0 %v360_v32 }
  0x41   : > { %897 = vmatmul.mubr.bf16.gmra.mxu1 %v364_v35 }
  0xf5   : > { %v886_v36 = vpop.f32.mrf.mxu0 }
  0xf6   : > { %v630_v48 = vmul.f32 %v886_v36, %v886_v36 }
  0xf7   : > { %v463_v29 = vpop.f32.mrf.mxu0 }
  0xf8   : > { %v628_v42 = vmul.f32 %v463_v29, %v463_v29 }
  0xf9   : > { %v887_v37 = vpop.f32.mrf.mxu0  ;;  %v894_v38 = vpop.f32.mrf.mxu1 }
  0xfa   : > { %v813_v39 = vpack.c.bf16 %v887_v37, %v886_v36  ;;  %v631_v54 = vmul.f32 %v887_v37, %v887_v37  ;;  %v638_v22 = vmul.f32 %v894_v38, %v894_v38 }
  0xfb   : > { %v466_v40 = vpop.f32.mrf.mxu0  ;;  %v495_v41 = vpop.f32.mrf.mxu1 }
  0xfc   : > { %845 = vst [vmem:[%s1052_s9 + $0x8] sm:$0xff] %v813_v39   ;;  %v808_v43 = vpack.c.bf16 %v466_v40, %v463_v29  ;;  %v606_v44 = vadd.f32 %v466_v40, %v463_v29  ;;  %v629_v45 = vmul.f32 %v466_v40, %v466_v40  ;;  %v636_v16 = vmul.f32 %v495_v41, %v495_v41 }
  0xfd   : > { %v890_v46 = vpop.f32.mrf.mxu0  ;;  %v895_v47 = vpop.f32.mrf.mxu1 }
  0xfe   : > { %809 = vst [vmem:[%s1052_s9] sm:$0xff] %v808_v43   ;;  %v607_v49 = vadd.f32 %v886_v36, %v606_v44  ;;  %v644_v50 = vadd.f32 %v629_v45, %v628_v42  ;;  %v833_v51 = vpack.c.bf16 %v895_v47, %v894_v38  ;;  %v634_v7 = vmul.f32 %v890_v46, %v890_v46 }
  0xff   : > { %v479_v52 = vpop.f32.mrf.mxu0  ;;  %v498_v53 = vpop.f32.mrf.mxu1  ;;  %v639_v25 = vmul.f32 %v895_v47, %v895_v47 }
 0x100   : > { %v645_v55 = vadd.f32 %v644_v50, %v630_v48  ;;  %v608_v56 = vadd.f32 %v887_v37, %v607_v49  ;;  %849 = vst [vmem:[%s1052_s9 + $0x28] sm:$0xff] %v833_v51   ;;  %v828_v57 = vpack.c.bf16 %v498_v53, %v495_v41  ;;  %v632_v61 = vmul.f32 %v479_v52, %v479_v52 }
 0x101   : > { %v891_v58 = vpop.f32.mrf.mxu0  ;;  %v898_v59 = vpop.f32.mrf.mxu1  ;;  %v637_v20 = vmul.f32 %v498_v53, %v498_v53 }
 0x102   : > { %v609_v60 = vadd.f32 %v608_v56, %v479_v52  ;;  %v646_v62 = vadd.f32 %v645_v55, %v631_v54  ;;  %v823_v63 = vpack.c.bf16 %v891_v58, %v890_v46  ;;  %848 = vst [vmem:[%s1052_s9 + $0x20] sm:$0xff] %v828_v57   ;;  %v635_v12 = vmul.f32 %v891_v58, %v891_v58 }
 0x103   : > { %v482_v0 = vpop.f32.mrf.mxu0  ;;  %v511_v1 = vpop.f32.mrf.mxu1  ;;  %v642_v35 = vmul.f32 %v898_v59, %v898_v59 }
 0x104   : > { %v647_v2 = vadd.f32 %v646_v62, %v632_v61  ;;  %847 = vst [vmem:[%s1052_s9 + $0x18] sm:$0xff] %v823_v63   ;;  %v818_v3 = vpack.c.bf16 %v482_v0, %v479_v52  ;;  %v610_v4 = vadd.f32 %v609_v60, %v482_v0  ;;  %v633_v5 = vmul.f32 %v482_v0, %v482_v0 }
 0x105   : > { %v899_v6 = vpop.f32.mrf.mxu1  ;;  %v640_v30 = vmul.f32 %v511_v1, %v511_v1 }
 0x106   : > { %846 = vst [vmem:[%s1052_s9 + $0x10] sm:$0xff] %v818_v3   ;;  %v611_v8 = vadd.f32 %v890_v46, %v610_v4  ;;  %v648_v9 = vadd.f32 %v647_v2, %v633_v5  ;;  %v843_v10 = vpack.c.bf16 %v899_v6, %v898_v59  ;;  %v643_v37 = vmul.f32 %v899_v6, %v899_v6 }
 0x107   : > { %v514_v11 = vpop.f32.mrf.mxu1 }
 0x108   : > { %v612_v13 = vadd.f32 %v891_v58, %v611_v8  ;;  %v649_v14 = vadd.f32 %v648_v9, %v634_v7  ;;  %851 = vst [vmem:[%s1052_s9 + $0x38] sm:$0xff] %v843_v10   ;;  %v838_v15 = vpack.c.bf16 %v514_v11, %v511_v1  ;;  %v641_v34 = vmul.f32 %v514_v11, %v514_v11 }
 0x10a   : > { %v650_v17 = vadd.f32 %v649_v14, %v635_v12  ;;  %v613_v18 = vadd.f32 %v612_v13, %v495_v41  ;;  %850 = vst [vmem:[%s1052_s9 + $0x30] sm:$0xff] %v838_v15  }
 0x10c   : > { %v614_v19 = vadd.f32 %v613_v18, %v498_v53  ;;  %v651_v21 = vadd.f32 %v650_v17, %v636_v16 }
 0x10e   : > { %v615_v23 = vadd.f32 %v894_v38, %v614_v19  ;;  %v652_v24 = vadd.f32 %v651_v21, %v637_v20 }
 0x110   : > { %v653_v26 = vadd.f32 %v652_v24, %v638_v22  ;;  %v616_v27 = vadd.f32 %v895_v47, %v615_v23 }
 0x112   : > { %v617_v28 = vadd.f32 %v616_v27, %v511_v1  ;;  %v654_v31 = vadd.f32 %v653_v26, %v639_v25 }
 0x114   : > { %v655_v32 = vadd.f32 %v654_v31, %v640_v30  ;;  %v618_v33 = vadd.f32 %v617_v28, %v514_v11 }
 0x116   : > { %v619_v36 = vadd.f32 %v898_v59, %v618_v33  ;;  %v656_v29 = vadd.f32 %v655_v32, %v641_v34 }
 0x118   : > { %v620_v39 = vadd.f32 %v899_v6, %v619_v36  ;;  %v657_v40 = vadd.f32 %v656_v29, %v642_v35 }
 0x11a   : > { %v621_v41 = vrot.slane %v620_v39, 4  ;;  %v658_v38 = vadd.f32 %v657_v40, %v643_v37 }
 0x11c   : > { %v622_v42 = vadd.f32 %v621_v41, %v620_v39  ;;  %v659_v43 = vrot.slane %v658_v38, 4 }
 0x11e   : > { %v623_v44 = vrot.slane %v622_v42, 2  ;;  %v660_v45 = vadd.f32 %v659_v43, %v658_v38 }
 0x120   : > { %v624_v46 = vadd.f32 %v623_v44, %v622_v42  ;;  %v661_v47 = vrot.slane %v660_v45, 2 }
 0x122   : > { %v625_v48 = vrot.slane %v624_v46, 1  ;;  %v662_v49 = vadd.f32 %v661_v47, %v660_v45 }
 0x124   : > { %v626_v50 = vadd.f32 %v625_v48, %v624_v46  ;;  %v663_v51 = vrot.slane %v662_v49, 1 }
 0x126   : > { %627 = vst [vmem:[%s265_s13] sm:$0x1] %v626_v50  ;;  %v664_v52 = vadd.f32 %v663_v51, %v662_v49 }
 0x128   : > { %665 = vst [vmem:[%s265_s13 + $0x1] sm:$0x1] %v664_v52 }
 0x129 PF: > { %s17_s21 = sadd.s32 1, %s940_s21  }
 0x12a   : > { %p14_p5 = scmp.ge.s32.totalorder %s17_s21, 6  }
 0x12c   :  { %16 = sbr.rel (!%p14_p5) target bundleno = 1 (0x1), region = 82 }

// kernel: basic_block.7
= control target key start
LH: loop header
LB: loop body
LE: loop exit
PB: predicated region body
PF: predicated region fallthrough
CT: control target
= control target key end

     0   :  { %11 = vsyncpa [#allocation3], 0  ;;  %s1142_s0 = inlined_call_operand.vmem [shape: bf16[512,128], index: 0, kind: input, shape index: {}]   ;;  %s1143_s1 = inlined_call_operand.vmem [shape: f32[512,128], index: 1, kind: input, shape index: {}]   ;;  %s1144_s2 = inlined_call_operand.vmem [shape: f32[2,128], index: 2, kind: input, shape index: {}]   ;;  %s1145_s3 = inlined_call_operand.vmem [shape: f32[1,128], index: 3, kind: input, shape index: {}]   ;;  %s1146_s4 = inlined_call_operand.vmem [shape: f32[1,128], index: 4, kind: input, shape index: {}]   ;;  %s1147_s5 = inlined_call_operand.vmem [shape: bf16[128,128], index: 5, kind: input, shape index: {}]   ;;  %s1148_s6 = inlined_call_operand.hbm [shape: f32[512,128], index: 6, kind: output, shape index: {}]  }
   0x1   :  { %13 = vsyncpa [#allocation3 + $0x1], 0  ;;  %s948_s21 = smov 0   ;;  %s950_s22 = smov 0  }
   0x2   :  { %s952_s23 = smov 0   ;;  %s954_s24 = smov 0  }
   0x3 LB: > { %s969_s25 = sadd.s32 4294967295, %s908_s24   ;;  %s671_s26 = sadd.s32 4294967294, %s908_s24   ;;  %s908_s24 = sphi %s954_s24, %s1154_s24   ;;  %s904_s23 = sphi %s952_s23, %s1153_s23   ;;  %s900_s22 = sphi %s950_s22, %s1152_s22   ;;  %s896_s21 = sphi %s948_s21, %s1151_s21  }
   0x4   : > { %s973_s27 = sadd.s32 1, %s908_s24   ;;  %s162_s28 = sadd.s32 1, %s904_s23 }
   0x5   : > { %s159_s29 = ssub.s32 %s908_s24, %s973_s27  ;;  %p172_p0 = scmp.ne.s32.totalorder %s904_s23, %s900_s22 }
   0x6   : > { %p160_p1 = scmp.eq.s32.totalorder %s159_s29, 0  ;;  %p173_p2 = scmp.eq.s32.totalorder %s969_s25, 3 }
   0x7   : > { %p178_p3 = scmp.ne.s32.totalorder %s900_s22, %s896_s21  ;;  %p179_p4 = scmp.eq.s32.totalorder %s671_s26, 3 }
   0x8   : > { %s984_s30 = scalar_select %p160_p1, %s904_s23, %s162_s28  }
   0x9   : > { %p986_p5 = por %p173_p2, %p172_p0  ;;  %p990_p6 = por %p179_p4, %p178_p3 }
   0xa   : > { %p674_p7 = scmp.ge.s32.totalorder %s908_s24, 1  ;;  %p227_p8 = scmp.lt.s32.totalorder %s908_s24, 5 }
   0xc   : > { %p228_p9 = pnand %p674_p7, %p227_p8 }
   0xd   : > { %s676_s29 = sshll.u32 (!%p228_p9), %s969_s25, 4  ;;  %s259_s10 = sand.u32 (!%p228_p9), 1, %s900_s22  }
   0xe   : > { %231 = sbr.rel (%p228_p9) target bundleno = 284 (0x11c), region = 44  ;;  %p263_p10 = scmp.lt.s32.totalorder (!%p228_p9), %s676_s29, 63 }
   0xf   : > { %s675_s14 = sshll.u32 (!%p228_p9), %s259_s10, 7  ;;  %s693_s15 = sshll.u32 (!%p228_p9), %s969_s25, 11 }
  0x10   : > { %s1092_s19 = scalar_lea.hbm (!%p228_p9), %s1148_s6, %s693_s15  ;;  %s1102_s25 = scalar_lea.sflag (!%p228_p9), [#allocation3], %s259_s10 }
  0x11   : > { %s910_s26 = smov (!%p228_p9), [#allocation2]  }
  0x12   : > { %s852_s28 = sshll.u32 (!%p228_p9), %s910_s26, 4  ;;  %s853_s28 = int_to_ptr.vmem [resolvable:$false] %s852_s28 }
  0x13   : > { %v838_v0 = vld [vmem:[%s1147_s5 + $0x38] sm:$0xff]   ;;  %v839_v1 = vld [vmem:[%s1147_s5 + $0x30] sm:$0xff]   ;;  %v840_v2 = vld [vmem:[%s1147_s5 + $0x28] sm:$0xff]   ;;  %s1156_s29 = smov (!%p263_p10, %s676_s29), 63  ;;  %v323_v15 = vlaneseq }
  0x14   : > { %749 = vmatprep.subr.bf16.mxu0 %v838_v0  ;;  %781 = vmatprep.subr.bf16.mxu1 %v838_v0  ;;  %v841_v3 = vld [vmem:[%s1147_s5 + $0x20] sm:$0xff]   ;;  %v842_v9 = vld [vmem:[%s1147_s5 + $0x18] sm:$0xff]   ;;  %v843_v12 = vld [vmem:[%s1147_s5 + $0x10] sm:$0xff]   ;;  %s677_s13 = sshll.u32 %s1156_s29, 2  ;;  %s679_s9 = sshll.u32 %s1156_s29, 3 }
  0x15   : > { %750 = vmatpush3.bf16.msra.mxu0 %v838_v0  ;;  %789 = vmatpush3.bf16.msra.mxu1 %v838_v0  ;;  %v276_v4 = vld [vmem:[%s1144_s2] sm:$0x1]  ;;  %v278_v5 = vld [vmem:[%s1144_s2 + $0x1] sm:$0x1]  ;;  %v844_v14 = vld [vmem:[%s1147_s5 + $0x8] sm:$0xff]   ;;  %s266_s18 = scalar_lea.vmem %s1142_s0, %s677_s13  ;;  %v324_v17 = vshrl.u32 %v323_v15, 7  ;;  %s1053_s13 = scalar_lea.vmem %s1143_s1, %s679_s9 }
  0x16   : > { %751 = vmatprep.subr.bf16.mxu0 %v839_v1  ;;  %782 = vmatprep.subr.bf16.mxu1 %v839_v1  ;;  %v1014_v6 = vmul.f32 0.001953125, %v276_v4  ;;  %v279_v7 = vmul.f32 0.001953125, %v278_v5  ;;  %v845_v16 = vld [vmem:[%s1147_s5] sm:$0xff]   ;;  %v726_v21 = vld [vmem:[%s266_s18 + $0x8] sm:$0xff]   ;;  %v727_v24 = vld [vmem:[%s266_s18 + $0x10] sm:$0xff]   ;;  %s1063_s29 = scalar_lea.vmem [#allocation2], %s675_s14 }
  0x17   : > { %v695_v18 = vld [vmem:[%s266_s18] sm:$0xff]   ;;  %v325_v22 = vsub.s32 0, %v324_v17  ;;  %v730_v23 = vld [vmem:[%s266_s18 + $0x28] sm:$0xff]   ;;  %v731_v29 = vld [vmem:[%s266_s18 + $0x30] sm:$0xff]   ;;  %v700_v32 = vunpack.c.l.bf16 %v726_v21  ;;  %v701_v33 = vunpack.c.h.bf16 %v726_v21  ;;  %v704_v39 = vunpack.c.l.bf16 %v727_v24  ;;  %s597_s16 = sshll.u32 %s1063_s29, 4  ;;  %s854_s9 = scalar_lea.vmem %s853_s28, 4096  ;;  %s1094_s16 = int_to_ptr.vmem [resolvable:$true] %s597_s16 }
  0x18   : > { %v280_v8 = vmul.f32 %v1014_v6, %v1014_v6  ;;  %v729_v19 = vld [vmem:[%s266_s18 + $0x20] sm:$0xff]   ;;  %v696_v26 = vunpack.c.l.bf16 %v695_v18  ;;  %v697_v27 = vunpack.c.h.bf16 %v695_v18  ;;  %v728_v34 = vld [vmem:[%s266_s18 + $0x18] sm:$0xff]   ;;  %v716_v37 = vunpack.c.l.bf16 %v730_v23  ;;  %s848_s20 = scalar_lea.vmem %s1094_s16, 2048  ;;  %p855_p0 = scmp.lt.s32.totalorder %s1094_s16, %s853_s28 }
  0x19   : > { %752 = vmatpush3.bf16.msra.mxu0 %v839_v1  ;;  %790 = vmatpush3.bf16.msra.mxu1 %v839_v1  ;;  %v283_v20 = vld [vmem:[%s1145_s3] sm:$0x1]  ;;  %v712_v28 = vunpack.c.l.bf16 %v729_v19  ;;  %v713_v31 = vunpack.c.h.bf16 %v729_v19  ;;  %v1040_v35 = vld [vmem:[%s266_s18 + $0x38] sm:$0xff]   ;;  %v717_v38 = vunpack.c.h.bf16 %v730_v23  ;;  %v705_v40 = vunpack.c.h.bf16 %v727_v24  ;;  %p849_p11 = scmp.ne.s32.totalorder %s1094_s16, %s848_s20  ;;  %p856_p1 = scmp.lt.s32.totalorder %s854_s9, %s848_s20 }
  0x1a   : > { %753 = vmatprep.subr.bf16.mxu0 %v840_v2  ;;  %783 = vmatprep.subr.bf16.mxu1 %v840_v2  ;;  %v281_v10 = vsub.f32 %v279_v7, %v280_v8  ;;  %v287_v36 = vld [vmem:[%s1146_s4] sm:$0x1]  ;;  %v720_v43 = vunpack.c.l.bf16 %v731_v29  ;;  %v721_v44 = vunpack.c.h.bf16 %v731_v29  ;;  %v708_v45 = vunpack.c.l.bf16 %v728_v34 }
  0x1b   : > { %v709_v46 = vunpack.c.h.bf16 %v728_v34  ;;  %v724_v47 = vunpack.c.l.bf16 %v1040_v35  ;;  %v725_v48 = vunpack.c.h.bf16 %v1040_v35  ;;  %p850_p12 = pnand %p849_p11, %p986_p5  ;;  %p857_p2 = por %p856_p1, %p855_p0 }
  0x1c   : > { %v282_v11 = vmax.f32 %v281_v10, 0.0 }
  0x1d   : > { %754 = vmatpush3.bf16.msra.mxu0 %v840_v2  ;;  %791 = vmatpush3.bf16.msra.mxu1 %v840_v2  ;;  %p851_p13 = pneg %p850_p12 }
  0x1e   : > { %755 = vmatprep.subr.bf16.mxu0 %v841_v3  ;;  %784 = vmatprep.subr.bf16.mxu1 %v841_v3  ;;  %v284_v13 = vadd.f32 1e-05, %v282_v11 }
  0x1f   : > { %p858_p3 = pnand %p857_p2, %p851_p13 }
  0x20   : > { %846 = vrsqrt.f32 %v284_v13 }
  0x21   : > { %756 = vmatpush3.bf16.msra.mxu0 %v841_v3  ;;  %792 = vmatpush3.bf16.msra.mxu1 %v841_v3 }
  0x22   : > { %757 = vmatprep.subr.bf16.mxu0 %v842_v9  ;;  %785 = vmatprep.subr.bf16.mxu1 %v842_v9 }
  0x25   : > { %758 = vmatpush3.bf16.msra.mxu0 %v842_v9  ;;  %793 = vmatpush3.bf16.msra.mxu1 %v842_v9 }
  0x26   : > { %759 = vmatprep.subr.bf16.mxu0 %v843_v12  ;;  %786 = vmatprep.subr.bf16.mxu1 %v843_v12 }
  0x29   : > { %760 = vmatpush3.bf16.msra.mxu0 %v843_v12  ;;  %794 = vmatpush3.bf16.msra.mxu1 %v843_v12 }
  0x2a   : > { %761 = vmatprep.subr.bf16.mxu0 %v844_v14  ;;  %787 = vmatprep.subr.bf16.mxu1 %v844_v14 }
  0x2d   : > { %762 = vmatpush3.bf16.msra.mxu0 %v844_v14  ;;  %795 = vmatpush3.bf16.msra.mxu1 %v844_v14  ;;  %v847_v25 = vpop.eup %846 }
  0x2e   : > { %763 = vmatprep.subr.bf16.mxu0 %v845_v16  ;;  %788 = vmatprep.subr.bf16.mxu1 %v845_v16  ;;  %v286_v30 = vmul.f32 %v847_v25, %v283_v20 }
  0x30   : > { %v288_v41 = vmul.f32 %v286_v30, %v1014_v6  ;;  %v326_v42 = vrot.slane %v286_v30, %v325_v22 }
  0x31   : > { %764 = vmatpush3.bf16.msra.mxu0 %v845_v16  ;;  %796 = vmatpush3.bf16.msra.mxu1 %v845_v16 }
  0x32   : > { %v289_v49 = vsub.f32 %v287_v36, %v288_v41  ;;  %v328_v50 = vmul.f32 %v696_v26, %v326_v42  ;;  %v329_v51 = vmul.f32 %v697_v27, %v326_v42  ;;  %v336_v52 = vmul.f32 %v712_v28, %v326_v42 }
  0x33   : > { %v337_v53 = vmul.f32 %v713_v31, %v326_v42  ;;  %v330_v54 = vmul.f32 %v700_v32, %v326_v42  ;;  %v331_v55 = vmul.f32 %v701_v33, %v326_v42  ;;  %v338_v56 = vmul.f32 %v716_v37, %v326_v42 }
  0x34   : > { %v348_v57 = vrot.slane %v289_v49, %v325_v22  ;;  %v339_v58 = vmul.f32 %v717_v38, %v326_v42  ;;  %v332_v59 = vmul.f32 %v704_v39, %v326_v42  ;;  %v333_v60 = vmul.f32 %v705_v40, %v326_v42 }
  0x35   : > { %v340_v61 = vmul.f32 %v720_v43, %v326_v42  ;;  %v341_v62 = vmul.f32 %v721_v44, %v326_v42  ;;  %v334_v63 = vmul.f32 %v708_v45, %v326_v42  ;;  %v335_v0 = vmul.f32 %v709_v46, %v326_v42  ;;  %v416_v44 = vld [vmem:[%s1053_s13 + $0x50] sm:$0xff] }
  0x36   : > { %v350_v1 = vadd.f32 %v348_v57, %v328_v50  ;;  %v351_v2 = vadd.f32 %v348_v57, %v329_v51  ;;  %v358_v3 = vadd.f32 %v348_v57, %v336_v52  ;;  %v359_v4 = vadd.f32 %v348_v57, %v337_v53  ;;  %v409_v53 = vld [vmem:[%s1053_s13 + $0x18] sm:$0xff] }
  0x37   : > { %v352_v5 = vadd.f32 %v348_v57, %v330_v54  ;;  %v353_v6 = vadd.f32 %v348_v57, %v331_v55  ;;  %v360_v7 = vadd.f32 %v348_v57, %v338_v56  ;;  %v361_v8 = vadd.f32 %v348_v57, %v339_v58  ;;  %v417_v54 = vld [vmem:[%s1053_s13 + $0x58] sm:$0xff] }
  0x38   : > { %v366_v9 = vmax.f32 %v350_v1, 0.0  ;;  %v367_v10 = vmax.f32 %v351_v2, 0.0  ;;  %v374_v11 = vmax.f32 %v358_v3, 0.0  ;;  %v375_v12 = vmax.f32 %v359_v4, 0.0  ;;  %v412_v1 = vld [vmem:[%s1053_s13 + $0x30] sm:$0xff] }
  0x39   : > { %v368_v13 = vmax.f32 %v352_v5, 0.0  ;;  %v369_v14 = vmax.f32 %v353_v6, 0.0  ;;  %v376_v15 = vmax.f32 %v360_v7, 0.0  ;;  %v377_v16 = vmax.f32 %v361_v8, 0.0  ;;  %v420_v2 = vld [vmem:[%s1053_s13 + $0x70] sm:$0xff]  ;;  %v410_v7 = vld [vmem:[%s1053_s13 + $0x20] sm:$0xff] }
  0x3a   : > { %v382_v17 = vpack.c.bf16 %v367_v10, %v366_v9  ;;  %v386_v18 = vpack.c.bf16 %v375_v12, %v374_v11  ;;  %v354_v19 = vadd.f32 %v348_v57, %v332_v59  ;;  %v355_v20 = vadd.f32 %v348_v57, %v333_v60  ;;  %v407_v59 = vld [vmem:[%s1053_s13 + $0x8] sm:$0xff]  ;;  %v418_v8 = vld [vmem:[%s1053_s13 + $0x60] sm:$0xff] }
  0x3b   : > { %v383_v21 = vpack.c.bf16 %v369_v14, %v368_v13  ;;  %v387_v22 = vpack.c.bf16 %v377_v16, %v376_v15  ;;  %v362_v23 = vadd.f32 %v348_v57, %v340_v61  ;;  %v363_v24 = vadd.f32 %v348_v57, %v341_v62  ;;  %v415_v60 = vld [vmem:[%s1053_s13 + $0x48] sm:$0xff]  ;;  %v413_v13 = vld [vmem:[%s1053_s13 + $0x38] sm:$0xff] }
  0x3c   : > { %765 = vmatprep.mubr.bf16.mxu0 %v382_v17  ;;  %773 = vmatprep.mubr.bf16.mxu1 %v386_v18  ;;  %v370_v25 = vmax.f32 %v354_v19, 0.0  ;;  %v371_v26 = vmax.f32 %v355_v20, 0.0  ;;  %v356_v27 = vadd.f32 %v348_v57, %v334_v63  ;;  %v357_v28 = vadd.f32 %v348_v57, %v335_v0  ;;  %v421_v14 = vld [vmem:[%s1053_s13 + $0x78] sm:$0xff]  ;;  %v411_v19 = vld [vmem:[%s1053_s13 + $0x28] sm:$0xff] }
  0x3d   : > { %766 = vmatmul.mubr.bf16.vlgmr.msra.gmra.mxu0 %v383_v21  ;;  %774 = vmatmul.mubr.bf16.vlgmr.msra.gmra.mxu1 %v387_v22  ;;  %v378_v29 = vmax.f32 %v362_v23, 0.0  ;;  %v379_v30 = vmax.f32 %v363_v24, 0.0  ;;  %v342_v31 = vmul.f32 %v724_v47, %v326_v42  ;;  %v343_v32 = vmul.f32 %v725_v48, %v326_v42  ;;  %v408_v42 = vld [vmem:[%s1053_s13 + $0x10] sm:$0xff]  ;;  %v406_v47 = vld [vmem:[%s1053_s13] sm:$0xff]  ;;  %v419_v20 = vld [vmem:[%s1053_s13 + $0x68] sm:$0xff] }
  0x3e   : > { %v384_v33 = vpack.c.bf16 %v371_v26, %v370_v25  ;;  %v372_v34 = vmax.f32 %v356_v27, 0.0  ;;  %v373_v35 = vmax.f32 %v357_v28, 0.0  ;;  %v414_v48 = vld [vmem:[%s1053_s13 + $0x40] sm:$0xff] }
  0x3f   : > { %v388_v36 = vpack.c.bf16 %v379_v30, %v378_v29  ;;  %v364_v37 = vadd.f32 %v348_v57, %v342_v31  ;;  %v365_v38 = vadd.f32 %v348_v57, %v343_v32 }
  0x40   : > { %769 = vmatprep.mubr.bf16.mxu0 %v384_v33  ;;  %v385_v39 = vpack.c.bf16 %v373_v35, %v372_v34 }
  0x41   : > { %777 = vmatprep.mubr.bf16.mxu1 %v388_v36  ;;  %v380_v40 = vmax.f32 %v364_v37, 0.0  ;;  %v381_v41 = vmax.f32 %v365_v38, 0.0 }
  0x43   : > { %v389_v43 = vpack.c.bf16 %v381_v41, %v380_v40 }
  0x45   : > { %770 = vmatmul.mubr.bf16.gmra.mxu0 %v385_v39  ;;  %778 = vmatmul.mubr.bf16.gmra.mxu1 %v389_v43 }
  0xfd   : > { %v767_v45 = vpop.f32.mrf.mxu0  ;;  %v775_v46 = vpop.f32.mrf.mxu1 }
  0xfe   : > { %v513_v49 = vadd.f32 %v767_v45, %v408_v42  ;;  %v545_v50 = vadd.f32 %v775_v46, %v416_v44 }
  0xff   : > { %v504_v51 = vpop.f32.mrf.mxu0  ;;  %v536_v52 = vpop.f32.mrf.mxu1 }
 0x100   : > { %569 = vst [vmem:[%s1063_s29 + $0x10] sm:$0xff] %v513_v49  ;;  %577 = vst [vmem:[%s1063_s29 + $0x50] sm:$0xff] %v545_v50  ;;  %v505_v55 = vadd.f32 %v504_v51, %v406_v47  ;;  %v537_v56 = vadd.f32 %v536_v52, %v414_v48 }
 0x101   : > { %v768_v57 = vpop.f32.mrf.mxu0  ;;  %v776_v58 = vpop.f32.mrf.mxu1 }
 0x102   : > { %567 = vst [vmem:[%s1063_s29] sm:$0xff] %v505_v55  ;;  %575 = vst [vmem:[%s1063_s29 + $0x40] sm:$0xff] %v537_v56  ;;  %v516_v61 = vadd.f32 %v768_v57, %v409_v53  ;;  %v548_v62 = vadd.f32 %v776_v58, %v417_v54 }
 0x103   : > { %v507_v63 = vpop.f32.mrf.mxu0  ;;  %v539_v0 = vpop.f32.mrf.mxu1 }
 0x104   : > { %570 = vst [vmem:[%s1063_s29 + $0x18] sm:$0xff] %v516_v61  ;;  %578 = vst [vmem:[%s1063_s29 + $0x58] sm:$0xff] %v548_v62  ;;  %v508_v3 = vadd.f32 %v507_v63, %v407_v59  ;;  %v540_v4 = vadd.f32 %v539_v0, %v415_v60 }
 0x105   : > { %v771_v5 = vpop.f32.mrf.mxu0  ;;  %v779_v6 = vpop.f32.mrf.mxu1 }
 0x106   : > { %568 = vst [vmem:[%s1063_s29 + $0x8] sm:$0xff] %v508_v3  ;;  %576 = vst [vmem:[%s1063_s29 + $0x48] sm:$0xff] %v540_v4  ;;  %v529_v9 = vadd.f32 %v771_v5, %v412_v1  ;;  %v561_v10 = vadd.f32 %v779_v6, %v420_v2 }
 0x107   : > { %v520_v11 = vpop.f32.mrf.mxu0  ;;  %v552_v12 = vpop.f32.mrf.mxu1 }
 0x108   : > { %573 = vst [vmem:[%s1063_s29 + $0x30] sm:$0xff] %v529_v9  ;;  %581 = vst [vmem:[%s1063_s29 + $0x70] sm:$0xff] %v561_v10  ;;  %v521_v15 = vadd.f32 %v520_v11, %v410_v7  ;;  %v553_v16 = vadd.f32 %v552_v12, %v418_v8 }
 0x109   : > { %v772_v17 = vpop.f32.mrf.mxu0  ;;  %v780_v18 = vpop.f32.mrf.mxu1 }
 0x10a   : > { %571 = vst [vmem:[%s1063_s29 + $0x20] sm:$0xff] %v521_v15  ;;  %579 = vst [vmem:[%s1063_s29 + $0x60] sm:$0xff] %v553_v16  ;;  %v532_v21 = vadd.f32 %v772_v17, %v413_v13  ;;  %v564_v22 = vadd.f32 %v780_v18, %v421_v14 }
 0x10b   : > { %v523_v23 = vpop.f32.mrf.mxu0  ;;  %v555_v24 = vpop.f32.mrf.mxu1 }
 0x10c   : > { %574 = vst [vmem:[%s1063_s29 + $0x38] sm:$0xff] %v532_v21  ;;  %582 = vst [vmem:[%s1063_s29 + $0x78] sm:$0xff] %v564_v22  ;;  %v524_v25 = vadd.f32 %v523_v23, %v411_v19  ;;  %v556_v26 = vadd.f32 %v555_v24, %v419_v20 }
 0x10e   : > { %572 = vst [vmem:[%s1063_s29 + $0x28] sm:$0xff] %v524_v25  ;;  %580 = vst [vmem:[%s1063_s29 + $0x68] sm:$0xff] %v556_v26 }
 0x10f   : > { %861 = shalt.err (!%p858_p3)
}
 0x110   : > { %s862_s10 = scalar_lea.hbm %s1092_s19, 2048  ;;  %s866_s13 = scalar_lea.hbm %s1148_s6, 8192 }
 0x111   : > { %p863_p4 = scmp.ne.s32.totalorder %s1092_s19, %s862_s10  ;;  %p867_p9 = scmp.lt.s32.totalorder %s1092_s19, %s1148_s6 }
 0x112   : > { %p868_p10 = scmp.lt.s32.totalorder %s866_s13, %s862_s10 }
 0x113   : > { %p864_p7 = pnand %p863_p4, %p986_p5 }
 0x114   : > { %p869_p11 = por %p868_p10, %p867_p9 }
 0x115   : > { %p865_p8 = pneg %p864_p7 }
 0x117   : > { %p870_p12 = pnand %p869_p11, %p865_p8 }
 0x119   : > { %873 = shalt.err (!%p870_p12)
}
 0x11a   : > { %s911_s15 = smov 128   ;;  %s912_s17 = smov 8  }
 0x11b   : > { %797 = dma.vmem_to_hbm [thread:$0]  (%p986_p5), %s1094_s16, 2048, %s1092_s19, %s1102_s25, %s911_s15, %s911_s15, %s912_s17  }
 0x11c PF: > { %p803_p13 = scmp.ge.s32.totalorder %s908_s24, 2  ;;  %s612_s18 = sand.u32 1, %s896_s21  }
 0x11d   : > { %s613_s20 = scalar_lea.sflag [#allocation3], %s612_s18 }
 0x11e   : > { %p800_p0 = pnand %p803_p13, %p990_p6 }
 0x120   : > { %p801_p1 = pneg %p800_p0 }
 0x122   : > { %891 = dma.done.wait (%p801_p1), %s613_s20, 2048  }
 0x123   : > { %893 = vsyncadd (%p801_p1), %s613_s20, 4294965248  ;;  %p16_p2 = scmp.ge.s32.totalorder %s973_s27, 6   ;;  %s1151_s21 = smov %s900_s22 }
 0x124   : > { %s1152_s22 = smov %s904_s23  ;;  %s1153_s23 = smov %s984_s30 }
 0x125   : > { %s1154_s24 = smov %s973_s27  ;;  %18 = sbr.rel (!%p16_p2) target bundleno = 3 (0x3), region = 82 }
 0x12a   :  { %618 = vsyncpa [#allocation3], 1 }
 0x12b   :  { %620 = vsyncpa [#allocation3 + $0x1], 1 }

// kernel: basic_block.6
= control target key start
LH: loop header
LB: loop body
LE: loop exit
PB: predicated region body
PF: predicated region fallthrough
CT: control target
= control target key end

     0   :  { %v11870_v0 = vmov 0   ;;  %vm382_vm0 = vcmask 1040384   ;;  %vm383_vm1 = vsmask.f32 256  ;;  %vm493_vm2 = vsmask.f32 7938  ;;  %s11863_s4 = inlined_call_operand.vmem [shape: bf16[1152,128], index: 4, kind: input, shape index: {}]   ;;  %s11864_s1 = inlined_call_operand.vmem [shape: f32[2,128], index: 1, kind: input, shape index: {}]   ;;  %s11865_s0 = inlined_call_operand.vmem [shape: bf16[512,128], index: 0, kind: input, shape index: {}]   ;;  %s11866_s2 = inlined_call_operand.vmem [shape: f32[1,128], index: 2, kind: input, shape index: {}]   ;;  %s11867_s3 = inlined_call_operand.vmem [shape: f32[1,128], index: 3, kind: input, shape index: {}]   ;;  %s11868_s5 = inlined_call_operand.vmem [shape: bf16[512,128], index: 5, kind: output, shape index: {0}]   ;;  %s11869_s6 = inlined_call_operand.vmem [shape: f32[1,2,128], index: 6, kind: output, shape index: {1}]  }
   0x1   :  { %5411 = vmatprep.subr.bf16.mxu0 %v11870_v0  ;;  %369 = vst [vmem:[#allocation2] sm:$0xf] %v11870_v0  ;;  %370 = vst [vmem:[#allocation2 + $0x4] sm:$0xf] %v11870_v0  ;;  %8474 = vmatprep.subr.bf16.mxu1 %v11870_v0  ;;  %v8507_v1 = vld [vmem:[%s11863_s4 + $0x38] sm:$0xff]   ;;  %v8508_v2 = vld [vmem:[%s11863_s4 + $0x30] sm:$0xff]   ;;  %v166_v48 = vlaneseq }
   0x2   :  { %371 = vst [vmem:[#allocation2 + $0x8] sm:$0x1] %v11870_v0  ;;  %372 = vst [vmem:[#allocation2 + $0xd8] sm:$0xf] %v11870_v0  ;;  %5412 = vmatpush1.bf16.msra.mxu0 %v8507_v1  ;;  %8490 = vmatpush1.bf16.msra.mxu1 %v8507_v1  ;;  %v8509_v3 = vld [vmem:[%s11863_s4 + $0x28] sm:$0xff]   ;;  %v8510_v4 = vld [vmem:[%s11863_s4 + $0x20] sm:$0xff]  }
   0x3   :  { %373 = vst [vmem:[#allocation2 + $0xdc] sm:$0xf] %v11870_v0  ;;  %374 = vst [vmem:[#allocation2 + $0xe0] sm:$0x1] %v11870_v0  ;;  %5413 = vmatprep.subr.bf16.mxu0 %v11870_v0  ;;  %8475 = vmatprep.subr.bf16.mxu1 %v11870_v0  ;;  %v8511_v5 = vld [vmem:[%s11863_s4 + $0x18] sm:$0xff]   ;;  %v8512_v12 = vld [vmem:[%s11863_s4 + $0x10] sm:$0xff]  }
   0x4   :  { %376 = vst [vmem:[#allocation2 + $0xcc] sm:$0xf] %v11870_v0  ;;  %377 = vst [vmem:[#allocation2 + $0xd0] sm:$0xf] %v11870_v0  ;;  %v23_v11 = vld [vmem:[%s11864_s1] sm:$0x1] }
   0x5   :  { %378 = vst [vmem:[#allocation2 + $0xd4] sm:$0x1] %v11870_v0  ;;  %379 = vst [vmem:[#allocation2 + $0x1a4] sm:$0xf] %v11870_v0  ;;  %v9044_v14 = vmul.f32 0.001953125, %v23_v11  ;;  %v8513_v22 = vld [vmem:[%s11863_s4 + $0x8] sm:$0xff]  }
   0x6   :  { %380 = vst [vmem:[#allocation2 + $0x1a8] sm:$0xf] %v11870_v0  ;;  %381 = vst [vmem:[#allocation2 + $0x1ac] sm:$0x1] %v11870_v0  ;;  %5414 = vmatpush1.bf16.msra.mxu0 %v8508_v2  ;;  %8491 = vmatpush1.bf16.msra.mxu1 %v8508_v2  ;;  %v25_v15 = vld [vmem:[%s11864_s1 + $0x1] sm:$0x1] }
   0x7   :  { %5415 = vmatprep.subr.bf16.mxu0 %v11870_v0  ;;  %8476 = vmatprep.subr.bf16.mxu1 %v11870_v0  ;;  %vm9025_vm3 = vmand %vm382_vm0, %vm383_vm1  ;;  %v26_v16 = vmul.f32 0.001953125, %v25_v15  ;;  %v463_v17 = vld [vmem:[#allocation2 + $0x138] sm:$0x1]  ;;  %v27_v18 = vmul.f32 %v9044_v14, %v9044_v14  ;;  %v573_v20 = vld [vmem:[#allocation2 + $0x140] sm:$0x1]  ;;  %v9106_v59 = vshrl.u32 %v166_v48, 7 }
   0x8   :  { %v385_v7 = vld [vmem:[#allocation2] sm:$0x1]  ;;  %vm9032_vm4 = vmand %vm382_vm0, %vm493_vm2  ;;  %v464_v19 = vsel %vm9025_vm3, 0, %v463_v17  ;;  %v1665_v24 = vld [vmem:[#allocation2 + $0x4] sm:$0xf]  ;;  %vm1438_vm6 = vcmask 1043456  }
   0x9   :  { %v495_v8 = vld [vmem:[#allocation2 + $0x8] sm:$0x1]  ;;  %v386_v9 = vsel %vm9025_vm3, 0, %v385_v7  ;;  %465 = vst [vmem:[#allocation2 + $0x138] sm:$0x1] %v464_v19  ;;  %v574_v21 = vsel %vm9032_vm4, 0, %v573_v20  ;;  %v28_v23 = vsub.f32 %v26_v16, %v27_v18  ;;  %vm9258_vm8 = vmand %vm1438_vm6, %vm493_vm2 }
   0xa   :  { %5416 = vmatpush1.bf16.msra.mxu0 %v8509_v3  ;;  %8492 = vmatpush1.bf16.msra.mxu1 %v8509_v3  ;;  %387 = vst [vmem:[#allocation2] sm:$0x1] %v386_v9  ;;  %v496_v13 = vsel %vm9032_vm4, 0, %v495_v8  ;;  %575 = vst [vmem:[#allocation2 + $0x140] sm:$0x1] %v574_v21  ;;  %v8514_v31 = vld [vmem:[%s11863_s4] sm:$0xff]  }
   0xb   :  { %5417 = vmatprep.subr.bf16.mxu0 %v11870_v0  ;;  %8477 = vmatprep.subr.bf16.mxu1 %v11870_v0  ;;  %497 = vst [vmem:[#allocation2 + $0x8] sm:$0x1] %v496_v13  ;;  %v29_v25 = vmax.f32 %v28_v23, 0.0  ;;  %v388_v26 = vld [vmem:[#allocation2 + $0xc] sm:$0x1]  ;;  %v8515_v37 = vld [vmem:[%s11863_s4 + $0x78] sm:$0xff]  }
   0xc   :  { %v498_v27 = vld [vmem:[#allocation2 + $0x14] sm:$0x1]  ;;  %v389_v29 = vsel %vm9025_vm3, 0, %v388_v26  ;;  %v466_v35 = vld [vmem:[#allocation2 + $0x144] sm:$0x1]  ;;  %v8517_v57 = vld [vmem:[%s11863_s4 + $0x68] sm:$0xff]  }
   0xd   :  { %v499_v30 = vsel %vm9032_vm4, 0, %v498_v27  ;;  %390 = vst [vmem:[#allocation2 + $0xc] sm:$0x1] %v389_v29  ;;  %v31_v34 = vadd.f32 1e-05, %v29_v25  ;;  %v467_v41 = vsel %vm9025_vm3, 0, %v466_v35 }
   0xe   :  { %5418 = vmatpush1.bf16.msra.mxu0 %v8510_v4  ;;  %8493 = vmatpush1.bf16.msra.mxu1 %v8510_v4  ;;  %500 = vst [vmem:[#allocation2 + $0x14] sm:$0x1] %v499_v30  ;;  %v576_v36 = vld [vmem:[#allocation2 + $0x14c] sm:$0x1]  ;;  %vm2337_vm5 = vsmask.f32 7424 }
   0xf   :  { %5419 = vmatprep.subr.bf16.mxu0 %v11870_v0  ;;  %8478 = vmatprep.subr.bf16.mxu1 %v11870_v0  ;;  %8867 = vrsqrt.f32 %v31_v34  ;;  %v577_v42 = vsel %vm9032_vm4, 0, %v576_v36  ;;  %468 = vst [vmem:[#allocation2 + $0x144] sm:$0x1] %v467_v41  ;;  %v391_v46 = vld [vmem:[#allocation2 + $0x18] sm:$0x1]  ;;  %v8516_v47 = vld [vmem:[%s11863_s4 + $0x70] sm:$0xff]  }
  0x10   :  { %578 = vst [vmem:[#allocation2 + $0x14c] sm:$0x1] %v577_v42  ;;  %v392_v49 = vsel %vm9025_vm3, 0, %v391_v46  ;;  %v501_v51 = vld [vmem:[#allocation2 + $0x20] sm:$0x1]  ;;  %v9104_v58 = vld [vmem:[%s11865_s0 + $0xb8] sm:$0xff]  }
  0x11   :  { %v1664_v28 = vld [vmem:[#allocation2] sm:$0xf]  ;;  %393 = vst [vmem:[#allocation2 + $0x18] sm:$0x1] %v392_v49  ;;  %v469_v52 = vld [vmem:[#allocation2 + $0x150] sm:$0x1]  ;;  %v8099_v13 = vunpack.c.h.bf16 %v9104_v58 }
  0x12   :  { %5420 = vmatpush1.bf16.msra.mxu0 %v8511_v5  ;;  %8494 = vmatpush1.bf16.msra.mxu1 %v8511_v5  ;;  %v9069_v32 = vcombine.low %v1664_v28, %v1665_v24  ;;  %v8524_v33 = vld [vmem:[#allocation2 + $0x8] ss:$0 sps:$4 sm:$0x11]   ;;  %v579_v53 = vld [vmem:[#allocation2 + $0x158] sm:$0x1]  ;;  %v502_v54 = vsel %vm9032_vm4, 0, %v501_v51 }
  0x13   :  { %5421 = vmatprep.subr.bf16.mxu0 %v11870_v0  ;;  %8479 = vmatprep.subr.bf16.mxu1 %v11870_v0  ;;  %v2346_v40 = vshll.u32 %v8524_v33, 16  ;;  %v470_v55 = vsel %vm9025_vm3, 0, %v469_v52  ;;  %v580_v56 = vsel %vm9032_vm4, 0, %v579_v53  ;;  %503 = vst [vmem:[#allocation2 + $0x20] sm:$0x1] %v502_v54  ;;  %v9114_v61 = vld [vmem:[%s11865_s0] sm:$0xff]  }
  0x14   :  { %v2339_v38 = vshrl.u32 %v9069_v32, 16  ;;  %v2341_v39 = vshll.u32 %v9069_v32, 16  ;;  %471 = vst [vmem:[#allocation2 + $0x150] sm:$0x1] %v470_v55  ;;  %581 = vst [vmem:[#allocation2 + $0x158] sm:$0x1] %v580_v56  ;;  %v8006_v20 = vunpack.c.l.bf16 %v9114_v61  ;;  %v8007_v21 = vunpack.c.h.bf16 %v9114_v61 }
  0x15   :  { %v2348_v44 = vrot.slane %v2346_v40, 1  ;;  %v30_v60 = vld [vmem:[%s11866_s2] sm:$0x1]  ;;  %v394_v62 = vld [vmem:[#allocation2 + $0x24] sm:$0x1]  ;;  %v9126_v2 = vld [vmem:[%s11865_s0 + $0x8] sm:$0xff]  }
  0x16   :  { %5422 = vmatpush1.bf16.msra.mxu0 %v8512_v12  ;;  %8495 = vmatpush1.bf16.msra.mxu1 %v8512_v12  ;;  %v2343_v43 = vrot.slane %v2341_v39, 1  ;;  %v504_v63 = vld [vmem:[#allocation2 + $0x2c] sm:$0x1]  ;;  %v9121_v1 = vld [vmem:[%s11865_s0 + $0xc0] sm:$0xff]   ;;  %v395_v3 = vsel %vm9025_vm3, 0, %v394_v62  ;;  %v8098_v12 = vunpack.c.l.bf16 %v9104_v58  ;;  %v168_v15 = vsub.s32 0, %v9106_v59 }
  0x17   :  { %5423 = vmatprep.subr.bf16.mxu0 %v11870_v0  ;;  %8480 = vmatprep.subr.bf16.mxu1 %v11870_v0  ;;  %v505_v4 = vsel %vm9032_vm4, 0, %v504_v63  ;;  %v472_v5 = vld [vmem:[#allocation2 + $0x15c] sm:$0x1]  ;;  %v8518_v7 = vld [vmem:[%s11863_s4 + $0x60] sm:$0xff]   ;;  %v9138_v8 = vld [vmem:[%s11865_s0 + $0xc8] sm:$0xff]   ;;  %v8103_v23 = vunpack.c.h.bf16 %v9121_v1  ;;  %v8010_v26 = vunpack.c.l.bf16 %v9126_v2  ;;  %v8011_v27 = vunpack.c.h.bf16 %v9126_v2 }
  0x18   :  { %v2344_v45 = vor.u32 %v2343_v43, %v2339_v38  ;;  %396 = vst [vmem:[#allocation2 + $0x24] sm:$0x1] %v395_v3  ;;  %506 = vst [vmem:[#allocation2 + $0x2c] sm:$0x1] %v505_v4  ;;  %v473_v9 = vsel %vm9025_vm3, 0, %v472_v5  ;;  %v9148_v16 = vld [vmem:[%s11865_s0 + $0x10] sm:$0xff]   ;;  %v8106_v28 = vunpack.c.l.bf16 %v9138_v8  ;;  %v8107_v29 = vunpack.c.h.bf16 %v9138_v8 }
  0x19   :  { %v582_v11 = vld [vmem:[#allocation2 + $0x164] sm:$0x1]  ;;  %v9153_v17 = vld [vmem:[%s11865_s0 + $0xd0] sm:$0xff]   ;;  %474 = vst [vmem:[#allocation2 + $0x15c] sm:$0x1] %v473_v9  ;;  %v8014_v30 = vunpack.c.l.bf16 %v9148_v16  ;;  %v9176_v34 = vld [vmem:[%s11865_s0 + $0x18] sm:$0xff]  }
  0x1a   :  { %5424 = vmatpush1.bf16.msra.mxu0 %v8513_v22  ;;  %8496 = vmatpush1.bf16.msra.mxu1 %v8513_v22  ;;  %v2349_v50 = vsel %vm2337_vm5, %v2344_v45, %v2348_v44  ;;  %v583_v18 = vsel %vm9032_vm4, 0, %v582_v11  ;;  %v8102_v22 = vunpack.c.l.bf16 %v9121_v1  ;;  %v34_v25 = vld [vmem:[%s11867_s3] sm:$0x1]  ;;  %v8110_v33 = vunpack.c.l.bf16 %v9153_v17  ;;  %v397_v35 = vld [vmem:[#allocation2 + $0x30] sm:$0x1]  ;;  %v9186_v41 = vld [vmem:[%s11865_s0 + $0xd8] sm:$0xff]  }
  0x1b   :  { %5425 = vmatprep.subr.bf16.mxu0 %v11870_v0  ;;  %8481 = vmatprep.subr.bf16.mxu1 %v11870_v0  ;;  %584 = vst [vmem:[#allocation2 + $0x164] sm:$0x1] %v583_v18  ;;  %v8111_v38 = vunpack.c.h.bf16 %v9153_v17  ;;  %v8018_v39 = vunpack.c.l.bf16 %v9176_v34  ;;  %v507_v40 = vld [vmem:[#allocation2 + $0x38] sm:$0x1]  ;;  %v475_v42 = vld [vmem:[#allocation2 + $0x168] sm:$0x1]  ;;  %v8114_v46 = vunpack.c.l.bf16 %v9186_v41  ;;  %v8115_v5 = vunpack.c.h.bf16 %v9186_v41 }
  0x1c   :  { %5443 = vmatprep.mubr.bf16.mxu0 %v2349_v50  ;;  %v8868_v19 = vpop.eup %8867  ;;  %v8519_v43 = vld [vmem:[%s11863_s4 + $0x58] sm:$0xff]   ;;  %v398_v44 = vsel %vm9025_vm3, 0, %v397_v35  ;;  %v508_v45 = vsel %vm9032_vm4, 0, %v507_v40  ;;  %v476_v50 = vsel %vm9025_vm3, 0, %v475_v42  ;;  %v585_v51 = vld [vmem:[#allocation2 + $0x170] sm:$0x1] }
  0x1d   :  { %v33_v24 = vmul.f32 %v8868_v19, %v30_v60  ;;  %399 = vst [vmem:[#allocation2 + $0x30] sm:$0x1] %v398_v44  ;;  %509 = vst [vmem:[#allocation2 + $0x38] sm:$0x1] %v508_v45  ;;  %vm795_vm7 = vsmask.f32 4368 }
  0x1e   :  { %5426 = vmatpush1.bf16.msra.mxu0 %v8514_v31  ;;  %8497 = vmatpush1.bf16.msra.mxu1 %v8514_v31  ;;  %v8015_v31 = vunpack.c.h.bf16 %v9148_v16  ;;  %477 = vst [vmem:[#allocation2 + $0x168] sm:$0x1] %v476_v50  ;;  %v8520_v60 = vld [vmem:[%s11863_s4 + $0x50] sm:$0xff]   ;;  %v586_v1 = vsel %vm9032_vm4, 0, %v585_v51  ;;  %v8521_v18 = vld [vmem:[%s11863_s4 + $0x48] sm:$0xff]   ;;  %v8522_v42 = vld [vmem:[%s11863_s4 + $0x40] sm:$0xff]  }
  0x1f   :  { %5427 = vmatprep.subr.bf16.mxu0 %v11870_v0  ;;  %8482 = vmatprep.subr.bf16.mxu1 %v11870_v0  ;;  %v35_v36 = vmul.f32 %v33_v24, %v9044_v14  ;;  %v8019_v14 = vunpack.c.h.bf16 %v9176_v34  ;;  %587 = vst [vmem:[#allocation2 + $0x170] sm:$0x1] %v586_v1  ;;  %v1601_v51 = vld [vmem:[#allocation2 + $0x138] sm:$0xf]  ;;  %vm9264_vm9 = vmor %vm383_vm1, %vm795_vm7  ;;  %v8556_v17 = vld [vmem:[%s11863_s4 + $0x120] sm:$0xff]   ;;  %vm2850_vm10 = vcmask 1046528  }
  0x20   :  { %v510_v41 = vld [vmem:[#allocation2 + $0x44] sm:$0x1] }
  0x22   :  { %5428 = vmatpush2.bf16.msra.mxu0 %v8515_v37  ;;  %8498 = vmatpush2.bf16.msra.mxu1 %v8515_v37  ;;  %v9179_v37 = vrot.slane %v33_v24, %v168_v15 }
  0x23   :  { %5429 = vmatprep.subr.bf16.mxu0 %v11870_v0  ;;  %8483 = vmatprep.subr.bf16.mxu1 %v11870_v0 }
  0x24   :  { %v217_v48 = vmul.f32 %v8098_v12, %v9179_v37  ;;  %v218_v49 = vmul.f32 %v8099_v13, %v9179_v37  ;;  %v171_v52 = vmul.f32 %v8006_v20, %v9179_v37  ;;  %v172_v53 = vmul.f32 %v8007_v21, %v9179_v37 }
  0x25   :  { %v219_v54 = vmul.f32 %v8102_v22, %v9179_v37  ;;  %v220_v55 = vmul.f32 %v8103_v23, %v9179_v37  ;;  %v174_v58 = vmul.f32 %v8011_v27, %v9179_v37  ;;  %v9212_v59 = vmul.f32 %v8106_v28, %v9179_v37 }
  0x26   :  { %5430 = vmatpush2.bf16.msra.mxu0 %v8516_v47  ;;  %8499 = vmatpush2.bf16.msra.mxu1 %v8516_v47  ;;  %v36_v47 = vsub.f32 %v34_v25, %v35_v36  ;;  %v9218_v61 = vmul.f32 %v8107_v29, %v9179_v37  ;;  %v9221_v62 = vmul.f32 %v8014_v30, %v9179_v37 }
  0x27   :  { %5431 = vmatprep.subr.bf16.mxu0 %v11870_v0  ;;  %8484 = vmatprep.subr.bf16.mxu1 %v11870_v0  ;;  %v9224_v63 = vmul.f32 %v8015_v31, %v9179_v37 }
  0x28   :  { %v9207_v56 = vrot.slane %v36_v47, %v168_v15 }
  0x2a   :  { %5432 = vmatpush2.bf16.msra.mxu0 %v8517_v57  ;;  %8500 = vmatpush2.bf16.msra.mxu1 %v8517_v57  ;;  %v173_v57 = vmul.f32 %v8010_v26, %v9179_v37  ;;  %v287_v2 = vadd.f32 %v9207_v56, %v217_v48  ;;  %v288_v3 = vadd.f32 %v9207_v56, %v218_v49 }
  0x2b   :  { %5433 = vmatprep.subr.bf16.mxu0 %v11870_v0  ;;  %8485 = vmatprep.subr.bf16.mxu1 %v11870_v0  ;;  %v241_v4 = vadd.f32 %v9207_v56, %v171_v52  ;;  %v289_v8 = vadd.f32 %v9207_v56, %v219_v54  ;;  %v290_v9 = vadd.f32 %v9207_v56, %v220_v55  ;;  %v1605_v55 = vld [vmem:[#allocation2 + $0x140] sm:$0x1] }
  0x2c   :  { %v243_v11 = vadd.f32 %v9207_v56, %v173_v57  ;;  %v351_v12 = vmax.f32 %v287_v2, 0.0  ;;  %v352_v13 = vmax.f32 %v288_v3, 0.0  ;;  %v9239_v16 = vadd.f32 %v9207_v56, %v174_v58  ;;  %v8528_v57 = vld [vmem:[%s11863_s4 + $0x138] sm:$0xff]  }
  0x2d   :  { %v305_v15 = vmax.f32 %v241_v4, 0.0  ;;  %v353_v20 = vmax.f32 %v289_v8, 0.0  ;;  %v354_v21 = vmax.f32 %v290_v9, 0.0  ;;  %v1440_v9 = vld [vmem:[#allocation2 + $0xc] sm:$0xf] }
  0x2e   :  { %5434 = vmatpush2.bf16.msra.mxu0 %v8518_v7  ;;  %8501 = vmatpush2.bf16.msra.mxu1 %v8518_v7  ;;  %v242_v7 = vadd.f32 %v9207_v56, %v172_v53  ;;  %v307_v22 = vmax.f32 %v243_v11, 0.0  ;;  %v7922_v23 = vpack.c.bf16 %v351_v12, %v351_v12  ;;  %v7923_v24 = vpack.c.bf16 %v352_v13, %v352_v13  ;;  %v1444_v11 = vld [vmem:[#allocation2 + $0x14] sm:$0x1] }
  0x2f   :  { %5435 = vmatprep.subr.bf16.mxu0 %v11870_v0  ;;  %8486 = vmatprep.subr.bf16.mxu1 %v11870_v0  ;;  %v7876_v25 = vpack.c.bf16 %v305_v15, %v305_v15  ;;  %v308_v26 = vmax.f32 %v9239_v16, 0.0  ;;  %v7924_v28 = vpack.c.bf16 %v353_v20, %v353_v20  ;;  %v9247_v29 = vpack.c.bf16 %v354_v21, %v354_v21 }
  0x30   :  { %v306_v19 = vmax.f32 %v242_v7, 0.0  ;;  %v9249_v30 = vpack.c.bf16 %v307_v22, %v307_v22  ;;  %v1189_v31 = vshrl.u32 %v7922_v23, 16  ;;  %v1192_v35 = vshll.u32 %v7922_v23, 16 }
  0x31   :  { %v1197_v36 = vshrl.u32 %v7923_v24, 16  ;;  %v1200_v40 = vshll.u32 %v7923_v24, 16  ;;  %v801_v44 = vshll.u32 %v7876_v25, 16  ;;  %v1206_v52 = vshrl.u32 %v7924_v28, 16 }
  0x32   :  { %5436 = vmatpush2.bf16.msra.mxu0 %v8519_v43  ;;  %8502 = vmatpush2.bf16.msra.mxu1 %v8519_v43  ;;  %v7877_v27 = vpack.c.bf16 %v306_v19, %v306_v19  ;;  %v798_v43 = vshrl.u32 %v7876_v25, 16  ;;  %v1191_v48 = vrot.slane %v1189_v31, 7  ;;  %v1209_v53 = vshll.u32 %v7924_v28, 16  ;;  %v1608_v19 = vld [vmem:[#allocation2 + $0x144] sm:$0xf] }
  0x33   :  { %5437 = vmatprep.subr.bf16.mxu0 %v11870_v0  ;;  %8487 = vmatprep.subr.bf16.mxu1 %v11870_v0  ;;  %v1199_v49 = vrot.slane %v1197_v36, 7  ;;  %v1214_v1 = vshrl.u32 %v9247_v29, 16  ;;  %v1217_v2 = vshll.u32 %v9247_v29, 16  ;;  %v1208_v23 = vrot.slane %v1206_v52, 7  ;;  %v1447_v52 = vld [vmem:[#allocation2 + $0x18] sm:$0xf] }
  0x34   :  { %v806_v45 = vshrl.u32 %v7877_v27, 16  ;;  %v809_v47 = vshll.u32 %v7877_v27, 16  ;;  %v800_v58 = vrot.slane %v798_v43, 7  ;;  %v1194_v3 = vor.u32 %v1192_v35, %v1191_v48  ;;  %v1612_v35 = vld [vmem:[#allocation2 + $0x14c] sm:$0x1] }
  0x35   :  { %v1195_v4 = vrot.slane %v1191_v48, 4  ;;  %v1202_v7 = vor.u32 %v1200_v40, %v1199_v49  ;;  %v1204_v8 = vrot.slane %v1199_v49, 4  ;;  %v1216_v28 = vrot.slane %v1214_v1, 7 }
  0x36   :  { %5438 = vmatpush2.bf16.msra.mxu0 %v8520_v60  ;;  %8503 = vmatpush2.bf16.msra.mxu1 %v8520_v60  ;;  %v808_v60 = vrot.slane %v806_v45, 7  ;;  %v803_v12 = vor.u32 %v801_v44, %v800_v58  ;;  %v804_v13 = vrot.slane %v800_v58, 4  ;;  %v1602_v21 = vsel %vm9258_vm8, %v1194_v3, %v1601_v51  ;;  %v8536_v44 = vld [vmem:[%s11863_s4 + $0x130] sm:$0xff]  }
  0x37   :  { %5439 = vmatprep.subr.bf16.mxu0 %v11870_v0  ;;  %8488 = vmatprep.subr.bf16.mxu1 %v11870_v0  ;;  %v1203_v20 = vsel %vm9264_vm9, %v1195_v4, %v1202_v7  ;;  %v1606_v22 = vsel %vm9025_vm3, %v1204_v8, %v1605_v55  ;;  %1603 = vst [vmem:[#allocation2 + $0x138] sm:$0xf] %v1602_v21  ;;  %v1212_v31 = vrot.slane %v1208_v23, 4  ;;  %v815_v40 = vshrl.u32 %v9249_v30, 16  ;;  %v8548_v4 = vld [vmem:[%s11863_s4 + $0x128] sm:$0xff]  }
  0x38   :  { %v811_v15 = vor.u32 %v809_v47, %v808_v60  ;;  %1604 = vst [vmem:[#allocation2 + $0x13c] sm:$0xf] %v1203_v20  ;;  %1607 = vst [vmem:[#allocation2 + $0x140] sm:$0x1] %v1606_v22  ;;  %v1441_v25 = vsel %vm9258_vm8, %v803_v12, %v1440_v9  ;;  %v1211_v29 = vor.u32 %v1209_v53, %v1208_v23  ;;  %v1221_v43 = vrot.slane %v1216_v28, 4 }
  0x39   :  { %1442 = vst [vmem:[#allocation2 + $0xc] sm:$0xf] %v1441_v25  ;;  %v7879_v36 = vpack.c.bf16 %v308_v26, %v308_v26  ;;  %v291_v45 = vadd.f32 %v9207_v56, %v9212_v59  ;;  %v817_v16 = vrot.slane %v815_v40, 7  ;;  %v9309_v58 = vadd.f32 %v9207_v56, %v9221_v62 }
  0x3a   :  { %5440 = vmatpush2.bf16.msra.mxu0 %v8521_v18  ;;  %8504 = vmatpush2.bf16.msra.mxu1 %v8521_v18  ;;  %v813_v18 = vrot.slane %v808_v60, 4  ;;  %v812_v24 = vsel %vm9264_vm9, %v804_v13, %v811_v15  ;;  %v1609_v47 = vsel %vm9258_vm8, %v1211_v29, %v1608_v19  ;;  %v1613_v51 = vsel %vm9025_vm3, %v1221_v43, %v1612_v35  ;;  %v1451_v60 = vld [vmem:[#allocation2 + $0x20] sm:$0x1] }
  0x3b   :  { %5441 = vmatprep.subr.bf16.mxu0 %v11870_v0  ;;  %8489 = vmatprep.subr.bf16.mxu1 %v11870_v0  ;;  %1443 = vst [vmem:[#allocation2 + $0x10] sm:$0xf] %v812_v24  ;;  %v823_v26 = vshrl.u32 %v7879_v36, 16  ;;  %v826_v48 = vshll.u32 %v7879_v36, 16  ;;  %1610 = vst [vmem:[#allocation2 + $0x144] sm:$0xf] %v1609_v47  ;;  %v9313_v3 = vadd.f32 %v9207_v56, %v9224_v63 }
  0x3c   :  { %v1445_v27 = vsel %vm9025_vm3, %v813_v18, %v1444_v11  ;;  %v355_v59 = vmax.f32 %v291_v45, 0.0  ;;  %1614 = vst [vmem:[#allocation2 + $0x14c] sm:$0x1] %v1613_v51  ;;  %v821_v55 = vrot.slane %v817_v16, 4  ;;  %v224_v11 = vmul.f32 %v8111_v38, %v9179_v37  ;;  %v1615_v47 = vld [vmem:[#allocation2 + $0x150] sm:$0xf] }
  0x3d   :  { %1446 = vst [vmem:[#allocation2 + $0x14] sm:$0x1] %v1445_v27  ;;  %v1619_v51 = vld [vmem:[#allocation2 + $0x158] sm:$0x1] }
  0x3e   :  { %5442 = vmatpush2.bf16.msra.mxu0 %v8522_v42  ;;  %8505 = vmatpush2.bf16.msra.mxu1 %v8522_v42  ;;  %v1219_v42 = vor.u32 %v1217_v2, %v1216_v28  ;;  %v7926_v2 = vpack.c.bf16 %v355_v59, %v355_v59  ;;  %v1712_v7 = vld [vmem:[#allocation2 + $0x138] sm:$0xf]  ;;  %v9341_v22 = vadd.f32 %v9207_v56, %v224_v11 }
  0x3f   :  { %5700 = vmatprep.subr.bf16.mxu1 %v11870_v0  ;;  %5989 = vmatprep.subr.bf16.mxu0 %v11870_v0  ;;  %v1713_v8 = vld [vmem:[#allocation2 + $0x13c] sm:$0xf]  ;;  %v8526_v12 = vld [vmem:[#allocation2 + $0x140] ss:$0 sps:$4 sm:$0x11]  }
  0x40   :  { %v1220_v49 = vsel %vm9264_vm9, %v1212_v31, %v1219_v42  ;;  %v7476_v63 = vcombine.low %v1712_v7, %v1713_v8  ;;  %v1666_v13 = vld [vmem:[#allocation2 + $0xc] sm:$0xf]  ;;  %v1223_v21 = vshrl.u32 %v7926_v2, 16  ;;  %v2634_v25 = vshll.u32 %v8526_v12, 16  ;;  %v8527_v59 = vld [vmem:[%s11863_s4 + $0xb8] sm:$0xff]  }
  0x41   :  { %5444 = vmatmul.mubr.bf16.vlgmr.msra.gmra.mxu0 %v9069_v32  ;;  %v818_v32 = vshll.u32 %v9249_v30, 16  ;;  %v292_v30 = vadd.f32 %v9207_v56, %v9218_v61  ;;  %1611 = vst [vmem:[#allocation2 + $0x148] sm:$0xf] %v1220_v49  ;;  %v223_v61 = vmul.f32 %v8110_v33, %v9179_v37  ;;  %v9330_v33 = vmul.f32 %v8018_v39, %v9179_v37 }
  0x42   :  { %5990 = vmatpush1.bf16.msra.mxu0 %v8528_v57  ;;  %v825_v57 = vrot.slane %v823_v26, 7  ;;  %v1667_v38 = vld [vmem:[#allocation2 + $0x10] sm:$0xf]  ;;  %v1226_v39 = vshll.u32 %v7926_v2, 16  ;;  %v2627_v23 = vshrl.u32 %v7476_v63, 16  ;;  %v2629_v24 = vshll.u32 %v7476_v63, 16 }
  0x43   :  { %5991 = vmatprep.subr.bf16.mxu0 %v11870_v0  ;;  %v820_v53 = vor.u32 %v818_v32, %v817_v16  ;;  %v356_v1 = vmax.f32 %v292_v30, 0.0  ;;  %v9333_v19 = vadd.f32 %v9207_v56, %v223_v61  ;;  %v7453_v27 = vcombine.low %v1666_v13, %v1667_v38  ;;  %v1714_v29 = vld [vmem:[#allocation2 + $0x144] sm:$0xf] }
  0x44   :  { %v828_v62 = vor.u32 %v826_v48, %v825_v57  ;;  %v830_v15 = vrot.slane %v825_v57, 4  ;;  %v8531_v28 = vld [vmem:[#allocation2 + $0x14] ss:$0 sps:$4 sm:$0x11]   ;;  %v1225_v35 = vrot.slane %v1223_v21, 7  ;;  %v2631_v42 = vrot.slane %v2629_v24, 1 }
  0x45   :  { %v1448_v9 = vsel %vm9258_vm8, %v820_v53, %v1447_v52  ;;  %v7927_v18 = vpack.c.bf16 %v356_v1, %v356_v1  ;;  %v2636_v43 = vrot.slane %v2634_v25, 1  ;;  %v2353_v32 = vshll.u32 %v7453_v27, 16  ;;  %v8533_v48 = vld [vmem:[#allocation2 + $0x14c] ss:$0 sps:$4 sm:$0x11]  }
  0x46   :  { %5992 = vmatpush1.bf16.msra.mxu0 %v8536_v44  ;;  %1449 = vst [vmem:[#allocation2 + $0x18] sm:$0xf] %v1448_v9  ;;  %v829_v20 = vsel %vm9264_vm9, %v821_v55, %v828_v62  ;;  %v1452_v31 = vsel %vm9025_vm3, %v830_v15, %v1451_v60  ;;  %v2351_v44 = vshrl.u32 %v7453_v27, 16  ;;  %v2358_v16 = vshll.u32 %v8531_v28, 16  ;;  %v8568_v15 = vld [vmem:[%s11863_s4 + $0x118] sm:$0xff]  }
  0x47   :  { %5993 = vmatprep.subr.bf16.mxu0 %v11870_v0  ;;  %1450 = vst [vmem:[#allocation2 + $0x1c] sm:$0xf] %v829_v20  ;;  %v1231_v36 = vshrl.u32 %v7927_v18, 16  ;;  %v1234_v40 = vshll.u32 %v7927_v18, 16  ;;  %1453 = vst [vmem:[#allocation2 + $0x20] sm:$0x1] %v1452_v31  ;;  %v1228_v49 = vor.u32 %v1226_v39, %v1225_v35  ;;  %v9351_v52 = vmul.f32 %v8019_v14, %v9179_v37 }
  0x48   :  { %v1715_v45 = vld [vmem:[#allocation2 + $0x148] sm:$0xf]  ;;  %v2632_v30 = vor.u32 %v2631_v42, %v2627_v23  ;;  %v2355_v53 = vrot.slane %v2353_v32, 1  ;;  %v1229_v55 = vrot.slane %v1225_v35, 4  ;;  %v2360_v60 = vrot.slane %v2358_v16, 1  ;;  %v8529_v18 = vld [vmem:[%s11863_s4 + $0xb0] sm:$0xff]  }
  0x49   :  { %v9346_v26 = vcombine.low %v1714_v29, %v1715_v45  ;;  %v1233_v57 = vrot.slane %v1231_v36, 7  ;;  %v2646_v61 = vshll.u32 %v8533_v48, 16  ;;  %v1616_v12 = vsel %vm9258_vm8, %v1228_v49, %v1615_v47  ;;  %v1454_v48 = vld [vmem:[#allocation2 + $0x24] sm:$0xf] }
  0x4a   :  { %5994 = vmatpush1.bf16.msra.mxu0 %v8548_v4  ;;  %v2637_v34 = vsel %vm2337_vm5, %v2632_v30, %v2636_v43  ;;  %v2356_v14 = vor.u32 %v2355_v53, %v2351_v44  ;;  %v309_v13 = vmax.f32 %v9309_v58, 0.0  ;;  %1617 = vst [vmem:[#allocation2 + $0x150] sm:$0xf] %v1616_v12  ;;  %v9379_v24 = vadd.f32 %v9207_v56, %v9330_v33 }
  0x4b   :  { %5995 = vmatprep.subr.bf16.mxu0 %v11870_v0  ;;  %v2639_v1 = vshrl.u32 %v9346_v26, 16  ;;  %v2641_v2 = vshll.u32 %v9346_v26, 16  ;;  %v1236_v7 = vor.u32 %v1234_v40, %v1233_v57  ;;  %v1238_v8 = vrot.slane %v1233_v57, 4  ;;  %5635 = vmatprep.mubr.bf16.mxu1 %v2637_v34 }
  0x4c   :  { %v2648_v9 = vrot.slane %v2646_v61, 1  ;;  %5636 = vmatmul.mubr.bf16.vlgmr.msra.gmra.mxu1 %v7476_v63  ;;  %v310_v63 = vmax.f32 %v9313_v3, 0.0  ;;  %v7880_v23 = vpack.c.bf16 %v309_v13, %v309_v13  ;;  %v357_v29 = vmax.f32 %v9333_v19, 0.0  ;;  %v8576_v3 = vld [vmem:[%s11863_s4 + $0x110] sm:$0xff]   ;;  %v8534_v19 = vld [vmem:[%s11863_s4 + $0xa8] sm:$0xff]  }
  0x4d   :  { %v1668_v4 = vld [vmem:[#allocation2 + $0x18] sm:$0xf]  ;;  %v2643_v62 = vrot.slane %v2641_v2, 1  ;;  %v1237_v20 = vsel %vm9264_vm9, %v1229_v55, %v1236_v7  ;;  %v1620_v58 = vsel %vm9025_vm3, %v1238_v8, %v1619_v51  ;;  %5701 = vmatpush1.bf16.msra.mxu1 %v8527_v59  ;;  %v358_v31 = vmax.f32 %v9341_v22, 0.0  ;;  %v8535_v59 = vld [vmem:[%s11863_s4 + $0xa0] sm:$0xff]  }
  0x4e   :  { %5996 = vmatpush1.bf16.msra.mxu0 %v8556_v17  ;;  %v1669_v11 = vld [vmem:[#allocation2 + $0x1c] sm:$0xf]  ;;  %v2361_v17 = vsel %vm2337_vm5, %v2356_v14, %v2360_v60  ;;  %v8538_v39 = vld [vmem:[#allocation2 + $0x20] ss:$0 sps:$4 sm:$0x11]   ;;  %5702 = vmatprep.subr.bf16.mxu1 %v11870_v0  ;;  %v7881_v33 = vpack.c.bf16 %v310_v63, %v310_v63  ;;  %v832_v40 = vshrl.u32 %v7880_v23, 16  ;;  %v7928_v43 = vpack.c.bf16 %v357_v29, %v357_v29 }
  0x4f   :  { %5997 = vmatprep.subr.bf16.mxu0 %v11870_v0  ;;  %v9370_v38 = vcombine.low %v1668_v4, %v1669_v11  ;;  %5451 = vmatprep.mubr.bf16.mxu0 %v2361_v17  ;;  %v2644_v21 = vor.u32 %v2643_v62, %v2639_v1  ;;  %1618 = vst [vmem:[#allocation2 + $0x154] sm:$0xf] %v1237_v20  ;;  %1621 = vst [vmem:[#allocation2 + $0x158] sm:$0x1] %v1620_v58  ;;  %v2370_v36 = vshll.u32 %v8538_v39, 16  ;;  %v8588_v4 = vld [vmem:[%s11863_s4 + $0x108] sm:$0xff]  }
  0x50   :  { %5452 = vmatmul.mubr.bf16.gmra.mxu0 %v7453_v27  ;;  %v835_v42 = vshll.u32 %v7880_v23, 16  ;;  %v7929_v44 = vpack.c.bf16 %v358_v31, %v358_v31  ;;  %v834_v32 = vrot.slane %v832_v40, 7  ;;  %v840_v45 = vshrl.u32 %v7881_v33, 16  ;;  %v1458_v1 = vld [vmem:[#allocation2 + $0x2c] sm:$0x1]  ;;  %v8295_v58 = vld [vmem:[%s11865_s0 + $0x20] sm:$0xff]  }
  0x51   :  { %v2363_v25 = vshrl.u32 %v9370_v38, 16  ;;  %v2365_v28 = vshll.u32 %v9370_v38, 16  ;;  %v2649_v35 = vsel %vm2337_vm5, %v2644_v21, %v2648_v9  ;;  %5703 = vmatpush1.bf16.msra.mxu1 %v8529_v18  ;;  %v2372_v22 = vrot.slane %v2370_v36, 1  ;;  %v1716_v53 = vld [vmem:[#allocation2 + $0x150] sm:$0xf] }
  0x52   :  { %5998 = vmatpush1.bf16.msra.mxu0 %v8568_v15  ;;  %5643 = vmatprep.mubr.bf16.mxu1 %v2649_v35  ;;  %v843_v47 = vshll.u32 %v7881_v33, 16  ;;  %v1240_v49 = vshrl.u32 %v7928_v43, 16  ;;  %v1243_v51 = vshll.u32 %v7928_v43, 16  ;;  %v1248_v30 = vshrl.u32 %v7929_v44, 16  ;;  %v1622_v61 = vld [vmem:[#allocation2 + $0x15c] sm:$0xf] }
  0x53   :  { %v2367_v27 = vrot.slane %v2365_v28, 1  ;;  %5999 = vmatprep.subr.bf16.mxu0 %v11870_v0  ;;  %5704 = vmatprep.subr.bf16.mxu1 %v11870_v0  ;;  %v837_v55 = vor.u32 %v835_v42, %v834_v32  ;;  %v838_v57 = vrot.slane %v834_v32, 4  ;;  %v842_v60 = vrot.slane %v840_v45, 7  ;;  %v1626_v15 = vld [vmem:[#allocation2 + $0x164] sm:$0x1] }
  0x54   :  { %v1251_v2 = vshll.u32 %v7929_v44, 16  ;;  %5644 = vmatmul.mubr.bf16.gmra.mxu1 %v9346_v26  ;;  %v1242_v7 = vrot.slane %v1240_v49, 7  ;;  %v1250_v8 = vrot.slane %v1248_v30, 7  ;;  %v248_v62 = vadd.f32 %v9207_v56, %v9351_v52  ;;  %v400_v35 = vld [vmem:[#allocation2 + $0x3c] sm:$0x1]  ;;  %v8542_v49 = vld [vmem:[%s11863_s4 + $0x90] sm:$0xff]  }
  0x55   :  { %v2368_v16 = vor.u32 %v2367_v27, %v2363_v25  ;;  %5705 = vmatpush1.bf16.msra.mxu1 %v8534_v19  ;;  %v845_v12 = vor.u32 %v843_v47, %v842_v60  ;;  %v847_v13 = vrot.slane %v842_v60, 4  ;;  %v1455_v26 = vsel %vm9258_vm8, %v837_v55, %v1454_v48  ;;  %v8541_v25 = vld [vmem:[%s11863_s4 + $0x98] sm:$0xff]  }
  0x56   :  { %6000 = vmatpush1.bf16.msra.mxu0 %v8576_v3  ;;  %v1717_v14 = vld [vmem:[#allocation2 + $0x154] sm:$0xf]  ;;  %v8540_v11 = vld [vmem:[#allocation2 + $0x158] ss:$0 sps:$4 sm:$0x11]   ;;  %5706 = vmatprep.subr.bf16.mxu1 %v11870_v0  ;;  %v1245_v18 = vor.u32 %v1243_v51, %v1242_v7  ;;  %v1246_v52 = vrot.slane %v1242_v7, 4  ;;  %v1253_v17 = vor.u32 %v1251_v2, %v1250_v8  ;;  %v225_v42 = vmul.f32 %v8114_v46, %v9179_v37 }
  0x57   :  { %v2373_v34 = vsel %vm2337_vm5, %v2368_v16, %v2372_v22  ;;  %6001 = vmatprep.subr.bf16.mxu0 %v11870_v0  ;;  %v9406_v9 = vcombine.low %v1716_v53, %v1717_v14  ;;  %1456 = vst [vmem:[#allocation2 + $0x24] sm:$0xf] %v1455_v26  ;;  %v1255_v20 = vrot.slane %v1250_v8, 4  ;;  %v2658_v63 = vshll.u32 %v8540_v11, 16 }
  0x58   :  { %5459 = vmatprep.mubr.bf16.mxu0 %v2373_v34  ;;  %v846_v23 = vsel %vm9264_vm9, %v838_v57, %v845_v12  ;;  %v1459_v28 = vsel %vm9025_vm3, %v847_v13, %v1458_v1  ;;  %v1254_v29 = vsel %vm9264_vm9, %v1246_v52, %v1253_v17  ;;  %v1623_v31 = vsel %vm9258_vm8, %v1245_v18, %v1622_v61  ;;  %v1461_v57 = vld [vmem:[#allocation2 + $0x30] sm:$0xf]  ;;  %v9460_v61 = vld [vmem:[%s11865_s0 + $0xe0] sm:$0xff]   ;;  %v8547_v34 = vld [vmem:[%s11863_s4 + $0x88] sm:$0xff]  }
  0x59   :  { %5460 = vmatmul.mubr.bf16.gmra.mxu0 %v9370_v38  ;;  %v2651_v21 = vshrl.u32 %v9406_v9, 16  ;;  %v2653_v39 = vshll.u32 %v9406_v9, 16  ;;  %v8594_v38 = vld [vmem:[%s11863_s4 + $0x100] sm:$0xff]   ;;  %1457 = vst [vmem:[#allocation2 + $0x28] sm:$0xf] %v846_v23  ;;  %v1627_v3 = vsel %vm9025_vm3, %v1255_v20, %v1626_v15  ;;  %5707 = vmatpush1.bf16.msra.mxu1 %v8535_v59  ;;  %v2660_v33 = vrot.slane %v2658_v63, 1 }
  0x5a   :  { %6002 = vmatpush1.bf16.msra.mxu0 %v8588_v4  ;;  %1460 = vst [vmem:[#allocation2 + $0x2c] sm:$0x1] %v1459_v28  ;;  %1624 = vst [vmem:[#allocation2 + $0x15c] sm:$0xf] %v1623_v31  ;;  %v311_v40 = vmax.f32 %v9379_v24, 0.0  ;;  %v312_v27 = vmax.f32 %v248_v62, 0.0  ;;  %5708 = vmatprep.subr.bf16.mxu1 %v11870_v0  ;;  %v226_v43 = vmul.f32 %v8115_v5, %v9179_v37  ;;  %v8022_v44 = vunpack.c.l.bf16 %v8295_v58 }
  0x5b   :  { %6003 = vmatprep.subr.bf16.mxu0 %v11870_v0  ;;  %v2655_v36 = vrot.slane %v2653_v39, 1  ;;  %1625 = vst [vmem:[#allocation2 + $0x160] sm:$0xf] %v1254_v29  ;;  %1628 = vst [vmem:[#allocation2 + $0x164] sm:$0x1] %v1627_v3  ;;  %v8023_v19 = vunpack.c.h.bf16 %v8295_v58  ;;  %v401_v47 = vsel %vm9025_vm3, 0, %v400_v35  ;;  %v295_v24 = vadd.f32 %v9207_v56, %v225_v42 }
  0x5c   :  { %v7882_v32 = vpack.c.bf16 %v311_v40, %v311_v40  ;;  %v7883_v45 = vpack.c.bf16 %v312_v27, %v312_v27  ;;  %v296_v16 = vadd.f32 %v9207_v56, %v226_v43  ;;  %v179_v48 = vmul.f32 %v8022_v44, %v9179_v37  ;;  %402 = vst [vmem:[#allocation2 + $0x3c] sm:$0x1] %v401_v47  ;;  %v1465_v13 = vld [vmem:[#allocation2 + $0x38] sm:$0x1]  ;;  %v8549_v43 = vld [vmem:[%s11863_s4 + $0x80] sm:$0xff]  }
  0x5d   :  { %v2656_v22 = vor.u32 %v2655_v36, %v2651_v21  ;;  %v180_v46 = vmul.f32 %v8023_v19, %v9179_v37  ;;  %5709 = vmatpush1.bf16.msra.mxu1 %v8541_v25  ;;  %v359_v60 = vmax.f32 %v295_v24, 0.0  ;;  %v511_v62 = vsel %vm9032_vm4, 0, %v510_v41  ;;  %v8606_v35 = vld [vmem:[%s11863_s4 + $0x178] sm:$0xff]  }
  0x5e   :  { %6004 = vmatpush1.bf16.msra.mxu0 %v8594_v38  ;;  %v1670_v51 = vld [vmem:[#allocation2 + $0x24] sm:$0xf]  ;;  %v849_v30 = vshrl.u32 %v7882_v32, 16  ;;  %v852_v59 = vshll.u32 %v7882_v32, 16  ;;  %v857_v53 = vshrl.u32 %v7883_v45, 16  ;;  %5710 = vmatprep.subr.bf16.mxu1 %v11870_v0  ;;  %v860_v55 = vshll.u32 %v7883_v45, 16 }
  0x5f   :  { %6005 = vmatprep.subr.bf16.mxu0 %v11870_v0  ;;  %v2661_v5 = vsel %vm2337_vm5, %v2656_v22, %v2660_v33  ;;  %v360_v1 = vmax.f32 %v296_v16, 0.0  ;;  %v9455_v2 = vadd.f32 %v9207_v56, %v179_v48  ;;  %v9467_v8 = vadd.f32 %v9207_v56, %v180_v46  ;;  %512 = vst [vmem:[#allocation2 + $0x44] sm:$0x1] %v511_v62  ;;  %v478_v32 = vld [vmem:[#allocation2 + $0x174] sm:$0x1] }
  0x60   :  { %5651 = vmatprep.mubr.bf16.mxu1 %v2661_v5  ;;  %v1671_v4 = vld [vmem:[#allocation2 + $0x28] sm:$0xf]  ;;  %v851_v14 = vrot.slane %v849_v30, 7  ;;  %v859_v7 = vrot.slane %v857_v53, 7  ;;  %v7930_v26 = vpack.c.bf16 %v359_v60, %v359_v60  ;;  %v8118_v58 = vunpack.c.l.bf16 %v9460_v61 }
  0x61   :  { %5652 = vmatmul.mubr.bf16.gmra.mxu1 %v9406_v9  ;;  %v9471_v11 = vcombine.low %v1670_v51, %v1671_v4  ;;  %v8544_v12 = vld [vmem:[#allocation2 + $0x2c] ss:$0 sps:$4 sm:$0x11]   ;;  %v9473_v15 = vpack.c.bf16 %v360_v1, %v360_v1  ;;  %v313_v9 = vmax.f32 %v9455_v2, 0.0  ;;  %v1718_v18 = vld [vmem:[#allocation2 + $0x15c] sm:$0xf]  ;;  %v8119_v21 = vunpack.c.h.bf16 %v9460_v61 }
  0x62   :  { %5711 = vmatpush1.bf16.msra.mxu1 %v8542_v49  ;;  %v1719_v52 = vld [vmem:[#allocation2 + $0x160] sm:$0xf]  ;;  %v854_v17 = vor.u32 %v852_v59, %v851_v14  ;;  %v862_v20 = vor.u32 %v860_v55, %v859_v7  ;;  %v2382_v23 = vshll.u32 %v8544_v12, 16  ;;  %v8546_v25 = vld [vmem:[#allocation2 + $0x164] ss:$0 sps:$4 sm:$0x11]   ;;  %6006 = vmatpush2.bf16.msra.mxu0 %v8606_v35  ;;  %v227_v2 = vmul.f32 %v8118_v58, %v9179_v37 }
  0x63   :  { %v2375_v39 = vshrl.u32 %v9471_v11, 16  ;;  %v2377_v63 = vshll.u32 %v9471_v11, 16  ;;  %v7479_v38 = vcombine.low %v1718_v18, %v1719_v52  ;;  %5712 = vmatprep.subr.bf16.mxu1 %v11870_v0  ;;  %v855_v28 = vrot.slane %v851_v14, 4  ;;  %6007 = vmatprep.subr.bf16.mxu0 %v11870_v0  ;;  %v1629_v5 = vld [vmem:[#allocation2 + $0x168] sm:$0xf] }
  0x64   :  { %v864_v29 = vrot.slane %v859_v7, 4  ;;  %v1462_v31 = vsel %vm9258_vm8, %v854_v17, %v1461_v57  ;;  %v1257_v3 = vshrl.u32 %v7930_v26, 16  ;;  %v2384_v33 = vrot.slane %v2382_v23, 1  ;;  %v1633_v55 = vld [vmem:[#allocation2 + $0x170] sm:$0x1]  ;;  %v8554_v57 = vld [vmem:[%s11863_s4 + $0xf8] sm:$0xff]  }
  0x65   :  { %v2379_v36 = vrot.slane %v2377_v63, 1  ;;  %v2663_v40 = vshrl.u32 %v7479_v38, 16  ;;  %v2665_v27 = vshll.u32 %v7479_v38, 16  ;;  %1463 = vst [vmem:[#allocation2 + $0x30] sm:$0xf] %v1462_v31  ;;  %v2670_v42 = vshll.u32 %v8546_v25, 16 }
  0x66   :  { %5713 = vmatpush1.bf16.msra.mxu1 %v8547_v34  ;;  %v863_v44 = vsel %vm9264_vm9, %v855_v28, %v862_v20  ;;  %v1466_v19 = vsel %vm9025_vm3, %v864_v29, %v1465_v13  ;;  %v1259_v22 = vrot.slane %v1257_v3, 7  ;;  %v1260_v24 = vshll.u32 %v7930_v26, 16  ;;  %v588_v34 = vld [vmem:[#allocation2 + $0x17c] sm:$0x1]  ;;  %v8296_v12 = vld [vmem:[%s11865_s0 + $0x28] sm:$0xff]   ;;  %v8555_v17 = vld [vmem:[%s11863_s4 + $0xf0] sm:$0xff]  }
  0x67   :  { %v2380_v45 = vor.u32 %v2379_v36, %v2375_v39  ;;  %v2667_v47 = vrot.slane %v2665_v27, 1  ;;  %5714 = vmatprep.subr.bf16.mxu1 %v11870_v0  ;;  %1464 = vst [vmem:[#allocation2 + $0x34] sm:$0xf] %v863_v44  ;;  %1467 = vst [vmem:[#allocation2 + $0x38] sm:$0x1] %v1466_v19  ;;  %v1265_v16 = vshrl.u32 %v9473_v15, 16  ;;  %v7884_v60 = vpack.c.bf16 %v313_v9, %v313_v9 }
  0x68   :  { %v2672_v48 = vrot.slane %v2670_v42, 1  ;;  %v1263_v46 = vrot.slane %v1259_v22, 4  ;;  %v1268_v41 = vshll.u32 %v9473_v15, 16  ;;  %v314_v49 = vmax.f32 %v9467_v8, 0.0  ;;  %v1468_v20 = vld [vmem:[#allocation2 + $0x3c] sm:$0xf] }
  0x69   :  { %v2385_v51 = vsel %vm2337_vm5, %v2380_v45, %v2384_v33  ;;  %v2668_v30 = vor.u32 %v2667_v47, %v2663_v40  ;;  %v1262_v59 = vor.u32 %v1260_v24, %v1259_v22  ;;  %v1267_v53 = vrot.slane %v1265_v16, 7  ;;  %v1472_v58 = vld [vmem:[#allocation2 + $0x44] sm:$0x1] }
  0x6a   :  { %5467 = vmatprep.mubr.bf16.mxu0 %v2385_v51  ;;  %5715 = vmatpush1.bf16.msra.mxu1 %v8549_v43  ;;  %v7885_v1 = vpack.c.bf16 %v314_v49, %v314_v49  ;;  %v479_v4 = vsel %vm9025_vm3, 0, %v478_v32  ;;  %v866_v26 = vshrl.u32 %v7884_v60, 16  ;;  %v869_v15 = vshll.u32 %v7884_v60, 16  ;;  %v403_v32 = vld [vmem:[#allocation2 + $0x48] sm:$0x1] }
  0x6b   :  { %v2673_v14 = vsel %vm2337_vm5, %v2668_v30, %v2672_v48  ;;  %5468 = vmatmul.mubr.bf16.gmra.mxu0 %v9471_v11  ;;  %v1270_v7 = vor.u32 %v1268_v41, %v1267_v53  ;;  %v1272_v8 = vrot.slane %v1267_v53, 4  ;;  %v1630_v62 = vsel %vm9258_vm8, %v1262_v59, %v1629_v5  ;;  %5716 = vmatprep.subr.bf16.mxu1 %v11870_v0  ;;  %v8561_v48 = vld [vmem:[%s11863_s4 + $0xe8] sm:$0xff]   ;;  %v513_v30 = vld [vmem:[#allocation2 + $0x50] sm:$0x1] }
  0x6c   :  { %480 = vst [vmem:[#allocation2 + $0x174] sm:$0x1] %v479_v4  ;;  %5659 = vmatprep.mubr.bf16.mxu1 %v2673_v14  ;;  %v1672_v13 = vld [vmem:[#allocation2 + $0x30] sm:$0xf]  ;;  %1631 = vst [vmem:[#allocation2 + $0x168] sm:$0xf] %v1630_v62  ;;  %v228_v39 = vmul.f32 %v8119_v21, %v9179_v37  ;;  %v297_v63 = vadd.f32 %v9207_v56, %v227_v2  ;;  %v8026_v28 = vunpack.c.l.bf16 %v8296_v12  ;;  %v8027_v29 = vunpack.c.h.bf16 %v8296_v12 }
  0x6d   :  { %v874_v9 = vshrl.u32 %v7885_v1, 16  ;;  %v877_v18 = vshll.u32 %v7885_v1, 16  ;;  %5660 = vmatmul.mubr.bf16.gmra.mxu1 %v7479_v38  ;;  %v1271_v11 = vsel %vm9264_vm9, %v1263_v46, %v1270_v7  ;;  %v1634_v52 = vsel %vm9025_vm3, %v1272_v8, %v1633_v55  ;;  %v8613_v21 = vld [vmem:[%s11863_s4 + $0x170] sm:$0xff]   ;;  %v9553_v60 = vld [vmem:[%s11865_s0 + $0xe8] sm:$0xff]  }
  0x6e   :  { %v1673_v23 = vld [vmem:[#allocation2 + $0x34] sm:$0xf]  ;;  %1632 = vst [vmem:[#allocation2 + $0x16c] sm:$0xf] %v1271_v11  ;;  %1635 = vst [vmem:[#allocation2 + $0x170] sm:$0x1] %v1634_v52  ;;  %5717 = vmatpush2.bf16.msra.mxu1 %v8554_v57  ;;  %v298_v35 = vadd.f32 %v9207_v56, %v228_v39  ;;  %6008 = vmatpush2.bf16.msra.mxu0 %v8613_v21  ;;  %v181_v51 = vmul.f32 %v8026_v28, %v9179_v37 }
  0x6f   :  { %v868_v38 = vrot.slane %v866_v26, 7  ;;  %v876_v25 = vrot.slane %v874_v9, 7  ;;  %v9524_v31 = vcombine.low %v1672_v13, %v1673_v23  ;;  %v8551_v3 = vld [vmem:[#allocation2 + $0x38] ss:$0 sps:$4 sm:$0x11]   ;;  %5718 = vmatprep.subr.bf16.mxu1 %v11870_v0  ;;  %v361_v36 = vmax.f32 %v297_v63, 0.0  ;;  %6009 = vmatprep.subr.bf16.mxu0 %v11870_v0 }
  0x70   :  { %v589_v61 = vsel %vm9032_vm4, 0, %v588_v34  ;;  %v2394_v19 = vshll.u32 %v8551_v3, 16  ;;  %v362_v22 = vmax.f32 %v298_v35, 0.0  ;;  %v182_v55 = vmul.f32 %v8027_v29, %v9179_v37  ;;  %v8562_v13 = vld [vmem:[%s11863_s4 + $0xe0] sm:$0xff]   ;;  %v8567_v29 = vld [vmem:[%s11863_s4 + $0xd8] sm:$0xff]  }
  0x71   :  { %v871_v33 = vor.u32 %v869_v15, %v868_v38  ;;  %v872_v40 = vrot.slane %v868_v38, 4  ;;  %v879_v27 = vor.u32 %v877_v18, %v876_v25  ;;  %v881_v42 = vrot.slane %v876_v25, 4  ;;  %590 = vst [vmem:[#allocation2 + $0x17c] sm:$0x1] %v589_v61 }
  0x72   :  { %v2387_v43 = vshrl.u32 %v9524_v31, 16  ;;  %v2389_v44 = vshll.u32 %v9524_v31, 16  ;;  %5719 = vmatpush2.bf16.msra.mxu1 %v8555_v17  ;;  %v7932_v16 = vpack.c.bf16 %v361_v36, %v361_v36  ;;  %v2396_v41 = vrot.slane %v2394_v19, 1 }
  0x73   :  { %v880_v45 = vsel %vm9264_vm9, %v872_v40, %v879_v27  ;;  %v1469_v47 = vsel %vm9258_vm8, %v871_v33, %v1468_v20  ;;  %v1473_v24 = vsel %vm9025_vm3, %v881_v42, %v1472_v58  ;;  %v1720_v5 = vld [vmem:[#allocation2 + $0x168] sm:$0xf]  ;;  %v7933_v49 = vpack.c.bf16 %v362_v22, %v362_v22  ;;  %5720 = vmatprep.subr.bf16.mxu1 %v11870_v0  ;;  %v1636_v14 = vld [vmem:[#allocation2 + $0x174] sm:$0xf] }
  0x74   :  { %v2391_v46 = vrot.slane %v2389_v44, 1  ;;  %1470 = vst [vmem:[#allocation2 + $0x3c] sm:$0xf] %v1469_v47  ;;  %1471 = vst [vmem:[#allocation2 + $0x40] sm:$0xf] %v880_v45  ;;  %v1274_v59 = vshrl.u32 %v7932_v16, 16  ;;  %v251_v7 = vadd.f32 %v9207_v56, %v181_v51  ;;  %v252_v26 = vadd.f32 %v9207_v56, %v182_v55 }
  0x75   :  { %1474 = vst [vmem:[#allocation2 + $0x44] sm:$0x1] %v1473_v24  ;;  %v1277_v53 = vshll.u32 %v7932_v16, 16  ;;  %v404_v57 = vsel %vm9025_vm3, 0, %v403_v32  ;;  %v1721_v2 = vld [vmem:[#allocation2 + $0x16c] sm:$0xf]  ;;  %v8122_v17 = vunpack.c.l.bf16 %v9553_v60  ;;  %v8123_v32 = vunpack.c.h.bf16 %v9553_v60 }
  0x76   :  { %v2392_v1 = vor.u32 %v2391_v46, %v2387_v43  ;;  %v1282_v4 = vshrl.u32 %v7933_v49, 16  ;;  %v1285_v34 = vshll.u32 %v7933_v49, 16  ;;  %405 = vst [vmem:[#allocation2 + $0x48] sm:$0x1] %v404_v57  ;;  %v9556_v8 = vcombine.low %v1720_v5, %v1721_v2  ;;  %5721 = vmatpush2.bf16.msra.mxu1 %v8561_v48  ;;  %v481_v48 = vld [vmem:[#allocation2 + $0x180] sm:$0x1] }
  0x77   :  { %v8553_v62 = vld [vmem:[#allocation2 + $0x170] ss:$0 sps:$4 sm:$0x11]   ;;  %v1276_v12 = vrot.slane %v1274_v59, 7  ;;  %v514_v15 = vsel %vm9032_vm4, 0, %v513_v30  ;;  %5722 = vmatprep.subr.bf16.mxu1 %v11870_v0  ;;  %v315_v52 = vmax.f32 %v251_v7, 0.0  ;;  %v229_v49 = vmul.f32 %v8122_v17, %v9179_v37 }
  0x78   :  { %v2397_v9 = vsel %vm2337_vm5, %v2392_v1, %v2396_v41  ;;  %v1284_v18 = vrot.slane %v1282_v4, 7  ;;  %v1640_v11 = vld [vmem:[#allocation2 + $0x17c] sm:$0x1]  ;;  %515 = vst [vmem:[#allocation2 + $0x50] sm:$0x1] %v514_v15  ;;  %v2675_v20 = vshrl.u32 %v9556_v8, 16  ;;  %v230_v60 = vmul.f32 %v8123_v32, %v9179_v37 }
  0x79   :  { %5475 = vmatprep.mubr.bf16.mxu0 %v2397_v9  ;;  %v2677_v58 = vshll.u32 %v9556_v8, 16  ;;  %v2682_v39 = vshll.u32 %v8553_v62, 16  ;;  %v1279_v63 = vor.u32 %v1277_v53, %v1276_v12  ;;  %v1280_v23 = vrot.slane %v1276_v12, 4  ;;  %v591_v51 = vld [vmem:[#allocation2 + $0x188] sm:$0x1]  ;;  %v8569_v30 = vld [vmem:[%s11863_s4 + $0xd0] sm:$0xff]  }
  0x7a   :  { %5476 = vmatmul.mubr.bf16.gmra.mxu0 %v9524_v31  ;;  %v1287_v38 = vor.u32 %v1285_v34, %v1284_v18  ;;  %v1289_v25 = vrot.slane %v1284_v18, 4  ;;  %v316_v28 = vmax.f32 %v252_v26, 0.0  ;;  %5723 = vmatpush2.bf16.msra.mxu1 %v8562_v13  ;;  %v7886_v33 = vpack.c.bf16 %v315_v52, %v315_v52  ;;  %v8297_v1 = vld [vmem:[%s11865_s0 + $0x30] sm:$0xff]   ;;  %v516_v12 = vld [vmem:[#allocation2 + $0x5c] sm:$0x1] }
  0x7b   :  { %v2679_v3 = vrot.slane %v2677_v58, 1  ;;  %v2684_v35 = vrot.slane %v2682_v39, 1  ;;  %v1674_v36 = vld [vmem:[#allocation2 + $0x3c] sm:$0xf]  ;;  %v1675_v61 = vld [vmem:[#allocation2 + $0x40] sm:$0xf]  ;;  %v1637_v21 = vsel %vm9258_vm8, %v1279_v63, %v1636_v14  ;;  %5724 = vmatprep.subr.bf16.mxu1 %v11870_v0  ;;  %v299_v14 = vadd.f32 %v9207_v56, %v229_v49 }
  0x7c   :  { %v9575_v40 = vcombine.low %v1674_v36, %v1675_v61  ;;  %v8558_v31 = vld [vmem:[#allocation2 + $0x44] ss:$0 sps:$4 sm:$0x11]   ;;  %v1288_v27 = vsel %vm9264_vm9, %v1280_v23, %v1287_v38  ;;  %1638 = vst [vmem:[#allocation2 + $0x174] sm:$0xf] %v1637_v21  ;;  %v1641_v42 = vsel %vm9025_vm3, %v1289_v25, %v1640_v11  ;;  %v7887_v43 = vpack.c.bf16 %v316_v28, %v316_v28  ;;  %v8574_v58 = vld [vmem:[%s11863_s4 + $0xc8] sm:$0xff]  }
  0x7d   :  { %v2680_v44 = vor.u32 %v2679_v3, %v2675_v20  ;;  %1639 = vst [vmem:[#allocation2 + $0x178] sm:$0xf] %v1288_v27  ;;  %1642 = vst [vmem:[#allocation2 + $0x17c] sm:$0x1] %v1641_v42  ;;  %v883_v19 = vshrl.u32 %v7886_v33, 16  ;;  %v886_v22 = vshll.u32 %v7886_v33, 16  ;;  %v300_v9 = vadd.f32 %v9207_v56, %v230_v60 }
  0x7e   :  { %v2399_v45 = vshrl.u32 %v9575_v40, 16  ;;  %v2401_v47 = vshll.u32 %v9575_v40, 16  ;;  %v2406_v24 = vshll.u32 %v8558_v31, 16  ;;  %v891_v16 = vshrl.u32 %v7887_v43, 16  ;;  %5725 = vmatpush2.bf16.msra.mxu1 %v8567_v29  ;;  %v1475_v57 = vld [vmem:[#allocation2 + $0x48] sm:$0xf] }
  0x7f   :  { %v2685_v46 = vsel %vm2337_vm5, %v2680_v44, %v2684_v35  ;;  %v885_v41 = vrot.slane %v883_v19, 7  ;;  %v894_v5 = vshll.u32 %v7887_v43, 16  ;;  %5726 = vmatprep.subr.bf16.mxu1 %v11870_v0  ;;  %v1479_v34 = vld [vmem:[#allocation2 + $0x50] sm:$0x1]  ;;  %v482_v7 = vsel %vm9025_vm3, 0, %v481_v48  ;;  %v8625_v39 = vld [vmem:[%s11863_s4 + $0x168] sm:$0xff]  }
  0x80   :  { %5667 = vmatprep.mubr.bf16.mxu1 %v2685_v46  ;;  %v2403_v59 = vrot.slane %v2401_v47, 1  ;;  %v2408_v53 = vrot.slane %v2406_v24, 1  ;;  %v893_v55 = vrot.slane %v891_v16, 7  ;;  %v406_v62 = vld [vmem:[#allocation2 + $0x54] sm:$0x1]  ;;  %v363_v52 = vmax.f32 %v299_v14, 0.0  ;;  %6010 = vmatpush2.bf16.msra.mxu0 %v8625_v39 }
  0x81   :  { %5668 = vmatmul.mubr.bf16.gmra.mxu1 %v9556_v8  ;;  %v888_v2 = vor.u32 %v886_v22, %v885_v41  ;;  %v889_v4 = vrot.slane %v885_v41, 4  ;;  %483 = vst [vmem:[#allocation2 + $0x180] sm:$0x1] %v482_v7  ;;  %v9603_v8 = vld [vmem:[%s11865_s0 + $0xf0] sm:$0xff]   ;;  %v592_v17 = vsel %vm9032_vm4, 0, %v591_v51  ;;  %v8030_v20 = vunpack.c.l.bf16 %v8297_v1  ;;  %6011 = vmatprep.subr.bf16.mxu0 %v11870_v0 }
  0x82   :  { %v2404_v13 = vor.u32 %v2403_v59, %v2399_v45  ;;  %v896_v26 = vor.u32 %v894_v5, %v893_v55  ;;  %v898_v15 = vrot.slane %v893_v55, 4  ;;  %5727 = vmatpush2.bf16.msra.mxu1 %v8569_v30  ;;  %v364_v28 = vmax.f32 %v300_v9, 0.0  ;;  %593 = vst [vmem:[#allocation2 + $0x188] sm:$0x1] %v592_v17  ;;  %v8631_v9 = vld [vmem:[%s11863_s4 + $0x160] sm:$0xff]  }
  0x83   :  { %v1722_v18 = vld [vmem:[#allocation2 + $0x174] sm:$0xf]  ;;  %v1476_v11 = vsel %vm9258_vm8, %v888_v2, %v1475_v57  ;;  %5728 = vmatprep.subr.bf16.mxu1 %v11870_v0  ;;  %v7934_v35 = vpack.c.bf16 %v363_v52, %v363_v52  ;;  %v8031_v36 = vunpack.c.h.bf16 %v8297_v1  ;;  %v183_v61 = vmul.f32 %v8030_v20, %v9179_v37  ;;  %v484_v17 = vld [vmem:[#allocation2 + $0x18c] sm:$0x1] }
  0x84   :  { %v2409_v63 = vsel %vm2337_vm5, %v2404_v13, %v2408_v53  ;;  %v1723_v23 = vld [vmem:[#allocation2 + $0x178] sm:$0xf]  ;;  %v897_v38 = vsel %vm9264_vm9, %v889_v4, %v896_v26  ;;  %1477 = vst [vmem:[#allocation2 + $0x48] sm:$0xf] %v1476_v11  ;;  %v1480_v25 = vsel %vm9025_vm3, %v898_v15, %v1479_v34  ;;  %v7935_v21 = vpack.c.bf16 %v364_v28, %v364_v28 }
  0x85   :  { %5483 = vmatprep.mubr.bf16.mxu0 %v2409_v63  ;;  %v7481_v29 = vcombine.low %v1722_v18, %v1723_v23  ;;  %v8560_v3 = vld [vmem:[#allocation2 + $0x17c] ss:$0 sps:$4 sm:$0x11]   ;;  %1478 = vst [vmem:[#allocation2 + $0x4c] sm:$0xf] %v897_v38  ;;  %v407_v33 = vsel %vm9025_vm3, 0, %v406_v62  ;;  %v8126_v27 = vunpack.c.l.bf16 %v9603_v8  ;;  %v184_v47 = vmul.f32 %v8031_v36, %v9179_v37  ;;  %6012 = vmatpush2.bf16.msra.mxu0 %v8631_v9 }
  0x86   :  { %1481 = vst [vmem:[#allocation2 + $0x50] sm:$0x1] %v1480_v25  ;;  %5484 = vmatmul.mubr.bf16.gmra.mxu0 %v9575_v40  ;;  %v517_v31 = vsel %vm9032_vm4, 0, %v516_v12  ;;  %v2694_v44 = vshll.u32 %v8560_v3, 16  ;;  %v1291_v19 = vshrl.u32 %v7934_v35, 16  ;;  %5729 = vmatpush2.bf16.msra.mxu1 %v8574_v58  ;;  %v8575_v40 = vld [vmem:[%s11863_s4 + $0xc0] sm:$0xff]   ;;  %v253_v46 = vadd.f32 %v9207_v56, %v183_v61 }
  0x87   :  { %v2687_v42 = vshrl.u32 %v7481_v29, 16  ;;  %v2689_v43 = vshll.u32 %v7481_v29, 16  ;;  %408 = vst [vmem:[#allocation2 + $0x54] sm:$0x1] %v407_v33  ;;  %518 = vst [vmem:[#allocation2 + $0x5c] sm:$0x1] %v517_v31  ;;  %5730 = vmatprep.subr.bf16.mxu1 %v11870_v0  ;;  %v254_v49 = vadd.f32 %v9207_v56, %v184_v47  ;;  %v8127_v51 = vunpack.c.h.bf16 %v9603_v8  ;;  %6013 = vmatprep.subr.bf16.mxu0 %v11870_v0 }
  0x88   :  { %v1294_v22 = vshll.u32 %v7934_v35, 16  ;;  %v1299_v32 = vshrl.u32 %v7935_v21, 16  ;;  %v1302_v45 = vshll.u32 %v7935_v21, 16  ;;  %v2696_v16 = vrot.slane %v2694_v44, 1  ;;  %v1643_v5 = vld [vmem:[#allocation2 + $0x180] sm:$0xf] }
  0x89   :  { %v2691_v24 = vrot.slane %v2689_v43, 1  ;;  %v1293_v48 = vrot.slane %v1291_v19, 7  ;;  %v231_v30 = vmul.f32 %v8126_v27, %v9179_v37  ;;  %v1647_v60 = vld [vmem:[#allocation2 + $0x188] sm:$0x1]  ;;  %v317_v1 = vmax.f32 %v253_v46, 0.0  ;;  %v8298_v36 = vld [vmem:[%s11865_s0 + $0x38] sm:$0xff]  }
  0x8a   :  { %v1301_v41 = vrot.slane %v1299_v32, 7  ;;  %5731 = vmatpush2.bf16.msra.mxu1 %v8575_v40  ;;  %v318_v14 = vmax.f32 %v254_v49, 0.0  ;;  %v232_v7 = vmul.f32 %v8127_v51, %v9179_v37  ;;  %v594_v23 = vld [vmem:[#allocation2 + $0x194] sm:$0x1]  ;;  %v519_v46 = vld [vmem:[#allocation2 + $0x68] sm:$0x1] }
  0x8b   :  { %v2692_v59 = vor.u32 %v2691_v24, %v2687_v42  ;;  %v1676_v53 = vld [vmem:[#allocation2 + $0x48] sm:$0xf]  ;;  %v1296_v55 = vor.u32 %v1294_v22, %v1293_v48  ;;  %v1297_v57 = vrot.slane %v1293_v48, 4  ;;  %6278 = vmatprep.subr.bf16.mxu1 %v11870_v0  ;;  %v7888_v15 = vpack.c.bf16 %v317_v1, %v317_v1 }
  0x8c   :  { %v1677_v2 = vld [vmem:[#allocation2 + $0x4c] sm:$0xf]  ;;  %v1304_v4 = vor.u32 %v1302_v45, %v1301_v41  ;;  %v1306_v34 = vrot.slane %v1301_v41, 4  ;;  %v7889_v11 = vpack.c.bf16 %v318_v14, %v318_v14  ;;  %v301_v52 = vadd.f32 %v9207_v56, %v231_v30  ;;  %v409_v45 = vld [vmem:[#allocation2 + $0x60] sm:$0x1] }
  0x8d   :  { %v2697_v62 = vsel %vm2337_vm5, %v2692_v59, %v2696_v16  ;;  %v7458_v12 = vcombine.low %v1676_v53, %v1677_v2  ;;  %v8564_v13 = vld [vmem:[#allocation2 + $0x50] ss:$0 sps:$4 sm:$0x11]   ;;  %v1644_v26 = vsel %vm9258_vm8, %v1296_v55, %v1643_v5  ;;  %v900_v63 = vshrl.u32 %v7888_v15, 16 }
  0x8e   :  { %5675 = vmatprep.mubr.bf16.mxu1 %v2697_v62  ;;  %v1305_v8 = vsel %vm9264_vm9, %v1297_v57, %v1304_v4  ;;  %1645 = vst [vmem:[#allocation2 + $0x180] sm:$0xf] %v1644_v26  ;;  %v1648_v18 = vsel %vm9025_vm3, %v1306_v34, %v1647_v60  ;;  %v2418_v39 = vshll.u32 %v8564_v13, 16  ;;  %v903_v38 = vshll.u32 %v7888_v15, 16  ;;  %v1482_v3 = vld [vmem:[#allocation2 + $0x54] sm:$0xf] }
  0x8f   :  { %5676 = vmatmul.mubr.bf16.gmra.mxu1 %v7481_v29  ;;  %v2411_v20 = vshrl.u32 %v7458_v12, 16  ;;  %v2413_v58 = vshll.u32 %v7458_v12, 16  ;;  %1646 = vst [vmem:[#allocation2 + $0x184] sm:$0xf] %v1305_v8  ;;  %1649 = vst [vmem:[#allocation2 + $0x188] sm:$0x1] %v1648_v18  ;;  %v302_v35 = vadd.f32 %v9207_v56, %v232_v7  ;;  %v8034_v48 = vunpack.c.l.bf16 %v8298_v36 }
  0x90   :  { %v908_v25 = vshrl.u32 %v7889_v11, 16  ;;  %v911_v28 = vshll.u32 %v7889_v11, 16  ;;  %v2420_v61 = vrot.slane %v2418_v39, 1  ;;  %v902_v21 = vrot.slane %v900_v63, 7  ;;  %v1486_v22 = vld [vmem:[#allocation2 + $0x5c] sm:$0x1] }
  0x91   :  { %v2415_v29 = vrot.slane %v2413_v58, 1  ;;  %v365_v33 = vmax.f32 %v301_v52, 0.0  ;;  %v366_v27 = vmax.f32 %v302_v35, 0.0  ;;  %v485_v42 = vsel %vm9025_vm3, 0, %v484_v17 }
  0x92   :  { %v910_v31 = vrot.slane %v908_v25, 7  ;;  %v595_v43 = vsel %vm9032_vm4, 0, %v594_v23  ;;  %v905_v19 = vor.u32 %v903_v38, %v902_v21  ;;  %v906_v40 = vrot.slane %v902_v21, 4  ;;  %486 = vst [vmem:[#allocation2 + $0x18c] sm:$0x1] %v485_v42 }
  0x93   :  { %v2416_v44 = vor.u32 %v2415_v29, %v2411_v20  ;;  %596 = vst [vmem:[#allocation2 + $0x194] sm:$0x1] %v595_v43  ;;  %v7936_v32 = vpack.c.bf16 %v365_v33, %v365_v33  ;;  %v7937_v16 = vpack.c.bf16 %v366_v27, %v366_v27  ;;  %v8035_v34 = vunpack.c.h.bf16 %v8298_v36 }
  0x94   :  { %v913_v47 = vor.u32 %v911_v28, %v910_v31  ;;  %v915_v24 = vrot.slane %v910_v31, 4  ;;  %v1483_v49 = vsel %vm9258_vm8, %v905_v19, %v1482_v3  ;;  %v185_v14 = vmul.f32 %v8034_v48, %v9179_v37  ;;  %v9688_v19 = vld [vmem:[#allocation2] sm:$0xe]  ;;  %v412_v48 = vld [vmem:[#allocation2 + $0x6c] sm:$0x1] }
  0x95   :  { %v2421_v41 = vsel %vm2337_vm5, %v2416_v44, %v2420_v61  ;;  %v1724_v5 = vld [vmem:[#allocation2 + $0x180] sm:$0xf]  ;;  %v1308_v51 = vshrl.u32 %v7936_v32, 16  ;;  %v1311_v30 = vshll.u32 %v7936_v32, 16  ;;  %1484 = vst [vmem:[#allocation2 + $0x54] sm:$0xf] %v1483_v49  ;;  %v186_v58 = vmul.f32 %v8035_v34, %v9179_v37 }
  0x96   :  { %5491 = vmatprep.mubr.bf16.mxu0 %v2421_v41  ;;  %v1725_v59 = vld [vmem:[#allocation2 + $0x184] sm:$0xf]  ;;  %v914_v53 = vsel %vm9264_vm9, %v906_v40, %v913_v47  ;;  %v1487_v55 = vsel %vm9025_vm3, %v915_v24, %v1486_v22  ;;  %v1316_v57 = vshrl.u32 %v7937_v16, 16  ;;  %v1319_v60 = vshll.u32 %v7937_v16, 16  ;;  %v8643_v32 = vld [vmem:[%s11863_s4 + $0x158] sm:$0xff]  }
  0x97   :  { %v7482_v1 = vcombine.low %v1724_v5, %v1725_v59  ;;  %v8566_v2 = vld [vmem:[#allocation2 + $0x188] ss:$0 sps:$4 sm:$0x11]   ;;  %5492 = vmatmul.mubr.bf16.gmra.mxu0 %v7458_v12  ;;  %1485 = vst [vmem:[#allocation2 + $0x58] sm:$0xf] %v914_v53  ;;  %v1310_v4 = vrot.slane %v1308_v51, 7  ;;  %v255_v38 = vadd.f32 %v9207_v56, %v185_v14  ;;  %v256_v3 = vadd.f32 %v9207_v56, %v186_v58 }
  0x98   :  { %1488 = vst [vmem:[#allocation2 + $0x5c] sm:$0x1] %v1487_v55  ;;  %v1318_v7 = vrot.slane %v1316_v57, 7  ;;  %v410_v62 = vsel %vm9025_vm3, 0, %v409_v45  ;;  %v520_v13 = vsel %vm9032_vm4, 0, %v519_v46  ;;  %v2706_v9 = vshll.u32 %v8566_v2, 16  ;;  %6014 = vmatpush2.bf16.msra.mxu0 %v8643_v32 }
  0x99   :  { %v2699_v26 = vshrl.u32 %v7482_v1, 16  ;;  %v2701_v15 = vshll.u32 %v7482_v1, 16  ;;  %v1313_v8 = vor.u32 %v1311_v30, %v1310_v4  ;;  %411 = vst [vmem:[#allocation2 + $0x60] sm:$0x1] %v410_v62  ;;  %521 = vst [vmem:[#allocation2 + $0x68] sm:$0x1] %v520_v13  ;;  %6015 = vmatprep.subr.bf16.mxu0 %v11870_v0 }
  0x9a   :  { %v8299_v12 = vld [vmem:[%s11865_s0 + $0x40] sm:$0xff]   ;;  %v1314_v18 = vrot.slane %v1310_v4, 4  ;;  %v1321_v11 = vor.u32 %v1319_v60, %v1318_v7  ;;  %v1323_v52 = vrot.slane %v1318_v7, 4  ;;  %v1650_v17 = vld [vmem:[#allocation2 + $0x18c] sm:$0xf]  ;;  %v2708_v63 = vrot.slane %v2706_v9, 1 }
  0x9b   :  { %v1654_v20 = vld [vmem:[#allocation2 + $0x194] sm:$0x1]  ;;  %v2703_v39 = vrot.slane %v2701_v15, 1  ;;  %v1651_v23 = vsel %vm9258_vm8, %v1313_v8, %v1650_v17  ;;  %v319_v29 = vmax.f32 %v255_v38, 0.0  ;;  %v320_v21 = vmax.f32 %v256_v3, 0.0 }
  0x9c   :  { %v1322_v25 = vsel %vm9264_vm9, %v1314_v18, %v1321_v11  ;;  %1652 = vst [vmem:[#allocation2 + $0x18c] sm:$0xf] %v1651_v23  ;;  %v1655_v28 = vsel %vm9025_vm3, %v1323_v52, %v1654_v20  ;;  %v1678_v36 = vld [vmem:[#allocation2 + $0x54] sm:$0xf]  ;;  %v8038_v33 = vunpack.c.l.bf16 %v8299_v12  ;;  %v8039_v40 = vunpack.c.h.bf16 %v8299_v12  ;;  %v8870_v4 = vld [vmem:[#allocation2 + $0x4] sm:$0xf] }
  0x9d   :  { %v2704_v35 = vor.u32 %v2703_v39, %v2699_v26  ;;  %1653 = vst [vmem:[#allocation2 + $0x190] sm:$0xf] %v1322_v25  ;;  %1656 = vst [vmem:[#allocation2 + $0x194] sm:$0x1] %v1655_v28  ;;  %v7890_v43 = vpack.c.bf16 %v319_v29, %v319_v29  ;;  %v7891_v44 = vpack.c.bf16 %v320_v21, %v320_v21  ;;  %v413_v7 = vsel %vm9025_vm3, 0, %v412_v48  ;;  %v8650_v25 = vld [vmem:[%s11863_s4 + $0x150] sm:$0xff]  }
  0x9e   :  { %v9684_v61 = vld [vmem:[#allocation2 + $0x58] sm:$0xf]  ;;  %v187_v22 = vmul.f32 %v8038_v33, %v9179_v37  ;;  %v9694_v46 = vld [vmem:[#allocation2 + $0x8] ss:$0 sps:$4 sm:$0x11]   ;;  %v188_v60 = vmul.f32 %v8039_v40, %v9179_v37  ;;  %v7516_v34 = vcombine.low %v9688_v19, %v8870_v4  ;;  %6016 = vmatpush2.bf16.msra.mxu0 %v8650_v25 }
  0x9f   :  { %v2709_v31 = vsel %vm2337_vm5, %v2704_v35, %v2708_v63  ;;  %v7459_v27 = vcombine.low %v1678_v36, %v9684_v61  ;;  %v8571_v42 = vld [vmem:[#allocation2 + $0x5c] ss:$0 sps:$4 sm:$0x11]   ;;  %v917_v16 = vshrl.u32 %v7890_v43, 16  ;;  %v2852_v41 = vrot.slane %v9694_v46, 1  ;;  %6017 = vmatprep.subr.bf16.mxu0 %v11870_v0 }
  0xa0   :  { %5683 = vmatprep.mubr.bf16.mxu1 %v2709_v31  ;;  %v2430_v24 = vshll.u32 %v8571_v42, 16  ;;  %v920_v5 = vshll.u32 %v7890_v43, 16  ;;  %v925_v49 = vshrl.u32 %v7891_v44, 16  ;;  %v928_v51 = vshll.u32 %v7891_v44, 16  ;;  %v1489_v57 = vld [vmem:[#allocation2 + $0x60] sm:$0xf] }
  0xa1   :  { %5684 = vmatmul.mubr.bf16.gmra.mxu1 %v7482_v1  ;;  %v2423_v45 = vshrl.u32 %v7459_v27, 16  ;;  %v2425_v47 = vshll.u32 %v7459_v27, 16  ;;  %v919_v55 = vrot.slane %v917_v16, 7  ;;  %v257_v14 = vadd.f32 %v9207_v56, %v187_v22  ;;  %v1493_v8 = vld [vmem:[#allocation2 + $0x68] sm:$0x1] }
  0xa2   :  { %v2432_v59 = vrot.slane %v2430_v24, 1  ;;  %v927_v2 = vrot.slane %v925_v49, 7  ;;  %v1792_v12 = vld [vmem:[#allocation2 + $0xc] sm:$0xf]  ;;  %v1793_v18 = vld [vmem:[#allocation2 + $0x10] sm:$0xf]  ;;  %v258_v17 = vadd.f32 %v9207_v56, %v188_v60 }
  0xa3   :  { %v2427_v30 = vrot.slane %v2425_v47, 1  ;;  %v1726_v53 = vld [vmem:[#allocation2 + $0x18c] sm:$0xf]  ;;  %v922_v15 = vor.u32 %v920_v5, %v919_v55  ;;  %v923_v9 = vrot.slane %v919_v55, 4  ;;  %414 = vst [vmem:[#allocation2 + $0x6c] sm:$0x1] %v413_v7  ;;  %v9719_v44 = vcombine.low %v1792_v12, %v1793_v18 }
  0xa4   :  { %v1727_v1 = vld [vmem:[#allocation2 + $0x190] sm:$0xf]  ;;  %v8573_v26 = vld [vmem:[#allocation2 + $0x194] ss:$0 sps:$4 sm:$0x11]   ;;  %v930_v11 = vor.u32 %v928_v51, %v927_v2  ;;  %v932_v52 = vrot.slane %v927_v2, 4 }
  0xa5   :  { %v2428_v62 = vor.u32 %v2427_v30, %v2423_v45  ;;  %v7483_v13 = vcombine.low %v1726_v53, %v1727_v1  ;;  %v321_v20 = vmax.f32 %v257_v14, 0.0  ;;  %v522_v58 = vld [vmem:[#allocation2 + $0x74] sm:$0x1]  ;;  %v2718_v38 = vshll.u32 %v8573_v26, 16  ;;  %v1761_v42 = vld [vmem:[#allocation2 + $0xc] sm:$0xe] }
  0xa6   :  { %v931_v28 = vsel %vm9264_vm9, %v923_v9, %v930_v11  ;;  %v1490_v3 = vsel %vm9258_vm8, %v922_v15, %v1489_v57  ;;  %v1494_v35 = vsel %vm9025_vm3, %v932_v52, %v1493_v8  ;;  %v322_v36 = vmax.f32 %v258_v17, 0.0  ;;  %v8300_v43 = vld [vmem:[%s11865_s0 + $0x48] sm:$0xff]   ;;  %v415_v40 = vld [vmem:[#allocation2 + $0x78] sm:$0x1]  ;;  %v525_v47 = vld [vmem:[#allocation2 + $0x80] sm:$0x1] }
  0xa7   :  { %v2433_v39 = vsel %vm2337_vm5, %v2428_v62, %v2432_v59  ;;  %v2711_v63 = vshrl.u32 %v7483_v13, 16  ;;  %v2713_v23 = vshll.u32 %v7483_v13, 16  ;;  %v2720_v21 = vrot.slane %v2718_v38, 1  ;;  %1491 = vst [vmem:[#allocation2 + $0x60] sm:$0xf] %v1490_v3  ;;  %v8301_v26 = vld [vmem:[%s11865_s0 + $0x50] sm:$0xff]  }
  0xa8   :  { %5499 = vmatprep.mubr.bf16.mxu0 %v2433_v39  ;;  %1492 = vst [vmem:[#allocation2 + $0x64] sm:$0xf] %v931_v28  ;;  %1495 = vst [vmem:[#allocation2 + $0x68] sm:$0x1] %v1494_v35  ;;  %v523_v33 = vsel %vm9032_vm4, 0, %v522_v58  ;;  %v7892_v31 = vpack.c.bf16 %v321_v20, %v321_v20  ;;  %v7893_v19 = vpack.c.bf16 %v322_v36, %v322_v36  ;;  %v2851_v24 = vrot.slane %v7516_v34, 1 }
  0xa9   :  { %v2715_v29 = vrot.slane %v2713_v23, 1  ;;  %5500 = vmatmul.mubr.bf16.gmra.mxu0 %v7459_v27  ;;  %524 = vst [vmem:[#allocation2 + $0x74] sm:$0x1] %v523_v33  ;;  %v1794_v45 = vld [vmem:[#allocation2 + $0x18] sm:$0xf]  ;;  %v8042_v49 = vunpack.c.l.bf16 %v8300_v43  ;;  %v8043_v59 = vunpack.c.h.bf16 %v8300_v43  ;;  %v416_v53 = vsel %vm9025_vm3, 0, %v415_v40 }
  0xaa   :  { %v934_v27 = vshrl.u32 %v7892_v31, 16  ;;  %v937_v32 = vshll.u32 %v7892_v31, 16  ;;  %v942_v16 = vshrl.u32 %v7893_v19, 16  ;;  %v945_v48 = vshll.u32 %v7893_v19, 16  ;;  %v1795_v5 = vld [vmem:[#allocation2 + $0x1c] sm:$0xf] }
  0xab   :  { %v2716_v22 = vor.u32 %v2715_v29, %v2711_v63  ;;  %v1496_v57 = vld [vmem:[#allocation2 + $0x6c] sm:$0xf]  ;;  %v8871_v60 = vld [vmem:[#allocation2 + $0x10] sm:$0xf]  ;;  %v189_v2 = vmul.f32 %v8042_v49, %v9179_v37  ;;  %417 = vst [vmem:[#allocation2 + $0x78] sm:$0x1] %v416_v53  ;;  %v190_v7 = vmul.f32 %v8043_v59, %v9179_v37  ;;  %v2853_v8 = vsel %vm2850_vm10, %v2851_v24, %v2852_v41 }
  0xac   :  { %v936_v30 = vrot.slane %v934_v27, 7  ;;  %v944_v55 = vrot.slane %v942_v16, 7  ;;  %v7517_v1 = vcombine.low %v1761_v42, %v8871_v60  ;;  %v526_v4 = vsel %vm9032_vm4, 0, %v525_v47  ;;  %v1762_v62 = vld [vmem:[#allocation2 + $0x18] sm:$0xe]  ;;  %v8595_v49 = vld [vmem:[%s11863_s4 + $0x1b0] sm:$0xff]  }
  0xad   :  { %v2721_v51 = vsel %vm2337_vm5, %v2716_v22, %v2720_v21  ;;  %527 = vst [vmem:[#allocation2 + $0x80] sm:$0x1] %v526_v4  ;;  %v9738_v12 = vcombine.low %v1794_v45, %v1795_v5  ;;  %v259_v18 = vadd.f32 %v9207_v56, %v189_v2  ;;  %v260_v39 = vadd.f32 %v9207_v56, %v190_v7  ;;  %v8872_v63 = vld [vmem:[#allocation2 + $0x14] ss:$0 sps:$4 sm:$0x11]   ;;  %v8582_v29 = vld [vmem:[%s11863_s4 + $0x1b8] sm:$0xff]  }
  0xae   :  { %5691 = vmatprep.mubr.bf16.mxu1 %v2721_v51  ;;  %v939_v34 = vor.u32 %v937_v32, %v936_v30  ;;  %v940_v14 = vrot.slane %v936_v30, 4  ;;  %v1680_v15 = vld [vmem:[#allocation2 + $0x60] sm:$0xf]  ;;  %v949_v17 = vrot.slane %v944_v55, 4  ;;  %v2854_v41 = vrot.slane %v7517_v1, 1 }
  0xaf   :  { %5692 = vmatmul.mubr.bf16.gmra.mxu1 %v7483_v13  ;;  %v9732_v9 = vld [vmem:[#allocation2 + $0x64] sm:$0xf]  ;;  %v947_v13 = vor.u32 %v945_v48, %v944_v55  ;;  %v9744_v52 = vld [vmem:[#allocation2 + $0x68] ss:$0 sps:$4 sm:$0x11]   ;;  %v2855_v23 = vrot.slane %v8872_v63, 1  ;;  %v8046_v43 = vunpack.c.l.bf16 %v8301_v26  ;;  %v8047_v27 = vunpack.c.h.bf16 %v8301_v26 }
  0xb0   :  { %5732 = vmatprep.mubr.bf16.mxu1 %v9719_v44  ;;  %v9742_v11 = vcombine.low %v1680_v15, %v9732_v9  ;;  %v1497_v20 = vsel %vm9258_vm8, %v939_v34, %v1496_v57  ;;  %v1500_v58 = vld [vmem:[#allocation2 + $0x74] sm:$0x1]  ;;  %v323_v38 = vmax.f32 %v259_v18, 0.0  ;;  %v418_v25 = vld [vmem:[#allocation2 + $0x84] sm:$0x1]  ;;  %v2442_v35 = vshll.u32 %v9744_v52, 16 }
  0xb1   :  { %v948_v46 = vsel %vm9264_vm9, %v940_v14, %v947_v13  ;;  %1498 = vst [vmem:[#allocation2 + $0x6c] sm:$0xf] %v1497_v20  ;;  %v1501_v36 = vsel %vm9025_vm3, %v949_v17, %v1500_v58  ;;  %v324_v21 = vmax.f32 %v260_v39, 0.0  ;;  %v8873_v31 = vld [vmem:[#allocation2 + $0x1c] sm:$0xf]  ;;  %v419_v32 = vsel %vm9025_vm3, 0, %v418_v25 }
  0xb2   :  { %v2435_v28 = vshrl.u32 %v9742_v11, 16  ;;  %v2437_v3 = vshll.u32 %v9742_v11, 16  ;;  %1499 = vst [vmem:[#allocation2 + $0x70] sm:$0xf] %v948_v46  ;;  %1502 = vst [vmem:[#allocation2 + $0x74] sm:$0x1] %v1501_v36  ;;  %v7894_v33 = vpack.c.bf16 %v323_v38, %v323_v38  ;;  %v7518_v42 = vcombine.low %v1762_v62, %v8873_v31 }
  0xb3   :  { %v528_v19 = vld [vmem:[#allocation2 + $0x8c] sm:$0x1]  ;;  %v2444_v22 = vrot.slane %v2442_v35, 1  ;;  %v9762_v45 = vsel %vm2850_vm10, %v2854_v41, %v2855_v23  ;;  %v7895_v47 = vpack.c.bf16 %v324_v21, %v324_v21  ;;  %v1796_v48 = vld [vmem:[#allocation2 + $0x24] sm:$0xf]  ;;  %v191_v30 = vmul.f32 %v8046_v43, %v9179_v37  ;;  %v9774_v57 = vld [vmem:[%s11865_s0 + $0x58] sm:$0xff]  }
  0xb4   :  { %v2439_v40 = vrot.slane %v2437_v3, 1  ;;  %v951_v24 = vshrl.u32 %v7894_v33, 16  ;;  %v954_v16 = vshll.u32 %v7894_v33, 16  ;;  %v1797_v5 = vld [vmem:[#allocation2 + $0x28] sm:$0xf]  ;;  %v192_v59 = vmul.f32 %v8047_v27, %v9179_v37 }
  0xb5   :  { %420 = vst [vmem:[#allocation2 + $0x84] sm:$0x1] %v419_v32  ;;  %v529_v53 = vsel %vm9032_vm4, 0, %v528_v19  ;;  %v1763_v55 = vld [vmem:[#allocation2 + $0x24] sm:$0xe]  ;;  %v959_v1 = vshrl.u32 %v7895_v47, 16  ;;  %v261_v15 = vadd.f32 %v9207_v56, %v191_v30  ;;  %v9788_v39 = vcombine.low %v1796_v48, %v1797_v5 }
  0xb6   :  { %v2440_v51 = vor.u32 %v2439_v40, %v2435_v28  ;;  %v953_v60 = vrot.slane %v951_v24, 7  ;;  %v962_v2 = vshll.u32 %v7895_v47, 16  ;;  %v9777_v4 = vrot.slane %v7518_v42, 1  ;;  %530 = vst [vmem:[#allocation2 + $0x8c] sm:$0x1] %v529_v53  ;;  %v8662_v43 = vld [vmem:[%s11863_s4 + $0x148] sm:$0xff]  }
  0xb7   :  { %5733 = vmatmul.mubr.bf16.vlgmr.msra.gmra.mxu1 %v2853_v8  ;;  %v1503_v7 = vld [vmem:[#allocation2 + $0x78] sm:$0xf]  ;;  %v9780_v62 = vld [vmem:[#allocation2 + $0x20] ss:$0 sps:$4 sm:$0x11]   ;;  %v262_v8 = vadd.f32 %v9207_v56, %v192_v59  ;;  %v961_v20 = vrot.slane %v959_v1, 7  ;;  %v8050_v25 = vunpack.c.l.bf16 %v9774_v57  ;;  %6018 = vmatpush2.bf16.msra.mxu0 %v8662_v43 }
  0xb8   :  { %6279 = vmatpush1.bf16.msra.mxu1 %v8582_v29  ;;  %5740 = vmatprep.mubr.bf16.mxu1 %v9738_v12  ;;  %v2445_v34 = vsel %vm2337_vm5, %v2440_v51, %v2444_v22  ;;  %v1682_v14 = vld [vmem:[#allocation2 + $0x6c] sm:$0xf]  ;;  %v2858_v26 = vrot.slane %v9780_v62, 1  ;;  %v956_v18 = vor.u32 %v954_v16, %v953_v60  ;;  %v957_v17 = vrot.slane %v953_v60, 4  ;;  %v1507_v58 = vld [vmem:[#allocation2 + $0x80] sm:$0x1] }
  0xb9   :  { %6280 = vmatprep.subr.bf16.mxu1 %v11870_v0  ;;  %5507 = vmatprep.mubr.bf16.mxu0 %v2445_v34  ;;  %v9786_v13 = vld [vmem:[#allocation2 + $0x70] sm:$0xf]  ;;  %v9794_v41 = vld [vmem:[#allocation2 + $0x74] ss:$0 sps:$4 sm:$0x11]   ;;  %v325_v63 = vmax.f32 %v261_v15, 0.0  ;;  %v964_v28 = vor.u32 %v962_v2, %v961_v20  ;;  %v8051_v60 = vunpack.c.h.bf16 %v9774_v57 }
  0xba   :  { %5508 = vmatmul.mubr.bf16.gmra.mxu0 %v9742_v11  ;;  %v9792_v46 = vcombine.low %v1682_v14, %v9786_v13  ;;  %v8875_v23 = vld [vmem:[#allocation2 + $0x28] sm:$0xf]  ;;  %v966_v3 = vrot.slane %v961_v20, 4  ;;  %v1504_v35 = vsel %vm9258_vm8, %v956_v18, %v1503_v7  ;;  %v326_v36 = vmax.f32 %v262_v8, 0.0  ;;  %v421_v42 = vld [vmem:[#allocation2 + $0x90] sm:$0x1]  ;;  %6019 = vmatprep.subr.bf16.mxu0 %v11870_v0 }
  0xbb   :  { %v7519_v38 = vcombine.low %v1763_v55, %v8875_v23  ;;  %v8607_v11 = vld [vmem:[%s11863_s4 + $0x1a8] sm:$0xff]   ;;  %v2454_v33 = vshll.u32 %v9794_v41, 16  ;;  %1505 = vst [vmem:[#allocation2 + $0x78] sm:$0xf] %v1504_v35  ;;  %v7896_v31 = vpack.c.bf16 %v325_v63, %v325_v63  ;;  %v965_v19 = vsel %vm9264_vm9, %v957_v17, %v964_v28  ;;  %v531_v32 = vld [vmem:[#allocation2 + $0x98] sm:$0x1] }
  0xbc   :  { %6281 = vmatpush1.bf16.msra.mxu1 %v8595_v49  ;;  %v2447_v29 = vshrl.u32 %v9792_v46, 16  ;;  %v2449_v21 = vshll.u32 %v9792_v46, 16  ;;  %v1508_v40 = vsel %vm9025_vm3, %v966_v3, %v1507_v58  ;;  %v7897_v22 = vpack.c.bf16 %v326_v36, %v326_v36  ;;  %1506 = vst [vmem:[#allocation2 + $0x7c] sm:$0xf] %v965_v19  ;;  %v1798_v5 = vld [vmem:[#allocation2 + $0x30] sm:$0xf] }
  0xbd   :  { %6282 = vmatprep.subr.bf16.mxu1 %v11870_v0  ;;  %v9813_v27 = vrot.slane %v7519_v38, 1  ;;  %v2456_v24 = vrot.slane %v2454_v33, 1  ;;  %1509 = vst [vmem:[#allocation2 + $0x80] sm:$0x1] %v1508_v40  ;;  %v968_v16 = vshrl.u32 %v7896_v31, 16  ;;  %v971_v48 = vshll.u32 %v7896_v31, 16 }
  0xbe   :  { %v2451_v47 = vrot.slane %v2449_v21, 1  ;;  %v1799_v49 = vld [vmem:[#allocation2 + $0x34] sm:$0xf]  ;;  %v976_v51 = vshrl.u32 %v7897_v22, 16  ;;  %v979_v30 = vshll.u32 %v7897_v22, 16  ;;  %v193_v14 = vmul.f32 %v8050_v25, %v9179_v37 }
  0xbf   :  { %5741 = vmatmul.mubr.bf16.gmra.mxu1 %v9762_v45  ;;  %v1510_v59 = vld [vmem:[#allocation2 + $0x84] sm:$0xf]  ;;  %v8876_v53 = vld [vmem:[#allocation2 + $0x2c] ss:$0 sps:$4 sm:$0x11]   ;;  %v970_v2 = vrot.slane %v968_v16, 7  ;;  %v2859_v57 = vsel %vm2850_vm10, %v9777_v4, %v2858_v26  ;;  %v194_v18 = vmul.f32 %v8051_v60, %v9179_v37  ;;  %v9835_v28 = vcombine.low %v1798_v5, %v1799_v49 }
  0xc0   :  { %5748 = vmatprep.mubr.bf16.mxu1 %v9788_v39  ;;  %v2861_v55 = vrot.slane %v8876_v53, 1  ;;  %6283 = vmatpush1.bf16.msra.mxu1 %v8607_v11  ;;  %v8619_v45 = vld [vmem:[%s11863_s4 + $0x1a0] sm:$0xff]   ;;  %v2452_v1 = vor.u32 %v2451_v47, %v2447_v29  ;;  %v1514_v34 = vld [vmem:[#allocation2 + $0x8c] sm:$0x1]  ;;  %v422_v7 = vsel %vm9025_vm3, 0, %v421_v42  ;;  %v978_v8 = vrot.slane %v976_v51, 7 }
  0xc1   :  { %v1764_v15 = vld [vmem:[#allocation2 + $0x30] sm:$0xe]  ;;  %6284 = vmatprep.subr.bf16.mxu1 %v11870_v0  ;;  %423 = vst [vmem:[#allocation2 + $0x90] sm:$0x1] %v422_v7  ;;  %v532_v17 = vsel %vm9032_vm4, 0, %v531_v32  ;;  %v973_v58 = vor.u32 %v971_v48, %v970_v2  ;;  %v974_v63 = vrot.slane %v970_v2, 4  ;;  %v263_v23 = vadd.f32 %v9207_v56, %v193_v14 }
  0xc2   :  { %v2457_v20 = vsel %vm2337_vm5, %v2452_v1, %v2456_v24  ;;  %533 = vst [vmem:[#allocation2 + $0x98] sm:$0x1] %v532_v17  ;;  %v1684_v38 = vld [vmem:[#allocation2 + $0x78] sm:$0xf]  ;;  %v981_v62 = vor.u32 %v979_v30, %v978_v8  ;;  %v983_v25 = vrot.slane %v978_v8, 4  ;;  %v264_v4 = vadd.f32 %v9207_v56, %v194_v18  ;;  %v8303_v29 = vld [vmem:[%s11865_s0 + $0x60] sm:$0xff]  }
  0xc3   :  { %5515 = vmatprep.mubr.bf16.mxu0 %v2457_v20  ;;  %v8632_v26 = vld [vmem:[%s11863_s4 + $0x198] sm:$0xff]   ;;  %v1511_v3 = vsel %vm9258_vm8, %v973_v58, %v1510_v59  ;;  %v327_v35 = vmax.f32 %v263_v23, 0.0  ;;  %v1801_v11 = vld [vmem:[#allocation2 + $0x40] sm:$0xf]  ;;  %v8877_v42 = vld [vmem:[#allocation2 + $0x34] sm:$0xf]  ;;  %v2862_v22 = vsel %vm2850_vm10, %v9813_v27, %v2861_v55  ;;  %v8054_v16 = vunpack.c.l.bf16 %v8303_v29 }
  0xc4   :  { %6285 = vmatpush1.bf16.msra.mxu1 %v8619_v45  ;;  %5516 = vmatmul.mubr.bf16.gmra.mxu0 %v9792_v46  ;;  %v1800_v36 = vld [vmem:[#allocation2 + $0x3c] sm:$0xf]  ;;  %v982_v33 = vsel %vm9264_vm9, %v974_v63, %v981_v62  ;;  %1512 = vst [vmem:[#allocation2 + $0x84] sm:$0xf] %v1511_v3  ;;  %v1515_v46 = vsel %vm9025_vm3, %v983_v25, %v1514_v34  ;;  %v328_v31 = vmax.f32 %v264_v4, 0.0  ;;  %v8055_v48 = vunpack.c.h.bf16 %v8303_v29  ;;  %v8644_v49 = vld [vmem:[%s11863_s4 + $0x190] sm:$0xff]  }
  0xc5   :  { %6286 = vmatprep.subr.bf16.mxu1 %v11870_v0  ;;  %v9848_v21 = vld [vmem:[#allocation2 + $0x7c] sm:$0xf]  ;;  %v7520_v43 = vcombine.low %v1764_v15, %v8877_v42  ;;  %v9857_v40 = vld [vmem:[#allocation2 + $0x80] ss:$0 sps:$4 sm:$0x11]   ;;  %v7898_v32 = vpack.c.bf16 %v327_v35, %v327_v35  ;;  %v9862_v24 = vcombine.low %v1800_v36, %v1801_v11  ;;  %v8656_v18 = vld [vmem:[%s11863_s4 + $0x188] sm:$0xff]   ;;  %v195_v20 = vmul.f32 %v8054_v16, %v9179_v37 }
  0xc6   :  { %v9855_v19 = vcombine.low %v1684_v38, %v9848_v21  ;;  %1513 = vst [vmem:[#allocation2 + $0x88] sm:$0xf] %v982_v33  ;;  %1516 = vst [vmem:[#allocation2 + $0x8c] sm:$0x1] %v1515_v46  ;;  %v7899_v47 = vpack.c.bf16 %v328_v31, %v328_v31  ;;  %v424_v5 = vld [vmem:[#allocation2 + $0x9c] sm:$0x1]  ;;  %v196_v58 = vmul.f32 %v8055_v48, %v9179_v37 }
  0xc7   :  { %5749 = vmatmul.mubr.bf16.gmra.mxu1 %v2859_v57  ;;  %v8668_v51 = vld [vmem:[%s11863_s4 + $0x140] sm:$0xff]   ;;  %v2466_v59 = vshll.u32 %v9857_v40, 16  ;;  %v985_v53 = vshrl.u32 %v7898_v32, 16  ;;  %v988_v60 = vshll.u32 %v7898_v32, 16  ;;  %v2863_v34 = vrot.slane %v7520_v43, 1 }
  0xc8   :  { %5756 = vmatprep.mubr.bf16.mxu1 %v9835_v28  ;;  %6287 = vmatpush1.bf16.msra.mxu1 %v8632_v26  ;;  %v2459_v27 = vshrl.u32 %v9855_v19, 16  ;;  %v2461_v30 = vshll.u32 %v9855_v19, 16  ;;  %v534_v55 = vld [vmem:[#allocation2 + $0xa4] sm:$0x1]  ;;  %v993_v45 = vshrl.u32 %v7899_v47, 16  ;;  %v996_v1 = vshll.u32 %v7899_v47, 16 }
  0xc9   :  { %6288 = vmatprep.subr.bf16.mxu1 %v11870_v0  ;;  %v1517_v2 = vld [vmem:[#allocation2 + $0x90] sm:$0xf]  ;;  %6020 = vmatpush2.bf16.msra.mxu0 %v8668_v51  ;;  %v2468_v7 = vrot.slane %v2466_v59, 1  ;;  %v987_v15 = vrot.slane %v985_v53, 7  ;;  %v425_v63 = vsel %vm9025_vm3, 0, %v424_v5  ;;  %v535_v26 = vsel %vm9032_vm4, 0, %v534_v55 }
  0xca   :  { %v2463_v14 = vrot.slane %v2461_v30, 1  ;;  %v8878_v57 = vld [vmem:[#allocation2 + $0x38] ss:$0 sps:$4 sm:$0x11]   ;;  %v995_v17 = vrot.slane %v993_v45, 7  ;;  %v265_v11 = vadd.f32 %v9207_v56, %v195_v20  ;;  %v266_v29 = vadd.f32 %v9207_v56, %v196_v58  ;;  %v8669_v30 = vld [vmem:[%s11863_s4 + $0x180] sm:$0xff]  }
  0xcb   :  { %v2864_v8 = vrot.slane %v8878_v57, 1  ;;  %v1686_v38 = vld [vmem:[#allocation2 + $0x84] sm:$0xf]  ;;  %v990_v62 = vor.u32 %v988_v60, %v987_v15  ;;  %v991_v25 = vrot.slane %v987_v15, 4  ;;  %v1521_v4 = vld [vmem:[#allocation2 + $0x98] sm:$0x1] }
  0xcc   :  { %6289 = vmatpush1.bf16.msra.mxu1 %v8644_v49  ;;  %v2464_v23 = vor.u32 %v2463_v14, %v2459_v27  ;;  %426 = vst [vmem:[#allocation2 + $0x9c] sm:$0x1] %v425_v63  ;;  %v998_v35 = vor.u32 %v996_v1, %v995_v17  ;;  %v1000_v36 = vrot.slane %v995_v17, 4  ;;  %536 = vst [vmem:[#allocation2 + $0xa4] sm:$0x1] %v535_v26  ;;  %v329_v16 = vmax.f32 %v265_v11, 0.0 }
  0xcd   :  { %6290 = vmatprep.subr.bf16.mxu1 %v11870_v0  ;;  %v9884_v3 = vld [vmem:[#allocation2 + $0x88] sm:$0xf]  ;;  %v9892_v31 = vld [vmem:[#allocation2 + $0x8c] ss:$0 sps:$4 sm:$0x11]   ;;  %v1518_v42 = vsel %vm9258_vm8, %v990_v62, %v1517_v2  ;;  %v330_v48 = vmax.f32 %v266_v29, 0.0  ;;  %v2865_v59 = vsel %vm2850_vm10, %v2863_v34, %v2864_v8 }
  0xce   :  { %v2469_v33 = vsel %vm2337_vm5, %v2464_v23, %v2468_v7  ;;  %v9890_v46 = vcombine.low %v1686_v38, %v9884_v3  ;;  %v1765_v43 = vld [vmem:[#allocation2 + $0x3c] sm:$0xe]  ;;  %v999_v32 = vsel %vm9264_vm9, %v991_v25, %v998_v35  ;;  %1519 = vst [vmem:[#allocation2 + $0x90] sm:$0xf] %v1518_v42  ;;  %v1522_v47 = vsel %vm9025_vm3, %v1000_v36, %v1521_v4  ;;  %v1802_v5 = vld [vmem:[#allocation2 + $0x48] sm:$0xf] }
  0xcf   :  { %5757 = vmatmul.mubr.bf16.gmra.mxu1 %v2862_v22  ;;  %5523 = vmatprep.mubr.bf16.mxu0 %v2469_v33  ;;  %v1803_v49 = vld [vmem:[#allocation2 + $0x4c] sm:$0xf]  ;;  %v2478_v27 = vshll.u32 %v9892_v31, 16  ;;  %1520 = vst [vmem:[#allocation2 + $0x94] sm:$0xf] %v999_v32  ;;  %v7900_v53 = vpack.c.bf16 %v329_v16, %v329_v16  ;;  %v7901_v55 = vpack.c.bf16 %v330_v48, %v330_v48 }
  0xd0   :  { %5764 = vmatprep.mubr.bf16.mxu1 %v9862_v24  ;;  %5524 = vmatmul.mubr.bf16.gmra.mxu0 %v9855_v19  ;;  %v2471_v22 = vshrl.u32 %v9890_v46, 16  ;;  %v2473_v51 = vshll.u32 %v9890_v46, 16  ;;  %1523 = vst [vmem:[#allocation2 + $0x98] sm:$0x1] %v1522_v47  ;;  %v8304_v19 = vld [vmem:[%s11865_s0 + $0x68] sm:$0xff]   ;;  %v9913_v1 = vcombine.low %v1802_v5, %v1803_v49 }
  0xd1   :  { %6291 = vmatpush1.bf16.msra.mxu1 %v8656_v18  ;;  %v2480_v45 = vrot.slane %v2478_v27, 1  ;;  %v8879_v2 = vld [vmem:[#allocation2 + $0x40] sm:$0xf]  ;;  %v427_v7 = vld [vmem:[#allocation2 + $0xa8] sm:$0x1]  ;;  %v1002_v15 = vshrl.u32 %v7900_v53, 16  ;;  %v8058_v23 = vunpack.c.l.bf16 %v8304_v19  ;;  %v8059_v25 = vunpack.c.h.bf16 %v8304_v19 }
  0xd2   :  { %6292 = vmatprep.subr.bf16.mxu1 %v11870_v0  ;;  %v2475_v60 = vrot.slane %v2473_v51, 1  ;;  %v7521_v14 = vcombine.low %v1765_v43, %v8879_v2  ;;  %v1005_v57 = vshll.u32 %v7900_v53, 16  ;;  %v1010_v18 = vshrl.u32 %v7901_v55, 16  ;;  %v537_v34 = vld [vmem:[#allocation2 + $0xb0] sm:$0x1]  ;;  %v8680_v19 = vld [vmem:[%s11863_s4 + $0x1f8] sm:$0xff]  }
  0xd3   :  { %v1013_v17 = vshll.u32 %v7901_v55, 16  ;;  %v1524_v20 = vld [vmem:[#allocation2 + $0x9c] sm:$0xf]  ;;  %v8880_v58 = vld [vmem:[#allocation2 + $0x44] ss:$0 sps:$4 sm:$0x11]   ;;  %v197_v29 = vmul.f32 %v8058_v23, %v9179_v37  ;;  %v198_v51 = vmul.f32 %v8059_v25, %v9179_v37 }
  0xd4   :  { %v2476_v8 = vor.u32 %v2475_v60, %v2471_v22  ;;  %v2867_v63 = vrot.slane %v8880_v58, 1  ;;  %v1004_v38 = vrot.slane %v1002_v15, 7  ;;  %v1012_v62 = vrot.slane %v1010_v18, 7  ;;  %v1528_v36 = vld [vmem:[#allocation2 + $0xa4] sm:$0x1] }
  0xd5   :  { %6293 = vmatpush1.bf16.msra.mxu1 %v8669_v30  ;;  %v428_v4 = vsel %vm9025_vm3, 0, %v427_v7  ;;  %v1688_v35 = vld [vmem:[#allocation2 + $0x90] sm:$0xf]  ;;  %v2866_v11 = vrot.slane %v7521_v14, 1  ;;  %v538_v33 = vsel %vm9032_vm4, 0, %v537_v34  ;;  %v267_v27 = vadd.f32 %v9207_v56, %v197_v29 }
  0xd6   :  { %6294 = vmatprep.subr.bf16.mxu1 %v11870_v0  ;;  %v2481_v26 = vsel %vm2337_vm5, %v2476_v8, %v2480_v45  ;;  %429 = vst [vmem:[#allocation2 + $0xa8] sm:$0x1] %v428_v4  ;;  %v1804_v42 = vld [vmem:[#allocation2 + $0x54] sm:$0xf]  ;;  %v1766_v43 = vld [vmem:[#allocation2 + $0x48] sm:$0xe]  ;;  %v1007_v47 = vor.u32 %v1005_v57, %v1004_v38  ;;  %v1015_v48 = vor.u32 %v1013_v17, %v1012_v62 }
  0xd7   :  { %5765 = vmatmul.mubr.bf16.gmra.mxu1 %v2865_v59  ;;  %5531 = vmatprep.mubr.bf16.mxu0 %v2481_v26  ;;  %v9922_v32 = vld [vmem:[#allocation2 + $0x94] sm:$0xf]  ;;  %v1008_v16 = vrot.slane %v1004_v38, 4  ;;  %v1017_v5 = vrot.slane %v1012_v62, 4  ;;  %539 = vst [vmem:[#allocation2 + $0xb0] sm:$0x1] %v538_v33  ;;  %v268_v14 = vadd.f32 %v9207_v56, %v198_v51  ;;  %v2868_v15 = vsel %vm2850_vm10, %v2866_v11, %v2867_v63 }
  0xd8   :  { %5772 = vmatprep.mubr.bf16.mxu1 %v9913_v1  ;;  %5532 = vmatmul.mubr.bf16.gmra.mxu0 %v9890_v46  ;;  %v7464_v49 = vcombine.low %v1688_v35, %v9922_v32  ;;  %v9927_v22 = vld [vmem:[#allocation2 + $0x98] ss:$0 sps:$4 sm:$0x11]   ;;  %v1525_v55 = vsel %vm9258_vm8, %v1007_v47, %v1524_v20  ;;  %v8305_v7 = vld [vmem:[%s11865_s0 + $0x70] sm:$0xff]   ;;  %v331_v57 = vmax.f32 %v267_v27, 0.0 }
  0xd9   :  { %v1805_v30 = vld [vmem:[#allocation2 + $0x58] sm:$0xf]  ;;  %v1016_v53 = vsel %vm9264_vm9, %v1008_v16, %v1015_v48  ;;  %v1529_v46 = vsel %vm9025_vm3, %v1017_v5, %v1528_v36  ;;  %v2490_v2 = vshll.u32 %v9927_v22, 16  ;;  %1526 = vst [vmem:[#allocation2 + $0x9c] sm:$0xf] %v1525_v55  ;;  %6295 = vmatpush2.bf16.msra.mxu1 %v8680_v19  ;;  %v332_v23 = vmax.f32 %v268_v14, 0.0 }
  0xda   :  { %v8679_v59 = vld [vmem:[%s11863_s4 + $0x238] sm:$0xff]   ;;  %v2483_v60 = vshrl.u32 %v7464_v49, 16  ;;  %v2485_v45 = vshll.u32 %v7464_v49, 16  ;;  %1527 = vst [vmem:[#allocation2 + $0xa0] sm:$0xf] %v1016_v53  ;;  %v9949_v18 = vcombine.low %v1804_v42, %v1805_v30  ;;  %6296 = vmatprep.subr.bf16.mxu1 %v11870_v0  ;;  %v7902_v38 = vpack.c.bf16 %v331_v57, %v331_v57 }
  0xdb   :  { %1530 = vst [vmem:[#allocation2 + $0xa4] sm:$0x1] %v1529_v46  ;;  %8394 = vmatprep.subr.bf16.mxu0 %v8679_v59  ;;  %v8881_v17 = vld [vmem:[#allocation2 + $0x4c] sm:$0xf]  ;;  %v430_v8 = vld [vmem:[#allocation2 + $0xb4] sm:$0x1]  ;;  %v8062_v26 = vunpack.c.l.bf16 %v8305_v7  ;;  %v7903_v63 = vpack.c.bf16 %v332_v23, %v332_v23  ;;  %v8063_v36 = vunpack.c.h.bf16 %v8305_v7 }
  0xdc   :  { %v7522_v34 = vcombine.low %v1766_v43, %v8881_v17  ;;  %v2487_v20 = vrot.slane %v2485_v45, 1  ;;  %v2492_v58 = vrot.slane %v2490_v2, 1  ;;  %v8882_v25 = vld [vmem:[#allocation2 + $0x50] ss:$0 sps:$4 sm:$0x11]   ;;  %v431_v11 = vsel %vm9025_vm3, 0, %v430_v8 }
  0xdd   :  { %v2870_v4 = vrot.slane %v8882_v25, 1  ;;  %v540_v29 = vld [vmem:[#allocation2 + $0xbc] sm:$0x1]  ;;  %v1806_v33 = vld [vmem:[#allocation2 + $0x60] sm:$0xf]  ;;  %v1019_v47 = vshrl.u32 %v7902_v38, 16  ;;  %v199_v48 = vmul.f32 %v8062_v26, %v9179_v37  ;;  %v200_v30 = vmul.f32 %v8063_v36, %v9179_v37 }
  0xde   :  { %v2869_v62 = vrot.slane %v7522_v34, 1  ;;  %v2488_v35 = vor.u32 %v2487_v20, %v2483_v60  ;;  %v1807_v42 = vld [vmem:[#allocation2 + $0x64] sm:$0xf]  ;;  %v1767_v43 = vld [vmem:[#allocation2 + $0x54] sm:$0xe]  ;;  %v1022_v16 = vshll.u32 %v7902_v38, 16 }
  0xdf   :  { %5773 = vmatmul.mubr.bf16.gmra.mxu1 %v2868_v15  ;;  %432 = vst [vmem:[#allocation2 + $0xb4] sm:$0x1] %v431_v11  ;;  %v1027_v51 = vshrl.u32 %v7903_v63, 16  ;;  %v1030_v27 = vshll.u32 %v7903_v63, 16  ;;  %v269_v46 = vadd.f32 %v9207_v56, %v199_v48  ;;  %v1021_v45 = vrot.slane %v1019_v47, 7 }
  0xe0   :  { %5780 = vmatprep.mubr.bf16.mxu1 %v9949_v18  ;;  %v2493_v5 = vsel %vm2337_vm5, %v2488_v35, %v2492_v58  ;;  %v1690_v59 = vld [vmem:[#allocation2 + $0x9c] sm:$0xf]  ;;  %v2871_v55 = vsel %vm2850_vm10, %v2869_v62, %v2870_v4  ;;  %v270_v14 = vadd.f32 %v9207_v56, %v200_v30  ;;  %v1531_v7 = vld [vmem:[#allocation2 + $0xa8] sm:$0xf]  ;;  %v541_v57 = vsel %vm9032_vm4, 0, %v540_v29  ;;  %v8689_v30 = vld [vmem:[%s11863_s4 + $0x1f0] sm:$0xff]  }
  0xe1   :  { %5539 = vmatprep.mubr.bf16.mxu0 %v2493_v5  ;;  %v9958_v53 = vld [vmem:[#allocation2 + $0xa0] sm:$0xf]  ;;  %v1029_v2 = vrot.slane %v1027_v51, 7  ;;  %v333_v15 = vmax.f32 %v269_v46, 0.0  ;;  %v9968_v17 = vcombine.low %v1806_v33, %v1807_v42  ;;  %v7523_v34 = vcombine.low %v1767_v43, %v9684_v61  ;;  %v1535_v23 = vld [vmem:[#allocation2 + $0xb0] sm:$0x1]  ;;  %6297 = vmatpush2.bf16.msra.mxu1 %v8689_v30 }
  0xe2   :  { %5540 = vmatmul.mubr.bf16.gmra.mxu0 %v7464_v49  ;;  %v7465_v19 = vcombine.low %v1690_v59, %v9958_v53  ;;  %v9963_v60 = vld [vmem:[#allocation2 + $0xa4] ss:$0 sps:$4 sm:$0x11]   ;;  %v1024_v58 = vor.u32 %v1022_v16, %v1021_v45  ;;  %542 = vst [vmem:[#allocation2 + $0xbc] sm:$0x1] %v541_v57  ;;  %v1025_v38 = vrot.slane %v1021_v45, 4  ;;  %6298 = vmatprep.subr.bf16.mxu1 %v11870_v0 }
  0xe3   :  { %v2502_v49 = vshll.u32 %v9963_v60, 16  ;;  %v1032_v62 = vor.u32 %v1030_v27, %v1029_v2  ;;  %v1034_v25 = vrot.slane %v1029_v2, 4  ;;  %v334_v4 = vmax.f32 %v270_v14, 0.0  ;;  %v439_v26 = vld [vmem:[#allocation2 + $0xd8] sm:$0x1] }
  0xe4   :  { %v2495_v8 = vshrl.u32 %v7465_v19, 16  ;;  %v2497_v20 = vshll.u32 %v7465_v19, 16  ;;  %v1532_v36 = vsel %vm9258_vm8, %v1024_v58, %v1531_v7  ;;  %v7904_v11 = vpack.c.bf16 %v333_v15, %v333_v15  ;;  %v549_v61 = vld [vmem:[#allocation2 + $0xe0] sm:$0x1]  ;;  %v1768_v29 = vld [vmem:[#allocation2 + $0x60] sm:$0xe] }
  0xe5   :  { %v2504_v63 = vrot.slane %v2502_v49, 1  ;;  %v1033_v33 = vsel %vm9264_vm9, %v1025_v38, %v1032_v62  ;;  %1533 = vst [vmem:[#allocation2 + $0xa8] sm:$0xf] %v1532_v36  ;;  %v1536_v42 = vsel %vm9025_vm3, %v1034_v25, %v1535_v23  ;;  %v7905_v43 = vpack.c.bf16 %v334_v4, %v334_v4  ;;  %v1808_v47 = vld [vmem:[#allocation2 + $0x6c] sm:$0xf]  ;;  %v8307_v23 = vld [vmem:[%s11865_s0 + $0x80] sm:$0xff]  }
  0xe6   :  { %v2499_v35 = vrot.slane %v2497_v20, 1  ;;  %v1809_v16 = vld [vmem:[#allocation2 + $0x70] sm:$0xf]  ;;  %1534 = vst [vmem:[#allocation2 + $0xac] sm:$0xf] %v1033_v33  ;;  %v1036_v5 = vshrl.u32 %v7904_v11, 16  ;;  %v7524_v58 = vcombine.low %v1768_v29, %v9732_v9  ;;  %v8070_v29 = vunpack.c.l.bf16 %v8307_v23 }
  0xe7   :  { %5781 = vmatmul.mubr.bf16.gmra.mxu1 %v2871_v55  ;;  %1537 = vst [vmem:[#allocation2 + $0xb0] sm:$0x1] %v1536_v42  ;;  %v1039_v51 = vshll.u32 %v7904_v11, 16  ;;  %v2872_v27 = vrot.slane %v7523_v34, 1  ;;  %v1044_v59 = vshrl.u32 %v7905_v43, 16  ;;  %v1047_v55 = vshll.u32 %v7905_v43, 16 }
  0xe8   :  { %5788 = vmatprep.mubr.bf16.mxu1 %v9968_v17  ;;  %v2500_v48 = vor.u32 %v2499_v35, %v2495_v8  ;;  %v8883_v46 = vld [vmem:[#allocation2 + $0x5c] ss:$0 sps:$4 sm:$0x11]   ;;  %v440_v2 = vsel %vm9025_vm3, 0, %v439_v26  ;;  %v1038_v7 = vrot.slane %v1036_v5, 7  ;;  %v550_v15 = vsel %vm9032_vm4, 0, %v549_v61 }
  0xe9   :  { %v2873_v45 = vrot.slane %v8883_v46, 1  ;;  %441 = vst [vmem:[#allocation2 + $0xd8] sm:$0x1] %v440_v2  ;;  %v442_v57 = vld [vmem:[#allocation2 + $0xe4] sm:$0x1]  ;;  %v1046_v34 = vrot.slane %v1044_v59, 7  ;;  %v9988_v49 = vcombine.low %v1808_v47, %v1809_v16  ;;  %v8071_v33 = vunpack.c.h.bf16 %v8307_v23 }
  0xea   :  { %v2505_v14 = vsel %vm2337_vm5, %v2500_v48, %v2504_v63  ;;  %v1538_v8 = vld [vmem:[#allocation2 + $0xb4] sm:$0xf]  ;;  %551 = vst [vmem:[#allocation2 + $0xe0] sm:$0x1] %v550_v15  ;;  %v552_v38 = vld [vmem:[#allocation2 + $0xec] sm:$0x1]  ;;  %v1041_v62 = vor.u32 %v1039_v51, %v1038_v7 }
  0xeb   :  { %5547 = vmatprep.mubr.bf16.mxu0 %v2505_v14  ;;  %v2874_v20 = vsel %vm2850_vm10, %v2872_v27, %v2873_v45  ;;  %v1042_v25 = vrot.slane %v1038_v7, 4  ;;  %v1542_v4 = vld [vmem:[#allocation2 + $0xbc] sm:$0x1]  ;;  %v1049_v26 = vor.u32 %v1047_v55, %v1046_v34  ;;  %v1051_v35 = vrot.slane %v1046_v34, 4  ;;  %v1810_v42 = vld [vmem:[#allocation2 + $0x78] sm:$0xf] }
  0xec   :  { %5548 = vmatmul.mubr.bf16.gmra.mxu0 %v7465_v19  ;;  %v1697_v63 = vld [vmem:[#allocation2 + $0xdc] sm:$0xf]  ;;  %v2875_v36 = vrot.slane %v7524_v58, 1  ;;  %v2876_v11 = vrot.slane %v9744_v52, 1  ;;  %v1692_v61 = vld [vmem:[#allocation2 + $0xa8] sm:$0xf]  ;;  %v1539_v9 = vsel %vm9258_vm8, %v1041_v62, %v1538_v8  ;;  %v203_v27 = vmul.f32 %v8070_v29, %v9179_v37 }
  0xed   :  { %v1769_v43 = vld [vmem:[#allocation2 + $0x6c] sm:$0xe]  ;;  %v1050_v19 = vsel %vm9264_vm9, %v1042_v25, %v1049_v26  ;;  %1540 = vst [vmem:[#allocation2 + $0xb4] sm:$0xf] %v1539_v9  ;;  %v1543_v16 = vsel %vm9025_vm3, %v1051_v35, %v1542_v4  ;;  %v443_v48 = vsel %vm9025_vm3, 0, %v442_v57  ;;  %v204_v30 = vmul.f32 %v8071_v33, %v9179_v37 }
  0xee   :  { %v9998_v47 = vld [vmem:[#allocation2 + $0xac] sm:$0xf]  ;;  %v2877_v52 = vsel %vm2850_vm10, %v2875_v36, %v2876_v11  ;;  %v10009_v51 = vld [vmem:[#allocation2 + $0xb0] ss:$0 sps:$4 sm:$0x11]   ;;  %v553_v59 = vsel %vm9032_vm4, 0, %v552_v38  ;;  %v7525_v45 = vcombine.low %v1769_v43, %v9786_v13  ;;  %v273_v34 = vadd.f32 %v9207_v56, %v203_v27 }
  0xef   :  { %5789 = vmatmul.mubr.bf16.gmra.mxu1 %v2874_v20  ;;  %v7466_v5 = vcombine.low %v1692_v61, %v9998_v47  ;;  %1541 = vst [vmem:[#allocation2 + $0xb8] sm:$0xf] %v1050_v19  ;;  %1544 = vst [vmem:[#allocation2 + $0xbc] sm:$0x1] %v1543_v16  ;;  %v1811_v55 = vld [vmem:[#allocation2 + $0x7c] sm:$0xf]  ;;  %v274_v8 = vadd.f32 %v9207_v56, %v204_v30 }
  0xf0   :  { %5796 = vmatprep.mubr.bf16.mxu1 %v9988_v49  ;;  %444 = vst [vmem:[#allocation2 + $0xe4] sm:$0x1] %v443_v48  ;;  %v1696_v46 = vld [vmem:[#allocation2 + $0xd8] sm:$0xf]  ;;  %554 = vst [vmem:[#allocation2 + $0xec] sm:$0x1] %v553_v59  ;;  %v10021_v20 = vcombine.low %v1810_v42, %v1811_v55 }
  0xf1   :  { %v2507_v2 = vshrl.u32 %v7466_v5, 16  ;;  %v2509_v14 = vshll.u32 %v7466_v5, 16  ;;  %v2514_v7 = vshll.u32 %v10009_v51, 16  ;;  %v10017_v15 = vcombine.low %v1696_v46, %v1697_v63  ;;  %v8627_v57 = vld [vmem:[#allocation2 + $0xe0] ss:$0 sps:$4 sm:$0x11]  }
  0xf2   :  { %v8308_v13 = vld [vmem:[%s11865_s0 + $0x88] sm:$0xff]   ;;  %v2538_v25 = vshll.u32 %v8627_v57, 16  ;;  %v337_v4 = vmax.f32 %v273_v34, 0.0  ;;  %v338_v26 = vmax.f32 %v274_v8, 0.0  ;;  %v2878_v11 = vrot.slane %v7525_v45, 1 }
  0xf3   :  { %v2511_v58 = vrot.slane %v2509_v14, 1  ;;  %v2516_v23 = vrot.slane %v2514_v7, 1  ;;  %v2531_v38 = vshrl.u32 %v10017_v15, 16  ;;  %v2533_v62 = vshll.u32 %v10017_v15, 16  ;;  %v445_v19 = vld [vmem:[#allocation2 + $0xf0] sm:$0x1] }
  0xf4   :  { %v1694_v63 = vld [vmem:[#allocation2 + $0xb4] sm:$0xf]  ;;  %v2879_v61 = vrot.slane %v9794_v41, 1  ;;  %v7908_v29 = vpack.c.bf16 %v337_v4, %v337_v4  ;;  %v7909_v33 = vpack.c.bf16 %v338_v26, %v338_v26  ;;  %v8074_v42 = vunpack.c.l.bf16 %v8308_v13  ;;  %v555_v59 = vld [vmem:[#allocation2 + $0xf8] sm:$0x1] }
  0xf5   :  { %v2512_v35 = vor.u32 %v2511_v58, %v2507_v2  ;;  %v2535_v36 = vrot.slane %v2533_v62, 1  ;;  %v8075_v43 = vunpack.c.h.bf16 %v8308_v13  ;;  %v2540_v30 = vrot.slane %v2538_v25, 1  ;;  %v1812_v2 = vld [vmem:[#allocation2 + $0x84] sm:$0xf]  ;;  %v1813_v8 = vld [vmem:[#allocation2 + $0x88] sm:$0xf] }
  0xf6   :  { %v10029_v9 = vld [vmem:[#allocation2 + $0xb8] sm:$0xf]  ;;  %v10036_v27 = vld [vmem:[#allocation2 + $0xbc] ss:$0 sps:$4 sm:$0x11]   ;;  %v1070_v41 = vshrl.u32 %v7908_v29, 16  ;;  %v2880_v34 = vsel %vm2850_vm10, %v2878_v11, %v2879_v61  ;;  %v205_v25 = vmul.f32 %v8074_v42, %v9179_v37 }
  0xf7   :  { %5797 = vmatmul.mubr.bf16.gmra.mxu1 %v2877_v52  ;;  %v2517_v16 = vsel %vm2337_vm5, %v2512_v35, %v2516_v23  ;;  %v10034_v48 = vcombine.low %v1694_v63, %v10029_v9  ;;  %v2536_v52 = vor.u32 %v2535_v36, %v2531_v38  ;;  %v1073_v55 = vshll.u32 %v7908_v29, 16  ;;  %v8699_v58 = vld [vmem:[%s11863_s4 + $0x1e8] sm:$0xff]   ;;  %v1552_v62 = vld [vmem:[#allocation2 + $0xe4] sm:$0xf]  ;;  %v8309_v42 = vld [vmem:[%s11865_s0 + $0x90] sm:$0xff]  }
  0xf8   :  { %5804 = vmatprep.mubr.bf16.mxu1 %v10021_v20  ;;  %5555 = vmatprep.mubr.bf16.mxu0 %v2517_v16  ;;  %v1078_v46 = vshrl.u32 %v7909_v33, 16  ;;  %v1081_v45 = vshll.u32 %v7909_v33, 16  ;;  %v2526_v57 = vshll.u32 %v10036_v27, 16  ;;  %v1072_v23 = vrot.slane %v1070_v41, 7  ;;  %v1556_v13 = vld [vmem:[#allocation2 + $0xec] sm:$0x1] }
  0xf9   :  { %5556 = vmatmul.mubr.bf16.gmra.mxu0 %v7466_v5  ;;  %v2519_v14 = vshrl.u32 %v10034_v48, 16  ;;  %v2521_v7 = vshll.u32 %v10034_v48, 16  ;;  %v206_v5 = vmul.f32 %v8075_v43, %v9179_v37  ;;  %v446_v35 = vsel %vm9025_vm3, 0, %v445_v19  ;;  %6299 = vmatpush2.bf16.msra.mxu1 %v8699_v58  ;;  %v1770_v41 = vld [vmem:[#allocation2 + $0x78] sm:$0xe] }
  0xfa   :  { %v1080_v38 = vrot.slane %v1078_v46, 7  ;;  %v2528_v26 = vrot.slane %v2526_v57, 1  ;;  %v556_v63 = vsel %vm9032_vm4, 0, %v555_v59  ;;  %v1075_v11 = vor.u32 %v1073_v55, %v1072_v23  ;;  %447 = vst [vmem:[#allocation2 + $0xf0] sm:$0x1] %v446_v35  ;;  %6300 = vmatprep.subr.bf16.mxu1 %v11870_v0 }
  0xfb   :  { %v2523_v4 = vrot.slane %v2521_v7, 1  ;;  %v1076_v61 = vrot.slane %v1072_v23, 4  ;;  %557 = vst [vmem:[#allocation2 + $0xf8] sm:$0x1] %v556_v63  ;;  %v275_v19 = vadd.f32 %v9207_v56, %v205_v25  ;;  %v276_v16 = vadd.f32 %v9207_v56, %v206_v5  ;;  %v448_v55 = vld [vmem:[#allocation2 + $0xfc] sm:$0x1] }
  0xfc   :  { %v1083_v29 = vor.u32 %v1081_v45, %v1080_v38  ;;  %v1085_v33 = vrot.slane %v1080_v38, 4  ;;  %v10059_v59 = vcombine.low %v1812_v2, %v1813_v8  ;;  %v1553_v7 = vsel %vm9258_vm8, %v1075_v11, %v1552_v62  ;;  %v558_v58 = vld [vmem:[#allocation2 + $0x104] sm:$0x1]  ;;  %v1814_v25 = vld [vmem:[#allocation2 + $0x90] sm:$0xf] }
  0xfd   :  { %v2524_v43 = vor.u32 %v2523_v4, %v2519_v14  ;;  %1554 = vst [vmem:[#allocation2 + $0xe4] sm:$0xf] %v1553_v7  ;;  %v339_v2 = vmax.f32 %v275_v19, 0.0  ;;  %v340_v8 = vmax.f32 %v276_v16, 0.0  ;;  %v7526_v38 = vcombine.low %v1770_v41, %v9848_v21  ;;  %v1815_v5 = vld [vmem:[#allocation2 + $0x94] sm:$0xf] }
  0xfe   :  { %v1084_v45 = vsel %vm9264_vm9, %v1076_v61, %v1083_v29  ;;  %v1557_v57 = vsel %vm9025_vm3, %v1085_v33, %v1556_v13  ;;  %v2882_v62 = vrot.slane %v9857_v40, 1  ;;  %v8078_v13 = vunpack.c.l.bf16 %v8309_v42  ;;  %v10083_v40 = vld [vmem:[%s11865_s0 + $0x98] sm:$0xff]   ;;  %v8900_v54 = vld [vmem:[#allocation2 + $0x88] sm:$0xf] }
  0xff   :  { %5805 = vmatmul.mubr.bf16.gmra.mxu1 %v2880_v34  ;;  %v2529_v14 = vsel %vm2337_vm5, %v2524_v43, %v2528_v26  ;;  %v2541_v34 = vsel %vm2337_vm5, %v2536_v52, %v2540_v30  ;;  %1555 = vst [vmem:[#allocation2 + $0xe8] sm:$0xf] %v1084_v45  ;;  %1558 = vst [vmem:[#allocation2 + $0xec] sm:$0x1] %v1557_v57  ;;  %v7910_v52 = vpack.c.bf16 %v339_v2, %v339_v2 }
 0x100   :  { %5812 = vmatprep.mubr.bf16.mxu1 %v10059_v59  ;;  %5563 = vmatprep.mubr.bf16.mxu0 %v2529_v14  ;;  %v7911_v30 = vpack.c.bf16 %v340_v8, %v340_v8  ;;  %v8079_v4 = vunpack.c.h.bf16 %v8309_v42  ;;  %v449_v26 = vsel %vm9025_vm3, 0, %v448_v55  ;;  %v2881_v63 = vrot.slane %v7526_v38, 1  ;;  %v1771_v42 = vld [vmem:[#allocation2 + $0x84] sm:$0xe] }
 0x101   :  { %v10051_v36 = vpop.f32.mrf.mxu0  ;;  %5564 = vmatmul.mubr.bf16.gmra.mxu0 %v10034_v48  ;;  %v207_v11 = vmul.f32 %v8078_v13, %v9179_v37  ;;  %450 = vst [vmem:[#allocation2 + $0xfc] sm:$0x1] %v449_v26  ;;  %v559_v21 = vsel %vm9032_vm4, 0, %v558_v58  ;;  %v1087_v48 = vshrl.u32 %v7910_v52, 16  ;;  %v1090_v61 = vshll.u32 %v7910_v52, 16 }
 0x102   :  { %5571 = vmatprep.mubr.bf16.mxu0 %v2541_v34  ;;  %v1095_v29 = vshrl.u32 %v7911_v30, 16  ;;  %v1098_v33 = vshll.u32 %v7911_v30, 16  ;;  %560 = vst [vmem:[#allocation2 + $0x104] sm:$0x1] %v559_v21  ;;  %v2883_v43 = vsel %vm2850_vm10, %v2881_v63, %v2882_v62  ;;  %v208_v19 = vmul.f32 %v8079_v4, %v9179_v37  ;;  %v1559_v45 = vld [vmem:[#allocation2 + $0xf0] sm:$0xf] }
 0x103   :  { %v5447_v46 = vpop.f32.mrf.mxu0  ;;  %v277_v16 = vadd.f32 %v9207_v56, %v207_v11  ;;  %v10088_v41 = vcombine.low %v1814_v25, %v1815_v5  ;;  %v1089_v55 = vrot.slane %v1087_v48, 7  ;;  %v7527_v34 = vcombine.low %v1771_v42, %v9884_v3  ;;  %v1563_v25 = vld [vmem:[#allocation2 + $0xf8] sm:$0x1]  ;;  %v8708_v11 = vld [vmem:[%s11863_s4 + $0x1e0] sm:$0xff]  }
 0x104   :  { %v1097_v46 = vrot.slane %v1095_v29, 7  ;;  %v1698_v7 = vld [vmem:[#allocation2 + $0xe4] sm:$0xf]  ;;  %v278_v14 = vadd.f32 %v9207_v56, %v208_v19  ;;  %v8082_v2 = vunpack.c.l.bf16 %v10083_v40  ;;  %v8083_v4 = vunpack.c.h.bf16 %v10083_v40  ;;  %v1817_v29 = vld [vmem:[#allocation2 + $0xa0] sm:$0xf]  ;;  %6301 = vmatpush2.bf16.msra.mxu1 %v8708_v11 }
 0x105   :  { %v10070_v23 = vpop.f32.mrf.mxu0  ;;  %v1092_v38 = vor.u32 %v1090_v61, %v1089_v55  ;;  %v1093_v62 = vrot.slane %v1089_v55, 4  ;;  %v341_v52 = vmax.f32 %v277_v16, 0.0  ;;  %v1816_v61 = vld [vmem:[#allocation2 + $0x9c] sm:$0xf]  ;;  %v451_v19 = vld [vmem:[#allocation2 + $0x108] sm:$0x1]  ;;  %6302 = vmatprep.subr.bf16.mxu1 %v11870_v0 }
 0x106   :  { %11886 = vst [vmem:[#allocation3_spill] sm:$0xff] %v10070_v23  ;;  %v10090_v57 = vld [vmem:[#allocation2 + $0xe8] sm:$0xf]  ;;  %v10097_v58 = vld [vmem:[#allocation2 + $0xec] ss:$0 sps:$4 sm:$0x11]   ;;  %v1100_v13 = vor.u32 %v1098_v33, %v1097_v46 }
 0x107   :  { %v5450_v35 = vpop.f32.mrf.mxu0  ;;  %5813 = vmatmul.mubr.bf16.gmra.mxu1 %v2883_v43  ;;  %v7469_v8 = vcombine.low %v1698_v7, %v10090_v57  ;;  %v1102_v5 = vrot.slane %v1097_v46, 4  ;;  %v342_v30 = vmax.f32 %v278_v14, 0.0  ;;  %v2550_v3 = vshll.u32 %v10097_v58, 16 }
 0x108   :  { %5820 = vmatprep.mubr.bf16.mxu1 %v10088_v41  ;;  %v1101_v63 = vsel %vm9264_vm9, %v1093_v62, %v1100_v13  ;;  %v1560_v21 = vsel %vm9258_vm8, %v1092_v38, %v1559_v45  ;;  %v7912_v48 = vpack.c.bf16 %v341_v52, %v341_v52  ;;  %v2884_v43 = vrot.slane %v7527_v34, 1  ;;  %v561_v45 = vld [vmem:[#allocation2 + $0x110] sm:$0x1]  ;;  %v1566_v11 = vld [vmem:[#allocation2 + $0xfc] sm:$0xf] }
 0x109   :  { %5572 = vmatmul.mubr.bf16.gmra.mxu0 %v10017_v15  ;;  %v2543_v26 = vshrl.u32 %v7469_v8, 16  ;;  %v2545_v35 = vshll.u32 %v7469_v8, 16  ;;  %1562 = vst [vmem:[#allocation2 + $0xf4] sm:$0xf] %v1101_v63  ;;  %v1564_v40 = vsel %vm9025_vm3, %v1102_v5, %v1563_v25  ;;  %v7913_v15 = vpack.c.bf16 %v342_v30, %v342_v30  ;;  %1561 = vst [vmem:[#allocation2 + $0xf0] sm:$0xf] %v1560_v21 }
 0x10a   :  { %v2552_v42 = vrot.slane %v2550_v3, 1  ;;  %1565 = vst [vmem:[#allocation2 + $0xf8] sm:$0x1] %v1564_v40  ;;  %v1104_v16 = vshrl.u32 %v7912_v48, 16  ;;  %v1107_v55 = vshll.u32 %v7912_v48, 16  ;;  %v2885_v62 = vrot.slane %v9892_v31, 1 }
 0x10b   :  { %v2547_v33 = vrot.slane %v2545_v35, 1  ;;  %v1112_v46 = vshrl.u32 %v7913_v15, 16  ;;  %v1115_v7 = vshll.u32 %v7913_v15, 16  ;;  %v209_v13 = vmul.f32 %v8082_v2, %v9179_v37 }
 0x10c   :  { %v10111_v14 = vpop.f32.mrf.mxu1  ;;  %v10116_v25 = vcombine.low %v1816_v61, %v1817_v29  ;;  %v1106_v5 = vrot.slane %v1104_v16, 7  ;;  %v210_v52 = vmul.f32 %v8083_v4, %v9179_v37  ;;  %v452_v30 = vsel %vm9025_vm3, 0, %v451_v19  ;;  %v1772_v19 = vld [vmem:[#allocation2 + $0x90] sm:$0xe]  ;;  %v8311_v16 = vld [vmem:[%s11865_s0 + $0xa0] sm:$0xff]  }
 0x10d   :  { %11887 = vst [vmem:[#allocation4_spill] sm:$0xff] %v10111_v14  ;;  %v2548_v38 = vor.u32 %v2547_v33, %v2543_v26  ;;  %v1114_v34 = vrot.slane %v1112_v46, 7  ;;  %v1570_v26 = vld [vmem:[#allocation2 + $0x104] sm:$0x1]  ;;  %v2886_v31 = vsel %vm2850_vm10, %v2884_v43, %v2885_v62  ;;  %v279_v2 = vadd.f32 %v9207_v56, %v209_v13  ;;  %453 = vst [vmem:[#allocation2 + $0x108] sm:$0x1] %v452_v30 }
 0x10e   :  { %v5639_v35 = vpop.f32.mrf.mxu1  ;;  %v562_v21 = vsel %vm9032_vm4, 0, %v561_v45  ;;  %v1109_v4 = vor.u32 %v1107_v55, %v1106_v5  ;;  %v1110_v40 = vrot.slane %v1106_v5, 4  ;;  %v2888_v30 = vrot.slane %v9927_v22, 1  ;;  %v1818_v22 = vld [vmem:[#allocation2 + $0xa8] sm:$0xf] }
 0x10f   :  { %v2553_v63 = vsel %vm2337_vm5, %v2548_v38, %v2552_v42  ;;  %v1117_v48 = vor.u32 %v1115_v7, %v1114_v34  ;;  %v1119_v15 = vrot.slane %v1114_v34, 4  ;;  %5821 = vmatmul.mubr.bf16.gmra.mxu1 %v2886_v31  ;;  %563 = vst [vmem:[#allocation2 + $0x110] sm:$0x1] %v562_v21  ;;  %v280_v42 = vadd.f32 %v9207_v56, %v210_v52 }
 0x110   :  { %v10121_v3 = vpop.f32.mrf.mxu0  ;;  %5579 = vmatprep.mubr.bf16.mxu0 %v2553_v63  ;;  %v10128_v61 = vpop.f32.mrf.mxu1  ;;  %v10130_v33 = vld [vmem:[#allocation2 + $0xf4] sm:$0xf]  ;;  %v343_v43 = vmax.f32 %v279_v2, 0.0  ;;  %5828 = vmatprep.mubr.bf16.mxu1 %v10116_v25  ;;  %v1700_v55 = vld [vmem:[#allocation2 + $0xf0] sm:$0xf]  ;;  %v1567_v7 = vsel %vm9258_vm8, %v1109_v4, %v1566_v11  ;;  %v7528_v52 = vcombine.low %v1772_v19, %v9922_v32  ;;  %v8086_v35 = vunpack.c.l.bf16 %v8311_v16 }
 0x111   :  { %11888 = vst [vmem:[#allocation5_spill] sm:$0xff] %v10121_v3  ;;  %11889 = vst [vmem:[#allocation6_spill] sm:$0xff] %v10128_v61  ;;  %5580 = vmatmul.mubr.bf16.gmra.mxu0 %v7469_v8  ;;  %v1118_v46 = vsel %vm9264_vm9, %v1110_v40, %v1117_v48  ;;  %v1571_v8 = vsel %vm9025_vm3, %v1119_v15, %v1570_v26  ;;  %v10146_v62 = vcombine.low %v1700_v55, %v10130_v33  ;;  %v10148_v13 = vld [vmem:[#allocation2 + $0xf8] ss:$0 sps:$4 sm:$0x11]  }
 0x112   :  { %v5455_v29 = vpop.f32.mrf.mxu0  ;;  %v5642_v45 = vpop.f32.mrf.mxu1  ;;  %1568 = vst [vmem:[#allocation2 + $0xfc] sm:$0xf] %v1567_v7  ;;  %1569 = vst [vmem:[#allocation2 + $0x100] sm:$0xf] %v1118_v46  ;;  %v344_v5 = vmax.f32 %v280_v42, 0.0  ;;  %v7914_v34 = vpack.c.bf16 %v343_v43, %v343_v43  ;;  %v8087_v63 = vunpack.c.h.bf16 %v8311_v16  ;;  %v2562_v4 = vshll.u32 %v10148_v13, 16 }
 0x113   :  { %1572 = vst [vmem:[#allocation2 + $0x104] sm:$0x1] %v1571_v8  ;;  %v454_v11 = vld [vmem:[#allocation2 + $0x114] sm:$0x1]  ;;  %v2555_v2 = vshrl.u32 %v10146_v62, 16  ;;  %v2557_v21 = vshll.u32 %v10146_v62, 16  ;;  %v211_v32 = vmul.f32 %v8086_v35, %v9179_v37 }
 0x114   :  { %v10143_v38 = vpop.f32.mrf.mxu0  ;;  %v10152_v26 = vpop.f32.mrf.mxu1  ;;  %v7915_v40 = vpack.c.bf16 %v344_v5, %v344_v5  ;;  %v564_v48 = vld [vmem:[#allocation2 + $0x11c] sm:$0x1]  ;;  %v1121_v15 = vshrl.u32 %v7914_v34, 16  ;;  %v1124_v29 = vshll.u32 %v7914_v34, 16  ;;  %v2887_v42 = vrot.slane %v7528_v52, 1 }
 0x115   :  { %11890 = vst [vmem:[#allocation7_spill] sm:$0xff] %v10143_v38  ;;  %11891 = vst [vmem:[#allocation8_spill] sm:$0xff] %v10152_v26  ;;  %v2559_v16 = vrot.slane %v2557_v21, 1  ;;  %v2564_v55 = vrot.slane %v2562_v4, 1  ;;  %v1819_v8 = vld [vmem:[#allocation2 + $0xac] sm:$0xf]  ;;  %v212_v5 = vmul.f32 %v8087_v63, %v9179_v37  ;;  %v281_v0 = vadd.f32 %v9207_v56, %v211_v32 }
 0x116   :  { %v5458_v31 = vpop.f32.mrf.mxu0  ;;  %v5647_v43 = vpop.f32.mrf.mxu1  ;;  %v1129_v46 = vshrl.u32 %v7915_v40, 16  ;;  %v1132_v7 = vshll.u32 %v7915_v40, 16  ;;  %v1123_v45 = vrot.slane %v1121_v15, 7  ;;  %v8718_v35 = vld [vmem:[%s11863_s4 + $0x1d8] sm:$0xff]   ;;  %v1573_v4 = vld [vmem:[#allocation2 + $0x108] sm:$0xf] }
 0x117   :  { %v2889_v31 = vsel %vm2850_vm10, %v2887_v42, %v2888_v30  ;;  %v2560_v43 = vor.u32 %v2559_v16, %v2555_v2  ;;  %v455_v40 = vsel %vm9025_vm3, 0, %v454_v11  ;;  %v565_v30 = vsel %vm9032_vm4, 0, %v564_v48  ;;  %6303 = vmatpush2.bf16.msra.mxu1 %v8718_v35  ;;  %v1577_v26 = vld [vmem:[#allocation2 + $0x110] sm:$0x1]  ;;  %v1773_v35 = vld [vmem:[#allocation2 + $0x9c] sm:$0xe] }
 0x118   :  { %v10163_v34 = vpop.f32.mrf.mxu1  ;;  %v1131_v21 = vrot.slane %v1129_v46, 7  ;;  %5829 = vmatmul.mubr.bf16.gmra.mxu1 %v2889_v31  ;;  %v1126_v42 = vor.u32 %v1124_v29, %v1123_v45  ;;  %v282_v32 = vadd.f32 %v9207_v56, %v212_v5  ;;  %456 = vst [vmem:[#allocation2 + $0x114] sm:$0x1] %v455_v40  ;;  %566 = vst [vmem:[#allocation2 + $0x11c] sm:$0x1] %v565_v30  ;;  %v1127_v48 = vrot.slane %v1123_v45, 4 }
 0x119   :  { %v10158_v19 = vpop.f32.mrf.mxu0  ;;  %11893 = vst [vmem:[#allocation10_spill] sm:$0xff] %v10163_v34  ;;  %v1702_v63 = vld [vmem:[#allocation2 + $0xfc] sm:$0xf]  ;;  %v10172_v15 = vld [vmem:[#allocation2 + $0x100] sm:$0xf]  ;;  %v2565_v46 = vsel %vm2337_vm5, %v2560_v43, %v2564_v55  ;;  %v11895_v29 = vmov 0  }
 0x11a   :  { %11892 = vst [vmem:[#allocation9_spill] sm:$0xff] %v10158_v19  ;;  %v5650_v2 = vpop.f32.mrf.mxu1  ;;  %v7471_v11 = vcombine.low %v1702_v63, %v10172_v15  ;;  %v10181_v31 = vld [vmem:[#allocation2 + $0x104] ss:$0 sps:$4 sm:$0x11]   ;;  %v1134_v34 = vor.u32 %v1132_v7, %v1131_v21  ;;  %6304 = vmatprep.subr.bf16.mxu1 %v11895_v29  ;;  %5587 = vmatprep.mubr.bf16.mxu0 %v2565_v46  ;;  %v1136_v5 = vrot.slane %v1131_v21, 4  ;;  %v346_v40 = vmax.f32 %v282_v32, 0.0 }
 0x11b   :  { %v5463_v52 = vpop.f32.mrf.mxu0  ;;  %5588 = vmatmul.mubr.bf16.gmra.mxu0 %v10146_v62  ;;  %v2574_v7 = vshll.u32 %v10181_v31, 16  ;;  %v8312_v63 = vld [vmem:[%s11865_s0 + $0xa8] sm:$0xff]   ;;  %v7529_v32 = vcombine.low %v1773_v35, %v9958_v53  ;;  %v457_v2 = vld [vmem:[#allocation2 + $0x120] sm:$0x1]  ;;  %v1775_v38 = vld [vmem:[#allocation2 + $0xb4] sm:$0xe] }
 0x11c   :  { %v10175_v52 = vcombine.low %v1818_v22, %v1819_v8  ;;  %v1574_v22 = vsel %vm9258_vm8, %v1126_v42, %v1573_v4  ;;  %v345_v8 = vmax.f32 %v281_v0, 0.0  ;;  %v2567_v43 = vshrl.u32 %v7471_v11, 16 }
 0x11d   :  { %v10177_v16 = vpop.f32.mrf.mxu0  ;;  %v2569_v30 = vshll.u32 %v7471_v11, 16  ;;  %v1135_v45 = vsel %vm9264_vm9, %v1127_v48, %v1134_v34  ;;  %1575 = vst [vmem:[#allocation2 + $0x108] sm:$0xf] %v1574_v22  ;;  %v1578_v21 = vsel %vm9025_vm3, %v1136_v5, %v1577_v26  ;;  %v7917_v4 = vpack.c.bf16 %v346_v40, %v346_v40  ;;  %v1820_v40 = vld [vmem:[#allocation2 + $0xb4] sm:$0xf] }
 0x11e   :  { %11894 = vst [vmem:[#allocation11_spill] sm:$0xff] %v10177_v16  ;;  %5836 = vmatprep.mubr.bf16.mxu1 %v10175_v52  ;;  %1576 = vst [vmem:[#allocation2 + $0x10c] sm:$0xf] %v1135_v45  ;;  %v7916_v0 = vpack.c.bf16 %v345_v8, %v345_v8  ;;  %v2576_v62 = vrot.slane %v2574_v7, 1  ;;  %v567_v45 = vld [vmem:[#allocation2 + $0x128] sm:$0x1]  ;;  %v8090_v8 = vunpack.c.l.bf16 %v8312_v63  ;;  %v8091_v7 = vunpack.c.h.bf16 %v8312_v63 }
 0x11f   :  { %v5466_v55 = vpop.f32.mrf.mxu0  ;;  %v2571_v42 = vrot.slane %v2569_v30, 1  ;;  %1579 = vst [vmem:[#allocation2 + $0x110] sm:$0x1] %v1578_v21  ;;  %v1146_v22 = vshrl.u32 %v7917_v4, 16  ;;  %v2890_v5 = vrot.slane %v7529_v32, 1  ;;  %v2891_v30 = vrot.slane %v9963_v60, 1 }
 0x120   :  { %v1138_v34 = vshrl.u32 %v7916_v0, 16  ;;  %v1141_v48 = vshll.u32 %v7916_v0, 16  ;;  %v1149_v55 = vshll.u32 %v7917_v4, 16  ;;  %v1821_v21 = vld [vmem:[#allocation2 + $0xb8] sm:$0xf]  ;;  %v213_v0 = vmul.f32 %v8090_v8, %v9179_v37 }
 0x121   :  { %v10197_v46 = vpop.f32.mrf.mxu1  ;;  %v2572_v26 = vor.u32 %v2571_v42, %v2567_v43  ;;  %v1148_v16 = vrot.slane %v1146_v22, 7  ;;  %v1580_v35 = vld [vmem:[#allocation2 + $0x114] sm:$0xf]  ;;  %v458_v4 = vsel %vm9025_vm3, 0, %v457_v2  ;;  %v568_v43 = vsel %vm9032_vm4, 0, %v567_v45 }
 0x122   :  { %11896 = vst [vmem:[#allocation12_spill] sm:$0xff] %v10197_v46  ;;  %v1140_v14 = vrot.slane %v1138_v34, 7  ;;  %v1584_v46 = vld [vmem:[#allocation2 + $0x11c] sm:$0x1]  ;;  %459 = vst [vmem:[#allocation2 + $0x120] sm:$0x1] %v458_v4  ;;  %v2892_v22 = vsel %vm2850_vm10, %v2890_v5, %v2891_v30  ;;  %v214_v2 = vmul.f32 %v8091_v7, %v9179_v37  ;;  %v10213_v45 = vcombine.low %v1820_v40, %v1821_v21 }
 0x123   :  { %v5655_v61 = vpop.f32.mrf.mxu1  ;;  %v2577_v53 = vsel %vm2337_vm5, %v2572_v26, %v2576_v62  ;;  %v1151_v63 = vor.u32 %v1149_v55, %v1148_v16  ;;  %v1153_v34 = vrot.slane %v1148_v16, 4  ;;  %569 = vst [vmem:[#allocation2 + $0x128] sm:$0x1] %v568_v43  ;;  %v283_v26 = vadd.f32 %v9207_v56, %v213_v0  ;;  %v1774_v8 = vld [vmem:[#allocation2 + $0xa8] sm:$0xe]  ;;  %5837 = vmatmul.mubr.bf16.gmra.mxu1 %v2892_v22  ;;  %v8313_v30 = vld [vmem:[%s11865_s0 + $0xb0] sm:$0xff]  }
 0x124   :  { %5595 = vmatprep.mubr.bf16.mxu0 %v2577_v53  ;;  %v1704_v61 = vld [vmem:[#allocation2 + $0x108] sm:$0xf]  ;;  %v1143_v32 = vor.u32 %v1141_v48, %v1140_v14  ;;  %v1144_v60 = vrot.slane %v1140_v14, 4  ;;  %v284_v5 = vadd.f32 %v9207_v56, %v214_v2  ;;  %5844 = vmatprep.mubr.bf16.mxu1 %v10213_v45  ;;  %v8727_v7 = vld [vmem:[%s11863_s4 + $0x1d0] sm:$0xff]   ;;  %v7530_v43 = vcombine.low %v1774_v8, %v9998_v47 }
 0x125   :  { %v10206_v42 = vpop.f32.mrf.mxu1  ;;  %5596 = vmatmul.mubr.bf16.gmra.mxu0 %v7471_v11  ;;  %v10208_v62 = vld [vmem:[#allocation2 + $0x10c] sm:$0xf]  ;;  %v1585_v55 = vsel %vm9025_vm3, %v1153_v34, %v1584_v46  ;;  %v347_v40 = vmax.f32 %v283_v26, 0.0  ;;  %6305 = vmatpush2.bf16.msra.mxu1 %v8727_v7  ;;  %v8094_v34 = vunpack.c.l.bf16 %v8313_v30 }
 0x126   :  { %11897 = vst [vmem:[#allocation13_spill] sm:$0xff] %v10206_v42  ;;  %v7472_v48 = vcombine.low %v1704_v61, %v10208_v62  ;;  %v10216_v14 = vld [vmem:[#allocation2 + $0x110] ss:$0 sps:$4 sm:$0x11]   ;;  %v1152_v16 = vsel %vm9264_vm9, %v1144_v60, %v1151_v63  ;;  %v1581_v11 = vsel %vm9258_vm8, %v1143_v32, %v1580_v35  ;;  %1586 = vst [vmem:[#allocation2 + $0x11c] sm:$0x1] %v1585_v55  ;;  %6306 = vmatprep.subr.bf16.mxu1 %v11895_v29 }
 0x127   :  { %v5658_v53 = vpop.f32.mrf.mxu1  ;;  %1582 = vst [vmem:[#allocation2 + $0x114] sm:$0xf] %v1581_v11  ;;  %1583 = vst [vmem:[#allocation2 + $0x118] sm:$0xf] %v1152_v16  ;;  %v2586_v46 = vshll.u32 %v10216_v14, 16  ;;  %v348_v0 = vmax.f32 %v284_v5, 0.0  ;;  %v7918_v4 = vpack.c.bf16 %v347_v40, %v347_v40  ;;  %v8095_v16 = vunpack.c.h.bf16 %v8313_v30 }
 0x128   :  { %v2579_v21 = vshrl.u32 %v7472_v48, 16  ;;  %v2581_v35 = vshll.u32 %v7472_v48, 16  ;;  %v460_v61 = vld [vmem:[#allocation2 + $0x12c] sm:$0x1]  ;;  %v2894_v63 = vrot.slane %v10009_v51, 1  ;;  %v8306_v11 = vld [vmem:[%s11865_s0 + $0x78] sm:$0xff]   ;;  %v215_v55 = vmul.f32 %v8094_v34, %v9179_v37 }
 0x129   :  { %v2588_v60 = vrot.slane %v2586_v46, 1  ;;  %v7919_v2 = vpack.c.bf16 %v348_v0, %v348_v0  ;;  %v1155_v26 = vshrl.u32 %v7918_v4, 16  ;;  %v1158_v53 = vshll.u32 %v7918_v4, 16  ;;  %v570_v5 = vld [vmem:[#allocation2 + $0x134] sm:$0x1] }
 0x12a   :  { %v2583_v32 = vrot.slane %v2581_v35, 1  ;;  %v2893_v8 = vrot.slane %v7530_v43, 1  ;;  %v461_v51 = vsel %vm9025_vm3, 0, %v460_v61  ;;  %v1587_v4 = vld [vmem:[#allocation2 + $0x120] sm:$0xf]  ;;  %v216_v30 = vmul.f32 %v8095_v16, %v9179_v37 }
 0x12b   :  { %v10235_v22 = vpop.f32.mrf.mxu0  ;;  %v1157_v35 = vrot.slane %v1155_v26, 7  ;;  %v1163_v46 = vshrl.u32 %v7919_v2, 16  ;;  %v1166_v0 = vshll.u32 %v7919_v2, 16  ;;  %462 = vst [vmem:[#allocation2 + $0x12c] sm:$0x1] %v461_v51  ;;  %v285_v61 = vadd.f32 %v9207_v56, %v215_v55 }
 0x12c   :  { %11898 = vst [vmem:[#allocation14_spill] sm:$0xff] %v10235_v22  ;;  %v2584_v47 = vor.u32 %v2583_v32, %v2579_v21  ;;  %v2895_v32 = vsel %vm2850_vm10, %v2893_v8, %v2894_v63  ;;  %v8066_v34 = vunpack.c.l.bf16 %v8306_v11  ;;  %v571_v63 = vsel %vm9032_vm4, 0, %v570_v5 }
 0x12d   :  { %v10244_v40 = vpop.f32.mrf.mxu1  ;;  %v5471_v7 = vpop.f32.mrf.mxu0  ;;  %v10255_v26 = vld [vmem:[#allocation2 + $0x11c] ss:$0 sps:$4 sm:$0x11]   ;;  %v1160_v16 = vor.u32 %v1158_v53, %v1157_v35  ;;  %v1161_v51 = vrot.slane %v1157_v35, 4  ;;  %5845 = vmatmul.mubr.bf16.gmra.mxu1 %v2895_v32  ;;  %v8067_v8 = vunpack.c.h.bf16 %v8306_v11  ;;  %v1591_v53 = vld [vmem:[#allocation2 + $0x128] sm:$0x1] }
 0x12e   :  { %11899 = vst [vmem:[#allocation15_spill] sm:$0xff] %v10244_v40  ;;  %v2589_v42 = vsel %vm2337_vm5, %v2584_v47, %v2588_v60  ;;  %v1706_v21 = vld [vmem:[#allocation2 + $0x114] sm:$0xf]  ;;  %v10248_v43 = vld [vmem:[#allocation2 + $0x118] sm:$0xf]  ;;  %v1165_v7 = vrot.slane %v1163_v46, 7  ;;  %v286_v60 = vadd.f32 %v9207_v56, %v216_v30 }
 0x12f   :  { %v5663_v22 = vpop.f32.mrf.mxu1  ;;  %v10252_v40 = vpop.f32.mrf.mxu0  ;;  %5603 = vmatprep.mubr.bf16.mxu0 %v2589_v42  ;;  %v7473_v2 = vcombine.low %v1706_v21, %v10248_v43  ;;  %v349_v47 = vmax.f32 %v285_v61, 0.0  ;;  %v2598_v21 = vshll.u32 %v10255_v26, 16  ;;  %572 = vst [vmem:[#allocation2 + $0x134] sm:$0x1] %v571_v63  ;;  %v433_v32 = vld [vmem:[#allocation2 + $0xc0] sm:$0x1] }
 0x130   :  { %11900 = vst [vmem:[#allocation16_spill] sm:$0xff] %v10252_v40  ;;  %5604 = vmatmul.mubr.bf16.gmra.mxu0 %v7472_v48  ;;  %v1168_v19 = vor.u32 %v1166_v0, %v1165_v7  ;;  %v1170_v35 = vrot.slane %v1165_v7, 4  ;;  %v1588_v48 = vsel %vm9258_vm8, %v1160_v16, %v1587_v4  ;;  %v350_v46 = vmax.f32 %v286_v60, 0.0 }
 0x131   :  { %v10260_v22 = vpop.f32.mrf.mxu1  ;;  %v5474_v55 = vpop.f32.mrf.mxu0  ;;  %v2591_v42 = vshrl.u32 %v7473_v2, 16  ;;  %v2593_v40 = vshll.u32 %v7473_v2, 16  ;;  %v7920_v30 = vpack.c.bf16 %v349_v47, %v349_v47  ;;  %v2600_v11 = vrot.slane %v2598_v21, 1  ;;  %1589 = vst [vmem:[#allocation2 + $0x120] sm:$0xf] %v1588_v48 }
 0x132   :  { %11901 = vst [vmem:[#allocation17_spill] sm:$0xff] %v10260_v22  ;;  %v1169_v55 = vsel %vm9264_vm9, %v1161_v51, %v1168_v19  ;;  %v201_v22 = vmul.f32 %v8066_v34, %v9179_v37  ;;  %v1592_v0 = vsel %vm9025_vm3, %v1170_v35, %v1591_v53  ;;  %v7921_v7 = vpack.c.bf16 %v350_v46, %v350_v46  ;;  %v1594_v35 = vld [vmem:[#allocation2 + $0x12c] sm:$0xf] }
 0x133   :  { %v5666_v61 = vpop.f32.mrf.mxu1  ;;  %v2595_v5 = vrot.slane %v2593_v40, 1  ;;  %1590 = vst [vmem:[#allocation2 + $0x124] sm:$0xf] %v1169_v55  ;;  %v1172_v63 = vshrl.u32 %v7920_v30, 16  ;;  %v1175_v4 = vshll.u32 %v7920_v30, 16  ;;  %v202_v60 = vmul.f32 %v8067_v8, %v9179_v37  ;;  %v8737_v8 = vld [vmem:[%s11863_s4 + $0x1c8] sm:$0xff]  }
 0x134   :  { %1593 = vst [vmem:[#allocation2 + $0x128] sm:$0x1] %v1592_v0  ;;  %v271_v40 = vadd.f32 %v9207_v56, %v201_v22  ;;  %v434_v19 = vsel %vm9025_vm3, 0, %v433_v32  ;;  %v1180_v47 = vshrl.u32 %v7921_v7, 16  ;;  %v1183_v34 = vshll.u32 %v7921_v7, 16  ;;  %6307 = vmatpush2.bf16.msra.mxu1 %v8737_v8 }
 0x135   :  { %v2596_v16 = vor.u32 %v2595_v5, %v2591_v42  ;;  %v1174_v51 = vrot.slane %v1172_v63, 7  ;;  %435 = vst [vmem:[#allocation2 + $0xc0] sm:$0x1] %v434_v19  ;;  %v7531_v21 = vcombine.low %v1775_v38, %v10029_v9  ;;  %v272_v48 = vadd.f32 %v9207_v56, %v202_v60  ;;  %6308 = vmatprep.subr.bf16.mxu1 %v11895_v29 }
 0x136   :  { %v335_v42 = vmax.f32 %v271_v40, 0.0  ;;  %v2897_v46 = vrot.slane %v10036_v27, 1  ;;  %v1182_v32 = vrot.slane %v1180_v47, 7  ;;  %v1598_v9 = vld [vmem:[#allocation2 + $0x134] sm:$0x1] }
 0x137   :  { %v2601_v53 = vsel %vm2337_vm5, %v2596_v16, %v2600_v11  ;;  %v1177_v22 = vor.u32 %v1175_v4, %v1174_v51  ;;  %v1178_v30 = vrot.slane %v1174_v51, 4  ;;  %v2896_v61 = vrot.slane %v7531_v21, 1 }
 0x138   :  { %5611 = vmatprep.mubr.bf16.mxu0 %v2601_v53  ;;  %v336_v38 = vmax.f32 %v272_v48, 0.0  ;;  %v7906_v11 = vpack.c.bf16 %v335_v42, %v335_v42  ;;  %v1708_v55 = vld [vmem:[#allocation2 + $0x120] sm:$0xf]  ;;  %v1185_v0 = vor.u32 %v1183_v34, %v1182_v32  ;;  %v1187_v7 = vrot.slane %v1182_v32, 4 }
 0x139   :  { %5612 = vmatmul.mubr.bf16.gmra.mxu0 %v7473_v2  ;;  %v1595_v27 = vsel %vm9258_vm8, %v1177_v22, %v1594_v35  ;;  %v10286_v63 = vsel %vm2850_vm10, %v2896_v61, %v2897_v46 }
 0x13a   :  { %v10281_v5 = vpop.f32.mrf.mxu0  ;;  %v10289_v16 = vld [vmem:[#allocation2 + $0x124] sm:$0xf]  ;;  %1596 = vst [vmem:[#allocation2 + $0x12c] sm:$0xf] %v1595_v27  ;;  %v7907_v2 = vpack.c.bf16 %v336_v38, %v336_v38  ;;  %v1053_v60 = vshrl.u32 %v7906_v11, 16  ;;  %v1056_v40 = vshll.u32 %v7906_v11, 16  ;;  %v1186_v47 = vsel %vm9264_vm9, %v1178_v30, %v1185_v0 }
 0x13b   :  { %11902 = vst [vmem:[#allocation18_spill] sm:$0xff] %v10281_v5  ;;  %v7474_v19 = vcombine.low %v1708_v55, %v10289_v16  ;;  %v10292_v51 = vld [vmem:[#allocation2 + $0x128] ss:$0 sps:$4 sm:$0x11]   ;;  %v1599_v34 = vsel %vm9025_vm3, %v1187_v7, %v1598_v9  ;;  %1597 = vst [vmem:[#allocation2 + $0x130] sm:$0xf] %v1186_v47 }
 0x13c   :  { %v5479_v4 = vpop.f32.mrf.mxu0  ;;  %1600 = vst [vmem:[#allocation2 + $0x134] sm:$0x1] %v1599_v34  ;;  %v1055_v29 = vrot.slane %v1053_v60, 7  ;;  %v1061_v53 = vshrl.u32 %v7907_v2, 16  ;;  %v1064_v35 = vshll.u32 %v7907_v2, 16  ;;  %v2610_v46 = vshll.u32 %v10292_v51, 16 }
 0x13d   :  { %v2603_v48 = vshrl.u32 %v7474_v19, 16  ;;  %v2605_v42 = vshll.u32 %v7474_v19, 16  ;;  %v1545_v8 = vld [vmem:[#allocation2 + $0xc0] sm:$0xf]  ;;  %v1888_v55 = vld [vmem:[#allocation2 + $0xc] sm:$0xe] }
 0x13e   :  { %v10298_v21 = vpop.f32.mrf.mxu0  ;;  %v1058_v32 = vor.u32 %v1056_v40, %v1055_v29  ;;  %v1059_v61 = vrot.slane %v1055_v29, 4  ;;  %v10301_v38 = vrot.slane %v1061_v53, 7  ;;  %v2612_v11 = vrot.slane %v2610_v46, 1  ;;  %v1777_v40 = vld [vmem:[#allocation2 + $0xe4] sm:$0xe] }
 0x13f   :  { %11903 = vst [vmem:[#allocation19_spill] sm:$0xff] %v10298_v21  ;;  %v2607_v9 = vrot.slane %v2605_v42, 1  ;;  %v8884_v34 = vld [vmem:[#allocation2 + $0x10] sm:$0xf]  ;;  %v3268_v21 = vshrl.u32 %v9719_v44, 16 }
 0x140   :  { %v5482_v22 = vpop.f32.mrf.mxu0  ;;  %v1066_v0 = vor.u32 %v1064_v35, %v10301_v38  ;;  %v1546_v7 = vsel %vm9258_vm8, %v1058_v32, %v1545_v8  ;;  %v7612_v29 = vcombine.low %v1888_v55, %v8884_v34  ;;  %v8677_v8 = vld [vmem:[#allocation2 + $0x14] ss:$0 sps:$4 sm:$0x11]   ;;  %v7533_v32 = vcombine.low %v1777_v40, %v10090_v57 }
 0x141   :  { %v10303_v30 = vpop.f32.mrf.mxu1  ;;  %v2608_v4 = vor.u32 %v2607_v9, %v2603_v48  ;;  %v1710_v2 = vld [vmem:[#allocation2 + $0x12c] sm:$0xf]  ;;  %1547 = vst [vmem:[#allocation2 + $0xc0] sm:$0xf] %v1546_v7  ;;  %v1778_v9 = vld [vmem:[#allocation2 + $0xf0] sm:$0xe] }
 0x142   :  { %11904 = vst [vmem:[#allocation20_spill] sm:$0xff] %v10303_v30  ;;  %v1067_v60 = vsel %vm9264_vm9, %v1059_v61, %v1066_v0  ;;  %v10313_v42 = vld [vmem:[#allocation2 + $0x130] sm:$0xf]  ;;  %v2903_v61 = vrot.slane %v10097_v58, 1  ;;  %v3779_v34 = vrot.slane %v7612_v29, 1  ;;  %v3780_v40 = vrot.slane %v8677_v8, 1 }
 0x143   :  { %v5671_v27 = vpop.f32.mrf.mxu1  ;;  %v2613_v53 = vsel %vm2337_vm5, %v2608_v4, %v2612_v11  ;;  %1548 = vst [vmem:[#allocation2 + $0xc4] sm:$0xf] %v1067_v60  ;;  %v7475_v48 = vcombine.low %v1710_v2, %v10313_v42  ;;  %v10318_v46 = vld [vmem:[#allocation2 + $0x134] ss:$0 sps:$4 sm:$0x11]   ;;  %v3270_v11 = vshll.u32 %v9719_v44, 16  ;;  %v7534_v58 = vcombine.low %v1778_v9, %v10130_v33 }
 0x144   :  { %5619 = vmatprep.mubr.bf16.mxu0 %v2613_v53  ;;  %v2622_v27 = vshll.u32 %v10318_v46, 16  ;;  %v1776_v4 = vld [vmem:[#allocation2 + $0xd8] sm:$0xe]  ;;  %v1824_v60 = vld [vmem:[#allocation2 + $0xe4] sm:$0xf]  ;;  %v2902_v53 = vrot.slane %v7533_v32, 1 }
 0x145   :  { %v10310_v47 = vpop.f32.mrf.mxu1  ;;  %5620 = vmatmul.mubr.bf16.gmra.mxu0 %v7474_v19  ;;  %v2615_v0 = vshrl.u32 %v7475_v48, 16  ;;  %v2617_v7 = vshll.u32 %v7475_v48, 16  ;;  %v1825_v2 = vld [vmem:[#allocation2 + $0xe8] sm:$0xf]  ;;  %v3272_v5 = vrot.slane %v3270_v11, 1  ;;  %v3275_v33 = vshll.u32 %v8677_v8, 16 }
 0x146   :  { %11905 = vst [vmem:[#allocation21_spill] sm:$0xff] %v10310_v47  ;;  %v10315_v35 = vpop.f32.mrf.mxu0  ;;  %v10328_v30 = vsel %vm2850_vm10, %v2902_v53, %v2903_v61  ;;  %v8885_v29 = vld [vmem:[#allocation2 + $0xdc] sm:$0xf]  ;;  %v2905_v9 = vrot.slane %v7534_v58, 1  ;;  %v2906_v44 = vrot.slane %v10148_v13, 1 }
 0x147   :  { %11906 = vst [vmem:[#allocation22_spill] sm:$0xff] %v10315_v35  ;;  %v5674_v22 = vpop.f32.mrf.mxu1  ;;  %v2619_v19 = vrot.slane %v2617_v7, 1  ;;  %v7532_v32 = vcombine.low %v1776_v4, %v8885_v29  ;;  %v8746_v7 = vld [vmem:[%s11863_s4 + $0x1c0] sm:$0xff]   ;;  %v1779_v53 = vld [vmem:[#allocation2 + $0xfc] sm:$0xe] }
 0x148   :  { %v5487_v55 = vpop.f32.mrf.mxu0  ;;  %v2624_v22 = vrot.slane %v2622_v27, 1  ;;  %v1822_v57 = vld [vmem:[#allocation2 + $0xc0] sm:$0xf]  ;;  %6309 = vmatpush2.bf16.msra.mxu1 %v8746_v7  ;;  %v1890_v58 = vld [vmem:[#allocation2 + $0x24] sm:$0xe]  ;;  %v2909_v7 = vrot.slane %v10181_v31, 1 }
 0x149   :  { %v1889_v55 = vld [vmem:[#allocation2 + $0x18] sm:$0xe]  ;;  %v2620_v3 = vor.u32 %v2619_v19, %v2615_v0  ;;  %v8886_v0 = vld [vmem:[#allocation2 + $0x1c] sm:$0xf]  ;;  %v2899_v8 = vrot.slane %v7532_v32, 1  ;;  %v3273_v19 = vor.u32 %v3272_v5, %v3268_v21  ;;  %v3280_v21 = vshrl.u32 %v9738_v12, 16 }
 0x14a   :  { %v10324_v47 = vpop.f32.mrf.mxu0  ;;  %v1823_v23 = vld [vmem:[#allocation2 + $0xc4] sm:$0xf]  ;;  %v7613_v4 = vcombine.low %v1889_v55, %v8886_v0 }
 0x14b   :  { %11907 = vst [vmem:[#allocation23_spill] sm:$0xff] %v10324_v47  ;;  %v10334_v27 = vcombine.low %v1822_v57, %v1823_v23  ;;  %v10336_v47 = vcombine.low %v1824_v60, %v1825_v2  ;;  %v2625_v61 = vsel %vm2337_vm5, %v2620_v3, %v2624_v22  ;;  %v8683_v23 = vld [vmem:[#allocation2 + $0x20] ss:$0 sps:$4 sm:$0x11]   ;;  %v10346_v2 = vsel %vm2850_vm10, %v2905_v9, %v2906_v44  ;;  %v1826_v57 = vld [vmem:[#allocation2 + $0xf0] sm:$0xf] }
 0x14c   :  { %v5490_v35 = vpop.f32.mrf.mxu0  ;;  %5627 = vmatprep.mubr.bf16.mxu0 %v2625_v61  ;;  %v8887_v60 = vld [vmem:[#allocation2 + $0xe0] ss:$0 sps:$4 sm:$0x11]   ;;  %v3277_v22 = vrot.slane %v3275_v33, 1  ;;  %v3782_v29 = vrot.slane %v7613_v4, 1  ;;  %v3783_v32 = vrot.slane %v8683_v23, 1 }
 0x14d   :  { %v3781_v35 = vsel %vm2850_vm10, %v3779_v34, %v3780_v40  ;;  %5852 = vmatprep.mubr.bf16.mxu1 %v10334_v27  ;;  %5628 = vmatmul.mubr.bf16.gmra.mxu0 %v7475_v48  ;;  %v2900_v3 = vrot.slane %v8887_v60, 1  ;;  %v3282_v34 = vshll.u32 %v9738_v12, 16  ;;  %v1827_v40 = vld [vmem:[#allocation2 + $0xf4] sm:$0xf]  ;;  %v7535_v48 = vcombine.low %v1779_v53, %v10172_v15  ;;  %v8888_v53 = vld [vmem:[#allocation2 + $0x28] sm:$0xf] }
 0x14e   :  { %5853 = vmatmul.mubr.bf16.gmra.mxu1 %v10286_v63  ;;  %6021 = vmatprep.mubr.bf16.mxu0 %v3781_v35  ;;  %v1780_v63 = vld [vmem:[#allocation2 + $0x108] sm:$0xe]  ;;  %v10355_v61 = vcombine.low %v1826_v57, %v1827_v40  ;;  %v3278_v5 = vsel %vm2337_vm5, %v3273_v19, %v3277_v22  ;;  %v3287_v0 = vshll.u32 %v8683_v23, 16  ;;  %v8687_v15 = vld [vmem:[#allocation2 + $0x2c] ss:$0 sps:$4 sm:$0x11]   ;;  %v7614_v60 = vcombine.low %v1890_v58, %v8888_v53 }
 0x14f   :  { %v10341_v11 = vpop.f32.mrf.mxu1  ;;  %5860 = vmatprep.mubr.bf16.mxu1 %v10336_v47  ;;  %v2901_v9 = vsel %vm2850_vm10, %v2899_v8, %v2900_v3  ;;  %v2908_v44 = vrot.slane %v7535_v48, 1  ;;  %v3284_v33 = vrot.slane %v3282_v34, 1  ;;  %v7536_v31 = vcombine.low %v1780_v63, %v10208_v62  ;;  %v8698_v8 = vld [vmem:[%s11863_s4 + $0x230] sm:$0xff]   ;;  %v8889_v62 = vld [vmem:[%s11863_s4 + $0x238] sm:$0xff]   ;;  %v1829_v63 = vld [vmem:[#allocation2 + $0x100] sm:$0xf] }
 0x150   :  { %11908 = vst [vmem:[#allocation24_spill] sm:$0xff] %v10341_v11  ;;  %v2912_v12 = vrot.slane %v10216_v14, 1  ;;  %v1781_v34 = vld [vmem:[#allocation2 + $0x114] sm:$0xe]  ;;  %v3294_v23 = vshll.u32 %v9788_v39, 16  ;;  %v3289_v58 = vrot.slane %v3287_v0, 1 }
 0x151   :  { %v5679_v13 = vpop.f32.mrf.mxu1  ;;  %v10360_v4 = vsel %vm2850_vm10, %v2908_v44, %v2909_v7  ;;  %v2911_v19 = vrot.slane %v7536_v31, 1  ;;  %v1891_v57 = vld [vmem:[#allocation2 + $0x30] sm:$0xe]  ;;  %v3285_v40 = vor.u32 %v3284_v33, %v3280_v21  ;;  %v1828_v48 = vld [vmem:[#allocation2 + $0xfc] sm:$0xf]  ;;  %v8717_v14 = vld [vmem:[%s11863_s4 + $0x228] sm:$0xff]  }
 0x152   :  { %v3784_v13 = vsel %vm2850_vm10, %v3782_v29, %v3783_v32  ;;  %v3785_v29 = vrot.slane %v7614_v60, 1  ;;  %v3786_v32 = vrot.slane %v8687_v15, 1  ;;  %v10385_v21 = vcombine.low %v1828_v48, %v1829_v63  ;;  %v1783_v48 = vld [vmem:[#allocation2 + $0x12c] sm:$0xe]  ;;  %v8897_v11 = vld [vmem:[#allocation2 + $0x7c] sm:$0xf] }
 0x153   :  { %v10351_v55 = vpop.f32.mrf.mxu1  ;;  %v10379_v7 = vsel %vm2850_vm10, %v2911_v19, %v2912_v12  ;;  %v3290_v53 = vsel %vm2337_vm5, %v3285_v40, %v3289_v58  ;;  %v3292_v60 = vshrl.u32 %v9788_v39, 16  ;;  %v3296_v31 = vrot.slane %v3294_v23, 1  ;;  %v8692_v12 = vld [vmem:[#allocation2 + $0x38] ss:$0 sps:$4 sm:$0x11]   ;;  %v8736_v39 = vld [vmem:[%s11863_s4 + $0x220] sm:$0xff]  }
 0x154   :  { %11909 = vst [vmem:[#allocation25_spill] sm:$0xff] %v10351_v55  ;;  %v8890_v19 = vld [vmem:[#allocation2 + $0x34] sm:$0xf]  ;;  %v3306_v23 = vshll.u32 %v9835_v28, 16  ;;  %v1830_v40 = vld [vmem:[#allocation2 + $0x108] sm:$0xf] }
 0x155   :  { %v5682_v35 = vpop.f32.mrf.mxu1  ;;  %6022 = vmatmul.mubr.bf16.vlgmr.msra.gmra.mxu0 %v3278_v5  ;;  %v1782_v5 = vld [vmem:[#allocation2 + $0x120] sm:$0xe]  ;;  %v3789_v63 = vrot.slane %v8692_v12, 1 }
 0x156   :  { %5861 = vmatmul.mubr.bf16.gmra.mxu1 %v2901_v9  ;;  %8395 = vmatpush3.bf16.msra.mxu0 %v8889_v62  ;;  %v7537_v9 = vcombine.low %v1781_v34, %v10248_v43  ;;  %v2915_v35 = vrot.slane %v10255_v26, 1  ;;  %v3787_v43 = vsel %vm2850_vm10, %v3785_v29, %v3786_v32  ;;  %v7538_v26 = vcombine.low %v1782_v5, %v10289_v16  ;;  %v8754_v5 = vld [vmem:[%s11863_s4 + $0x218] sm:$0xff]  }
 0x157   :  { %v10366_v3 = vpop.f32.mrf.mxu0  ;;  %5868 = vmatprep.mubr.bf16.mxu1 %v10355_v61  ;;  %6029 = vmatprep.mubr.bf16.mxu0 %v3784_v13  ;;  %v3299_v13 = vshll.u32 %v8687_v15, 16  ;;  %v2918_v62 = vrot.slane %v10292_v51, 1  ;;  %v3297_v16 = vor.u32 %v3296_v31, %v3292_v60  ;;  %v1831_v51 = vld [vmem:[#allocation2 + $0x10c] sm:$0xf]  ;;  %v3304_v31 = vshrl.u32 %v9835_v28, 16 }
 0x158   :  { %11910 = vst [vmem:[#allocation26_spill] sm:$0xff] %v10366_v3  ;;  %8396 = vmatprep.subr.bf16.mxu0 %v8698_v8  ;;  %v2914_v33 = vrot.slane %v7537_v9, 1  ;;  %v1892_v9 = vld [vmem:[#allocation2 + $0x3c] sm:$0xe]  ;;  %v3318_v28 = vshll.u32 %v9862_v24, 16 }
 0x159   :  { %v5495_v22 = vpop.f32.mrf.mxu0  ;;  %v8730_v3 = vld [vmem:[#allocation2 + $0x98] ss:$0 sps:$4 sm:$0x11]  }
 0x15a   :  { %8397 = vmatpush3.bf16.msra.mxu0 %v8698_v8  ;;  %v7615_v22 = vcombine.low %v1891_v57, %v8890_v19  ;;  %v10391_v34 = vsel %vm2850_vm10, %v2914_v33, %v2915_v35  ;;  %v2917_v8 = vrot.slane %v7538_v26, 1  ;;  %v3301_v57 = vrot.slane %v3299_v13, 1  ;;  %v8891_v19 = vld [vmem:[#allocation2 + $0x40] sm:$0xf] }
 0x15b   :  { %v10382_v44 = vpop.f32.mrf.mxu0  ;;  %8398 = vmatprep.subr.bf16.mxu0 %v8717_v14  ;;  %v2921_v35 = vrot.slane %v10318_v46, 1  ;;  %v10411_v33 = vcombine.low %v1830_v40, %v1831_v51  ;;  %v3308_v13 = vrot.slane %v3306_v23, 1  ;;  %v1833_v23 = vld [vmem:[#allocation2 + $0x118] sm:$0xf]  ;;  %v3316_v51 = vshrl.u32 %v9862_v24, 16 }
 0x15c   :  { %11911 = vst [vmem:[#allocation27_spill] sm:$0xff] %v10382_v44  ;;  %v3788_v58 = vrot.slane %v7615_v22, 1  ;;  %v10404_v29 = vsel %vm2850_vm10, %v2917_v8, %v2918_v62  ;;  %v3302_v60 = vsel %vm2337_vm5, %v3297_v16, %v3301_v57  ;;  %v7616_v22 = vcombine.low %v1892_v9, %v8891_v19  ;;  %v1832_v8 = vld [vmem:[#allocation2 + $0x114] sm:$0xf] }
 0x15d   :  { %v5498_v0 = vpop.f32.mrf.mxu0  ;;  %6030 = vmatmul.mubr.bf16.gmra.mxu0 %v3290_v53  ;;  %v8702_v9 = vld [vmem:[#allocation2 + $0x50] ss:$0 sps:$4 sm:$0x11]  }
 0x15e   :  { %5869 = vmatmul.mubr.bf16.gmra.mxu1 %v10328_v30  ;;  %6037 = vmatprep.mubr.bf16.mxu0 %v3787_v43  ;;  %v7539_v30 = vcombine.low %v1783_v48, %v10313_v42  ;;  %v3311_v42 = vshll.u32 %v8692_v12, 16  ;;  %v3790_v46 = vsel %vm2850_vm10, %v3788_v58, %v3789_v63  ;;  %v3309_v12 = vor.u32 %v3308_v13, %v3304_v31 }
 0x15f   :  { %5876 = vmatprep.mubr.bf16.mxu1 %v10385_v21  ;;  %8399 = vmatpush3.bf16.msra.mxu0 %v8717_v14  ;;  %v8696_v14 = vld [vmem:[#allocation2 + $0x44] ss:$0 sps:$4 sm:$0x11]   ;;  %v3791_v16 = vrot.slane %v7616_v22, 1  ;;  %v3320_v58 = vrot.slane %v3318_v28, 1 }
 0x160   :  { %8400 = vmatprep.subr.bf16.mxu0 %v8736_v39  ;;  %v2920_v53 = vrot.slane %v7539_v30, 1  ;;  %v3313_v48 = vrot.slane %v3311_v42, 1  ;;  %v3792_v57 = vrot.slane %v8696_v14, 1  ;;  %v3323_v30 = vshll.u32 %v8696_v14, 16  ;;  %v1834_v14 = vld [vmem:[#allocation2 + $0x120] sm:$0xf] }
 0x161   :  { %v10399_v15 = vpop.f32.mrf.mxu1  ;;  %v3321_v42 = vor.u32 %v3320_v58, %v3316_v51  ;;  %v1835_v22 = vld [vmem:[#allocation2 + $0x124] sm:$0xf]  ;;  %v8706_v58 = vld [vmem:[#allocation2 + $0x5c] ss:$0 sps:$4 sm:$0x11]  }
 0x162   :  { %11912 = vst [vmem:[#allocation28_spill] sm:$0xff] %v10399_v15  ;;  %v10419_v26 = vsel %vm2850_vm10, %v2920_v53, %v2921_v35  ;;  %v3314_v63 = vsel %vm2337_vm5, %v3309_v12, %v3313_v48  ;;  %v8892_v35 = vld [vmem:[#allocation2 + $0x4c] sm:$0xf]  ;;  %v3325_v19 = vrot.slane %v3323_v30, 1  ;;  %v1894_v12 = vld [vmem:[#allocation2 + $0x54] sm:$0xe] }
 0x163   :  { %v5687_v32 = vpop.f32.mrf.mxu1  ;;  %8401 = vmatpush3.bf16.msra.mxu0 %v8736_v39  ;;  %v1893_v39 = vld [vmem:[#allocation2 + $0x48] sm:$0xe]  ;;  %v3328_v48 = vshrl.u32 %v9913_v1, 16  ;;  %v3342_v30 = vshll.u32 %v9949_v18, 16  ;;  %v8896_v15 = vld [vmem:[#allocation2 + $0x13c] sm:$0xf] }
 0x164   :  { %8402 = vmatprep.subr.bf16.mxu0 %v8754_v5  ;;  %v10430_v32 = vcombine.low %v1832_v8, %v1833_v23  ;;  %v7617_v53 = vcombine.low %v1893_v39, %v8892_v35  ;;  %v3326_v23 = vsel %vm2337_vm5, %v3321_v42, %v3325_v19  ;;  %v8767_v35 = vld [vmem:[%s11863_s4 + $0x210] sm:$0xff]   ;;  %v3798_v42 = vrot.slane %v8706_v58, 1 }
 0x165   :  { %v10413_v0 = vpop.f32.mrf.mxu1  ;;  %6038 = vmatmul.mubr.bf16.gmra.mxu0 %v3302_v60  ;;  %v3793_v60 = vsel %vm2850_vm10, %v3791_v16, %v3792_v57  ;;  %v10442_v16 = vcombine.low %v1834_v14, %v1835_v22  ;;  %v3335_v57 = vshll.u32 %v8702_v9, 16  ;;  %v3344_v22 = vrot.slane %v3342_v30, 1  ;;  %v487_v30 = vld [vmem:[#allocation2 + $0x198] sm:$0x1] }
 0x166   :  { %11913 = vst [vmem:[#allocation29_spill] sm:$0xff] %v10413_v0  ;;  %5877 = vmatmul.mubr.bf16.gmra.mxu1 %v10346_v2  ;;  %6045 = vmatprep.mubr.bf16.mxu0 %v3790_v46  ;;  %v3794_v46 = vrot.slane %v7617_v53, 1  ;;  %v1895_v53 = vld [vmem:[#allocation2 + $0x60] sm:$0xe] }
 0x167   :  { %v5690_v43 = vpop.f32.mrf.mxu1  ;;  %5884 = vmatprep.mubr.bf16.mxu1 %v10411_v33  ;;  %8403 = vmatpush3.bf16.msra.mxu0 %v8754_v5  ;;  %v3330_v5 = vshll.u32 %v9913_v1, 16 }
 0x168   :  { %v3795_v43 = vrot.slane %v8702_v9, 1  ;;  %8404 = vmatprep.subr.bf16.mxu0 %v8767_v35 }
 0x169   :  { %v10422_v62 = vpop.f32.mrf.mxu0 }
 0x16a   :  { %11914 = vst [vmem:[#allocation30_spill] sm:$0xff] %v10422_v62  ;;  %v3796_v51 = vsel %vm2850_vm10, %v3794_v46, %v3795_v43  ;;  %v8721_v62 = vld [vmem:[#allocation2 + $0x80] ss:$0 sps:$4 sm:$0x11]  }
 0x16b   :  { %v5503_v40 = vpop.f32.mrf.mxu0  ;;  %8405 = vmatpush3.bf16.msra.mxu0 %v8767_v35  ;;  %v3354_v35 = vshll.u32 %v9968_v17, 16 }
 0x16c   :  { %v8893_v40 = vld [vmem:[#allocation2 + $0x58] sm:$0xf] }
 0x16d   :  { %v10427_v2 = vpop.f32.mrf.mxu0  ;;  %6046 = vmatmul.mubr.bf16.gmra.mxu0 %v3314_v63  ;;  %v7618_v39 = vcombine.low %v1894_v12, %v8893_v40  ;;  %v8894_v12 = vld [vmem:[#allocation2 + $0x64] sm:$0xf]  ;;  %v8711_v40 = vld [vmem:[#allocation2 + $0x68] ss:$0 sps:$4 sm:$0x11]  }
 0x16e   :  { %11915 = vst [vmem:[#allocation31_spill] sm:$0xff] %v10427_v2  ;;  %5885 = vmatmul.mubr.bf16.gmra.mxu1 %v10360_v4  ;;  %6053 = vmatprep.mubr.bf16.mxu0 %v3793_v60  ;;  %v3332_v4 = vrot.slane %v3330_v5, 1  ;;  %v3337_v60 = vrot.slane %v3335_v57, 1 }
 0x16f   :  { %v10433_v31 = vpop.f32.mrf.mxu1  ;;  %v5506_v13 = vpop.f32.mrf.mxu0  ;;  %5892 = vmatprep.mubr.bf16.mxu1 %v10430_v32  ;;  %v3797_v5 = vrot.slane %v7618_v39, 1 }
 0x170   :  { %11916 = vst [vmem:[#allocation32_spill] sm:$0xff] %v10433_v31  ;;  %v3333_v9 = vor.u32 %v3332_v4, %v3328_v48  ;;  %v1836_v13 = vld [vmem:[#allocation2 + $0x12c] sm:$0xf]  ;;  %v8895_v31 = vld [vmem:[#allocation2 + $0x70] sm:$0xf] }
 0x171   :  { %v5695_v24 = vpop.f32.mrf.mxu1  ;;  %v3799_v57 = vsel %vm2850_vm10, %v3797_v5, %v3798_v42  ;;  %v1839_v42 = vld [vmem:[#allocation2 + $0x13c] sm:$0xf] }
 0x172   :  { %v1837_v24 = vld [vmem:[#allocation2 + $0x130] sm:$0xf]  ;;  %v3338_v48 = vsel %vm2337_vm5, %v3333_v9, %v3337_v60 }
 0x173   :  { %v10438_v28 = vpop.f32.mrf.mxu1  ;;  %v10459_v4 = vcombine.low %v1836_v13, %v1837_v24  ;;  %v1838_v13 = vld [vmem:[#allocation2 + $0x138] sm:$0xf] }
 0x174   :  { %11917 = vst [vmem:[#allocation33_spill] sm:$0xff] %v10438_v28  ;;  %v488_v28 = vsel %vm9025_vm3, 0, %v487_v30  ;;  %v3359_v30 = vshll.u32 %v8711_v40, 16 }
 0x175   :  { %v5698_v8 = vpop.f32.mrf.mxu1  ;;  %6054 = vmatmul.mubr.bf16.gmra.mxu0 %v3326_v23  ;;  %v3347_v23 = vshll.u32 %v8706_v58, 16  ;;  %489 = vst [vmem:[#allocation2 + $0x198] sm:$0x1] %v488_v28 }
 0x176   :  { %5893 = vmatmul.mubr.bf16.gmra.mxu1 %v10379_v7  ;;  %6061 = vmatprep.mubr.bf16.mxu0 %v3796_v51  ;;  %v3340_v7 = vshrl.u32 %v9949_v18, 16  ;;  %v7619_v8 = vcombine.low %v1895_v53, %v8894_v12  ;;  %v8322_v18 = vld [vmem:[%s11865_s0 + $0xf8] sm:$0xff]  }
 0x177   :  { %v10445_v63 = vpop.f32.mrf.mxu1  ;;  %5900 = vmatprep.mubr.bf16.mxu1 %v10442_v16  ;;  %v3349_v60 = vrot.slane %v3347_v23, 1  ;;  %v8130_v5 = vunpack.c.l.bf16 %v8322_v18  ;;  %v8131_v12 = vunpack.c.h.bf16 %v8322_v18 }
 0x178   :  { %v3345_v9 = vor.u32 %v3344_v22, %v3340_v7  ;;  %v3800_v24 = vrot.slane %v7619_v8, 1  ;;  %v3352_v7 = vshrl.u32 %v9968_v17, 16  ;;  %v3356_v22 = vrot.slane %v3354_v35, 1 }
 0x179   :  { %v5736_v1 = vpop.f32.mrf.mxu1 }
 0x17a   :  { %v10453_v19 = vpop.f32.mrf.mxu0  ;;  %v543_v1 = vld [vmem:[#allocation2 + $0xc8] sm:$0x1]  ;;  %v3350_v18 = vsel %vm2337_vm5, %v3345_v9, %v3349_v60  ;;  %v3366_v9 = vshll.u32 %v9988_v49, 16 }
 0x17b   :  { %v10455_v14 = vpop.f32.mrf.mxu1 }
 0x17c   :  { %v5511_v46 = vpop.f32.mrf.mxu0 }
 0x17d   :  { %v5739_v43 = vpop.f32.mrf.mxu1  ;;  %6062 = vmatmul.mubr.bf16.gmra.mxu0 %v3338_v48  ;;  %v3801_v46 = vrot.slane %v8711_v40, 1  ;;  %v1896_v48 = vld [vmem:[#allocation2 + $0x6c] sm:$0xe] }
 0x17e   :  { %v10462_v39 = vpop.f32.mrf.mxu0  ;;  %5901 = vmatmul.mubr.bf16.gmra.mxu1 %v10391_v34  ;;  %6069 = vmatprep.mubr.bf16.mxu0 %v3799_v57  ;;  %v544_v34 = vsel %vm9032_vm4, 0, %v543_v1  ;;  %v234_v57 = vmul.f32 %v8131_v12, %v9179_v37  ;;  %v7620_v0 = vcombine.low %v1896_v48, %v8895_v31 }
 0x17f   :  { %v10464_v51 = vpop.f32.mrf.mxu1  ;;  %5908 = vmatprep.mubr.bf16.mxu1 %v10459_v4  ;;  %545 = vst [vmem:[#allocation2 + $0xc8] sm:$0x1] %v544_v34  ;;  %v3802_v28 = vsel %vm2850_vm10, %v3800_v24, %v3801_v46  ;;  %v3361_v24 = vrot.slane %v3359_v30, 1  ;;  %v1841_v46 = vld [vmem:[#allocation2 + $0x148] sm:$0xf] }
 0x180   :  { %v5514_v53 = vpop.f32.mrf.mxu0  ;;  %v304_v34 = vadd.f32 %v9207_v56, %v234_v57  ;;  %v3803_v48 = vrot.slane %v7620_v0, 1 }
 0x181   :  { %v5744_v58 = vpop.f32.mrf.mxu1  ;;  %v233_v53 = vmul.f32 %v8130_v5, %v9179_v37  ;;  %v10488_v5 = vld [vmem:[#allocation2 + $0x74] ss:$0 sps:$4 sm:$0x11]   ;;  %v1068_v37 = vrot.slane %v10301_v38, 4 }
 0x182   :  { %v10484_v58 = vcombine.low %v1838_v13, %v1839_v42  ;;  %v368_v60 = vmax.f32 %v304_v34, 0.0  ;;  %v3357_v13 = vor.u32 %v3356_v22, %v3352_v7  ;;  %v1840_v42 = vld [vmem:[#allocation2 + $0x144] sm:$0xf]  ;;  %v3804_v38 = vrot.slane %v10488_v5, 1 }
 0x183   :  { %v10472_v43 = vpop.f32.mrf.mxu1  ;;  %v303_v1 = vadd.f32 %v9207_v56, %v233_v53  ;;  %v1784_v53 = vld [vmem:[#allocation2 + $0x138] sm:$0xe]  ;;  %v3368_v22 = vrot.slane %v3366_v9, 1  ;;  %v10505_v30 = vcombine.low %v1840_v42, %v1841_v46  ;;  %v3371_v55 = vshll.u32 %v10488_v5, 16 }
 0x184   :  { %v10480_v8 = vpop.f32.mrf.mxu0  ;;  %v1657_v42 = vld [vmem:[#allocation2 + $0x198] sm:$0xf] }
 0x185   :  { %v5747_v23 = vpop.f32.mrf.mxu1  ;;  %v367_v12 = vmax.f32 %v303_v1, 0.0  ;;  %6070 = vmatmul.mubr.bf16.gmra.mxu0 %v3350_v18  ;;  %v3364_v1 = vshrl.u32 %v9988_v49, 16 }
 0x186   :  { %v5519_v17 = vpop.f32.mrf.mxu0  ;;  %5909 = vmatmul.mubr.bf16.gmra.mxu1 %v10404_v29  ;;  %6077 = vmatprep.mubr.bf16.mxu0 %v3802_v28  ;;  %v7939_v29 = vpack.c.bf16 %v368_v60, %v368_v60  ;;  %v1549_v18 = vld [vmem:[#allocation2 + $0xc8] sm:$0x1]  ;;  %v7540_v60 = vcombine.low %v1784_v53, %v8896_v15  ;;  %v8898_v15 = vld [vmem:[#allocation2 + $0x140] ss:$0 sps:$4 sm:$0x11]   ;;  %v3373_v53 = vrot.slane %v3371_v55, 1 }
 0x187   :  { %v10490_v35 = vpop.f32.mrf.mxu1  ;;  %5916 = vmatprep.mubr.bf16.mxu1 %v10484_v58  ;;  %v7938_v56 = vpack.c.bf16 %v367_v12, %v367_v12  ;;  %v1897_v17 = vld [vmem:[#allocation2 + $0x78] sm:$0xe]  ;;  %v1550_v7 = vsel %vm9025_vm3, %v1068_v37, %v1549_v18  ;;  %v3378_v18 = vshll.u32 %v10021_v20, 16  ;;  %v2924_v5 = vrot.slane %v8898_v15, 1 }
 0x188   :  { %v10496_v40 = vpop.f32.mrf.mxu0  ;;  %v1333_v28 = vshrl.u32 %v7939_v29, 16  ;;  %v1336_v12 = vshll.u32 %v7939_v29, 16  ;;  %1551 = vst [vmem:[#allocation2 + $0xc8] sm:$0x1] %v1550_v7  ;;  %v7621_v2 = vcombine.low %v1897_v17, %v8897_v11  ;;  %v1842_v17 = vld [vmem:[#allocation2 + $0x150] sm:$0xf] }
 0x189   :  { %v5752_v31 = vpop.f32.mrf.mxu1  ;;  %v1325_v34 = vshrl.u32 %v7938_v56, 16  ;;  %v3807_v7 = vrot.slane %v8721_v62, 1  ;;  %v3380_v55 = vrot.slane %v3378_v18, 1  ;;  %v3383_v15 = vshll.u32 %v8721_v62, 16 }
 0x18a   :  { %v5522_v23 = vpop.f32.mrf.mxu0  ;;  %v1328_v31 = vshll.u32 %v7938_v56, 16  ;;  %v3805_v56 = vsel %vm2850_vm10, %v3803_v48, %v3804_v38  ;;  %v10512_v9 = vrot.slane %v1333_v28, 7  ;;  %v2923_v48 = vrot.slane %v7540_v60, 1 }
 0x18b   :  { %v10500_v57 = vpop.f32.mrf.mxu1  ;;  %v3362_v23 = vsel %vm2337_vm5, %v3357_v13, %v3361_v24  ;;  %v1327_v49 = vrot.slane %v1325_v34, 7  ;;  %v3369_v38 = vor.u32 %v3368_v22, %v3364_v1  ;;  %v1843_v34 = vld [vmem:[#allocation2 + $0x154] sm:$0xf]  ;;  %v3376_v1 = vshrl.u32 %v10021_v20, 16 }
 0x18c   :  { %11918 = vst [vmem:[#allocation34_spill] sm:$0xff] %v10500_v57  ;;  %v1338_v24 = vor.u32 %v1336_v12, %v10512_v9  ;;  %v10527_v22 = vcombine.low %v1842_v17, %v1843_v34  ;;  %v3390_v18 = vshll.u32 %v10059_v59, 16  ;;  %v1844_v17 = vld [vmem:[#allocation2 + $0x15c] sm:$0xf] }
 0x18d   :  { %v5755_v0 = vpop.f32.mrf.mxu1  ;;  %v1330_v46 = vor.u32 %v1328_v31, %v1327_v49  ;;  %v1331_v29 = vrot.slane %v1327_v49, 4  ;;  %6078 = vmatmul.mubr.bf16.gmra.mxu0 %v3362_v23  ;;  %v1898_v49 = vld [vmem:[#allocation2 + $0x84] sm:$0xe] }
 0x18e   :  { %5917 = vmatmul.mubr.bf16.gmra.mxu1 %v10419_v26  ;;  %6085 = vmatprep.mubr.bf16.mxu0 %v3805_v56  ;;  %v3806_v26 = vrot.slane %v7621_v2, 1  ;;  %v1785_v0 = vld [vmem:[#allocation2 + $0x144] sm:$0xe]  ;;  %v2925_v2 = vsel %vm2850_vm10, %v2923_v48, %v2924_v5  ;;  %v3374_v56 = vsel %vm2337_vm5, %v3369_v38, %v3373_v53  ;;  %v8901_v48 = vld [vmem:[#allocation2 + $0x14c] ss:$0 sps:$4 sm:$0x11]   ;;  %v3381_v53 = vor.u32 %v3380_v55, %v3376_v1 }
 0x18f   :  { %v10510_v37 = vpop.f32.mrf.mxu1  ;;  %5924 = vmatprep.mubr.bf16.mxu1 %v10505_v30  ;;  %v1658_v31 = vsel %vm9258_vm8, %v1330_v46, %v1657_v42  ;;  %v1339_v12 = vsel %vm9264_vm9, %v1331_v29, %v1338_v24  ;;  %v8899_v42 = vld [vmem:[#allocation2 + $0x148] sm:$0xf]  ;;  %v7622_v29 = vcombine.low %v1898_v49, %v8900_v54  ;;  %v8725_v24 = vld [vmem:[#allocation2 + $0x8c] ss:$0 sps:$4 sm:$0x11]   ;;  %v2927_v38 = vrot.slane %v8901_v48, 1 }
 0x190   :  { %11919 = vst [vmem:[#allocation35_spill] sm:$0xff] %v10510_v37  ;;  %v10516_v13 = vpop.f32.mrf.mxu0  ;;  %1659 = vst [vmem:[#allocation2 + $0x198] sm:$0xf] %v1658_v31  ;;  %v7541_v46 = vcombine.low %v1785_v0, %v8899_v42  ;;  %v8780_v0 = vld [vmem:[%s11863_s4 + $0x208] sm:$0xff]   ;;  %v1786_v49 = vld [vmem:[#allocation2 + $0x150] sm:$0xe] }
 0x191   :  { %v5760_v11 = vpop.f32.mrf.mxu1  ;;  %1660 = vst [vmem:[#allocation2 + $0x19c] sm:$0xf] %v1339_v12  ;;  %v3810_v12 = vrot.slane %v8725_v24, 1  ;;  %8406 = vmatprep.subr.bf16.mxu0 %v8780_v0  ;;  %v3388_v42 = vshrl.u32 %v10059_v59, 16  ;;  %v8903_v48 = vld [vmem:[#allocation2 + $0x94] sm:$0xf] }
 0x192   :  { %v5527_v28 = vpop.f32.mrf.mxu0  ;;  %v3808_v11 = vsel %vm2850_vm10, %v3806_v26, %v3807_v7  ;;  %v2926_v62 = vrot.slane %v7541_v46, 1  ;;  %v3385_v26 = vrot.slane %v3383_v15, 1  ;;  %v1845_v7 = vld [vmem:[#allocation2 + $0x160] sm:$0xf]  ;;  %v3392_v46 = vrot.slane %v3390_v18, 1  ;;  %8407 = vmatpush3.bf16.msra.mxu0 %v8780_v0 }
 0x193   :  { %v10522_v23 = vpop.f32.mrf.mxu1  ;;  %v3809_v28 = vrot.slane %v7622_v29, 1  ;;  %v10546_v54 = vcombine.low %v1844_v17, %v1845_v7  ;;  %v3402_v17 = vshll.u32 %v10088_v41, 16  ;;  %v1846_v7 = vld [vmem:[#allocation2 + $0x168] sm:$0xf] }
 0x194   :  { %11920 = vst [vmem:[#allocation36_spill] sm:$0xff] %v10522_v23  ;;  %v10529_v60 = vpop.f32.mrf.mxu0  ;;  %v2928_v15 = vsel %vm2850_vm10, %v2926_v62, %v2927_v38  ;;  %v3386_v29 = vsel %vm2337_vm5, %v3381_v53, %v3385_v26  ;;  %v8904_v38 = vld [vmem:[#allocation2 + $0x158] ss:$0 sps:$4 sm:$0x11]   ;;  %v3393_v53 = vor.u32 %v3392_v46, %v3388_v42  ;;  %v8905_v46 = vld [vmem:[#allocation2 + $0x160] sm:$0xf] }
 0x195   :  { %v5763_v50 = vpop.f32.mrf.mxu1  ;;  %6086 = vmatmul.mubr.bf16.gmra.mxu0 %v3374_v56  ;;  %v1899_v56 = vld [vmem:[#allocation2 + $0x90] sm:$0xe]  ;;  %v3811_v44 = vsel %vm2850_vm10, %v3809_v28, %v3810_v12  ;;  %v3813_v12 = vrot.slane %v8730_v3, 1  ;;  %v8744_v37 = vld [vmem:[#allocation2 + $0xbc] ss:$0 sps:$4 sm:$0x11]  }
 0x196   :  { %v5530_v31 = vpop.f32.mrf.mxu0  ;;  %5925 = vmatmul.mubr.bf16.gmra.mxu1 %v2925_v2  ;;  %6093 = vmatprep.mubr.bf16.mxu0 %v3808_v11  ;;  %v8902_v11 = vld [vmem:[#allocation2 + $0x154] sm:$0xf] }
 0x197   :  { %v10534_v20 = vpop.f32.mrf.mxu1  ;;  %5932 = vmatprep.mubr.bf16.mxu1 %v10527_v22  ;;  %v7542_v31 = vcombine.low %v1786_v49, %v8902_v11  ;;  %v1847_v49 = vld [vmem:[#allocation2 + $0x16c] sm:$0xf] }
 0x198   :  { %11921 = vst [vmem:[#allocation37_spill] sm:$0xff] %v10534_v20  ;;  %v10537_v34 = vpop.f32.mrf.mxu0 }
 0x199   :  { %v5768_v5 = vpop.f32.mrf.mxu1  ;;  %v2929_v62 = vrot.slane %v7542_v31, 1 }
 0x19a   :  { %v5535_v50 = vpop.f32.mrf.mxu0  ;;  %v3395_v5 = vshll.u32 %v8725_v24, 16  ;;  %v2930_v24 = vrot.slane %v8904_v38, 1  ;;  %v8906_v38 = vld [vmem:[#allocation2 + $0xa0] sm:$0xf] }
 0x19b   :  { %v10543_v2 = vpop.f32.mrf.mxu1  ;;  %v7623_v50 = vcombine.low %v1899_v56, %v8903_v48  ;;  %v1787_v56 = vld [vmem:[#allocation2 + $0x15c] sm:$0xe]  ;;  %v3404_v48 = vrot.slane %v3402_v17, 1  ;;  %v3414_v17 = vshll.u32 %v10116_v25, 16 }
 0x19c   :  { %11922 = vst [vmem:[#allocation38_spill] sm:$0xff] %v10543_v2  ;;  %v10548_v1 = vpop.f32.mrf.mxu0  ;;  %v3397_v26 = vrot.slane %v3395_v5, 1  ;;  %v7543_v5 = vcombine.low %v1787_v56, %v8905_v46  ;;  %v1901_v46 = vld [vmem:[#allocation2 + $0xa8] sm:$0xe] }
 0x19d   :  { %v5771_v55 = vpop.f32.mrf.mxu1  ;;  %6094 = vmatmul.mubr.bf16.gmra.mxu0 %v3386_v29  ;;  %v3812_v28 = vrot.slane %v7623_v50, 1  ;;  %v3400_v29 = vshrl.u32 %v10088_v41, 16  ;;  %v3407_v50 = vshll.u32 %v8730_v3, 16 }
 0x19e   :  { %v5538_v59 = vpop.f32.mrf.mxu0  ;;  %5933 = vmatmul.mubr.bf16.gmra.mxu1 %v2928_v15  ;;  %6101 = vmatprep.mubr.bf16.mxu0 %v3811_v44  ;;  %v1900_v15 = vld [vmem:[#allocation2 + $0x9c] sm:$0xe]  ;;  %v3398_v42 = vsel %vm2337_vm5, %v3393_v53, %v3397_v26  ;;  %v2932_v3 = vrot.slane %v7543_v5, 1  ;;  %v8907_v53 = vld [vmem:[#allocation2 + $0x164] ss:$0 sps:$4 sm:$0x11]  }
 0x19f   :  { %v10553_v18 = vpop.f32.mrf.mxu1  ;;  %5940 = vmatprep.mubr.bf16.mxu1 %v10546_v54  ;;  %v10562_v59 = vcombine.low %v1846_v7, %v1847_v49  ;;  %v3814_v2 = vsel %vm2850_vm10, %v3812_v28, %v3813_v12  ;;  %v1848_v7 = vld [vmem:[#allocation2 + $0x174] sm:$0xf]  ;;  %v2933_v26 = vrot.slane %v8907_v53, 1  ;;  %v3405_v49 = vor.u32 %v3404_v48, %v3400_v29  ;;  %v1849_v12 = vld [vmem:[#allocation2 + $0x178] sm:$0xf] }
 0x1a0   :  { %11923 = vst [vmem:[#allocation39_spill] sm:$0xff] %v10553_v18  ;;  %v7624_v18 = vcombine.low %v1900_v15, %v8906_v38  ;;  %v3409_v28 = vrot.slane %v3407_v50, 1  ;;  %v10576_v38 = vcombine.low %v1848_v7, %v1849_v12  ;;  %v8908_v48 = vld [vmem:[#allocation2 + $0x16c] sm:$0xf]  ;;  %v1850_v7 = vld [vmem:[#allocation2 + $0x180] sm:$0xf] }
 0x1a1   :  { %v5776_v0 = vpop.f32.mrf.mxu1  ;;  %v2934_v5 = vsel %vm2850_vm10, %v2932_v3, %v2933_v26  ;;  %v8910_v26 = vld [vmem:[#allocation2 + $0x170] ss:$0 sps:$4 sm:$0x11]  }
 0x1a2   :  { %v10557_v55 = vpop.f32.mrf.mxu0  ;;  %v2931_v0 = vsel %vm2850_vm10, %v2929_v62, %v2930_v24  ;;  %v3815_v56 = vrot.slane %v7624_v18, 1  ;;  %11927 = vst [vmem:[#allocation43_spill] sm:$0xff] %v10576_v38  ;;  %v3410_v29 = vsel %vm2337_vm5, %v3405_v49, %v3409_v28  ;;  %v2936_v49 = vrot.slane %v8910_v26, 1 }
 0x1a3   :  { %v10559_v11 = vpop.f32.mrf.mxu1 }
 0x1a4   :  { %11924 = vst [vmem:[#allocation40_spill] sm:$0xff] %v10559_v11  ;;  %v5543_v44 = vpop.f32.mrf.mxu0  ;;  %v8734_v11 = vld [vmem:[#allocation2 + $0xa4] ss:$0 sps:$4 sm:$0x11]  }
 0x1a5   :  { %v5779_v31 = vpop.f32.mrf.mxu1  ;;  %6102 = vmatmul.mubr.bf16.gmra.mxu0 %v3398_v42  ;;  %v3816_v15 = vrot.slane %v8734_v11, 1  ;;  %v1788_v44 = vld [vmem:[#allocation2 + $0x168] sm:$0xe]  ;;  %v3416_v42 = vrot.slane %v3414_v17, 1  ;;  %v3419_v18 = vshll.u32 %v8734_v11, 16  ;;  %v3426_v17 = vshll.u32 %v10175_v52, 16 }
 0x1a6   :  { %v10567_v20 = vpop.f32.mrf.mxu0  ;;  %5941 = vmatmul.mubr.bf16.gmra.mxu1 %v2931_v0  ;;  %6109 = vmatprep.mubr.bf16.mxu0 %v3814_v2  ;;  %v3412_v0 = vshrl.u32 %v10116_v25, 16  ;;  %v7544_v50 = vcombine.low %v1788_v44, %v8908_v48 }
 0x1a7   :  { %v10569_v41 = vpop.f32.mrf.mxu1  ;;  %5948 = vmatprep.mubr.bf16.mxu1 %v10562_v59 }
 0x1a8   :  { %11925 = vst [vmem:[#allocation41_spill] sm:$0xff] %v10569_v41  ;;  %v5546_v62 = vpop.f32.mrf.mxu0  ;;  %v8740_v41 = vld [vmem:[#allocation2 + $0xb0] ss:$0 sps:$4 sm:$0x11]   ;;  %v2935_v11 = vrot.slane %v7544_v50, 1  ;;  %v3417_v28 = vor.u32 %v3416_v42, %v3412_v0 }
 0x1a9   :  { %v5784_v24 = vpop.f32.mrf.mxu1  ;;  %v3819_v44 = vrot.slane %v8740_v41, 1  ;;  %v8911_v0 = vld [vmem:[#allocation2 + $0x178] sm:$0xf] }
 0x1aa   :  { %v8909_v24 = vld [vmem:[#allocation2 + $0xac] sm:$0xf] }
 0x1ab   :  { %v10573_v31 = vpop.f32.mrf.mxu1  ;;  %v7625_v53 = vcombine.low %v1901_v46, %v8909_v24  ;;  %v1789_v46 = vld [vmem:[#allocation2 + $0x174] sm:$0xe]  ;;  %v3428_v24 = vrot.slane %v3426_v17, 1 }
 0x1ac   :  { %11926 = vst [vmem:[#allocation42_spill] sm:$0xff] %v10573_v31  ;;  %v10578_v62 = vpop.f32.mrf.mxu0  ;;  %v3817_v31 = vsel %vm2850_vm10, %v3815_v56, %v3816_v15  ;;  %v3421_v56 = vrot.slane %v3419_v18, 1  ;;  %v1851_v15 = vld [vmem:[#allocation2 + $0x184] sm:$0xf]  ;;  %v7545_v42 = vcombine.low %v1789_v46, %v8911_v0  ;;  %v3431_v18 = vshll.u32 %v8740_v41, 16 }
 0x1ad   :  { %v5787_v2 = vpop.f32.mrf.mxu1  ;;  %6110 = vmatmul.mubr.bf16.gmra.mxu0 %v3410_v29  ;;  %v3424_v29 = vshrl.u32 %v10175_v52, 16  ;;  %v3438_v52 = vshll.u32 %v10213_v45, 16  ;;  %v8913_v41 = vld [vmem:[#allocation2 + $0x17c] ss:$0 sps:$4 sm:$0x11]   ;;  %v3822_v46 = vrot.slane %v8744_v37, 1 }
 0x1ae   :  { %v5551_v23 = vpop.f32.mrf.mxu0  ;;  %5949 = vmatmul.mubr.bf16.gmra.mxu1 %v2934_v5  ;;  %6117 = vmatprep.mubr.bf16.mxu0 %v3817_v31  ;;  %v1902_v5 = vld [vmem:[#allocation2 + $0xb4] sm:$0xe]  ;;  %v2937_v31 = vsel %vm2850_vm10, %v2935_v11, %v2936_v49  ;;  %v3422_v50 = vsel %vm2337_vm5, %v3417_v28, %v3421_v56  ;;  %v2939_v11 = vrot.slane %v8913_v41, 1  ;;  %v3433_v28 = vrot.slane %v3431_v18, 1  ;;  %v1790_v56 = vld [vmem:[#allocation2 + $0x180] sm:$0xe] }
 0x1af   :  { %v10583_v25 = vpop.f32.mrf.mxu1  ;;  %5956 = vmatprep.mubr.bf16.mxu1 %v10576_v38  ;;  %v3818_v23 = vrot.slane %v7625_v53, 1  ;;  %v8912_v53 = vld [vmem:[#allocation2 + $0xb8] sm:$0xf]  ;;  %v3429_v49 = vor.u32 %v3428_v24, %v3424_v29  ;;  %v3436_v29 = vshrl.u32 %v10213_v45, 16  ;;  %v3440_v24 = vrot.slane %v3438_v52, 1 }
 0x1b0   :  { %11928 = vst [vmem:[#allocation44_spill] sm:$0xff] %v10583_v25  ;;  %v10586_v12 = vpop.f32.mrf.mxu0  ;;  %v7626_v26 = vcombine.low %v1902_v5, %v8912_v53  ;;  %v3443_v53 = vshll.u32 %v8744_v37, 16  ;;  %v10618_v45 = vld [vmem:[#allocation2 + $0xc8] ss:$0 sps:$4 sm:$0x11]  }
 0x1b1   :  { %v5792_v3 = vpop.f32.mrf.mxu1 }
 0x1b2   :  { %v5554_v2 = vpop.f32.mrf.mxu0  ;;  %v10592_v3 = vcombine.low %v1850_v7, %v1851_v15  ;;  %v2938_v7 = vrot.slane %v7545_v42, 1  ;;  %v1903_v15 = vld [vmem:[#allocation2 + $0xc0] sm:$0xe]  ;;  %v8914_v42 = vld [vmem:[#allocation2 + $0x184] sm:$0xf] }
 0x1b3   :  { %v10589_v48 = vpop.f32.mrf.mxu1  ;;  %v3820_v2 = vsel %vm2850_vm10, %v3818_v23, %v3819_v44  ;;  %v1853_v23 = vld [vmem:[#allocation2 + $0x190] sm:$0xf]  ;;  %v3821_v44 = vrot.slane %v7626_v26, 1  ;;  %v7546_v18 = vcombine.low %v1790_v56, %v8914_v42  ;;  %v8915_v26 = vld [vmem:[#allocation2 + $0xc4] sm:$0xf]  ;;  %v3450_v56 = vshll.u32 %v10334_v27, 16 }
 0x1b4   :  { %11929 = vst [vmem:[#allocation45_spill] sm:$0xff] %v10589_v48  ;;  %11930 = vst [vmem:[#allocation46_spill] sm:$0xff] %v10592_v3  ;;  %v7627_v41 = vcombine.low %v1903_v15, %v8915_v26  ;;  %v1924_v42 = vld [vmem:[#allocation2 + $0x28] sm:$0xf] }
 0x1b5   :  { %v5795_v25 = vpop.f32.mrf.mxu1  ;;  %6118 = vmatmul.mubr.bf16.gmra.mxu0 %v3422_v50  ;;  %v1922_v50 = vld [vmem:[#allocation2 + $0x1c] sm:$0xf]  ;;  %v3452_v26 = vrot.slane %v3450_v56, 1 }
 0x1b6   :  { %5957 = vmatmul.mubr.bf16.gmra.mxu1 %v2937_v31  ;;  %v1852_v25 = vld [vmem:[#allocation2 + $0x18c] sm:$0xf]  ;;  %6125 = vmatprep.mubr.bf16.mxu0 %v3820_v2  ;;  %v1921_v31 = vld [vmem:[#allocation2 + $0x18] sm:$0xf] }
 0x1b7   :  { %v5798_v48 = vpop.f32.mrf.mxu1  ;;  %5964 = vmatprep.mubr.bf16.mxu1 %v10592_v3  ;;  %v3434_v3 = vsel %vm2337_vm5, %v3429_v49, %v3433_v28  ;;  %v10613_v38 = vcombine.low %v1852_v25, %v1853_v23  ;;  %v10620_v52 = vcombine.low %v1921_v31, %v1922_v50  ;;  %v8916_v25 = vld [vmem:[#allocation2 + $0x188] ss:$0 sps:$4 sm:$0x11]   ;;  %v3441_v49 = vor.u32 %v3440_v24, %v3436_v29  ;;  %v1923_v50 = vld [vmem:[#allocation2 + $0x24] sm:$0xf] }
 0x1b8   :  { %v10598_v57 = vadd.f32 %v5798_v48, %v10453_v19  ;;  %v8793_v19 = vld [vmem:[%s11863_s4 + $0x200] sm:$0xff]   ;;  %v3445_v28 = vrot.slane %v3443_v53, 1  ;;  %v3824_v31 = vrot.slane %v7627_v41, 1  ;;  %v3448_v29 = vshrl.u32 %v10334_v27, 16 }
 0x1b9   :  { %v5800_v17 = vpop.f32.mrf.mxu1  ;;  %v10605_v48 = vpop.f32.mrf.mxu0  ;;  %8408 = vmatprep.subr.bf16.mxu0 %v8793_v19  ;;  %11933 = vst [vmem:[#allocation49_spill] sm:$0xff] %v10613_v38  ;;  %v1904_v24 = vld [vmem:[#allocation2 + $0xe4] sm:$0xe] }
 0x1ba   :  { %11931 = vst [vmem:[#allocation47_spill] sm:$0xff] %v10598_v57  ;;  %8409 = vmatpush3.bf16.msra.mxu0 %v8793_v19  ;;  %v2940_v57 = vsel %vm2850_vm10, %v2938_v7, %v2939_v11  ;;  %v1791_v19 = vld [vmem:[#allocation2 + $0x18c] sm:$0xe]  ;;  %v2941_v7 = vrot.slane %v7546_v18, 1  ;;  %v2942_v11 = vrot.slane %v8916_v25, 1 }
 0x1bb   :  { %v5801_v5 = vpop.f32.mrf.mxu1  ;;  %v5559_v2 = vpop.f32.mrf.mxu0 }
 0x1bc   :  { %v10608_v0 = vadd.f32 %v5801_v5, %v10462_v39  ;;  %v3823_v39 = vsel %vm2850_vm10, %v3821_v44, %v3822_v46  ;;  %v8753_v44 = vld [vmem:[#allocation2 + $0x20] ss:$0 sps:$4 sm:$0x11]   ;;  %v1854_v2 = vld [vmem:[#allocation2 + $0x198] sm:$0xf]  ;;  %v2943_v41 = vsel %vm2850_vm10, %v2941_v7, %v2942_v11 }
 0x1bd   :  { %v5803_v17 = vpop.f32.mrf.mxu1  ;;  %v10616_v5 = vpop.f32.mrf.mxu0  ;;  %6126 = vmatmul.mubr.bf16.gmra.mxu0 %v3434_v3  ;;  %v4198_v3 = vshll.u32 %v10620_v52, 16  ;;  %v4203_v27 = vshll.u32 %v8753_v44, 16 }
 0x1be   :  { %11932 = vst [vmem:[#allocation48_spill] sm:$0xff] %v10608_v0  ;;  %5965 = vmatmul.mubr.bf16.gmra.mxu1 %v2940_v57  ;;  %6133 = vmatprep.mubr.bf16.mxu0 %v3823_v39  ;;  %v1855_v17 = vld [vmem:[#allocation2 + $0x19c] sm:$0xf]  ;;  %v3446_v39 = vsel %vm2337_vm5, %v3441_v49, %v3445_v28  ;;  %v3455_v0 = vshll.u32 %v10618_v45, 16 }
 0x1bf   :  { %v5806_v37 = vpop.f32.mrf.mxu1  ;;  %v5562_v23 = vpop.f32.mrf.mxu0  ;;  %5972 = vmatprep.mubr.bf16.mxu1 %v10613_v38  ;;  %v10642_v38 = vcombine.low %v1923_v50, %v1924_v42  ;;  %v4200_v49 = vrot.slane %v4198_v3, 1  ;;  %v8919_v50 = vld [vmem:[#allocation2 + $0x194] ss:$0 sps:$4 sm:$0x11]  }
 0x1c0   :  { %v10624_v15 = vadd.f32 %v5806_v37, %v10480_v8  ;;  %v3825_v8 = vrot.slane %v10618_v45, 1  ;;  %v8917_v37 = vld [vmem:[#allocation2 + $0x190] sm:$0xf]  ;;  %v2945_v42 = vrot.slane %v8919_v50, 1 }
 0x1c1   :  { %v5808_v46 = vpop.f32.mrf.mxu1  ;;  %v10628_v57 = vpop.f32.mrf.mxu0  ;;  %v7547_v25 = vcombine.low %v1791_v19, %v8917_v37  ;;  %v4196_v19 = vshrl.u32 %v10620_v52, 16  ;;  %v436_v37 = vld [vmem:[#allocation2 + $0xcc] sm:$0x1] }
 0x1c2   :  { %11934 = vst [vmem:[#allocation50_spill] sm:$0xff] %v10624_v15  ;;  %11935 = vst [vmem:[#allocation51_spill] sm:$0xff] %v10628_v57  ;;  %v10637_v46 = vld [vmem:[#allocation2 + $0xec] ss:$0 sps:$4 sm:$0x11]   ;;  %v10639_v15 = vcombine.low %v1854_v2, %v1855_v17  ;;  %v3826_v7 = vsel %vm2850_vm10, %v3824_v31, %v3825_v8  ;;  %v3462_v2 = vshll.u32 %v10336_v47, 16  ;;  %v3453_v17 = vor.u32 %v3452_v26, %v3448_v29 }
 0x1c3   :  { %v5809_v18 = vpop.f32.mrf.mxu1  ;;  %v5567_v23 = vpop.f32.mrf.mxu0  ;;  %v2944_v44 = vrot.slane %v7547_v25, 1  ;;  %v8757_v8 = vld [vmem:[#allocation2 + $0x2c] ss:$0 sps:$4 sm:$0x11]   ;;  %v4201_v25 = vor.u32 %v4200_v49, %v4196_v19  ;;  %v3467_v19 = vshll.u32 %v10637_v46, 16 }
 0x1c4   :  { %v10633_v53 = vadd.f32 %v5809_v18, %v10496_v40  ;;  %v597_v40 = vld [vmem:[#allocation2 + $0x1a0] sm:$0x1]  ;;  %v8918_v18 = vld [vmem:[#allocation2 + $0xe8] sm:$0xf]  ;;  %v1905_v23 = vld [vmem:[#allocation2 + $0xf0] sm:$0xe] }
 0x1c5   :  { %v5811_v57 = vpop.f32.mrf.mxu1  ;;  %v7628_v56 = vcombine.low %v1904_v24, %v8918_v18  ;;  %v10645_v11 = vpop.f32.mrf.mxu0  ;;  %6134 = vmatmul.mubr.bf16.gmra.mxu0 %v3446_v39  ;;  %v598_v3 = vsel %vm9032_vm4, 0, %v597_v40  ;;  %v3457_v18 = vrot.slane %v3455_v0, 1  ;;  %v3828_v39 = vrot.slane %v10637_v46, 1  ;;  %v8755_v49 = vld [vmem:[#allocation2 + $0xf8] ss:$0 sps:$4 sm:$0x11]  }
 0x1c6   :  { %11936 = vst [vmem:[#allocation52_spill] sm:$0xff] %v10645_v11  ;;  %v546_v57 = vld [vmem:[#allocation2 + $0xd4] sm:$0x1]  ;;  %5973 = vmatmul.mubr.bf16.gmra.mxu1 %v2943_v41  ;;  %6141 = vmatprep.mubr.bf16.mxu0 %v3826_v7  ;;  %599 = vst [vmem:[#allocation2 + $0x1a0] sm:$0x1] %v598_v3  ;;  %v437_v41 = vsel %vm9025_vm3, 0, %v436_v37 }
 0x1c7   :  { %v5814_v28 = vpop.f32.mrf.mxu1  ;;  %v5570_v31 = vpop.f32.mrf.mxu0  ;;  %5980 = vmatprep.mubr.bf16.mxu1 %v10639_v15  ;;  %v547_v29 = vsel %vm9032_vm4, 0, %v546_v57  ;;  %v3827_v26 = vrot.slane %v7628_v56, 1  ;;  %438 = vst [vmem:[#allocation2 + $0xcc] sm:$0x1] %v437_v41  ;;  %v3460_v0 = vshrl.u32 %v10336_v47, 16  ;;  %v3464_v7 = vrot.slane %v3462_v2, 1 }
 0x1c8   :  { %v10650_v45 = vadd.f32 %v5814_v28, %v10516_v13  ;;  %v4210_v13 = vshll.u32 %v10642_v38, 16  ;;  %v4205_v28 = vrot.slane %v4203_v27, 1  ;;  %548 = vst [vmem:[#allocation2 + $0xd4] sm:$0x1] %v547_v29  ;;  %v1925_v31 = vld [vmem:[#allocation2 + $0x30] sm:$0xf]  ;;  %v2946_v56 = vsel %vm2850_vm10, %v2944_v44, %v2945_v42 }
 0x1c9   :  { %v5816_v24 = vpop.f32.mrf.mxu1  ;;  %v10661_v40 = vpop.f32.mrf.mxu0  ;;  %v8920_v3 = vld [vmem:[#allocation2 + $0xf4] sm:$0xf]  ;;  %v1340_v29 = vrot.slane %v10512_v9, 4  ;;  %v3458_v47 = vsel %vm2337_vm5, %v3453_v17, %v3457_v18  ;;  %v4215_v11 = vshll.u32 %v8757_v8, 16  ;;  %v3474_v42 = vshll.u32 %v10355_v61, 16 }
 0x1ca   :  { %11937 = vst [vmem:[#allocation53_spill] sm:$0xff] %v10661_v40  ;;  %v1926_v24 = vld [vmem:[#allocation2 + $0x34] sm:$0xf]  ;;  %v7629_v57 = vcombine.low %v1905_v23, %v8920_v3  ;;  %v4208_v40 = vshrl.u32 %v10642_v38, 16  ;;  %v4212_v2 = vrot.slane %v4210_v13, 1  ;;  %v3465_v3 = vor.u32 %v3464_v7, %v3460_v0 }
 0x1cb   :  { %v5817_v50 = vpop.f32.mrf.mxu1  ;;  %v5575_v27 = vpop.f32.mrf.mxu0  ;;  %v10676_v44 = vcombine.low %v1925_v31, %v1926_v24  ;;  %v8760_v46 = vld [vmem:[#allocation2 + $0x38] ss:$0 sps:$4 sm:$0x11]   ;;  %v1906_v18 = vld [vmem:[#allocation2 + $0xfc] sm:$0xe]  ;;  %v3469_v8 = vrot.slane %v3467_v19, 1 }
 0x1cc   :  { %v10665_v37 = vadd.f32 %v5817_v50, %v10529_v60  ;;  %v3829_v60 = vsel %vm2850_vm10, %v3827_v26, %v3828_v39  ;;  %v4206_v50 = vsel %vm2337_vm5, %v4201_v25, %v4205_v28  ;;  %v3830_v9 = vrot.slane %v7629_v57, 1  ;;  %v1927_v7 = vld [vmem:[#allocation2 + $0x3c] sm:$0xf]  ;;  %v1928_v24 = vld [vmem:[#allocation2 + $0x40] sm:$0xf] }
 0x1cd   :  { %v5819_v41 = vpop.f32.mrf.mxu1  ;;  %v10674_v23 = vpop.f32.mrf.mxu0  ;;  %6142 = vmatmul.mubr.bf16.gmra.mxu0 %v3458_v47  ;;  %v1661_v17 = vld [vmem:[#allocation2 + $0x1a0] sm:$0x1]  ;;  %v4213_v13 = vor.u32 %v4212_v2, %v4208_v40  ;;  %v4217_v26 = vrot.slane %v4215_v11, 1  ;;  %v4222_v31 = vshll.u32 %v10676_v44, 16  ;;  %v3476_v19 = vrot.slane %v3474_v42, 1 }
 0x1ce   :  { %11938 = vst [vmem:[#allocation54_spill] sm:$0xff] %v10674_v23  ;;  %5981 = vmatmul.mubr.bf16.gmra.mxu1 %v2946_v56  ;;  %v3831_v41 = vrot.slane %v8755_v49, 1  ;;  %6149 = vmatprep.mubr.bf16.mxu0 %v3829_v60  ;;  %v1662_v25 = vsel %vm9025_vm3, %v1340_v29, %v1661_v17  ;;  %v3472_v56 = vshrl.u32 %v10355_v61, 16  ;;  %v8921_v40 = vld [vmem:[#allocation2 + $0x100] sm:$0xf]  ;;  %v3470_v29 = vsel %vm2337_vm5, %v3465_v3, %v3469_v8 }
 0x1cf   :  { %v5578_v27 = vpop.f32.mrf.mxu0  ;;  %6310 = vmatprep.mubr.bf16.mxu1 %v4206_v50  ;;  %v5822_v39 = vpop.f32.mrf.mxu1  ;;  %1663 = vst [vmem:[#allocation2 + $0x1a0] sm:$0x1] %v1662_v25  ;;  %v7630_v11 = vcombine.low %v1906_v18, %v8921_v40  ;;  %v4218_v60 = vsel %vm2337_vm5, %v4213_v13, %v4217_v26  ;;  %v3479_v50 = vshll.u32 %v8755_v49, 16  ;;  %v4220_v25 = vshrl.u32 %v10676_v44, 16  ;;  %v1907_v3 = vld [vmem:[#allocation2 + $0x108] sm:$0xe] }
 0x1d0   :  { %v10685_v0 = vadd.f32 %v5822_v39, %v10537_v34  ;;  %v3832_v47 = vsel %vm2850_vm10, %v3830_v9, %v3831_v41  ;;  %v8758_v27 = vld [vmem:[#allocation2 + $0x104] ss:$0 sps:$4 sm:$0x11]   ;;  %v4227_v34 = vshll.u32 %v8760_v46, 16  ;;  %v10694_v61 = vcombine.low %v1927_v7, %v1928_v24  ;;  %v1929_v40 = vld [vmem:[#allocation2 + $0x48] sm:$0xf] }
 0x1d1   :  { %v10681_v28 = vpop.f32.mrf.mxu0  ;;  %v5824_v57 = vpop.f32.mrf.mxu1  ;;  %v3486_v41 = vshll.u32 %v10385_v21, 16  ;;  %v8763_v46 = vld [vmem:[#allocation2 + $0x44] ss:$0 sps:$4 sm:$0x11]   ;;  %v3477_v18 = vor.u32 %v3476_v19, %v3472_v56  ;;  %v3481_v8 = vrot.slane %v3479_v50, 1  ;;  %v3833_v13 = vrot.slane %v7630_v11, 1 }
 0x1d2   :  { %11939 = vst [vmem:[#allocation55_spill] sm:$0xff] %v10681_v28  ;;  %v4224_v57 = vrot.slane %v4222_v31, 1  ;;  %v3834_v26 = vrot.slane %v8758_v27, 1  ;;  %v4229_v7 = vrot.slane %v4227_v34, 1  ;;  %v3491_v11 = vshll.u32 %v8758_v27, 16 }
 0x1d3   :  { %v5583_v2 = vpop.f32.mrf.mxu0  ;;  %v5825_v17 = vpop.f32.mrf.mxu1  ;;  %v3482_v56 = vsel %vm2337_vm5, %v3477_v18, %v3481_v8  ;;  %v8761_v50 = vld [vmem:[#allocation2 + $0x110] ss:$0 sps:$4 sm:$0x11]   ;;  %v4239_v34 = vshll.u32 %v8763_v46, 16  ;;  %v1908_v18 = vld [vmem:[#allocation2 + $0x114] sm:$0xe] }
 0x1d4   :  { %v10697_v42 = vadd.f32 %v5825_v17, %v10548_v1  ;;  %v4225_v31 = vor.u32 %v4224_v57, %v4220_v25  ;;  %v4234_v1 = vshll.u32 %v10694_v61, 16  ;;  %v1930_v2 = vld [vmem:[#allocation2 + $0x4c] sm:$0xf]  ;;  %v3835_v19 = vsel %vm2850_vm10, %v3833_v13, %v3834_v26  ;;  %v10840_v23 = vld [vmem:[#allocation2 + $0x100] sm:$0xf] }
 0x1d5   :  { %v10691_v39 = vpop.f32.mrf.mxu0  ;;  %v5827_v9 = vpop.f32.mrf.mxu1  ;;  %6150 = vmatmul.mubr.bf16.gmra.mxu0 %v3470_v29  ;;  %v3488_v29 = vrot.slane %v3486_v41, 1  ;;  %v3493_v13 = vrot.slane %v3491_v11, 1  ;;  %v8764_v11 = vld [vmem:[#allocation2 + $0x11c] ss:$0 sps:$4 sm:$0x11]   ;;  %v3640_v10 = vshrl.u32 %v10639_v15, 16 }
 0x1d6   :  { %11940 = vst [vmem:[#allocation56_spill] sm:$0xff] %v10691_v39  ;;  %6311 = vmatmul.mubr.bf16.vlgmr.msra.gmra.mxu1 %v10620_v52  ;;  %6157 = vmatprep.mubr.bf16.mxu0 %v3832_v47  ;;  %v3484_v52 = vshrl.u32 %v10385_v21, 16  ;;  %v8922_v9 = vld [vmem:[#allocation2 + $0x10c] sm:$0xf]  ;;  %v4230_v25 = vsel %vm2337_vm5, %v4225_v31, %v4229_v7  ;;  %v3837_v31 = vrot.slane %v8761_v50, 1 }
 0x1d7   :  { %v5586_v49 = vpop.f32.mrf.mxu0  ;;  %6318 = vmatprep.mubr.bf16.mxu1 %v4218_v60  ;;  %v7631_v47 = vcombine.low %v1907_v3, %v8922_v9  ;;  %v3498_v3 = vshll.u32 %v10411_v33, 16  ;;  %v8766_v7 = vld [vmem:[#allocation2 + $0x50] ss:$0 sps:$4 sm:$0x11]   ;;  %v1931_v9 = vld [vmem:[#allocation2 + $0x54] sm:$0xf] }
 0x1d8   :  { %v5830_v24 = vpop.f32.mrf.mxu1  ;;  %v4236_v49 = vrot.slane %v4234_v1, 1  ;;  %v3489_v8 = vor.u32 %v3488_v29, %v3484_v52 }
 0x1d9   :  { %v10703_v17 = vadd.f32 %v5830_v24, %v10557_v55  ;;  %v4232_v55 = vshrl.u32 %v10694_v61, 16  ;;  %v10712_v24 = vcombine.low %v1929_v40, %v1930_v2  ;;  %v3836_v26 = vrot.slane %v7631_v47, 1 }
 0x1da   :  { %v5832_v60 = vpop.f32.mrf.mxu1  ;;  %v3494_v52 = vsel %vm2337_vm5, %v3489_v8, %v3493_v13  ;;  %v3503_v47 = vshll.u32 %v8761_v50, 16 }
 0x1db   :  { %v10709_v57 = vpop.f32.mrf.mxu0  ;;  %v4237_v40 = vor.u32 %v4236_v49, %v4232_v55  ;;  %v4246_v2 = vshll.u32 %v10712_v24, 16  ;;  %v1932_v60 = vld [vmem:[#allocation2 + $0x58] sm:$0xf]  ;;  %v3838_v29 = vsel %vm2850_vm10, %v3836_v26, %v3837_v31  ;;  %v4244_v49 = vshrl.u32 %v10712_v24, 16 }
 0x1dc   :  { %11941 = vst [vmem:[#allocation57_spill] sm:$0xff] %v10709_v57  ;;  %v5833_v21 = vpop.f32.mrf.mxu1  ;;  %v3505_v26 = vrot.slane %v3503_v47, 1 }
 0x1dd   :  { %v10715_v41 = vadd.f32 %v5833_v21, %v10567_v20  ;;  %6158 = vmatmul.mubr.bf16.gmra.mxu0 %v3482_v56  ;;  %v5591_v27 = vpop.f32.mrf.mxu0  ;;  %v4241_v20 = vrot.slane %v4239_v34, 1  ;;  %v3496_v56 = vshrl.u32 %v10411_v33, 16  ;;  %v8923_v21 = vld [vmem:[#allocation2 + $0x118] sm:$0xf] }
 0x1de   :  { %6319 = vmatmul.mubr.bf16.gmra.mxu1 %v10642_v38  ;;  %v5835_v46 = vpop.f32.mrf.mxu1  ;;  %6165 = vmatprep.mubr.bf16.mxu0 %v3835_v19  ;;  %v3500_v38 = vrot.slane %v3498_v3, 1  ;;  %v7632_v27 = vcombine.low %v1908_v18, %v8923_v21  ;;  %v3510_v3 = vshll.u32 %v10430_v32, 16  ;;  %v1909_v18 = vld [vmem:[#allocation2 + $0x120] sm:$0xe] }
 0x1df   :  { %6326 = vmatprep.mubr.bf16.mxu1 %v4230_v25  ;;  %v10719_v1 = vpop.f32.mrf.mxu0  ;;  %v4251_v25 = vshll.u32 %v8766_v7, 16  ;;  %v4242_v55 = vsel %vm2337_vm5, %v4237_v40, %v4241_v20  ;;  %v4248_v46 = vrot.slane %v4246_v2, 1  ;;  %v3840_v7 = vrot.slane %v8764_v11, 1  ;;  %v8770_v40 = vld [vmem:[#allocation2 + $0x5c] ss:$0 sps:$4 sm:$0x11]  }
 0x1e0   :  { %11942 = vst [vmem:[#allocation58_spill] sm:$0xff] %v10719_v1  ;;  %v10729_v1 = vcombine.low %v1931_v9, %v1932_v60  ;;  %v3501_v13 = vor.u32 %v3500_v38, %v3496_v56  ;;  %v3839_v31 = vrot.slane %v7632_v27, 1 }
 0x1e1   :  { %v5594_v19 = vpop.f32.mrf.mxu0  ;;  %v4249_v9 = vor.u32 %v4248_v46, %v4244_v49  ;;  %v4253_v60 = vrot.slane %v4251_v25, 1  ;;  %v3515_v49 = vshll.u32 %v8764_v11, 16  ;;  %v8768_v25 = vld [vmem:[#allocation2 + $0x128] ss:$0 sps:$4 sm:$0x11]   ;;  %v4263_v46 = vshll.u32 %v8770_v40, 16 }
 0x1e2   :  { %v4258_v21 = vshll.u32 %v10729_v1, 16  ;;  %v3506_v27 = vsel %vm2337_vm5, %v3501_v13, %v3505_v26  ;;  %v3841_v47 = vsel %vm2850_vm10, %v3839_v31, %v3840_v7  ;;  %v3843_v7 = vrot.slane %v8768_v25, 1  ;;  %v8773_v40 = vld [vmem:[#allocation2 + $0x68] ss:$0 sps:$4 sm:$0x11]  }
 0x1e3   :  { %v5838_v33 = vpop.f32.mrf.mxu1  ;;  %v3517_v26 = vrot.slane %v3515_v49, 1  ;;  %v3527_v49 = vshll.u32 %v8768_v25, 16 }
 0x1e4   :  { %v10734_v50 = vadd.f32 %v5838_v33, %v10578_v62  ;;  %v3508_v62 = vshrl.u32 %v10430_v32, 16  ;;  %v3512_v33 = vrot.slane %v3510_v3, 1  ;;  %v4260_v32 = vrot.slane %v4258_v21, 1 }
 0x1e5   :  { %v10726_v34 = vpop.f32.mrf.mxu0  ;;  %6166 = vmatmul.mubr.bf16.gmra.mxu0 %v3494_v52  ;;  %v5840_v20 = vpop.f32.mrf.mxu1  ;;  %v1934_v52 = vld [vmem:[#allocation2 + $0x64] sm:$0xf]  ;;  %v4265_v21 = vrot.slane %v4263_v46, 1  ;;  %v4275_v46 = vshll.u32 %v8773_v40, 16 }
 0x1e6   :  { %11943 = vst [vmem:[#allocation59_spill] sm:$0xff] %v10726_v34  ;;  %6327 = vmatmul.mubr.bf16.gmra.mxu1 %v10676_v44  ;;  %11944 = vst [vmem:[#allocation60_spill] sm:$0xff] %v10734_v50  ;;  %6173 = vmatprep.mubr.bf16.mxu0 %v3838_v29  ;;  %v1933_v44 = vld [vmem:[#allocation2 + $0x60] sm:$0xf]  ;;  %v8924_v29 = vld [vmem:[#allocation2 + $0x124] sm:$0xf]  ;;  %v4254_v20 = vsel %vm2337_vm5, %v4249_v9, %v4253_v60 }
 0x1e7   :  { %v5599_v8 = vpop.f32.mrf.mxu0  ;;  %6334 = vmatprep.mubr.bf16.mxu1 %v4242_v55  ;;  %v5841_v19 = vpop.f32.mrf.mxu1  ;;  %v7633_v55 = vcombine.low %v1909_v18, %v8924_v29  ;;  %v10747_v3 = vcombine.low %v1933_v44, %v1934_v52  ;;  %v3522_v18 = vshll.u32 %v10442_v16, 16  ;;  %v1910_v29 = vld [vmem:[#allocation2 + $0x12c] sm:$0xe] }
 0x1e8   :  { %v10741_v38 = vadd.f32 %v5841_v19, %v10586_v12  ;;  %v3513_v12 = vor.u32 %v3512_v33, %v3508_v62  ;;  %v1936_v62 = vld [vmem:[#allocation2 + $0x70] sm:$0xf]  ;;  %v3520_v33 = vshrl.u32 %v10442_v16, 16 }
 0x1e9   :  { %v10736_v2 = vpop.f32.mrf.mxu0  ;;  %v5843_v8 = vpop.f32.mrf.mxu1  ;;  %v3842_v31 = vrot.slane %v7633_v55, 1  ;;  %v4270_v19 = vshll.u32 %v10747_v3, 16  ;;  %v4268_v16 = vshrl.u32 %v10747_v3, 16 }
 0x1ea   :  { %11945 = vst [vmem:[#allocation61_spill] sm:$0xff] %v10736_v2  ;;  %11946 = vst [vmem:[#allocation62_spill] sm:$0xff] %v10741_v38  ;;  %v4256_v2 = vshrl.u32 %v10729_v1, 16  ;;  %v3518_v8 = vsel %vm2337_vm5, %v3513_v12, %v3517_v26  ;;  %v3534_v12 = vshll.u32 %v10459_v4, 16  ;;  %v1911_v26 = vld [vmem:[#allocation2 + $0x138] sm:$0xe] }
 0x1eb   :  { %v5602_v56 = vpop.f32.mrf.mxu0  ;;  %v11980_v38 = vld [vmem:[#allocation16_spill] sm:$0xff] }
 0x1ec   :  { %v4261_v60 = vor.u32 %v4260_v32, %v4256_v2  ;;  %v3524_v56 = vrot.slane %v3522_v18, 1  ;;  %v8771_v2 = vld [vmem:[#allocation2 + $0x134] ss:$0 sps:$4 sm:$0x11]   ;;  %v4272_v18 = vrot.slane %v4270_v19, 1 }
 0x1ed   :  { %6174 = vmatmul.mubr.bf16.gmra.mxu0 %v3506_v27  ;;  %v5846_v13 = vpop.f32.mrf.mxu1  ;;  %v8925_v27 = vld [vmem:[#allocation2 + $0x130] sm:$0xf]  ;;  %v3846_v40 = vrot.slane %v8771_v2, 1 }
 0x1ee   :  { %6335 = vmatmul.mubr.bf16.gmra.mxu1 %v10694_v61  ;;  %6181 = vmatprep.mubr.bf16.mxu0 %v3841_v47  ;;  %v10754_v9 = vadd.f32 %v5846_v13, %v10605_v48  ;;  %v1935_v61 = vld [vmem:[#allocation2 + $0x6c] sm:$0xf]  ;;  %v7634_v47 = vcombine.low %v1910_v29, %v8925_v27  ;;  %v3844_v48 = vsel %vm2850_vm10, %v3842_v31, %v3843_v7  ;;  %v10774_v27 = vld [vmem:[#allocation2 + $0x7c] sm:$0xf] }
 0x1ef   :  { %6342 = vmatprep.mubr.bf16.mxu1 %v4254_v20  ;;  %v5848_v44 = vpop.f32.mrf.mxu1  ;;  %v4266_v13 = vsel %vm2337_vm5, %v4261_v60, %v4265_v21  ;;  %v10767_v29 = vcombine.low %v1935_v61, %v1936_v62  ;;  %v3525_v31 = vor.u32 %v3524_v56, %v3520_v33  ;;  %v8776_v60 = vld [vmem:[#allocation2 + $0x74] ss:$0 sps:$4 sm:$0x11]   ;;  %v4273_v19 = vor.u32 %v4272_v18, %v4268_v16  ;;  %v1937_v62 = vld [vmem:[#allocation2 + $0x78] sm:$0xf] }
 0x1f0   :  { %v10751_v11 = vpop.f32.mrf.mxu0  ;;  %11948 = vst [vmem:[#allocation64_spill] sm:$0xff] %v10754_v9  ;;  %v3845_v7 = vrot.slane %v7634_v47, 1  ;;  %v3539_v47 = vshll.u32 %v8771_v2, 16 }
 0x1f1   :  { %11947 = vst [vmem:[#allocation63_spill] sm:$0xff] %v10751_v11  ;;  %v5849_v55 = vpop.f32.mrf.mxu1  ;;  %v4282_v61 = vshll.u32 %v10767_v29, 16  ;;  %v4280_v18 = vshrl.u32 %v10767_v29, 16 }
 0x1f2   :  { %v5607_v52 = vpop.f32.mrf.mxu0  ;;  %v10763_v32 = vadd.f32 %v5849_v55, %v10616_v5  ;;  %v3529_v5 = vrot.slane %v3527_v49, 1  ;;  %v3532_v55 = vshrl.u32 %v10459_v4, 16  ;;  %v3847_v56 = vsel %vm2850_vm10, %v3845_v7, %v3846_v40  ;;  %v8774_v49 = vld [vmem:[#allocation2 + $0x140] ss:$0 sps:$4 sm:$0x11]  }
 0x1f3   :  { %v5851_v44 = vpop.f32.mrf.mxu1  ;;  %v4277_v52 = vrot.slane %v4275_v46, 1  ;;  %v10784_v4 = vcombine.low %v1937_v62, %v10774_v27  ;;  %v3849_v7 = vrot.slane %v8774_v49, 1  ;;  %v10788_v40 = vld [vmem:[#allocation2 + $0x80] ss:$0 sps:$4 sm:$0x11]  }
 0x1f4   :  { %v10759_v20 = vpop.f32.mrf.mxu0  ;;  %11950 = vst [vmem:[#allocation66_spill] sm:$0xff] %v10763_v32  ;;  %v3530_v33 = vsel %vm2337_vm5, %v3525_v31, %v3529_v5  ;;  %v4287_v44 = vshll.u32 %v8776_v60, 16  ;;  %v3541_v31 = vrot.slane %v3539_v47, 1  ;;  %v1912_v60 = vld [vmem:[#allocation2 + $0x144] sm:$0xe]  ;;  %v4299_v47 = vshll.u32 %v10788_v40, 16 }
 0x1f5   :  { %11949 = vst [vmem:[#allocation65_spill] sm:$0xff] %v10759_v20  ;;  %6182 = vmatmul.mubr.bf16.gmra.mxu0 %v3518_v8  ;;  %v3536_v8 = vrot.slane %v3534_v12, 1  ;;  %v4278_v46 = vsel %vm2337_vm5, %v4273_v19, %v4277_v52  ;;  %v3546_v12 = vshll.u32 %v10484_v58, 16  ;;  %v1939_v62 = vld [vmem:[#allocation2 + $0x84] sm:$0xf] }
 0x1f6   :  { %v5610_v25 = vpop.f32.mrf.mxu0  ;;  %6343 = vmatmul.mubr.bf16.gmra.mxu1 %v10712_v24  ;;  %6189 = vmatprep.mubr.bf16.mxu0 %v3844_v48  ;;  %v8926_v24 = vld [vmem:[#allocation2 + $0x13c] sm:$0xf]  ;;  %v4289_v52 = vrot.slane %v4287_v44, 1  ;;  %v8781_v20 = vld [vmem:[#allocation2 + $0x158] ss:$0 sps:$4 sm:$0x11]  }
 0x1f7   :  { %6350 = vmatprep.mubr.bf16.mxu1 %v4266_v13  ;;  %v7635_v48 = vcombine.low %v1911_v26, %v8926_v24  ;;  %v4284_v25 = vrot.slane %v4282_v61, 1  ;;  %v3537_v2 = vor.u32 %v3536_v8, %v3532_v55  ;;  %v4294_v61 = vshll.u32 %v10784_v4, 16  ;;  %v10791_v24 = vld [vmem:[#allocation2 + $0x88] sm:$0xf] }
 0x1f9   :  { %v10771_v21 = vpop.f32.mrf.mxu0  ;;  %v3848_v5 = vrot.slane %v7635_v48, 1  ;;  %v4285_v19 = vor.u32 %v4284_v25, %v4280_v18  ;;  %v3542_v55 = vsel %vm2337_vm5, %v3537_v2, %v3541_v31  ;;  %v8777_v48 = vld [vmem:[#allocation2 + $0x14c] ss:$0 sps:$4 sm:$0x11]   ;;  %v4292_v18 = vshrl.u32 %v10784_v4, 16 }
 0x1fa   :  { %11951 = vst [vmem:[#allocation67_spill] sm:$0xff] %v10771_v21  ;;  %v4296_v25 = vrot.slane %v4294_v61, 1  ;;  %v10806_v31 = vld [vmem:[#allocation2 + $0x8c] ss:$0 sps:$4 sm:$0x11]  }
 0x1fb   :  { %v5615_v13 = vpop.f32.mrf.mxu0  ;;  %v3850_v8 = vsel %vm2850_vm10, %v3848_v5, %v3849_v7  ;;  %v4290_v44 = vsel %vm2337_vm5, %v4285_v19, %v4289_v52  ;;  %v1913_v5 = vld [vmem:[#allocation2 + $0x150] sm:$0xe]  ;;  %v3852_v19 = vrot.slane %v8777_v48, 1 }
 0x1fc   :  { %v3544_v13 = vshrl.u32 %v10484_v58, 16  ;;  %v1941_v52 = vld [vmem:[#allocation2 + $0x90] sm:$0xf]  ;;  %v4297_v61 = vor.u32 %v4296_v25, %v4292_v18  ;;  %v3563_v18 = vshll.u32 %v8777_v48, 16  ;;  %v3570_v48 = vshll.u32 %v10527_v22, 16 }
 0x1fd   :  { %v10779_v16 = vpop.f32.mrf.mxu0  ;;  %6190 = vmatmul.mubr.bf16.gmra.mxu0 %v3530_v33  ;;  %v3551_v33 = vshll.u32 %v8774_v49, 16  ;;  %v3558_v49 = vshll.u32 %v10505_v30, 16 }
 0x1fe   :  { %11952 = vst [vmem:[#allocation68_spill] sm:$0xff] %v10779_v16  ;;  %6351 = vmatmul.mubr.bf16.gmra.mxu1 %v10729_v1  ;;  %6197 = vmatprep.mubr.bf16.mxu0 %v3847_v56  ;;  %v3548_v1 = vrot.slane %v3546_v12, 1  ;;  %v8927_v56 = vld [vmem:[#allocation2 + $0x148] sm:$0xf]  ;;  %v10809_v16 = vld [vmem:[#allocation2 + $0xd0] sm:$0xf] }
 0x1ff   :  { %v5618_v26 = vpop.f32.mrf.mxu0  ;;  %6358 = vmatprep.mubr.bf16.mxu1 %v4278_v46  ;;  %v7636_v46 = vcombine.low %v1912_v60, %v8927_v56  ;;  %v3553_v2 = vrot.slane %v3551_v33, 1  ;;  %v10816_v33 = vld [vmem:[#allocation2 + $0xd4] ss:$0 sps:$4 sm:$0x11]  }
 0x200   :  { %v10800_v26 = vcombine.low %v1939_v62, %v10791_v24  ;;  %v3549_v12 = vor.u32 %v3548_v1, %v3544_v13  ;;  %v4301_v62 = vrot.slane %v4299_v47, 1  ;;  %v10814_v1 = vld [vmem:[#allocation2 + $0x94] sm:$0xf]  ;;  %v4753_v34 = vrot.slane %v10816_v33, 1 }
 0x201   :  { %v3851_v60 = vrot.slane %v7636_v46, 1  ;;  %v3560_v46 = vrot.slane %v3558_v49, 1  ;;  %v10826_v49 = vcombine.low %v1941_v52, %v10814_v1 }
 0x202   :  { %v4306_v56 = vshll.u32 %v10800_v26, 16  ;;  %v3554_v47 = vsel %vm2337_vm5, %v3549_v12, %v3553_v2  ;;  %v4302_v57 = vsel %vm2337_vm5, %v4297_v61, %v4301_v62  ;;  %v4304_v39 = vshrl.u32 %v10800_v26, 16  ;;  %v10837_v61 = vld [vmem:[#allocation2 + $0x98] ss:$0 sps:$4 sm:$0x11]  }
 0x203   :  { %v3853_v21 = vsel %vm2850_vm10, %v3851_v60, %v3852_v19  ;;  %v3565_v19 = vrot.slane %v3563_v18, 1  ;;  %v1914_v62 = vld [vmem:[#allocation2 + $0x15c] sm:$0xe]  ;;  %v4318_v28 = vshll.u32 %v10826_v49, 16 }
 0x205   :  { %v10802_v58 = vpop.f32.mrf.mxu0  ;;  %6198 = vmatmul.mubr.bf16.gmra.mxu0 %v3542_v55  ;;  %v2032_v55 = vld [vmem:[#allocation2 + $0xcc] sm:$0xe]  ;;  %v4320_v9 = vrot.slane %v4318_v28, 1 }
 0x206   :  { %6359 = vmatmul.mubr.bf16.gmra.mxu1 %v10747_v3  ;;  %6205 = vmatprep.mubr.bf16.mxu0 %v3850_v8  ;;  %v3556_v3 = vshrl.u32 %v10505_v30, 16  ;;  %v7723_v8 = vcombine.low %v2032_v55, %v10809_v16  ;;  %v4311_v30 = vshll.u32 %v10806_v31, 16  ;;  %v4308_v55 = vrot.slane %v4306_v56, 1 }
 0x207   :  { %v5623_v7 = vpop.f32.mrf.mxu0  ;;  %6366 = vmatprep.mubr.bf16.mxu1 %v4290_v44  ;;  %v8928_v44 = vld [vmem:[#allocation2 + $0x154] sm:$0xf]  ;;  %v3855_v56 = vrot.slane %v8781_v20, 1 }
 0x208   :  { %v7637_v7 = vcombine.low %v1913_v5, %v8928_v44  ;;  %v4752_v11 = vrot.slane %v7723_v8, 1  ;;  %v3561_v60 = vor.u32 %v3560_v46, %v3556_v3  ;;  %v4309_v44 = vor.u32 %v4308_v55, %v4304_v39  ;;  %v10843_v3 = vld [vmem:[#allocation2 + $0xa0] sm:$0xf]  ;;  %v10845_v46 = vld [vmem:[#allocation2 + $0x104] ss:$0 sps:$4 sm:$0x11]  }
 0x209   :  { %v10812_v13 = vpop.f32.mrf.mxu0  ;;  %v3575_v55 = vshll.u32 %v8781_v20, 16  ;;  %v4759_v32 = vrot.slane %v10845_v46, 1  ;;  %v5735_v20 = vadd.f32 %v10445_v63, %v10051_v36  ;;  %v10875_v63 = vld [vmem:[#allocation2 + $0xa4] ss:$0 sps:$4 sm:$0x11]  }
 0x20a   :  { %v10829_v12 = vsel %vm2850_vm10, %v4752_v11, %v4753_v34  ;;  %v3854_v52 = vrot.slane %v7637_v7, 1  ;;  %v1943_v34 = vld [vmem:[#allocation2 + $0x9c] sm:$0xf]  ;;  %v8929_v7 = vld [vmem:[#allocation2 + $0x160] sm:$0xf] }
 0x20b   :  { %v5626_v25 = vpop.f32.mrf.mxu0  ;;  %11953 = vst [vmem:[#allocation69_spill] sm:$0xff] %v10829_v12  ;;  %v7638_v18 = vcombine.low %v1914_v62, %v8929_v7  ;;  %v10854_v12 = vld [vmem:[#allocation2 + $0x164] ss:$0 sps:$4 sm:$0x11]   ;;  %v4316_v7 = vshrl.u32 %v10826_v49, 16  ;;  %v3577_v28 = vrot.slane %v3575_v55, 1 }
 0x20c   :  { %v4313_v25 = vrot.slane %v4311_v30, 1  ;;  %v3566_v30 = vsel %vm2337_vm5, %v3561_v60, %v3565_v19  ;;  %v3582_v19 = vshll.u32 %v10546_v54, 16  ;;  %v3858_v36 = vrot.slane %v10854_v12, 1 }
 0x20d   :  { %v10832_v2 = vpop.f32.mrf.mxu0  ;;  %6206 = vmatmul.mubr.bf16.gmra.mxu0 %v3554_v47  ;;  %v2034_v47 = vld [vmem:[#allocation2 + $0xfc] sm:$0xe]  ;;  %v3580_v55 = vshrl.u32 %v10546_v54, 16 }
 0x20e   :  { %v10834_v5 = vpop.f32.mrf.mxu1  ;;  %6367 = vmatmul.mubr.bf16.gmra.mxu1 %v10767_v29  ;;  %6213 = vmatprep.mubr.bf16.mxu0 %v3853_v21  ;;  %v3568_v29 = vshrl.u32 %v10527_v22, 16  ;;  %v3572_v21 = vrot.slane %v3570_v48, 1  ;;  %v4323_v22 = vshll.u32 %v10837_v61, 16  ;;  %v4314_v62 = vsel %vm2337_vm5, %v4309_v44, %v4313_v25 }
 0x20f   :  { %11954 = vst [vmem:[#allocation70_spill] sm:$0xff] %v10834_v5  ;;  %6374 = vmatprep.mubr.bf16.mxu1 %v4302_v57  ;;  %v5631_v11 = vpop.f32.mrf.mxu0  ;;  %v7725_v57 = vcombine.low %v2034_v47, %v10840_v23 }
 0x210   :  { %v5856_v8 = vpop.f32.mrf.mxu1  ;;  %v3573_v44 = vor.u32 %v3572_v21, %v3568_v29  ;;  %v1945_v29 = vld [vmem:[#allocation2 + $0xa8] sm:$0xf]  ;;  %v10880_v21 = vld [vmem:[#allocation2 + $0xac] sm:$0xf] }
 0x211   :  { %v10848_v11 = vpop.f32.mrf.mxu0  ;;  %v3856_v8 = vsel %vm2850_vm10, %v3854_v52, %v3855_v56  ;;  %v4758_v5 = vrot.slane %v7725_v57, 1  ;;  %v1915_v52 = vld [vmem:[#allocation2 + $0x168] sm:$0xe] }
 0x212   :  { %v10850_v39 = vpop.f32.mrf.mxu1 }
 0x213   :  { %11955 = vst [vmem:[#allocation71_spill] sm:$0xff] %v10850_v39  ;;  %v5634_v47 = vpop.f32.mrf.mxu0  ;;  %v10861_v39 = vcombine.low %v1943_v34, %v10843_v3  ;;  %v10866_v60 = vsel %vm2850_vm10, %v4758_v5, %v4759_v32  ;;  %v3857_v34 = vrot.slane %v7638_v18, 1  ;;  %v8930_v18 = vld [vmem:[#allocation2 + $0x16c] sm:$0xf] }
 0x214   :  { %v5859_v48 = vpop.f32.mrf.mxu1  ;;  %11956 = vst [vmem:[#allocation72_spill] sm:$0xff] %v10866_v60  ;;  %v4321_v47 = vor.u32 %v4320_v9, %v4316_v7  ;;  %v3587_v7 = vshll.u32 %v10854_v12, 16 }
 0x215   :  { %v6023_v57 = vpop.f32.mrf.mxu0  ;;  %6214 = vmatmul.mubr.bf16.gmra.mxu0 %v3566_v30  ;;  %v4325_v48 = vrot.slane %v4323_v22, 1  ;;  %v4330_v60 = vshll.u32 %v10861_v39, 16  ;;  %v11959_v30 = vld [vmem:[#allocation3_spill] sm:$0xff]  ;;  %v3859_v22 = vsel %vm2850_vm10, %v3857_v34, %v3858_v36  ;;  %v3594_v34 = vshll.u32 %v10562_v59, 16 }
 0x216   :  { %v10869_v56 = vpop.f32.mrf.mxu1  ;;  %6375 = vmatmul.mubr.bf16.gmra.mxu1 %v10784_v4  ;;  %v10872_v25 = vadd.f32 %v6023_v57, %v5735_v20  ;;  %6221 = vmatprep.mubr.bf16.mxu0 %v3856_v8  ;;  %v5738_v4 = vadd.f32 %v10455_v14, %v11959_v30  ;;  %v3584_v8 = vrot.slane %v3582_v19, 1  ;;  %v8787_v14 = vld [vmem:[#allocation2 + $0x170] ss:$0 sps:$4 sm:$0x11]   ;;  %v4328_v19 = vshrl.u32 %v10861_v39, 16 }
 0x217   :  { %11957 = vst [vmem:[#allocation73_spill] sm:$0xff] %v10869_v56  ;;  %6382 = vmatprep.mubr.bf16.mxu1 %v4314_v62  ;;  %v6025_v5 = vpop.f32.mrf.mxu0  ;;  %v7639_v62 = vcombine.low %v1915_v52, %v8930_v18  ;;  %v4326_v54 = vsel %vm2337_vm5, %v4321_v47, %v4325_v48  ;;  %v4332_v52 = vrot.slane %v4330_v60, 1  ;;  %v10894_v18 = vcombine.low %v1945_v29, %v10880_v21  ;;  %v1916_v36 = vld [vmem:[#allocation2 + $0x174] sm:$0xe] }
 0x218   :  { %11958 = vst [vmem:[#allocation74_spill] sm:$0xff] %v10872_v25  ;;  %v5864_v32 = vpop.f32.mrf.mxu1  ;;  %v4335_v5 = vshll.u32 %v10875_v63, 16  ;;  %v3589_v60 = vrot.slane %v3587_v7, 1  ;;  %v3861_v29 = vrot.slane %v8787_v14, 1  ;;  %v8931_v7 = vld [vmem:[#allocation2 + $0x178] sm:$0xf] }
 0x219   :  { %v6026_v57 = vpop.f32.mrf.mxu0  ;;  %v3578_v32 = vsel %vm2337_vm5, %v3573_v44, %v3577_v28  ;;  %v11962_v44 = vld [vmem:[#allocation5_spill] sm:$0xff]  ;;  %v3860_v48 = vrot.slane %v7639_v62, 1  ;;  %v7640_v62 = vcombine.low %v1916_v36, %v8931_v7 }
 0x21a   :  { %v10883_v20 = vpop.f32.mrf.mxu1  ;;  %v10886_v9 = vadd.f32 %v6026_v57, %v5738_v4  ;;  %v5743_v28 = vadd.f32 %v10464_v51, %v11962_v44  ;;  %v10904_v57 = vld [vmem:[#allocation2 + $0xb0] ss:$0 sps:$4 sm:$0x11]   ;;  %v4333_v44 = vor.u32 %v4332_v52, %v4328_v19  ;;  %v8790_v52 = vld [vmem:[#allocation2 + $0x17c] ss:$0 sps:$4 sm:$0x11]  }
 0x21b   :  { %11960 = vst [vmem:[#allocation3_spill] sm:$0xff] %v10883_v20  ;;  %v6028_v25 = vpop.f32.mrf.mxu0  ;;  %v11965_v20 = vld [vmem:[#allocation7_spill] sm:$0xff]  ;;  %v3862_v19 = vsel %vm2850_vm10, %v3860_v48, %v3861_v29 }
 0x21c   :  { %11961 = vst [vmem:[#allocation75_spill] sm:$0xff] %v10886_v9  ;;  %v5867_v30 = vpop.f32.mrf.mxu1  ;;  %v3585_v25 = vor.u32 %v3584_v8, %v3580_v55  ;;  %v4337_v9 = vrot.slane %v4335_v5, 1  ;;  %v10909_v55 = vld [vmem:[#allocation2 + $0xb8] sm:$0xf]  ;;  %v3592_v8 = vshrl.u32 %v10562_v59, 16 }
 0x21d   :  { %v6031_v4 = vpop.f32.mrf.mxu0  ;;  %6222 = vmatmul.mubr.bf16.gmra.mxu0 %v3578_v32  ;;  %v5746_v32 = vadd.f32 %v10472_v43, %v11965_v20  ;;  %v4347_v43 = vshll.u32 %v10904_v57, 16 }
 0x21e   :  { %v10899_v12 = vpop.f32.mrf.mxu1  ;;  %6383 = vmatmul.mubr.bf16.gmra.mxu1 %v10800_v26  ;;  %v10902_v47 = vadd.f32 %v6031_v4, %v5743_v28  ;;  %6229 = vmatprep.mubr.bf16.mxu0 %v3859_v22  ;;  %v1947_v26 = vld [vmem:[#allocation2 + $0xb4] sm:$0xf]  ;;  %v3596_v22 = vrot.slane %v3594_v34, 1  ;;  %v3599_v4 = vshll.u32 %v8787_v14, 16  ;;  %v3590_v5 = vsel %vm2337_vm5, %v3585_v25, %v3589_v60  ;;  %v11968_v14 = vld [vmem:[#allocation9_spill] sm:$0xff] }
 0x21f   :  { %11963 = vst [vmem:[#allocation5_spill] sm:$0xff] %v10899_v12  ;;  %6390 = vmatprep.mubr.bf16.mxu1 %v4326_v54  ;;  %v6033_v30 = vpop.f32.mrf.mxu0  ;;  %v4342_v12 = vshll.u32 %v10894_v18, 16  ;;  %v4338_v59 = vsel %vm2337_vm5, %v4333_v44, %v4337_v9  ;;  %v4340_v34 = vshrl.u32 %v10894_v18, 16  ;;  %v10922_v7 = vcombine.low %v1947_v26, %v10909_v55  ;;  %v1917_v60 = vld [vmem:[#allocation2 + $0x180] sm:$0xe] }
 0x220   :  { %11964 = vst [vmem:[#allocation76_spill] sm:$0xff] %v10902_v47  ;;  %v5872_v51 = vpop.f32.mrf.mxu1  ;;  %v3601_v9 = vrot.slane %v3599_v4, 1  ;;  %v3864_v26 = vrot.slane %v8790_v52, 1  ;;  %v11972_v47 = vld [vmem:[#allocation11_spill] sm:$0xff] }
 0x221   :  { %v6034_v28 = vpop.f32.mrf.mxu0  ;;  %v4344_v36 = vrot.slane %v4342_v12, 1  ;;  %v3863_v12 = vrot.slane %v7640_v62, 1 }
 0x222   :  { %v10912_v54 = vpop.f32.mrf.mxu1  ;;  %v10914_v51 = vadd.f32 %v6034_v28, %v5746_v32  ;;  %v5751_v32 = vadd.f32 %v10490_v35, %v11968_v14  ;;  %v11969_v28 = vld [vmem:[#allocation43_spill] sm:$0xff] }
 0x223   :  { %11966 = vst [vmem:[#allocation7_spill] sm:$0xff] %v10912_v54  ;;  %v6036_v30 = vpop.f32.mrf.mxu0  ;;  %v3606_v25 = vshll.u32 %v11969_v28, 16  ;;  %v4349_v54 = vrot.slane %v4347_v43, 1  ;;  %v3865_v43 = vsel %vm2850_vm10, %v3863_v12, %v3864_v26  ;;  %v1918_v12 = vld [vmem:[#allocation2 + $0x18c] sm:$0xe] }
 0x224   :  { %11967 = vst [vmem:[#allocation77_spill] sm:$0xff] %v10914_v51  ;;  %v5875_v20 = vpop.f32.mrf.mxu1  ;;  %v10932_v30 = vld [vmem:[#allocation2 + $0xbc] ss:$0 sps:$4 sm:$0x11]   ;;  %v4345_v51 = vor.u32 %v4344_v36, %v4340_v34  ;;  %v3611_v36 = vshll.u32 %v8790_v52, 16 }
 0x225   :  { %v6039_v29 = vpop.f32.mrf.mxu0  ;;  %6230 = vmatmul.mubr.bf16.gmra.mxu0 %v3590_v5  ;;  %v3597_v20 = vor.u32 %v3596_v22, %v3592_v8  ;;  %v11973_v5 = vld [vmem:[#allocation34_spill] sm:$0xff]  ;;  %v10937_v8 = vld [vmem:[#allocation2 + $0xc4] sm:$0xf]  ;;  %v3604_v22 = vshrl.u32 %v11969_v28, 16  ;;  %v3608_v4 = vrot.slane %v3606_v25, 1  ;;  %v4352_v25 = vshrl.u32 %v10922_v7, 16 }
 0x226   :  { %v10927_v48 = vpop.f32.mrf.mxu1  ;;  %6391 = vmatmul.mubr.bf16.gmra.mxu1 %v10826_v49  ;;  %v10930_v44 = vadd.f32 %v6039_v29, %v5751_v32  ;;  %6237 = vmatprep.mubr.bf16.mxu0 %v3862_v19  ;;  %v5754_v56 = vadd.f32 %v11973_v5, %v11972_v47  ;;  %v1949_v49 = vld [vmem:[#allocation2 + $0xc0] sm:$0xf]  ;;  %v8932_v19 = vld [vmem:[#allocation2 + $0x184] sm:$0xf]  ;;  %v4359_v47 = vshll.u32 %v10932_v30, 16  ;;  %v4350_v28 = vsel %vm2337_vm5, %v4345_v51, %v4349_v54 }
 0x227   :  { %11970 = vst [vmem:[#allocation9_spill] sm:$0xff] %v10927_v48  ;;  %6398 = vmatprep.mubr.bf16.mxu1 %v4338_v59  ;;  %v6041_v14 = vpop.f32.mrf.mxu0  ;;  %v4354_v48 = vshll.u32 %v10922_v7, 16  ;;  %v7641_v62 = vcombine.low %v1917_v60, %v8932_v19  ;;  %v3602_v29 = vsel %vm2337_vm5, %v3597_v20, %v3601_v9  ;;  %v10950_v19 = vcombine.low %v1949_v49, %v10937_v8  ;;  %v11977_v20 = vld [vmem:[#allocation35_spill] sm:$0xff]  ;;  %v11978_v9 = vld [vmem:[#allocation46_spill] sm:$0xff] }
 0x228   :  { %11971 = vst [vmem:[#allocation43_spill] sm:$0xff] %v10930_v44  ;;  %v5880_v35 = vpop.f32.mrf.mxu1  ;;  %v3613_v51 = vrot.slane %v3611_v36, 1  ;;  %v4361_v44 = vrot.slane %v4359_v47, 1 }
 0x229   :  { %v6042_v32 = vpop.f32.mrf.mxu0  ;;  %v8794_v35 = vld [vmem:[#allocation2 + $0x188] ss:$0 sps:$4 sm:$0x11]   ;;  %v4356_v60 = vrot.slane %v4354_v48, 1  ;;  %v3866_v48 = vrot.slane %v7641_v62, 1 }
 0x22a   :  { %v10940_v59 = vpop.f32.mrf.mxu1  ;;  %v10943_v34 = vadd.f32 %v6042_v32, %v5754_v56  ;;  %v3618_v32 = vshll.u32 %v11978_v9, 16  ;;  %v3867_v49 = vrot.slane %v8794_v35, 1 }
 0x22b   :  { %11974 = vst [vmem:[#allocation11_spill] sm:$0xff] %v10940_v59  ;;  %v6044_v5 = vpop.f32.mrf.mxu0  ;;  %v11976_v59 = vld [vmem:[#allocation14_spill] sm:$0xff] }
 0x22c   :  { %11975 = vst [vmem:[#allocation34_spill] sm:$0xff] %v10943_v34  ;;  %v5883_v14 = vpop.f32.mrf.mxu1  ;;  %v5759_v56 = vadd.f32 %v11977_v20, %v11976_v59  ;;  %v10960_v5 = vld [vmem:[#allocation2 + $0xc8] ss:$0 sps:$4 sm:$0x11]   ;;  %v4357_v34 = vor.u32 %v4356_v60, %v4352_v25  ;;  %v3868_v47 = vsel %vm2850_vm10, %v3866_v48, %v3867_v49  ;;  %v1919_v48 = vld [vmem:[#allocation2 + $0x198] sm:$0xe] }
 0x22d   :  { %v6047_v26 = vpop.f32.mrf.mxu0  ;;  %6238 = vmatmul.mubr.bf16.gmra.mxu0 %v3602_v29  ;;  %v3609_v14 = vor.u32 %v3608_v4, %v3604_v22  ;;  %v11981_v29 = vld [vmem:[#allocation36_spill] sm:$0xff]  ;;  %v3616_v22 = vshrl.u32 %v11978_v9, 16  ;;  %v3620_v4 = vrot.slane %v3618_v32, 1  ;;  %v10972_v60 = vld [vmem:[#allocation2 + $0x194] ss:$0 sps:$4 sm:$0x11]  }
 0x22e   :  { %v10955_v52 = vpop.f32.mrf.mxu1  ;;  %6399 = vmatmul.mubr.bf16.gmra.mxu1 %v10861_v39  ;;  %v10958_v54 = vadd.f32 %v6047_v26, %v5759_v56  ;;  %6245 = vmatprep.mubr.bf16.mxu0 %v3865_v43  ;;  %v5762_v50 = vadd.f32 %v11981_v29, %v11980_v38  ;;  %v1951_v39 = vld [vmem:[#allocation2 + $0xcc] sm:$0xf]  ;;  %v8933_v43 = vld [vmem:[#allocation2 + $0x190] sm:$0xf]  ;;  %v3623_v56 = vshll.u32 %v8794_v35, 16  ;;  %v4371_v38 = vshll.u32 %v10960_v5, 16 }
 0x22f   :  { %11979 = vst [vmem:[#allocation14_spill] sm:$0xff] %v10955_v52  ;;  %6406 = vmatprep.mubr.bf16.mxu1 %v4350_v28  ;;  %v6049_v20 = vpop.f32.mrf.mxu0  ;;  %v4366_v52 = vshll.u32 %v10950_v19, 16  ;;  %v7642_v28 = vcombine.low %v1918_v12, %v8933_v43  ;;  %v3614_v25 = vsel %vm2337_vm5, %v3609_v14, %v3613_v51  ;;  %v4362_v9 = vsel %vm2337_vm5, %v4357_v34, %v4361_v44  ;;  %v11985_v35 = vld [vmem:[#allocation37_spill] sm:$0xff] }
 0x230   :  { %v5888_v59 = vpop.f32.mrf.mxu1  ;;  %v4364_v32 = vshrl.u32 %v10950_v19, 16  ;;  %v10978_v29 = vcombine.low %v1951_v39, %v10809_v16  ;;  %v11986_v14 = vld [vmem:[#allocation49_spill] sm:$0xff]  ;;  %v3625_v44 = vrot.slane %v3623_v56, 1  ;;  %v1953_v39 = vld [vmem:[#allocation2 + $0xf0] sm:$0xf] }
 0x231   :  { %v6050_v62 = vpop.f32.mrf.mxu0  ;;  %v4368_v12 = vrot.slane %v4366_v52, 1  ;;  %v3630_v51 = vshll.u32 %v11986_v14, 16  ;;  %v3869_v16 = vrot.slane %v7642_v28, 1  ;;  %v3870_v52 = vrot.slane %v10972_v60, 1 }
 0x232   :  { %v10966_v36 = vpop.f32.mrf.mxu1  ;;  %v10968_v26 = vadd.f32 %v6050_v62, %v5762_v50  ;;  %v11984_v50 = vld [vmem:[#allocation18_spill] sm:$0xff] }
 0x233   :  { %11982 = vst [vmem:[#allocation35_spill] sm:$0xff] %v10966_v36  ;;  %v6052_v20 = vpop.f32.mrf.mxu0  ;;  %v5767_v43 = vadd.f32 %v11985_v35, %v11984_v50  ;;  %v11989_v36 = vld [vmem:[#allocation19_spill] sm:$0xff]  ;;  %v3632_v56 = vrot.slane %v3630_v51, 1 }
 0x234   :  { %11983 = vst [vmem:[#allocation46_spill] sm:$0xff] %v10968_v26  ;;  %v5891_v59 = vpop.f32.mrf.mxu1  ;;  %v10989_v20 = vld [vmem:[#allocation2 + $0xf4] sm:$0xf]  ;;  %v4369_v26 = vor.u32 %v4368_v12, %v4364_v32  ;;  %v490_v32 = vld [vmem:[#allocation2 + $0x1a4] sm:$0x1]  ;;  %v3871_v12 = vsel %vm2850_vm10, %v3869_v16, %v3870_v52  ;;  %v3642_v16 = vshll.u32 %v10639_v15, 16 }
 0x235   :  { %v6055_v62 = vpop.f32.mrf.mxu0  ;;  %6246 = vmatmul.mubr.bf16.gmra.mxu0 %v3614_v25  ;;  %v3621_v59 = vor.u32 %v3620_v4, %v3616_v22  ;;  %v4378_v25 = vshll.u32 %v10978_v29, 16  ;;  %v3628_v4 = vshrl.u32 %v11986_v14, 16  ;;  %v4376_v14 = vshrl.u32 %v10978_v29, 16 }
 0x236   :  { %v10983_v49 = vpop.f32.mrf.mxu1  ;;  %6407 = vmatmul.mubr.bf16.gmra.mxu1 %v10894_v18  ;;  %v10986_v34 = vadd.f32 %v6055_v62, %v5767_v43  ;;  %6253 = vmatprep.mubr.bf16.mxu0 %v3868_v47  ;;  %v11990_v18 = vld [vmem:[#allocation38_spill] sm:$0xff]  ;;  %v8934_v47 = vld [vmem:[#allocation2 + $0x19c] sm:$0xf] }
 0x237   :  { %11987 = vst [vmem:[#allocation16_spill] sm:$0xff] %v10983_v49  ;;  %6414 = vmatprep.mubr.bf16.mxu1 %v4362_v9  ;;  %v6057_v35 = vpop.f32.mrf.mxu0  ;;  %v4373_v49 = vrot.slane %v4371_v38, 1  ;;  %v5770_v22 = vadd.f32 %v11990_v18, %v11989_v36  ;;  %v7643_v9 = vcombine.low %v1919_v48, %v8934_v47  ;;  %v3626_v62 = vsel %vm2337_vm5, %v3621_v59, %v3625_v44  ;;  %v8800_v18 = vld [vmem:[#allocation2 + $0x1a0] ss:$0 sps:$4 sm:$0x11]  }
 0x238   :  { %11988 = vst [vmem:[#allocation36_spill] sm:$0xff] %v10986_v34  ;;  %v5896_v50 = vpop.f32.mrf.mxu1  ;;  %v3635_v36 = vshll.u32 %v10972_v60, 16  ;;  %v4380_v47 = vrot.slane %v4378_v25, 1  ;;  %v4383_v59 = vshll.u32 %v10816_v33, 16  ;;  %v491_v44 = vsel %vm9025_vm3, 0, %v490_v32 }
 0x239   :  { %v6058_v43 = vpop.f32.mrf.mxu0  ;;  %v10999_v50 = vcombine.low %v1953_v39, %v10989_v20  ;;  %v4374_v48 = vsel %vm2337_vm5, %v4369_v26, %v4373_v49  ;;  %v11993_v39 = vld [vmem:[#allocation22_spill] sm:$0xff]  ;;  %492 = vst [vmem:[#allocation2 + $0x1a4] sm:$0x1] %v491_v44  ;;  %v11016_v26 = vld [vmem:[#allocation2 + $0xf8] ss:$0 sps:$4 sm:$0x11]   ;;  %v3633_v25 = vor.u32 %v3632_v56, %v3628_v4 }
 0x23a   :  { %v10995_v28 = vpop.f32.mrf.mxu1  ;;  %v11001_v38 = vadd.f32 %v6058_v43, %v5770_v22  ;;  %v11994_v22 = vld [vmem:[#allocation39_spill] sm:$0xff]  ;;  %v600_v60 = vld [vmem:[#allocation2 + $0x1ac] sm:$0x1]  ;;  %v3637_v32 = vrot.slane %v3635_v36, 1  ;;  %v4395_v36 = vshll.u32 %v11016_v26, 16 }
 0x23b   :  { %11991 = vst [vmem:[#allocation18_spill] sm:$0xff] %v10995_v28  ;;  %v6060_v35 = vpop.f32.mrf.mxu0  ;;  %v5775_v43 = vadd.f32 %v11994_v22, %v11993_v39  ;;  %v4390_v33 = vshll.u32 %v10999_v50, 16  ;;  %v601_v6 = vsel %vm9032_vm4, 0, %v600_v60  ;;  %v3873_v22 = vrot.slane %v8800_v18, 1  ;;  %v11998_v28 = vld [vmem:[#allocation40_spill] sm:$0xff] }
 0x23c   :  { %11992 = vst [vmem:[#allocation37_spill] sm:$0xff] %v11001_v38  ;;  %v5899_v51 = vpop.f32.mrf.mxu1  ;;  %v2017_v35 = vld [vmem:[#allocation2 + $0x18] sm:$0xe]  ;;  %602 = vst [vmem:[#allocation2 + $0x1ac] sm:$0x1] %v601_v6  ;;  %v11997_v38 = vld [vmem:[#allocation23_spill] sm:$0xff] }
 0x23d   :  { %v6063_v51 = vpop.f32.mrf.mxu0  ;;  %6254 = vmatmul.mubr.bf16.gmra.mxu0 %v3626_v62  ;;  %v3872_v62 = vrot.slane %v7643_v9, 1  ;;  %v5778_v34 = vadd.f32 %v11998_v28, %v11997_v38  ;;  %v3644_v60 = vrot.slane %v3642_v16, 1  ;;  %v4388_v4 = vshrl.u32 %v10999_v50, 16 }
 0x23e   :  { %v11013_v52 = vpop.f32.mrf.mxu1  ;;  %6415 = vmatmul.mubr.bf16.gmra.mxu1 %v10922_v7  ;;  %v11021_v49 = vadd.f32 %v6063_v51, %v5775_v43  ;;  %6261 = vmatprep.mubr.bf16.mxu0 %v3871_v12  ;;  %v4381_v7 = vor.u32 %v4380_v47, %v4376_v14  ;;  %v1955_v43 = vld [vmem:[#allocation2 + $0xfc] sm:$0xf]  ;;  %v4392_v56 = vrot.slane %v4390_v33, 1  ;;  %v3638_v14 = vsel %vm2337_vm5, %v3633_v25, %v3637_v32  ;;  %v12001_v33 = vld [vmem:[#allocation41_spill] sm:$0xff] }
 0x23f   :  { %11995 = vst [vmem:[#allocation49_spill] sm:$0xff] %v11013_v52  ;;  %6422 = vmatprep.mubr.bf16.mxu1 %v4374_v48  ;;  %v6065_v39 = vpop.f32.mrf.mxu0  ;;  %v4385_v52 = vrot.slane %v4383_v59, 1  ;;  %v8935_v48 = vld [vmem:[#allocation2 + $0x1c] sm:$0xf]  ;;  %v3647_v47 = vshll.u32 %v8800_v18, 16  ;;  %v3874_v15 = vsel %vm2850_vm10, %v3872_v62, %v3873_v22  ;;  %v11036_v16 = vcombine.low %v1955_v43, %v10840_v23 }
 0x240   :  { %11996 = vst [vmem:[#allocation19_spill] sm:$0xff] %v11021_v49  ;;  %v5904_v44 = vpop.f32.mrf.mxu1  ;;  %v7708_v9 = vcombine.low %v2017_v35, %v8935_v48  ;;  %v4393_v25 = vor.u32 %v4392_v56, %v4388_v4  ;;  %v4397_v18 = vrot.slane %v4395_v36, 1  ;;  %v2018_v35 = vld [vmem:[#allocation2 + $0x24] sm:$0xe]  ;;  %v1957_v43 = vld [vmem:[#allocation2 + $0x108] sm:$0xf] }
 0x241   :  { %v6066_v12 = vpop.f32.mrf.mxu0  ;;  %v4386_v59 = vsel %vm2337_vm5, %v4381_v7, %v4385_v52  ;;  %v12000_v44 = vld [vmem:[#allocation26_spill] sm:$0xff]  ;;  %v3649_v23 = vrot.slane %v3647_v47, 1  ;;  %v8936_v22 = vld [vmem:[#allocation2 + $0x20] ss:$0 sps:$4 sm:$0x11]  }
 0x242   :  { %v11026_v51 = vpop.f32.mrf.mxu1  ;;  %v11030_v6 = vadd.f32 %v6066_v12, %v5778_v34  ;;  %v5783_v39 = vadd.f32 %v12001_v33, %v12000_v44  ;;  %v3645_v34 = vor.u32 %v3644_v60, %v3640_v10  ;;  %v4707_v32 = vrot.slane %v7708_v9, 1  ;;  %v11046_v12 = vld [vmem:[#allocation2 + $0x10c] sm:$0xf]  ;;  %v12002_v60 = vld [vmem:[#allocation27_spill] sm:$0xff]  ;;  %v8937_v9 = vld [vmem:[#allocation2 + $0x28] sm:$0xf] }
 0x243   :  { %11999 = vst [vmem:[#allocation38_spill] sm:$0xff] %v11026_v51  ;;  %v6068_v38 = vpop.f32.mrf.mxu0  ;;  %v4708_v7 = vrot.slane %v8936_v22, 1  ;;  %v4402_v10 = vshll.u32 %v11036_v16, 16  ;;  %v12003_v4 = vld [vmem:[#allocation42_spill] sm:$0xff]  ;;  %v2019_v36 = vld [vmem:[#allocation2 + $0x30] sm:$0xe]  ;;  %v11053_v47 = vcombine.low %v1957_v43, %v11046_v12 }
 0x244   :  { %v5907_v28 = vpop.f32.mrf.mxu1  ;;  %v5786_v56 = vadd.f32 %v12003_v4, %v12002_v60  ;;  %v12004_v43 = vld [vmem:[#allocation30_spill] sm:$0xff] }
 0x245   :  { %v6071_v49 = vpop.f32.mrf.mxu0  ;;  %6262 = vmatmul.mubr.bf16.gmra.mxu0 %v3638_v14  ;;  %v7709_v14 = vcombine.low %v2018_v35, %v8937_v9  ;;  %v4404_v22 = vrot.slane %v4402_v10, 1  ;;  %v11073_v10 = vld [vmem:[#allocation2 + $0x110] ss:$0 sps:$4 sm:$0x11]  }
 0x246   :  { %v5910_v51 = vpop.f32.mrf.mxu1  ;;  %6423 = vmatmul.mubr.bf16.gmra.mxu1 %v10950_v19  ;;  %v11044_v52 = vadd.f32 %v6071_v49, %v5783_v39  ;;  %6269 = vmatprep.mubr.bf16.mxu0 %v3874_v15  ;;  %v4398_v49 = vsel %vm2337_vm5, %v4393_v25, %v4397_v18  ;;  %v3650_v15 = vsel %vm2337_vm5, %v3645_v34, %v3649_v23  ;;  %v4400_v39 = vshrl.u32 %v11036_v16, 16  ;;  %v8938_v18 = vld [vmem:[#allocation2 + $0x34] sm:$0xf] }
 0x247   :  { %v11042_v62 = vadd.f32 %v5910_v51, %v10802_v58  ;;  %6430 = vmatprep.mubr.bf16.mxu1 %v4386_v59  ;;  %v6073_v19 = vpop.f32.mrf.mxu0  ;;  %v4709_v59 = vsel %vm2850_vm10, %v4707_v32, %v4708_v7  ;;  %v4407_v25 = vshll.u32 %v10845_v46, 16  ;;  %v7710_v35 = vcombine.low %v2019_v36, %v8938_v18  ;;  %v2020_v46 = vld [vmem:[#allocation2 + $0x3c] sm:$0xe]  ;;  %v12007_v18 = vld [vmem:[#allocation45_spill] sm:$0xff] }
 0x248   :  { %v5912_v48 = vpop.f32.mrf.mxu1  ;;  %v4710_v34 = vrot.slane %v7709_v14, 1  ;;  %v4414_v32 = vshll.u32 %v11053_v47, 16  ;;  %v2021_v14 = vld [vmem:[#allocation2 + $0x48] sm:$0xe] }
 0x249   :  { %v6074_v51 = vpop.f32.mrf.mxu0  ;;  %v12005_v48 = vld [vmem:[#allocation44_spill] sm:$0xff]  ;;  %v4409_v9 = vrot.slane %v4407_v25, 1 }
 0x24a   :  { %v5913_v58 = vpop.f32.mrf.mxu1  ;;  %v11058_v38 = vadd.f32 %v6074_v51, %v5786_v56  ;;  %v5791_v19 = vadd.f32 %v12005_v48, %v12004_v43  ;;  %v4405_v51 = vor.u32 %v4404_v22, %v4400_v39  ;;  %v11077_v48 = vld [vmem:[#allocation2 + $0x118] sm:$0xf]  ;;  %v4416_v39 = vrot.slane %v4414_v32, 1 }
 0x24b   :  { %v11056_v28 = vadd.f32 %v5913_v58, %v10812_v13  ;;  %v6076_v33 = vpop.f32.mrf.mxu0  ;;  %v8939_v13 = vld [vmem:[#allocation2 + $0x2c] ss:$0 sps:$4 sm:$0x11]  }
 0x24c   :  { %v5915_v44 = vpop.f32.mrf.mxu1  ;;  %v4711_v60 = vrot.slane %v8939_v13, 1  ;;  %v12006_v33 = vld [vmem:[#allocation31_spill] sm:$0xff]  ;;  %v8941_v13 = vld [vmem:[#allocation2 + $0x40] sm:$0xf] }
 0x24d   :  { %v6079_v56 = vpop.f32.mrf.mxu0  ;;  %6270 = vmatmul.mubr.bf16.gmra.mxu0 %v3650_v15  ;;  %v4713_v15 = vrot.slane %v7710_v35, 1  ;;  %v8940_v44 = vld [vmem:[#allocation2 + $0x38] ss:$0 sps:$4 sm:$0x11]   ;;  %v5794_v43 = vadd.f32 %v12007_v18, %v12006_v33  ;;  %v4419_v35 = vshll.u32 %v11073_v10, 16  ;;  %v4410_v18 = vsel %vm2337_vm5, %v4405_v51, %v4409_v9 }
 0x24e   :  { %v5918_v4 = vpop.f32.mrf.mxu1  ;;  %6431 = vmatmul.mubr.bf16.gmra.mxu1 %v10978_v29  ;;  %v11071_v7 = vadd.f32 %v6079_v56, %v5791_v19  ;;  %8410 = vmatprep.mubr.bf16.mxu0 %v4709_v59  ;;  %v4714_v29 = vrot.slane %v8940_v44, 1  ;;  %v4712_v59 = vsel %vm2850_vm10, %v4710_v34, %v4711_v60  ;;  %v4412_v56 = vshrl.u32 %v11053_v47, 16 }
 0x24f   :  { %v11069_v23 = vadd.f32 %v5918_v4, %v10832_v2  ;;  %6438 = vmatprep.mubr.bf16.mxu1 %v4398_v49  ;;  %v6081_v58 = vpop.f32.mrf.mxu0  ;;  %v1959_v2 = vld [vmem:[#allocation2 + $0x114] sm:$0xf]  ;;  %v7711_v4 = vcombine.low %v2020_v46, %v8941_v13  ;;  %v4421_v51 = vrot.slane %v4419_v35, 1 }
 0x250   :  { %v5920_v36 = vpop.f32.mrf.mxu1  ;;  %v4715_v60 = vsel %vm2850_vm10, %v4713_v15, %v4714_v29  ;;  %v11090_v34 = vcombine.low %v1959_v2, %v11077_v48  ;;  %v12011_v13 = vld [vmem:[#allocation47_spill] sm:$0xff]  ;;  %v11098_v2 = vld [vmem:[#allocation2 + $0x11c] ss:$0 sps:$4 sm:$0x11]  }
 0x251   :  { %v6082_v49 = vpop.f32.mrf.mxu0  ;;  %v8942_v36 = vld [vmem:[#allocation2 + $0x4c] sm:$0xf]  ;;  %v8944_v15 = vld [vmem:[#allocation2 + $0x50] ss:$0 sps:$4 sm:$0x11]  }
 0x252   :  { %v5921_v19 = vpop.f32.mrf.mxu1  ;;  %v11084_v25 = vadd.f32 %v6082_v49, %v5794_v43  ;;  %v7712_v58 = vcombine.low %v2021_v14, %v8942_v36  ;;  %v8943_v43 = vld [vmem:[#allocation2 + $0x44] ss:$0 sps:$4 sm:$0x11]   ;;  %v4417_v49 = vor.u32 %v4416_v39, %v4412_v56  ;;  %v2022_v14 = vld [vmem:[#allocation2 + $0x54] sm:$0xe]  ;;  %v4720_v29 = vrot.slane %v8944_v15, 1 }
 0x253   :  { %v11082_v22 = vadd.f32 %v5921_v19, %v10848_v11  ;;  %v6084_v33 = vpop.f32.mrf.mxu0  ;;  %v4716_v11 = vrot.slane %v7711_v4, 1  ;;  %v4717_v19 = vrot.slane %v8943_v43, 1  ;;  %v11101_v4 = vld [vmem:[#allocation2 + $0x124] sm:$0xf]  ;;  %v2023_v56 = vld [vmem:[#allocation2 + $0x60] sm:$0xe] }
 0x254   :  { %12009 = vst [vmem:[#allocation39_spill] sm:$0xff] %v11084_v25  ;;  %v5923_v44 = vpop.f32.mrf.mxu1  ;;  %v4719_v9 = vrot.slane %v7712_v58, 1  ;;  %v12014_v58 = vld [vmem:[#allocation48_spill] sm:$0xff]  ;;  %v4431_v25 = vshll.u32 %v11098_v2, 16 }
 0x255   :  { %12008 = vst [vmem:[#allocation22_spill] sm:$0xff] %v11082_v22  ;;  %v6087_v32 = vpop.f32.mrf.mxu0  ;;  %8411 = vmatmul.mubr.bf16.vlgmr.msra.gmra.mxu0 %v4712_v59  ;;  %v1961_v59 = vld [vmem:[#allocation2 + $0x120] sm:$0xf] }
 0x256   :  { %v11092_v46 = vpop.f32.mrf.mxu1  ;;  %6439 = vmatmul.mubr.bf16.gmra.mxu1 %v10999_v50  ;;  %v11096_v36 = vadd.f32 %v6087_v32, %v12011_v13  ;;  %8414 = vmatprep.mubr.bf16.mxu0 %v4715_v60  ;;  %v4426_v50 = vshll.u32 %v11090_v34, 16  ;;  %v8945_v60 = vld [vmem:[#allocation2 + $0x58] sm:$0xf]  ;;  %v4422_v13 = vsel %vm2337_vm5, %v4417_v49, %v4421_v51  ;;  %v4721_v15 = vsel %vm2850_vm10, %v4719_v9, %v4720_v29  ;;  %v8947_v51 = vld [vmem:[#allocation2 + $0x5c] ss:$0 sps:$4 sm:$0x11]  }
 0x257   :  { %12010 = vst [vmem:[#allocation23_spill] sm:$0xff] %v11092_v46  ;;  %6446 = vmatprep.mubr.bf16.mxu1 %v4410_v18  ;;  %v6089_v33 = vpop.f32.mrf.mxu0  ;;  %v4718_v18 = vsel %vm2850_vm10, %v4716_v11, %v4717_v19  ;;  %v7713_v35 = vcombine.low %v2022_v14, %v8945_v60  ;;  %v4424_v46 = vshrl.u32 %v11090_v34, 16  ;;  %v8946_v11 = vld [vmem:[#allocation2 + $0x64] sm:$0xf]  ;;  %v4723_v9 = vrot.slane %v8947_v51, 1 }
 0x258   :  { %12012 = vst [vmem:[#allocation40_spill] sm:$0xff] %v11096_v36  ;;  %v5928_v44 = vpop.f32.mrf.mxu1  ;;  %v7714_v19 = vcombine.low %v2023_v56, %v8946_v11  ;;  %v11119_v29 = vld [vmem:[#allocation2 + $0x128] ss:$0 sps:$4 sm:$0x11]   ;;  %v4433_v11 = vrot.slane %v4431_v25, 1 }
 0x259   :  { %v6090_v32 = vpop.f32.mrf.mxu0  ;;  %v11112_v44 = vcombine.low %v1961_v59, %v11101_v4  ;;  %v4722_v49 = vrot.slane %v7713_v35, 1  ;;  %v12017_v59 = vld [vmem:[#allocation50_spill] sm:$0xff]  ;;  %v2025_v35 = vld [vmem:[#allocation2 + $0x78] sm:$0xe]  ;;  %v11125_v51 = vld [vmem:[#allocation2 + $0x130] sm:$0xf] }
 0x25a   :  { %v11103_v39 = vpop.f32.mrf.mxu1  ;;  %v11107_v43 = vadd.f32 %v6090_v32, %v12014_v58 }
 0x25b   :  { %12013 = vst [vmem:[#allocation26_spill] sm:$0xff] %v11103_v39  ;;  %v6092_v36 = vpop.f32.mrf.mxu0  ;;  %v4428_v39 = vrot.slane %v4426_v50, 1  ;;  %v2024_v50 = vld [vmem:[#allocation2 + $0x6c] sm:$0xe]  ;;  %v4438_v60 = vshll.u32 %v11112_v44, 16  ;;  %v4436_v25 = vshrl.u32 %v11112_v44, 16 }
 0x25c   :  { %12015 = vst [vmem:[#allocation41_spill] sm:$0xff] %v11107_v43  ;;  %v5931_v33 = vpop.f32.mrf.mxu1  ;;  %v1963_v43 = vld [vmem:[#allocation2 + $0x12c] sm:$0xf] }
 0x25d   :  { %v6095_v32 = vpop.f32.mrf.mxu0  ;;  %8415 = vmatmul.mubr.bf16.gmra.mxu0 %v4718_v18  ;;  %v4429_v33 = vor.u32 %v4428_v39, %v4424_v46  ;;  %v4440_v46 = vrot.slane %v4438_v60, 1  ;;  %v7716_v39 = vcombine.low %v2025_v35, %v10774_v27  ;;  %v2026_v27 = vld [vmem:[#allocation2 + $0x84] sm:$0xe] }
 0x25e   :  { %v11116_v14 = vpop.f32.mrf.mxu1  ;;  %6447 = vmatmul.mubr.bf16.gmra.mxu1 %v11036_v16  ;;  %v11122_v36 = vadd.f32 %v6095_v32, %v12017_v59  ;;  %8418 = vmatprep.mubr.bf16.mxu0 %v4721_v15  ;;  %v8948_v16 = vld [vmem:[#allocation2 + $0x68] ss:$0 sps:$4 sm:$0x11]   ;;  %v8949_v15 = vld [vmem:[#allocation2 + $0x70] sm:$0xf] }
 0x25f   :  { %12016 = vst [vmem:[#allocation27_spill] sm:$0xff] %v11116_v14  ;;  %6454 = vmatprep.mubr.bf16.mxu1 %v4422_v13  ;;  %v6097_v58 = vpop.f32.mrf.mxu0  ;;  %v4725_v14 = vrot.slane %v7714_v19, 1  ;;  %v4726_v18 = vrot.slane %v8948_v16, 1  ;;  %v4724_v13 = vsel %vm2850_vm10, %v4722_v49, %v4723_v9  ;;  %v7715_v59 = vcombine.low %v2024_v50, %v8949_v15 }
 0x260   :  { %12018 = vst [vmem:[#allocation42_spill] sm:$0xff] %v11122_v36  ;;  %v5936_v56 = vpop.f32.mrf.mxu1  ;;  %v4443_v36 = vshll.u32 %v11119_v29, 16  ;;  %v4434_v16 = vsel %vm2337_vm5, %v4429_v33, %v4433_v11  ;;  %v11139_v49 = vcombine.low %v1963_v43, %v11125_v51  ;;  %v4731_v33 = vrot.slane %v7716_v39, 1  ;;  %v1965_v11 = vld [vmem:[#allocation2 + $0x138] sm:$0xf] }
 0x261   :  { %v6098_v32 = vpop.f32.mrf.mxu0  ;;  %v4732_v43 = vrot.slane %v10788_v40, 1 }
 0x262   :  { %v11127_v22 = vpop.f32.mrf.mxu1  ;;  %v11132_v56 = vadd.f32 %v6098_v32, %v10633_v53  ;;  %v4728_v53 = vrot.slane %v7715_v59, 1  ;;  %v8950_v32 = vld [vmem:[#allocation2 + $0x74] ss:$0 sps:$4 sm:$0x11]   ;;  %v4445_v15 = vrot.slane %v4443_v36, 1  ;;  %v4450_v59 = vshll.u32 %v11139_v49, 16 }
 0x263   :  { %12019 = vst [vmem:[#allocation30_spill] sm:$0xff] %v11127_v22  ;;  %v6100_v58 = vpop.f32.mrf.mxu0  ;;  %v4727_v22 = vsel %vm2850_vm10, %v4725_v14, %v4726_v18  ;;  %v4729_v60 = vrot.slane %v8950_v32, 1  ;;  %v4441_v14 = vor.u32 %v4440_v46, %v4436_v25  ;;  %v11148_v18 = vld [vmem:[#allocation2 + $0x13c] sm:$0xf]  ;;  %v2027_v36 = vld [vmem:[#allocation2 + $0x90] sm:$0xe]  ;;  %v4733_v39 = vsel %vm2850_vm10, %v4731_v33, %v4732_v43 }
 0x264   :  { %v5939_v19 = vpop.f32.mrf.mxu1  ;;  %v11176_v33 = vld [vmem:[#allocation2 + $0x140] ss:$0 sps:$4 sm:$0x11]  }
 0x265   :  { %v6103_v50 = vpop.f32.mrf.mxu0  ;;  %8419 = vmatmul.mubr.bf16.gmra.mxu0 %v4724_v13  ;;  %v11150_v13 = vld [vmem:[#allocation2 + $0x134] ss:$0 sps:$4 sm:$0x11]   ;;  %v4730_v25 = vsel %vm2850_vm10, %v4728_v53, %v4729_v60  ;;  %v4446_v46 = vsel %vm2337_vm5, %v4441_v14, %v4445_v15  ;;  %v4735_v15 = vrot.slane %v10806_v31, 1  ;;  %v2028_v14 = vld [vmem:[#allocation2 + $0x9c] sm:$0xe] }
 0x266   :  { %v11141_v9 = vpop.f32.mrf.mxu1  ;;  %6455 = vmatmul.mubr.bf16.gmra.mxu1 %v11053_v47  ;;  %v11145_v35 = vadd.f32 %v6103_v50, %v10650_v45  ;;  %8422 = vmatprep.mubr.bf16.mxu0 %v4727_v22  ;;  %v11157_v22 = vcombine.low %v1965_v11, %v11148_v18 }
 0x267   :  { %6462 = vmatprep.mubr.bf16.mxu1 %v4434_v16  ;;  %v6105_v47 = vpop.f32.mrf.mxu0  ;;  %v7717_v16 = vcombine.low %v2026_v27, %v10791_v24  ;;  %v7718_v24 = vcombine.low %v2027_v36, %v10814_v1 }
 0x268   :  { %v5944_v19 = vpop.f32.mrf.mxu1  ;;  %v4452_v47 = vrot.slane %v4450_v59, 1  ;;  %v4462_v53 = vshll.u32 %v11157_v22, 16  ;;  %v4460_v31 = vshrl.u32 %v11157_v22, 16 }
 0x269   :  { %v6106_v45 = vpop.f32.mrf.mxu0  ;;  %v4448_v19 = vshrl.u32 %v11139_v49, 16 }
 0x26a   :  { %v11153_v58 = vpop.f32.mrf.mxu1  ;;  %v11160_v40 = vadd.f32 %v6106_v45, %v10665_v37  ;;  %v4734_v37 = vrot.slane %v7717_v16, 1  ;;  %v4737_v45 = vrot.slane %v7718_v24, 1  ;;  %v2029_v16 = vld [vmem:[#allocation2 + $0xa8] sm:$0xe] }
 0x26b   :  { %12020 = vst [vmem:[#allocation44_spill] sm:$0xff] %v11153_v58  ;;  %v6108_v32 = vpop.f32.mrf.mxu0  ;;  %v4455_v58 = vshll.u32 %v11150_v13, 16  ;;  %v4453_v59 = vor.u32 %v4452_v47, %v4448_v19  ;;  %v4467_v19 = vshll.u32 %v11176_v33, 16 }
 0x26c   :  { %v5947_v50 = vpop.f32.mrf.mxu1  ;;  %v4464_v32 = vrot.slane %v4462_v53, 1 }
 0x26d   :  { %v6111_v11 = vpop.f32.mrf.mxu0  ;;  %8423 = vmatmul.mubr.bf16.gmra.mxu0 %v4730_v25  ;;  %v4457_v36 = vrot.slane %v4455_v58, 1  ;;  %v1967_v25 = vld [vmem:[#allocation2 + $0x144] sm:$0xf]  ;;  %v11179_v50 = vld [vmem:[#allocation2 + $0x148] sm:$0xf]  ;;  %v4736_v58 = vsel %vm2850_vm10, %v4734_v37, %v4735_v15  ;;  %v4741_v37 = vrot.slane %v10875_v63, 1 }
 0x26e   :  { %v11168_v27 = vpop.f32.mrf.mxu1  ;;  %6463 = vmatmul.mubr.bf16.gmra.mxu1 %v11090_v34  ;;  %v11173_v60 = vadd.f32 %v6111_v11, %v10685_v0  ;;  %8426 = vmatprep.mubr.bf16.mxu0 %v4733_v39  ;;  %v4738_v34 = vrot.slane %v10837_v61, 1  ;;  %v7719_v39 = vcombine.low %v2028_v14, %v10843_v3  ;;  %v7720_v61 = vcombine.low %v2029_v16, %v10880_v21  ;;  %v2030_v21 = vld [vmem:[#allocation2 + $0xb4] sm:$0xe]  ;;  %v2031_v63 = vld [vmem:[#allocation2 + $0xc0] sm:$0xe] }
 0x26f   :  { %6470 = vmatprep.mubr.bf16.mxu1 %v4446_v46  ;;  %v6113_v43 = vpop.f32.mrf.mxu0  ;;  %v11194_v3 = vcombine.low %v1967_v25, %v11179_v50  ;;  %v4465_v15 = vor.u32 %v4464_v32, %v4460_v31 }
 0x270   :  { %v5952_v1 = vpop.f32.mrf.mxu1  ;;  %v4739_v43 = vsel %vm2850_vm10, %v4737_v45, %v4738_v34  ;;  %v4744_v45 = vrot.slane %v10904_v57, 1  ;;  %v11204_v34 = vld [vmem:[#allocation2 + $0x14c] ss:$0 sps:$4 sm:$0x11]  }
 0x271   :  { %v6114_v46 = vpop.f32.mrf.mxu0  ;;  %v4458_v1 = vsel %vm2337_vm5, %v4453_v59, %v4457_v36  ;;  %v4469_v59 = vrot.slane %v4467_v19, 1  ;;  %v4743_v36 = vrot.slane %v7720_v61, 1  ;;  %v7721_v19 = vcombine.low %v2030_v21, %v10909_v55  ;;  %v11228_v21 = vld [vmem:[#allocation2 + $0x158] ss:$0 sps:$4 sm:$0x11]  }
 0x272   :  { %v11181_v0 = vpop.f32.mrf.mxu1  ;;  %v11186_v11 = vadd.f32 %v6114_v46, %v10697_v42  ;;  %v4740_v42 = vrot.slane %v7719_v39, 1  ;;  %v1969_v39 = vld [vmem:[#allocation2 + $0x150] sm:$0xf] }
 0x273   :  { %v6116_v24 = vpop.f32.mrf.mxu0  ;;  %v4470_v57 = vsel %vm2337_vm5, %v4465_v15, %v4469_v59  ;;  %v4747_v15 = vrot.slane %v10932_v30, 1  ;;  %v12022_v59 = vld [vmem:[#allocation60_spill] sm:$0xff] }
 0x274   :  { %v5955_v47 = vpop.f32.mrf.mxu1  ;;  %v4742_v32 = vsel %vm2850_vm10, %v4740_v42, %v4741_v37  ;;  %v7722_v42 = vcombine.low %v2031_v63, %v10937_v8  ;;  %v4746_v37 = vrot.slane %v7721_v19, 1  ;;  %v1971_v19 = vld [vmem:[#allocation2 + $0x15c] sm:$0xf] }
 0x275   :  { %v6119_v53 = vpop.f32.mrf.mxu0  ;;  %8427 = vmatmul.mubr.bf16.gmra.mxu0 %v4736_v58  ;;  %v11207_v58 = vld [vmem:[#allocation2 + $0x154] sm:$0xf]  ;;  %v4745_v47 = vsel %vm2850_vm10, %v4743_v36, %v4744_v45 }
 0x276   :  { %v11196_v14 = vpop.f32.mrf.mxu1  ;;  %6471 = vmatmul.mubr.bf16.gmra.mxu1 %v11112_v44  ;;  %v11201_v16 = vadd.f32 %v6119_v53, %v10703_v17  ;;  %8430 = vmatprep.mubr.bf16.mxu0 %v4739_v43  ;;  %v4474_v44 = vshll.u32 %v11194_v3, 16  ;;  %v11219_v24 = vcombine.low %v1969_v39, %v11207_v58  ;;  %v4472_v53 = vshrl.u32 %v11194_v3, 16 }
 0x277   :  { %6478 = vmatprep.mubr.bf16.mxu1 %v4458_v1  ;;  %v6121_v46 = vpop.f32.mrf.mxu0 }
 0x278   :  { %v5960_v25 = vpop.f32.mrf.mxu1  ;;  %v4479_v46 = vshll.u32 %v11204_v34, 16  ;;  %v4486_v45 = vshll.u32 %v11219_v24, 16 }
 0x279   :  { %v6122_v17 = vpop.f32.mrf.mxu0  ;;  %v4476_v25 = vrot.slane %v4474_v44, 1 }
 0x27a   :  { %v11209_v31 = vpop.f32.mrf.mxu1  ;;  %v11214_v61 = vadd.f32 %v6122_v17, %v10715_v41  ;;  %v4481_v63 = vrot.slane %v4479_v46, 1  ;;  %v4749_v17 = vrot.slane %v7722_v42, 1 }
 0x27b   :  { %v6124_v43 = vpop.f32.mrf.mxu0  ;;  %v4477_v39 = vor.u32 %v4476_v25, %v4472_v53  ;;  %v4484_v53 = vshrl.u32 %v11219_v24, 16  ;;  %v4488_v25 = vrot.slane %v4486_v45, 1 }
 0x27c   :  { %v5963_v1 = vpop.f32.mrf.mxu1 }
 0x27d   :  { %v6127_v41 = vpop.f32.mrf.mxu0  ;;  %8431 = vmatmul.mubr.bf16.gmra.mxu0 %v4742_v32  ;;  %v2033_v32 = vld [vmem:[#allocation2 + $0xf0] sm:$0xe]  ;;  %v11235_v1 = vld [vmem:[#allocation2 + $0x160] sm:$0xf] }
 0x27e   :  { %v11224_v55 = vpop.f32.mrf.mxu1  ;;  %6479 = vmatmul.mubr.bf16.gmra.mxu1 %v11139_v49  ;;  %v11231_v36 = vadd.f32 %v6127_v41, %v12022_v59  ;;  %8434 = vmatprep.mubr.bf16.mxu0 %v4745_v47  ;;  %v4750_v49 = vrot.slane %v10960_v5, 1  ;;  %v4748_v41 = vsel %vm2850_vm10, %v4746_v37, %v4747_v15  ;;  %v12025_v47 = vld [vmem:[#allocation62_spill] sm:$0xff]  ;;  %v7724_v46 = vcombine.low %v2033_v32, %v10989_v20 }
 0x27f   :  { %12021 = vst [vmem:[#allocation31_spill] sm:$0xff] %v11224_v55  ;;  %6486 = vmatprep.mubr.bf16.mxu1 %v4470_v57  ;;  %v6129_v8 = vpop.f32.mrf.mxu0  ;;  %v4491_v57 = vshll.u32 %v11228_v21, 16  ;;  %v4489_v20 = vor.u32 %v4488_v25, %v4484_v53  ;;  %v12031_v53 = vld [vmem:[#allocation66_spill] sm:$0xff] }
 0x280   :  { %12023 = vst [vmem:[#allocation45_spill] sm:$0xff] %v11231_v36  ;;  %v5968_v44 = vpop.f32.mrf.mxu1  ;;  %v4751_v8 = vsel %vm2850_vm10, %v4749_v17, %v4750_v49  ;;  %v4755_v32 = vrot.slane %v7724_v46, 1  ;;  %v11258_v17 = vld [vmem:[#allocation2 + $0x16c] sm:$0xf]  ;;  %v11290_v36 = vld [vmem:[#allocation2 + $0x178] sm:$0xf] }
 0x281   :  { %v6130_v43 = vpop.f32.mrf.mxu0  ;;  %v4482_v44 = vsel %vm2337_vm5, %v4477_v39, %v4481_v63  ;;  %v4756_v39 = vrot.slane %v11016_v26, 1  ;;  %v1973_v63 = vld [vmem:[#allocation2 + $0x168] sm:$0xf] }
 0x282   :  { %v11237_v30 = vpop.f32.mrf.mxu1  ;;  %v11242_v59 = vadd.f32 %v6130_v43, %v12025_v47  ;;  %v4493_v43 = vrot.slane %v4491_v57, 1  ;;  %v12028_v47 = vld [vmem:[#allocation64_spill] sm:$0xff] }
 0x283   :  { %12024 = vst [vmem:[#allocation47_spill] sm:$0xff] %v11237_v30  ;;  %v6132_v42 = vpop.f32.mrf.mxu0  ;;  %v11249_v30 = vcombine.low %v1971_v19, %v11235_v1  ;;  %v4757_v46 = vsel %vm2850_vm10, %v4755_v32, %v4756_v39 }
 0x284   :  { %12026 = vst [vmem:[#allocation48_spill] sm:$0xff] %v11242_v59  ;;  %v5971_v5 = vpop.f32.mrf.mxu1  ;;  %v4494_v26 = vsel %vm2337_vm5, %v4489_v20, %v4493_v43  ;;  %v12036_v43 = vld [vmem:[#allocation69_spill] sm:$0xff]  ;;  %v11282_v20 = vld [vmem:[#allocation2 + $0x170] ss:$0 sps:$4 sm:$0x11]  }
 0x285   :  { %v6135_v15 = vpop.f32.mrf.mxu0  ;;  %8435 = vmatmul.mubr.bf16.gmra.mxu0 %v4748_v41  ;;  %v11260_v5 = vld [vmem:[#allocation2 + $0x164] ss:$0 sps:$4 sm:$0x11]   ;;  %v2035_v41 = vld [vmem:[#allocation2 + $0x108] sm:$0xe] }
 0x286   :  { %v11251_v37 = vpop.f32.mrf.mxu1  ;;  %6487 = vmatmul.mubr.bf16.gmra.mxu1 %v11157_v22  ;;  %v11255_v45 = vadd.f32 %v6135_v15, %v12028_v47  ;;  %8438 = vmatprep.mubr.bf16.mxu0 %v4751_v8  ;;  %v4498_v22 = vshll.u32 %v11249_v30, 16  ;;  %v4496_v47 = vshrl.u32 %v11249_v30, 16 }
 0x287   :  { %12027 = vst [vmem:[#allocation50_spill] sm:$0xff] %v11251_v37  ;;  %6494 = vmatprep.mubr.bf16.mxu1 %v4482_v44  ;;  %v6137_v19 = vpop.f32.mrf.mxu0  ;;  %v11266_v44 = vcombine.low %v1973_v63, %v11258_v17  ;;  %v12034_v37 = vld [vmem:[#allocation70_spill] sm:$0xff] }
 0x288   :  { %12029 = vst [vmem:[#allocation60_spill] sm:$0xff] %v11255_v45  ;;  %v5976_v49 = vpop.f32.mrf.mxu1  ;;  %v4503_v19 = vshll.u32 %v11260_v5, 16  ;;  %v12033_v45 = vld [vmem:[#allocation51_spill] sm:$0xff] }
 0x289   :  { %v6138_v42 = vpop.f32.mrf.mxu0  ;;  %v4500_v49 = vrot.slane %v4498_v22, 1  ;;  %v5855_v63 = vadd.f32 %v12034_v37, %v12033_v45  ;;  %v4510_v32 = vshll.u32 %v11266_v44, 16  ;;  %v2036_v22 = vld [vmem:[#allocation2 + $0x114] sm:$0xe] }
 0x28a   :  { %v11263_v57 = vpop.f32.mrf.mxu1  ;;  %v11269_v25 = vadd.f32 %v6138_v42, %v12031_v53  ;;  %v4505_v37 = vrot.slane %v4503_v19, 1 }
 0x28b   :  { %12030 = vst [vmem:[#allocation62_spill] sm:$0xff] %v11263_v57  ;;  %v6140_v15 = vpop.f32.mrf.mxu0  ;;  %v7726_v57 = vcombine.low %v2035_v41, %v11046_v12  ;;  %v4501_v53 = vor.u32 %v4500_v49, %v4496_v47  ;;  %v4515_v47 = vshll.u32 %v11282_v20, 16 }
 0x28c   :  { %12032 = vst [vmem:[#allocation64_spill] sm:$0xff] %v11269_v25  ;;  %v5979_v8 = vpop.f32.mrf.mxu1  ;;  %v2037_v15 = vld [vmem:[#allocation2 + $0x120] sm:$0xe]  ;;  %v1975_v25 = vld [vmem:[#allocation2 + $0x174] sm:$0xf] }
 0x28d   :  { %v6143_v42 = vpop.f32.mrf.mxu0  ;;  %8439 = vmatmul.mubr.bf16.gmra.mxu0 %v12036_v43  ;;  %v4761_v45 = vrot.slane %v7726_v57, 1  ;;  %v4762_v8 = vrot.slane %v11073_v10, 1  ;;  %v7728_v10 = vcombine.low %v2037_v15, %v11101_v4  ;;  %v4765_v4 = vrot.slane %v11098_v2, 1 }
 0x28e   :  { %v11278_v59 = vpop.f32.mrf.mxu1  ;;  %6495 = vmatmul.mubr.bf16.gmra.mxu1 %v11194_v3  ;;  %v11285_v39 = vadd.f32 %v6143_v42, %v5855_v63  ;;  %8442 = vmatprep.mubr.bf16.mxu0 %v4757_v46  ;;  %v12037_v3 = vld [vmem:[#allocation52_spill] sm:$0xff]  ;;  %v4508_v46 = vshrl.u32 %v11266_v44, 16  ;;  %v4512_v42 = vrot.slane %v4510_v32, 1 }
 0x28f   :  { %12035 = vst [vmem:[#allocation66_spill] sm:$0xff] %v11278_v59  ;;  %6502 = vmatprep.mubr.bf16.mxu1 %v4494_v26  ;;  %v6145_v41 = vpop.f32.mrf.mxu0  ;;  %v12038_v59 = vld [vmem:[#allocation71_spill] sm:$0xff]  ;;  %v7727_v26 = vcombine.low %v2036_v22, %v11077_v48  ;;  %v12042_v48 = vld [vmem:[#allocation73_spill] sm:$0xff] }
 0x290   :  { %v5984_v12 = vpop.f32.mrf.mxu1  ;;  %v5858_v43 = vadd.f32 %v12038_v59, %v12037_v3  ;;  %v4506_v59 = vsel %vm2337_vm5, %v4501_v53, %v4505_v37  ;;  %v11303_v41 = vcombine.low %v1975_v25, %v11290_v36  ;;  %v12041_v3 = vld [vmem:[#allocation53_spill] sm:$0xff]  ;;  %v4513_v15 = vor.u32 %v4512_v42, %v4508_v46  ;;  %v2038_v53 = vld [vmem:[#allocation2 + $0x12c] sm:$0xe] }
 0x291   :  { %v6146_v63 = vpop.f32.mrf.mxu0  ;;  %v4763_v12 = vsel %vm2850_vm10, %v4761_v45, %v4762_v8  ;;  %v5863_v22 = vadd.f32 %v12042_v48, %v12041_v3  ;;  %v12045_v45 = vld [vmem:[#allocation74_spill] sm:$0xff]  ;;  %v4767_v8 = vrot.slane %v7728_v10, 1  ;;  %v1977_v3 = vld [vmem:[#allocation2 + $0x180] sm:$0xf]  ;;  %v7729_v10 = vcombine.low %v2038_v53, %v11125_v51 }
 0x292   :  { %v11292_v55 = vpop.f32.mrf.mxu1  ;;  %v11297_v57 = vadd.f32 %v6146_v63, %v5858_v43  ;;  %v12043_v43 = vld [vmem:[#allocation72_spill] sm:$0xff]  ;;  %v4764_v63 = vrot.slane %v7727_v26, 1  ;;  %v4522_v2 = vshll.u32 %v11303_v41, 16  ;;  %v12047_v46 = vld [vmem:[#allocation54_spill] sm:$0xff]  ;;  %v12053_v53 = vld [vmem:[#allocation5_spill] sm:$0xff] }
 0x293   :  { %12039 = vst [vmem:[#allocation51_spill] sm:$0xff] %v11292_v55  ;;  %v6148_v19 = vpop.f32.mrf.mxu0 }
 0x294   :  { %12040 = vst [vmem:[#allocation70_spill] sm:$0xff] %v11297_v57  ;;  %v5987_v49 = vpop.f32.mrf.mxu1  ;;  %v4768_v19 = vrot.slane %v11119_v29, 1 }
 0x295   :  { %v6151_v55 = vpop.f32.mrf.mxu0  ;;  %8443 = vmatmul.mubr.bf16.gmra.mxu0 %v12043_v43  ;;  %v4517_v49 = vrot.slane %v4515_v47, 1  ;;  %v11318_v43 = vld [vmem:[#allocation2 + $0x17c] ss:$0 sps:$4 sm:$0x11]   ;;  %v2039_v47 = vld [vmem:[#allocation2 + $0x138] sm:$0xe] }
 0x296   :  { %v6312_v32 = vpop.f32.mrf.mxu1  ;;  %6503 = vmatmul.mubr.bf16.gmra.mxu1 %v11219_v24  ;;  %v11310_v37 = vadd.f32 %v6151_v55, %v5863_v22  ;;  %8446 = vmatprep.mubr.bf16.mxu0 %v4763_v12  ;;  %v11316_v24 = vld [vmem:[#allocation2 + $0x184] sm:$0xf]  ;;  %v12048_v55 = vld [vmem:[#allocation3_spill] sm:$0xff]  ;;  %v4769_v57 = vsel %vm2850_vm10, %v4767_v8, %v4768_v19  ;;  %v7730_v51 = vcombine.low %v2039_v47, %v11148_v18  ;;  %v12055_v19 = vld [vmem:[#allocation76_spill] sm:$0xff]  ;;  %v4770_v18 = vrot.slane %v7729_v10, 1 }
 0x297   :  { %v11313_v25 = vadd.f32 %v6312_v32, %v12045_v45  ;;  %6510 = vmatprep.mubr.bf16.mxu1 %v4506_v59  ;;  %v6153_v48 = vpop.f32.mrf.mxu0  ;;  %v5866_v42 = vadd.f32 %v12048_v55, %v12047_v46  ;;  %v4766_v59 = vsel %vm2850_vm10, %v4764_v63, %v4765_v4  ;;  %v11326_v29 = vcombine.low %v1977_v3, %v11316_v24  ;;  %v12050_v45 = vld [vmem:[#allocation75_spill] sm:$0xff] }
 0x298   :  { %12044 = vst [vmem:[#allocation69_spill] sm:$0xff] %v11310_v37  ;;  %v6314_v26 = vpop.f32.mrf.mxu1  ;;  %v4524_v37 = vrot.slane %v4522_v2, 1  ;;  %v4527_v63 = vshll.u32 %v11318_v43, 16  ;;  %v12052_v4 = vld [vmem:[#allocation55_spill] sm:$0xff]  ;;  %v4771_v47 = vrot.slane %v11150_v13, 1 }
 0x299   :  { %12046 = vst [vmem:[#allocation52_spill] sm:$0xff] %v11313_v25  ;;  %v6154_v22 = vpop.f32.mrf.mxu0  ;;  %v4518_v26 = vsel %vm2337_vm5, %v4513_v15, %v4517_v49  ;;  %v4520_v25 = vshrl.u32 %v11303_v41, 16  ;;  %v5871_v3 = vadd.f32 %v12053_v53, %v12052_v4  ;;  %v11341_v15 = vld [vmem:[#allocation2 + $0x188] ss:$0 sps:$4 sm:$0x11]   ;;  %v4534_v49 = vshll.u32 %v11326_v29, 16 }
 0x29a   :  { %v6315_v32 = vpop.f32.mrf.mxu1  ;;  %v11328_v12 = vadd.f32 %v6154_v22, %v5866_v42  ;;  %v4774_v4 = vrot.slane %v11176_v33, 1  ;;  %v2041_v53 = vld [vmem:[#allocation2 + $0x150] sm:$0xe]  ;;  %v4532_v13 = vshrl.u32 %v11326_v29, 16 }
 0x29b   :  { %v11331_v48 = vadd.f32 %v6315_v32, %v12050_v45  ;;  %v6156_v46 = vpop.f32.mrf.mxu0  ;;  %v2040_v32 = vld [vmem:[#allocation2 + $0x144] sm:$0xe] }
 0x29c   :  { %12049 = vst [vmem:[#allocation71_spill] sm:$0xff] %v11328_v12  ;;  %v6317_v55 = vpop.f32.mrf.mxu1  ;;  %v7731_v10 = vcombine.low %v2040_v32, %v11179_v50  ;;  %v12061_v12 = vld [vmem:[#allocation9_spill] sm:$0xff] }
 0x29d   :  { %12051 = vst [vmem:[#allocation53_spill] sm:$0xff] %v11331_v48  ;;  %v6159_v42 = vpop.f32.mrf.mxu0  ;;  %8447 = vmatmul.mubr.bf16.gmra.mxu0 %v4766_v59  ;;  %v4525_v55 = vor.u32 %v4524_v37, %v4520_v25  ;;  %v4773_v59 = vrot.slane %v7730_v51, 1  ;;  %v12056_v48 = vld [vmem:[#allocation56_spill] sm:$0xff]  ;;  %v4539_v37 = vshll.u32 %v11341_v15, 16  ;;  %v4772_v51 = vsel %vm2850_vm10, %v4770_v18, %v4771_v47 }
 0x29e   :  { %v6320_v22 = vpop.f32.mrf.mxu1  ;;  %6511 = vmatmul.mubr.bf16.gmra.mxu1 %v11249_v30  ;;  %v11344_v8 = vadd.f32 %v6159_v42, %v5871_v3  ;;  %8450 = vmatprep.mubr.bf16.mxu0 %v4769_v57  ;;  %v4529_v30 = vrot.slane %v4527_v63, 1  ;;  %v12057_v3 = vld [vmem:[#allocation7_spill] sm:$0xff]  ;;  %v12059_v63 = vld [vmem:[#allocation77_spill] sm:$0xff]  ;;  %v4776_v18 = vrot.slane %v7731_v10, 1 }
 0x29f   :  { %v11347_v2 = vadd.f32 %v6320_v22, %v12055_v19  ;;  %6518 = vmatprep.mubr.bf16.mxu1 %v4518_v26  ;;  %v6161_v45 = vpop.f32.mrf.mxu0  ;;  %v5874_v42 = vadd.f32 %v12057_v3, %v12056_v48  ;;  %v11353_v22 = vld [vmem:[#allocation2 + $0x190] sm:$0xf]  ;;  %v4536_v19 = vrot.slane %v4534_v49, 1  ;;  %v7732_v48 = vcombine.low %v2041_v53, %v11207_v58  ;;  %v12060_v49 = vld [vmem:[#allocation57_spill] sm:$0xff] }
 0x2a0   :  { %12054 = vst [vmem:[#allocation73_spill] sm:$0xff] %v11344_v8  ;;  %v6322_v46 = vpop.f32.mrf.mxu1  ;;  %v1979_v8 = vld [vmem:[#allocation2 + $0x18c] sm:$0xf]  ;;  %v4530_v3 = vsel %vm2337_vm5, %v4525_v55, %v4529_v30  ;;  %v4775_v50 = vsel %vm2850_vm10, %v4773_v59, %v4774_v4  ;;  %v4777_v58 = vrot.slane %v11204_v34, 1  ;;  %v4541_v53 = vrot.slane %v4539_v37, 1  ;;  %v12062_v30 = vld [vmem:[#allocation43_spill] sm:$0xff] }
 0x2a1   :  { %v6162_v26 = vpop.f32.mrf.mxu0  ;;  %v11368_v32 = vcombine.low %v1979_v8, %v11353_v22  ;;  %v4537_v47 = vor.u32 %v4536_v19, %v4532_v13  ;;  %v4779_v8 = vrot.slane %v7732_v48, 1  ;;  %v1981_v4 = vld [vmem:[#allocation2 + $0x198] sm:$0xf]  ;;  %v12063_v13 = vld [vmem:[#allocation58_spill] sm:$0xff]  ;;  %v12064_v19 = vld [vmem:[#allocation11_spill] sm:$0xff] }
 0x2a2   :  { %v6323_v57 = vpop.f32.mrf.mxu1  ;;  %v11358_v25 = vadd.f32 %v6162_v26, %v5874_v42  ;;  %v5879_v42 = vadd.f32 %v12061_v12, %v12060_v49  ;;  %v4780_v12 = vrot.slane %v11228_v21, 1  ;;  %v5882_v37 = vadd.f32 %v12064_v19, %v12063_v13  ;;  %v12066_v49 = vld [vmem:[#allocation34_spill] sm:$0xff] }
 0x2a3   :  { %v11361_v33 = vadd.f32 %v6323_v57, %v12059_v63  ;;  %v6164_v45 = vpop.f32.mrf.mxu0  ;;  %v2042_v57 = vld [vmem:[#allocation2 + $0x15c] sm:$0xe]  ;;  %v4546_v34 = vshll.u32 %v11368_v32, 16  ;;  %v4544_v13 = vshrl.u32 %v11368_v32, 16 }
 0x2a4   :  { %12058 = vst [vmem:[#allocation72_spill] sm:$0xff] %v11358_v25  ;;  %v6325_v46 = vpop.f32.mrf.mxu1  ;;  %v11380_v63 = vld [vmem:[#allocation2 + $0x19c] sm:$0xf]  ;;  %v2043_v45 = vld [vmem:[#allocation2 + $0x168] sm:$0xe]  ;;  %v7733_v48 = vcombine.low %v2042_v57, %v11235_v1 }
 0x2a5   :  { %v6167_v26 = vpop.f32.mrf.mxu0  ;;  %8451 = vmatmul.mubr.bf16.gmra.mxu0 %v4772_v51  ;;  %v11382_v51 = vld [vmem:[#allocation2 + $0x194] ss:$0 sps:$4 sm:$0x11]   ;;  %v11390_v21 = vcombine.low %v1981_v4, %v11380_v63  ;;  %v4548_v19 = vrot.slane %v4546_v34, 1  ;;  %v7734_v1 = vcombine.low %v2043_v45, %v11258_v17  ;;  %v12068_v57 = vld [vmem:[#allocation14_spill] sm:$0xff]  ;;  %v4783_v34 = vrot.slane %v11260_v5, 1 }
 0x2a6   :  { %v6328_v25 = vpop.f32.mrf.mxu1  ;;  %6519 = vmatmul.mubr.bf16.gmra.mxu1 %v11266_v44  ;;  %v11374_v55 = vadd.f32 %v6167_v26, %v5879_v42  ;;  %8454 = vmatprep.mubr.bf16.mxu0 %v4775_v50  ;;  %v4542_v26 = vsel %vm2337_vm5, %v4537_v47, %v4541_v53  ;;  %v11405_v47 = vld [vmem:[#allocation2 + $0x1a0] ss:$0 sps:$4 sm:$0x11]   ;;  %v4782_v17 = vrot.slane %v7733_v48, 1  ;;  %v2044_v45 = vld [vmem:[#allocation2 + $0x174] sm:$0xe] }
 0x2a7   :  { %v11377_v59 = vadd.f32 %v6328_v25, %v12062_v30  ;;  %6526 = vmatprep.mubr.bf16.mxu1 %v4530_v3  ;;  %v6169_v44 = vpop.f32.mrf.mxu0  ;;  %v4778_v3 = vsel %vm2850_vm10, %v4776_v18, %v4777_v58  ;;  %v4781_v30 = vsel %vm2850_vm10, %v4779_v8, %v4780_v12  ;;  %v4551_v18 = vshll.u32 %v11382_v51, 16  ;;  %v12067_v58 = vld [vmem:[#allocation59_spill] sm:$0xff] }
 0x2a8   :  { %v6330_v10 = vpop.f32.mrf.mxu1  ;;  %v5887_v4 = vadd.f32 %v12068_v57, %v12067_v58  ;;  %v4558_v53 = vshll.u32 %v11390_v21, 16  ;;  %v2045_v58 = vld [vmem:[#allocation2 + $0x180] sm:$0xe]  ;;  %v7735_v48 = vcombine.low %v2044_v45, %v11290_v36  ;;  %v4556_v5 = vshrl.u32 %v11390_v21, 16 }
 0x2a9   :  { %v6170_v25 = vpop.f32.mrf.mxu0  ;;  %v12070_v57 = vld [vmem:[#allocation61_spill] sm:$0xff] }
 0x2aa   :  { %v6331_v46 = vpop.f32.mrf.mxu1  ;;  %v11392_v50 = vadd.f32 %v6170_v25, %v5882_v37 }
 0x2ab   :  { %v11395_v42 = vadd.f32 %v6331_v46, %v12066_v49  ;;  %v6172_v44 = vpop.f32.mrf.mxu0 }
 0x2ac   :  { %12065 = vst [vmem:[#allocation74_spill] sm:$0xff] %v11392_v50  ;;  %v6333_v10 = vpop.f32.mrf.mxu1  ;;  %v4549_v44 = vor.u32 %v4548_v19, %v4544_v13  ;;  %v1983_v50 = vld [vmem:[#allocation2 + $0x1a4] sm:$0xf]  ;;  %v4563_v13 = vshll.u32 %v11405_v47, 16 }
 0x2ad   :  { %v6175_v37 = vpop.f32.mrf.mxu0  ;;  %8455 = vmatmul.mubr.bf16.gmra.mxu0 %v4778_v3  ;;  %v4785_v3 = vrot.slane %v7734_v1, 1  ;;  %v4786_v10 = vrot.slane %v11282_v20, 1  ;;  %v4784_v1 = vsel %vm2850_vm10, %v4782_v17, %v4783_v34  ;;  %v4788_v17 = vrot.slane %v7735_v48, 1 }
 0x2ae   :  { %v6336_v25 = vpop.f32.mrf.mxu1  ;;  %6527 = vmatmul.mubr.bf16.gmra.mxu1 %v11303_v41  ;;  %v11408_v8 = vadd.f32 %v6175_v37, %v5887_v4  ;;  %8458 = vmatprep.mubr.bf16.mxu0 %v4781_v30  ;;  %v4553_v41 = vrot.slane %v4551_v18, 1  ;;  %v12071_v4 = vld [vmem:[#allocation35_spill] sm:$0xff]  ;;  %v12073_v18 = vld [vmem:[#allocation46_spill] sm:$0xff] }
 0x2af   :  { %v11411_v12 = vadd.f32 %v6336_v25, %v10958_v54  ;;  %6534 = vmatprep.mubr.bf16.mxu1 %v4542_v26  ;;  %v6177_v46 = vpop.f32.mrf.mxu0  ;;  %v5890_v37 = vadd.f32 %v12071_v4, %v12070_v57  ;;  %v11417_v54 = vld [vmem:[#allocation2 + $0x1a8] sm:$0xf]  ;;  %v4560_v25 = vrot.slane %v4558_v53, 1  ;;  %v4787_v36 = vsel %vm2850_vm10, %v4785_v3, %v4786_v10  ;;  %v12074_v53 = vld [vmem:[#allocation63_spill] sm:$0xff]  ;;  %v2046_v3 = vld [vmem:[#allocation2 + $0x18c] sm:$0xe] }
 0x2b0   :  { %12069 = vst [vmem:[#allocation54_spill] sm:$0xff] %v11408_v8  ;;  %v6338_v49 = vpop.f32.mrf.mxu1  ;;  %v7736_v46 = vcombine.low %v2045_v58, %v11316_v24  ;;  %v4554_v4 = vsel %vm2337_vm5, %v4549_v44, %v4553_v41  ;;  %v11432_v45 = vcombine.low %v1983_v50, %v11417_v54  ;;  %v12075_v8 = vld [vmem:[#allocation16_spill] sm:$0xff]  ;;  %v4789_v24 = vrot.slane %v11318_v43, 1  ;;  %v12077_v43 = vld [vmem:[#allocation65_spill] sm:$0xff] }
 0x2b1   :  { %v6178_v26 = vpop.f32.mrf.mxu0  ;;  %v4561_v34 = vor.u32 %v4560_v25, %v4556_v5  ;;  %v4565_v58 = vrot.slane %v4563_v13, 1  ;;  %v12076_v44 = vld [vmem:[#allocation36_spill] sm:$0xff]  ;;  %v12078_v5 = vld [vmem:[#allocation18_spill] sm:$0xff] }
 0x2b2   :  { %v6339_v30 = vpop.f32.mrf.mxu1  ;;  %v11422_v19 = vadd.f32 %v6178_v26, %v5890_v37  ;;  %v5895_v37 = vadd.f32 %v12075_v8, %v12074_v53  ;;  %v4791_v50 = vrot.slane %v7736_v46, 1  ;;  %v4792_v8 = vrot.slane %v11341_v15, 1  ;;  %v2047_v13 = vld [vmem:[#allocation2 + $0x198] sm:$0xe]  ;;  %v12079_v15 = vld [vmem:[#allocation37_spill] sm:$0xff] }
 0x2b3   :  { %v11425_v20 = vadd.f32 %v6339_v30, %v12073_v18  ;;  %v6180_v49 = vpop.f32.mrf.mxu0  ;;  %v4570_v48 = vshll.u32 %v11432_v45, 16  ;;  %v5898_v25 = vadd.f32 %v12078_v5, %v12077_v43 }
 0x2b4   :  { %12072 = vst [vmem:[#allocation3_spill] sm:$0xff] %v11422_v19  ;;  %v6341_v57 = vpop.f32.mrf.mxu1  ;;  %v4793_v53 = vsel %vm2850_vm10, %v4791_v50, %v4792_v8 }
 0x2b5   :  { %v6183_v26 = vpop.f32.mrf.mxu0  ;;  %8459 = vmatmul.mubr.bf16.gmra.mxu0 %v4784_v1  ;;  %v7737_v57 = vcombine.low %v2046_v3, %v11353_v22  ;;  %v12081_v22 = vld [vmem:[#allocation49_spill] sm:$0xff] }
 0x2b6   :  { %v6344_v19 = vpop.f32.mrf.mxu1  ;;  %6535 = vmatmul.mubr.bf16.gmra.mxu1 %v11326_v29  ;;  %v11438_v30 = vadd.f32 %v6183_v26, %v5895_v37  ;;  %8462 = vmatprep.mubr.bf16.mxu0 %v4787_v36  ;;  %v11444_v29 = vld [vmem:[#allocation2 + $0x1ac] ss:$0 sps:$4 sm:$0x11]   ;;  %v4566_v36 = vsel %vm2337_vm5, %v4561_v34, %v4565_v58  ;;  %v12082_v58 = vld [vmem:[#allocation19_spill] sm:$0xff] }
 0x2b7   :  { %v11441_v41 = vadd.f32 %v6344_v19, %v12076_v44  ;;  %6542 = vmatprep.mubr.bf16.mxu1 %v4554_v4  ;;  %v6185_v10 = vpop.f32.mrf.mxu0  ;;  %v4790_v19 = vsel %vm2850_vm10, %v4788_v17, %v4789_v24  ;;  %v4568_v44 = vshrl.u32 %v11432_v45, 16  ;;  %v7738_v17 = vcombine.low %v2047_v13, %v11380_v63  ;;  %v12080_v24 = vld [vmem:[#allocation67_spill] sm:$0xff] }
 0x2b8   :  { %v6346_v18 = vpop.f32.mrf.mxu1  ;;  %v4572_v10 = vrot.slane %v4570_v48, 1  ;;  %v5903_v3 = vadd.f32 %v12081_v22, %v12080_v24  ;;  %v4794_v8 = vrot.slane %v7737_v57, 1  ;;  %v4795_v48 = vrot.slane %v11382_v51, 1 }
 0x2b9   :  { %v6186_v1 = vpop.f32.mrf.mxu0  ;;  %v4575_v18 = vshll.u32 %v11444_v29, 16 }
 0x2ba   :  { %v6347_v49 = vpop.f32.mrf.mxu1  ;;  %v11451_v46 = vadd.f32 %v6186_v1, %v5898_v25  ;;  %v4573_v13 = vor.u32 %v4572_v10, %v4568_v44  ;;  %v4796_v51 = vsel %vm2850_vm10, %v4794_v8, %v4795_v48 }
 0x2bb   :  { %v11454_v4 = vadd.f32 %v6347_v49, %v12079_v15  ;;  %v6188_v37 = vpop.f32.mrf.mxu0  ;;  %v4577_v1 = vrot.slane %v4575_v18, 1  ;;  %v4797_v49 = vrot.slane %v7738_v17, 1  ;;  %v4798_v15 = vrot.slane %v11405_v47, 1 }
 0x2bc   :  { %v6349_v26 = vpop.f32.mrf.mxu1  ;;  %v2048_v37 = vld [vmem:[#allocation2 + $0x1a4] sm:$0xe] }
 0x2bd   :  { %v6191_v43 = vpop.f32.mrf.mxu0  ;;  %8463 = vmatmul.mubr.bf16.gmra.mxu0 %v4790_v19  ;;  %v12084_v19 = vld [vmem:[#allocation38_spill] sm:$0xff]  ;;  %v7739_v57 = vcombine.low %v2048_v37, %v11417_v54  ;;  %v4578_v10 = vsel %vm2337_vm5, %v4573_v13, %v4577_v1  ;;  %v4799_v47 = vsel %vm2850_vm10, %v4797_v49, %v4798_v15 }
 0x2be   :  { %v6352_v5 = vpop.f32.mrf.mxu1  ;;  %6543 = vmatmul.mubr.bf16.gmra.mxu1 %v11368_v32  ;;  %v11464_v34 = vadd.f32 %v6191_v43, %v5903_v3  ;;  %8466 = vmatprep.mubr.bf16.mxu0 %v4793_v53  ;;  %v12083_v32 = vld [vmem:[#allocation68_spill] sm:$0xff] }
 0x2bf   :  { %v11467_v50 = vadd.f32 %v6352_v5, %v12082_v58  ;;  %6550 = vmatprep.mubr.bf16.mxu1 %v4566_v36  ;;  %v6193_v25 = vpop.f32.mrf.mxu0  ;;  %v5906_v26 = vadd.f32 %v12084_v19, %v12083_v32  ;;  %v4800_v54 = vrot.slane %v7739_v57, 1  ;;  %v4801_v5 = vrot.slane %v11444_v29, 1  ;;  %v12085_v19 = vld [vmem:[#allocation22_spill] sm:$0xff] }
 0x2c0   :  { %v6354_v63 = vpop.f32.mrf.mxu1 }
 0x2c1   :  { %v6194_v24 = vpop.f32.mrf.mxu0 }
 0x2c2   :  { %v6355_v22 = vpop.f32.mrf.mxu1  ;;  %v11473_v3 = vadd.f32 %v6194_v24, %v5906_v26  ;;  %v12086_v24 = vld [vmem:[#allocation39_spill] sm:$0xff] }
 0x2c3   :  { %v11476_v36 = vadd.f32 %v6355_v22, %v11030_v6  ;;  %v6196_v53 = vpop.f32.mrf.mxu0 }
 0x2c4   :  { %v6357_v44 = vpop.f32.mrf.mxu1  ;;  %v12088_v53 = vld [vmem:[#allocation23_spill] sm:$0xff] }
 0x2c5   :  { %v6199_v18 = vpop.f32.mrf.mxu0  ;;  %8467 = vmatmul.mubr.bf16.gmra.mxu0 %v4796_v51 }
 0x2c6   :  { %v6360_v17 = vpop.f32.mrf.mxu1  ;;  %6551 = vmatmul.mubr.bf16.gmra.mxu1 %v11390_v21  ;;  %v11484_v43 = vadd.f32 %v6199_v18, %v11042_v62  ;;  %8470 = vmatprep.mubr.bf16.mxu0 %v4799_v47  ;;  %v4802_v62 = vsel %vm2850_vm10, %v4800_v54, %v4801_v5  ;;  %v12091_v5 = vld [vmem:[#allocation6_spill] sm:$0xff] }
 0x2c7   :  { %v11487_v6 = vadd.f32 %v6360_v17, %v11044_v52  ;;  %6558 = vmatprep.mubr.bf16.mxu1 %v4578_v10  ;;  %v6201_v58 = vpop.f32.mrf.mxu0 }
 0x2c8   :  { %v6362_v8 = vpop.f32.mrf.mxu1  ;;  %v12092_v58 = vld [vmem:[#allocation26_spill] sm:$0xff] }
 0x2c9   :  { %v6202_v48 = vpop.f32.mrf.mxu0  ;;  %v5930_v8 = vadd.f32 %v12092_v58, %v12091_v5 }
 0x2ca   :  { %v6363_v25 = vpop.f32.mrf.mxu1  ;;  %v11491_v63 = vadd.f32 %v6202_v48, %v11056_v28 }
 0x2cb   :  { %v11494_v21 = vadd.f32 %v6363_v25, %v11058_v38  ;;  %v6204_v13 = vpop.f32.mrf.mxu0 }
 0x2cc   :  { %v6365_v52 = vpop.f32.mrf.mxu1  ;;  %v12094_v13 = vld [vmem:[#allocation41_spill] sm:$0xff] }
 0x2cd   :  { %v6207_v1 = vpop.f32.mrf.mxu0  ;;  %8471 = vmatmul.mubr.bf16.gmra.mxu0 %v4802_v62 }
 0x2ce   :  { %v6368_v49 = vpop.f32.mrf.mxu1  ;;  %6559 = vmatmul.mubr.bf16.gmra.mxu1 %v11432_v45  ;;  %v11499_v29 = vadd.f32 %v6207_v1, %v11069_v23  ;;  %v12087_v45 = vld [vmem:[#allocation4_spill] sm:$0xff] }
 0x2cf   :  { %v11502_v15 = vadd.f32 %v6368_v49, %v11071_v7  ;;  %v6209_v28 = vpop.f32.mrf.mxu0  ;;  %v5927_v44 = vadd.f32 %v12088_v53, %v12087_v45  ;;  %v12090_v7 = vld [vmem:[#allocation40_spill] sm:$0xff] }
 0x2d0   :  { %v6370_v37 = vpop.f32.mrf.mxu1  ;;  %v12095_v28 = vld [vmem:[#allocation8_spill] sm:$0xff] }
 0x2d1   :  { %v6210_v32 = vpop.f32.mrf.mxu0  ;;  %v12096_v37 = vld [vmem:[#allocation27_spill] sm:$0xff] }
 0x2d2   :  { %v6371_v38 = vpop.f32.mrf.mxu1  ;;  %v11505_v26 = vadd.f32 %v6210_v32, %v12085_v19  ;;  %v5935_v32 = vadd.f32 %v12096_v37, %v12095_v28 }
 0x2d3   :  { %v11508_v22 = vadd.f32 %v6371_v38, %v12086_v24  ;;  %v6212_v51 = vpop.f32.mrf.mxu0 }
 0x2d4   :  { %v6373_v57 = vpop.f32.mrf.mxu1  ;;  %v12098_v51 = vld [vmem:[#allocation42_spill] sm:$0xff] }
 0x2d5   :  { %v6215_v23 = vpop.f32.mrf.mxu0 }
 0x2d6   :  { %v6376_v10 = vpop.f32.mrf.mxu1  ;;  %v11512_v47 = vadd.f32 %v6215_v23, %v5927_v44  ;;  %v12099_v44 = vld [vmem:[#allocation10_spill] sm:$0xff] }
 0x2d7   :  { %v11515_v18 = vadd.f32 %v6376_v10, %v12090_v7  ;;  %v6217_v17 = vpop.f32.mrf.mxu0  ;;  %v12100_v23 = vld [vmem:[#allocation30_spill] sm:$0xff] }
 0x2d8   :  { %12089 = vst [vmem:[#allocation75_spill] sm:$0xff] %v11512_v47  ;;  %v6378_v54 = vpop.f32.mrf.mxu1  ;;  %v5938_v10 = vadd.f32 %v12100_v23, %v12099_v44 }
 0x2d9   :  { %v6218_v48 = vpop.f32.mrf.mxu0 }
 0x2da   :  { %v6379_v25 = vpop.f32.mrf.mxu1  ;;  %v11519_v62 = vadd.f32 %v6218_v48, %v5930_v8  ;;  %v12102_v48 = vld [vmem:[#allocation12_spill] sm:$0xff] }
 0x2db   :  { %v11522_v52 = vadd.f32 %v6379_v25, %v12094_v13  ;;  %v6220_v1 = vpop.f32.mrf.mxu0  ;;  %v5943_v25 = vadd.f32 %v11141_v9, %v12102_v48 }
 0x2dc   :  { %12093 = vst [vmem:[#allocation55_spill] sm:$0xff] %v11519_v62  ;;  %v6381_v49 = vpop.f32.mrf.mxu1 }
 0x2dd   :  { %v6223_v38 = vpop.f32.mrf.mxu0 }
 0x2de   :  { %v6384_v19 = vpop.f32.mrf.mxu1  ;;  %v11526_v24 = vadd.f32 %v6223_v38, %v5935_v32  ;;  %v12104_v38 = vld [vmem:[#allocation13_spill] sm:$0xff] }
 0x2df   :  { %v11529_v57 = vadd.f32 %v6384_v19, %v12098_v51  ;;  %v6225_v45 = vpop.f32.mrf.mxu0  ;;  %v12105_v19 = vld [vmem:[#allocation44_spill] sm:$0xff] }
 0x2e0   :  { %12097 = vst [vmem:[#allocation5_spill] sm:$0xff] %v11526_v24  ;;  %v6386_v53 = vpop.f32.mrf.mxu1  ;;  %v5946_v51 = vadd.f32 %v12105_v19, %v12104_v38 }
 0x2e1   :  { %v6226_v7 = vpop.f32.mrf.mxu0 }
 0x2e2   :  { %v6387_v17 = vpop.f32.mrf.mxu1  ;;  %v11533_v54 = vadd.f32 %v6226_v7, %v5938_v10  ;;  %v12107_v10 = vld [vmem:[#allocation15_spill] sm:$0xff] }
 0x2e3   :  { %v11536_v5 = vadd.f32 %v6387_v17, %v11132_v56  ;;  %v6228_v58 = vpop.f32.mrf.mxu0  ;;  %v5951_v7 = vadd.f32 %v11168_v27, %v12107_v10 }
 0x2e4   :  { %12101 = vst [vmem:[#allocation76_spill] sm:$0xff] %v11533_v54  ;;  %v6389_v8 = vpop.f32.mrf.mxu1 }
 0x2e5   :  { %v6231_v13 = vpop.f32.mrf.mxu0 }
 0x2e6   :  { %v6392_v1 = vpop.f32.mrf.mxu1  ;;  %v11540_v49 = vadd.f32 %v6231_v13, %v5943_v25  ;;  %v12109_v13 = vld [vmem:[#allocation17_spill] sm:$0xff] }
 0x2e7   :  { %v11543_v28 = vadd.f32 %v6392_v1, %v11145_v35  ;;  %v6233_v37 = vpop.f32.mrf.mxu0  ;;  %v5954_v1 = vadd.f32 %v11181_v0, %v12109_v13 }
 0x2e8   :  { %12103 = vst [vmem:[#allocation56_spill] sm:$0xff] %v11540_v49  ;;  %v6394_v32 = vpop.f32.mrf.mxu1 }
 0x2e9   :  { %v6234_v45 = vpop.f32.mrf.mxu0 }
 0x2ea   :  { %v6395_v56 = vpop.f32.mrf.mxu1  ;;  %v11547_v53 = vadd.f32 %v6234_v45, %v5946_v51  ;;  %v12111_v51 = vld [vmem:[#allocation20_spill] sm:$0xff] }
 0x2eb   :  { %v11550_v44 = vadd.f32 %v6395_v56, %v11160_v40  ;;  %v6236_v9 = vpop.f32.mrf.mxu0  ;;  %v5959_v45 = vadd.f32 %v11196_v14, %v12111_v51  ;;  %v12118_v51 = vld [vmem:[#allocation45_spill] sm:$0xff] }
 0x2ec   :  { %12106 = vst [vmem:[#allocation7_spill] sm:$0xff] %v11547_v53  ;;  %v6397_v23 = vpop.f32.mrf.mxu1 }
 0x2ed   :  { %v6239_v17 = vpop.f32.mrf.mxu0 }
 0x2ee   :  { %v6400_v35 = vpop.f32.mrf.mxu1  ;;  %v11554_v58 = vadd.f32 %v6239_v17, %v5951_v7  ;;  %v12113_v7 = vld [vmem:[#allocation21_spill] sm:$0xff] }
 0x2ef   :  { %v11557_v8 = vadd.f32 %v6400_v35, %v11173_v60  ;;  %v6241_v48 = vpop.f32.mrf.mxu0  ;;  %v5962_v17 = vadd.f32 %v11209_v31, %v12113_v7 }
 0x2f0   :  { %12108 = vst [vmem:[#allocation77_spill] sm:$0xff] %v11554_v58  ;;  %v6402_v25 = vpop.f32.mrf.mxu1 }
 0x2f1   :  { %v6242_v37 = vpop.f32.mrf.mxu0 }
 0x2f2   :  { %v6403_v40 = vpop.f32.mrf.mxu1  ;;  %v11561_v32 = vadd.f32 %v6242_v37, %v5954_v1  ;;  %v12115_v1 = vld [vmem:[#allocation24_spill] sm:$0xff]  ;;  %v12116_v37 = vld [vmem:[#allocation31_spill] sm:$0xff] }
 0x2f3   :  { %v11564_v38 = vadd.f32 %v6403_v40, %v11186_v11  ;;  %v6244_v27 = vpop.f32.mrf.mxu0  ;;  %v5967_v40 = vadd.f32 %v12116_v37, %v12115_v1  ;;  %v12123_v1 = vld [vmem:[#allocation28_spill] sm:$0xff]  ;;  %v12124_v37 = vld [vmem:[#allocation50_spill] sm:$0xff] }
 0x2f4   :  { %12110 = vst [vmem:[#allocation57_spill] sm:$0xff] %v11561_v32  ;;  %v6405_v19 = vpop.f32.mrf.mxu1 }
 0x2f5   :  { %v6247_v56 = vpop.f32.mrf.mxu0 }
 0x2f6   :  { %v6408_v60 = vpop.f32.mrf.mxu1  ;;  %v11568_v9 = vadd.f32 %v6247_v56, %v5959_v45 }
 0x2f7   :  { %v11571_v23 = vadd.f32 %v6408_v60, %v11201_v16  ;;  %v6249_v0 = vpop.f32.mrf.mxu0  ;;  %v12119_v60 = vld [vmem:[#allocation25_spill] sm:$0xff] }
 0x2f8   :  { %12112 = vst [vmem:[#allocation9_spill] sm:$0xff] %v11568_v9  ;;  %v6410_v10 = vpop.f32.mrf.mxu1  ;;  %v12120_v0 = vld [vmem:[#allocation47_spill] sm:$0xff]  ;;  %v12137_v9 = vld [vmem:[#allocation69_spill] sm:$0xff] }
 0x2f9   :  { %v6250_v35 = vpop.f32.mrf.mxu0  ;;  %v5970_v10 = vadd.f32 %v12120_v0, %v12119_v60 }
 0x2fa   :  { %v6411_v11 = vpop.f32.mrf.mxu1  ;;  %v11575_v48 = vadd.f32 %v6250_v35, %v5962_v17  ;;  %v12122_v35 = vld [vmem:[#allocation48_spill] sm:$0xff] }
 0x2fb   :  { %v11578_v25 = vadd.f32 %v6411_v11, %v11214_v61  ;;  %v6252_v14 = vpop.f32.mrf.mxu0 }
 0x2fc   :  { %12114 = vst [vmem:[#allocation43_spill] sm:$0xff] %v11575_v48  ;;  %v6413_v13 = vpop.f32.mrf.mxu1  ;;  %v12127_v48 = vld [vmem:[#allocation29_spill] sm:$0xff] }
 0x2fd   :  { %v6255_v27 = vpop.f32.mrf.mxu0 }
 0x2fe   :  { %v6416_v16 = vpop.f32.mrf.mxu1  ;;  %v11582_v19 = vadd.f32 %v6255_v27, %v5967_v40  ;;  %v5975_v40 = vadd.f32 %v12124_v37, %v12123_v1 }
 0x2ff   :  { %v11585_v45 = vadd.f32 %v6416_v16, %v12118_v51  ;;  %v6257_v31 = vpop.f32.mrf.mxu0 }
 0x300   :  { %12117 = vst [vmem:[#allocation58_spill] sm:$0xff] %v11582_v19  ;;  %v6418_v56 = vpop.f32.mrf.mxu1  ;;  %v12126_v31 = vld [vmem:[#allocation60_spill] sm:$0xff] }
 0x301   :  { %v6258_v7 = vpop.f32.mrf.mxu0  ;;  %v12131_v19 = vld [vmem:[#allocation32_spill] sm:$0xff] }
 0x302   :  { %v6419_v61 = vpop.f32.mrf.mxu1  ;;  %v11589_v17 = vadd.f32 %v6258_v7, %v5970_v10  ;;  %v12128_v10 = vld [vmem:[#allocation62_spill] sm:$0xff] }
 0x303   :  { %v11592_v11 = vadd.f32 %v6419_v61, %v12122_v35  ;;  %v6260_v14 = vpop.f32.mrf.mxu0  ;;  %v5978_v7 = vadd.f32 %v12128_v10, %v12127_v48  ;;  %v12134_v10 = vld [vmem:[#allocation33_spill] sm:$0xff] }
 0x304   :  { %12121 = vst [vmem:[#allocation11_spill] sm:$0xff] %v11589_v17  ;;  %v6421_v13 = vpop.f32.mrf.mxu1  ;;  %v12130_v14 = vld [vmem:[#allocation64_spill] sm:$0xff] }
 0x305   :  { %v6263_v27 = vpop.f32.mrf.mxu0 }
 0x306   :  { %v6424_v16 = vpop.f32.mrf.mxu1  ;;  %v11596_v51 = vadd.f32 %v6263_v27, %v5975_v40  ;;  %v12132_v40 = vld [vmem:[#allocation66_spill] sm:$0xff] }
 0x307   :  { %v11599_v56 = vadd.f32 %v6424_v16, %v12126_v31  ;;  %v6265_v60 = vpop.f32.mrf.mxu0  ;;  %v5983_v27 = vadd.f32 %v12132_v40, %v12131_v19 }
 0x308   :  { %12125 = vst [vmem:[#allocation34_spill] sm:$0xff] %v11596_v51  ;;  %v6426_v0 = vpop.f32.mrf.mxu1 }
 0x309   :  { %v6266_v17 = vpop.f32.mrf.mxu0 }
 0x30a   :  { %v6427_v61 = vpop.f32.mrf.mxu1  ;;  %v11603_v35 = vadd.f32 %v6266_v17, %v5978_v7  ;;  %v12135_v17 = vld [vmem:[#allocation51_spill] sm:$0xff] }
 0x30b   :  { %v11606_v13 = vadd.f32 %v6427_v61, %v12130_v14  ;;  %v6268_v1 = vpop.f32.mrf.mxu0  ;;  %v5986_v7 = vadd.f32 %v12135_v17, %v12134_v10  ;;  %v12139_v17 = vld [vmem:[#allocation71_spill] sm:$0xff] }
 0x30c   :  { %12129 = vst [vmem:[#allocation59_spill] sm:$0xff] %v11603_v35  ;;  %v6429_v37 = vpop.f32.mrf.mxu1 }
 0x30d   :  { %v6271_v51 = vpop.f32.mrf.mxu0 }
 0x30e   :  { %v6432_v16 = vpop.f32.mrf.mxu1  ;;  %v11610_v31 = vadd.f32 %v6271_v51, %v5983_v27 }
 0x30f   :  { %v11613_v60 = vadd.f32 %v6432_v16, %v11285_v39  ;;  %v6273_v48 = vpop.f32.mrf.mxu0 }
 0x310   :  { %12133 = vst [vmem:[#allocation14_spill] sm:$0xff] %v11610_v31  ;;  %v6434_v0 = vpop.f32.mrf.mxu1  ;;  %v12138_v31 = vld [vmem:[#allocation52_spill] sm:$0xff] }
 0x311   :  { %v6274_v35 = vpop.f32.mrf.mxu0 }
 0x312   :  { %v11617_v61 = vpop.f32.mrf.mxu1  ;;  %v11619_v14 = vadd.f32 %v6274_v35, %v5986_v7 }
 0x313   :  { %v6276_v1 = vpop.f32.mrf.mxu0 }
 0x314   :  { %12136 = vst [vmem:[#allocation61_spill] sm:$0xff] %v11619_v14  ;;  %v6437_v37 = vpop.f32.mrf.mxu1  ;;  %v12140_v14 = vld [vmem:[#allocation53_spill] sm:$0xff] }
 0x315   :  { %v8412_v40 = vpop.f32.mrf.mxu0 }
 0x316   :  { %v6440_v19 = vpop.f32.mrf.mxu1  ;;  %v6610_v0 = vadd.f32 %v8412_v40, %v11347_v2 }
 0x317   :  { %v11622_v51 = vadd.f32 %v6440_v19, %v12137_v9  ;;  %v6601_v39 = vpop.f32.mrf.mxu0 }
 0x318   :  { %v6442_v27 = vpop.f32.mrf.mxu1  ;;  %v6602_v10 = vadd.f32 %v6601_v39, %v12138_v31 }
 0x319   :  { %v8413_v48 = vpop.f32.mrf.mxu0 }
 0x31a   :  { %v6443_v16 = vpop.f32.mrf.mxu1  ;;  %v6613_v35 = vadd.f32 %v8413_v48, %v11361_v33  ;;  %v7246_v27 = vmul.f32 %v6602_v10, %v6602_v10 }
 0x31b   :  { %v11627_v53 = vadd.f32 %v6443_v16, %v12139_v17  ;;  %v6604_v1 = vpop.f32.mrf.mxu0  ;;  %v7248_v17 = vmul.f32 %v6610_v0, %v6610_v0 }
 0x31c   :  { %v6445_v7 = vpop.f32.mrf.mxu1  ;;  %v8140_v37 = vpack.c.bf16 %v6613_v35, %v6610_v0  ;;  %v6605_v32 = vadd.f32 %v6604_v1, %v12140_v14  ;;  %v7249_v58 = vmul.f32 %v6613_v35, %v6613_v35 }
 0x31d   :  { %v8416_v19 = vpop.f32.mrf.mxu0 }
 0x31e   :  { %v11631_v9 = vpop.f32.mrf.mxu1  ;;  %8323 = vst [vmem:[%s11868_s5 + $0x8] sm:$0xff] %v8140_v37   ;;  %v8135_v2 = vpack.c.bf16 %v6605_v32, %v6602_v10  ;;  %v7176_v31 = vadd.f32 %v6605_v32, %v6602_v10  ;;  %v7247_v40 = vmul.f32 %v6605_v32, %v6605_v32  ;;  %v6626_v10 = vadd.f32 %v8416_v19, %v11411_v12 }
 0x31f   :  { %v6617_v16 = vpop.f32.mrf.mxu0 }
 0x320   :  { %v6450_v39 = vpop.f32.mrf.mxu1  ;;  %8136 = vst [vmem:[%s11868_s5] sm:$0xff] %v8135_v2   ;;  %v7177_v33 = vadd.f32 %v7176_v31, %v6610_v0  ;;  %v7310_v14 = vadd.f32 %v7247_v40, %v7246_v27  ;;  %v6618_v48 = vadd.f32 %v6617_v16, %v11377_v59 }
 0x321   :  { %v8417_v1 = vpop.f32.mrf.mxu0 }
 0x322   :  { %v11640_v7 = vpop.f32.mrf.mxu1  ;;  %v7311_v49 = vadd.f32 %v7310_v14, %v7248_v17  ;;  %v7178_v37 = vadd.f32 %v7177_v33, %v6613_v35  ;;  %v6629_v32 = vadd.f32 %v8417_v1, %v11425_v20  ;;  %v7250_v24 = vmul.f32 %v6618_v48, %v6618_v48 }
 0x323   :  { %v6620_v62 = vpop.f32.mrf.mxu0  ;;  %v7252_v35 = vmul.f32 %v6626_v10, %v6626_v10 }
 0x324   :  { %v6453_v39 = vpop.f32.mrf.mxu1  ;;  %v7179_v54 = vadd.f32 %v7178_v37, %v6618_v48  ;;  %v7312_v47 = vadd.f32 %v7311_v49, %v7249_v58  ;;  %v6621_v0 = vadd.f32 %v6620_v62, %v11395_v42  ;;  %v8150_v27 = vpack.c.bf16 %v6629_v32, %v6626_v10 }
 0x325   :  { %v8420_v59 = vpop.f32.mrf.mxu0 }
 0x326   :  { %v11645_v2 = vpop.f32.mrf.mxu1  ;;  %v7313_v31 = vadd.f32 %v7312_v47, %v7250_v24  ;;  %v8145_v40 = vpack.c.bf16 %v6621_v0, %v6618_v48  ;;  %v7180_v16 = vadd.f32 %v7179_v54, %v6621_v0  ;;  %v7251_v17 = vmul.f32 %v6621_v0, %v6621_v0  ;;  %8325 = vst [vmem:[%s11868_s5 + $0x18] sm:$0xff] %v8150_v27  }
 0x327   :  { %v6633_v20 = vpop.f32.mrf.mxu0  ;;  %v7253_v24 = vmul.f32 %v6629_v32, %v6629_v32  ;;  %v6642_v33 = vadd.f32 %v8420_v59, %v11467_v50 }
 0x328   :  { %v6458_v12 = vpop.f32.mrf.mxu1  ;;  %8324 = vst [vmem:[%s11868_s5 + $0x10] sm:$0xff] %v8145_v40   ;;  %v7181_v42 = vadd.f32 %v7180_v16, %v6626_v10  ;;  %v7314_v62 = vadd.f32 %v7313_v31, %v7251_v17  ;;  %v6634_v49 = vadd.f32 %v6633_v20, %v11441_v41 }
 0x329   :  { %v8421_v47 = vpop.f32.mrf.mxu0 }
 0x32a   :  { %v11654_v58 = vpop.f32.mrf.mxu1  ;;  %v7315_v54 = vadd.f32 %v7314_v62, %v7252_v35  ;;  %v7182_v19 = vadd.f32 %v7181_v42, %v6629_v32  ;;  %v6645_v14 = vadd.f32 %v8421_v47, %v11476_v36  ;;  %v7254_v39 = vmul.f32 %v6634_v49, %v6634_v49 }
 0x32b   :  { %v6636_v1 = vpop.f32.mrf.mxu0  ;;  %v7256_v32 = vmul.f32 %v6642_v33, %v6642_v33 }
 0x32c   :  { %v6461_v48 = vpop.f32.mrf.mxu1  ;;  %v7183_v37 = vadd.f32 %v7182_v19, %v6634_v49  ;;  %v7316_v0 = vadd.f32 %v7315_v54, %v7253_v24  ;;  %v6637_v10 = vadd.f32 %v6636_v1, %v11454_v4  ;;  %v8160_v27 = vpack.c.bf16 %v6645_v14, %v6642_v33 }
 0x32d   :  { %v8424_v41 = vpop.f32.mrf.mxu0  ;;  %v7257_v62 = vmul.f32 %v6645_v14, %v6645_v14 }
 0x32e   :  { %v11659_v31 = vpop.f32.mrf.mxu1  ;;  %v7317_v40 = vadd.f32 %v7316_v0, %v7254_v39  ;;  %v8155_v16 = vpack.c.bf16 %v6637_v10, %v6634_v49  ;;  %v7184_v17 = vadd.f32 %v7183_v37, %v6637_v10  ;;  %v7255_v12 = vmul.f32 %v6637_v10, %v6637_v10  ;;  %8327 = vst [vmem:[%s11868_s5 + $0x28] sm:$0xff] %v8160_v27  }
 0x32f   :  { %v6649_v36 = vpop.f32.mrf.mxu0  ;;  %v6658_v24 = vadd.f32 %v8424_v41, %v11502_v15 }
 0x330   :  { %v6466_v50 = vpop.f32.mrf.mxu1  ;;  %8326 = vst [vmem:[%s11868_s5 + $0x20] sm:$0xff] %v8155_v16   ;;  %v7185_v4 = vadd.f32 %v7184_v17, %v6642_v33  ;;  %v7318_v59 = vadd.f32 %v7317_v40, %v7255_v12  ;;  %v6650_v20 = vadd.f32 %v6649_v36, %v11487_v6 }
 0x331   :  { %v8425_v42 = vpop.f32.mrf.mxu0 }
 0x332   :  { %v11668_v35 = vpop.f32.mrf.mxu1  ;;  %v7319_v49 = vadd.f32 %v7318_v59, %v7256_v32  ;;  %v7186_v47 = vadd.f32 %v7185_v4, %v6645_v14  ;;  %v6661_v54 = vadd.f32 %v8425_v42, %v11508_v22  ;;  %v7258_v37 = vmul.f32 %v6650_v20, %v6650_v20 }
 0x333   :  { %v6652_v48 = vpop.f32.mrf.mxu0  ;;  %v7260_v14 = vmul.f32 %v6658_v24, %v6658_v24 }
 0x334   :  { %v6469_v19 = vpop.f32.mrf.mxu1  ;;  %v7187_v1 = vadd.f32 %v7186_v47, %v6650_v20  ;;  %v7320_v39 = vadd.f32 %v7319_v49, %v7257_v62  ;;  %v6653_v33 = vadd.f32 %v6652_v48, %v11494_v21  ;;  %v8170_v0 = vpack.c.bf16 %v6661_v54, %v6658_v24 }
 0x335   :  { %v8428_v6 = vpop.f32.mrf.mxu0  ;;  %v7261_v32 = vmul.f32 %v6661_v54, %v6661_v54 }
 0x336   :  { %v11673_v10 = vpop.f32.mrf.mxu1  ;;  %v7321_v27 = vadd.f32 %v7320_v39, %v7258_v37  ;;  %v8165_v40 = vpack.c.bf16 %v6653_v33, %v6650_v20  ;;  %v7188_v16 = vadd.f32 %v7187_v1, %v6653_v33  ;;  %v7259_v17 = vmul.f32 %v6653_v33, %v6653_v33  ;;  %8329 = vst [vmem:[%s11868_s5 + $0x38] sm:$0xff] %v8170_v0  }
 0x337   :  { %v6665_v22 = vpop.f32.mrf.mxu0  ;;  %v6674_v20 = vadd.f32 %v8428_v6, %v11529_v57 }
 0x338   :  { %v6474_v15 = vpop.f32.mrf.mxu1  ;;  %8328 = vst [vmem:[%s11868_s5 + $0x30] sm:$0xff] %v8165_v40   ;;  %v7189_v21 = vadd.f32 %v7188_v16, %v6658_v24  ;;  %v7322_v41 = vadd.f32 %v7321_v27, %v7259_v17  ;;  %v6666_v12 = vadd.f32 %v6665_v22, %v11515_v18 }
 0x339   :  { %v8429_v36 = vpop.f32.mrf.mxu0 }
 0x33a   :  { %v11682_v50 = vpop.f32.mrf.mxu1  ;;  %v7323_v4 = vadd.f32 %v7322_v41, %v7260_v14  ;;  %v7190_v59 = vadd.f32 %v7189_v21, %v6661_v54  ;;  %v6677_v42 = vadd.f32 %v8429_v36, %v11536_v5  ;;  %v7262_v19 = vmul.f32 %v6666_v12, %v6666_v12 }
 0x33b   :  { %v6668_v49 = vpop.f32.mrf.mxu0  ;;  %v7264_v54 = vmul.f32 %v6674_v20, %v6674_v20 }
 0x33c   :  { %v6477_v62 = vpop.f32.mrf.mxu1  ;;  %v7191_v47 = vadd.f32 %v7190_v59, %v6666_v12  ;;  %v7324_v48 = vadd.f32 %v7323_v4, %v7261_v32  ;;  %v6669_v24 = vadd.f32 %v6668_v49, %v11522_v52  ;;  %v8180_v1 = vpack.c.bf16 %v6677_v42, %v6674_v20 }
 0x33d   :  { %v8432_v18 = vpop.f32.mrf.mxu0  ;;  %v7265_v15 = vmul.f32 %v6677_v42, %v6677_v42 }
 0x33e   :  { %v11687_v37 = vpop.f32.mrf.mxu1  ;;  %v7325_v39 = vadd.f32 %v7324_v48, %v7262_v19  ;;  %v8175_v33 = vpack.c.bf16 %v6669_v24, %v6666_v12  ;;  %v7192_v0 = vadd.f32 %v7191_v47, %v6669_v24  ;;  %v7263_v27 = vmul.f32 %v6669_v24, %v6669_v24  ;;  %8331 = vst [vmem:[%s11868_s5 + $0x48] sm:$0xff] %v8180_v1  }
 0x33f   :  { %v6681_v5 = vpop.f32.mrf.mxu0  ;;  %v6690_v21 = vadd.f32 %v8432_v18, %v11557_v8 }
 0x340   :  { %v6482_v57 = vpop.f32.mrf.mxu1  ;;  %8330 = vst [vmem:[%s11868_s5 + $0x40] sm:$0xff] %v8175_v33   ;;  %v7193_v52 = vadd.f32 %v7192_v0, %v6674_v20  ;;  %v7326_v6 = vadd.f32 %v7325_v39, %v7263_v27  ;;  %v6682_v40 = vadd.f32 %v6681_v5, %v11543_v28 }
 0x341   :  { %v8433_v17 = vpop.f32.mrf.mxu0 }
 0x342   :  { %v11696_v16 = vpop.f32.mrf.mxu1  ;;  %v7327_v22 = vadd.f32 %v7326_v6, %v7264_v54  ;;  %v7194_v14 = vadd.f32 %v7193_v52, %v6677_v42  ;;  %v6693_v41 = vadd.f32 %v8433_v17, %v11564_v38  ;;  %v7266_v4 = vmul.f32 %v6682_v40, %v6682_v40 }
 0x343   :  { %v6684_v36 = vpop.f32.mrf.mxu0  ;;  %v7268_v42 = vmul.f32 %v6690_v21, %v6690_v21 }
 0x344   :  { %v6485_v12 = vpop.f32.mrf.mxu1  ;;  %v7195_v32 = vadd.f32 %v7194_v14, %v6682_v40  ;;  %v7328_v59 = vadd.f32 %v7327_v22, %v7265_v15  ;;  %v6685_v20 = vadd.f32 %v6684_v36, %v11550_v44  ;;  %v8190_v62 = vpack.c.bf16 %v6693_v41, %v6690_v21 }
 0x345   :  { %v8436_v28 = vpop.f32.mrf.mxu0  ;;  %v7269_v0 = vmul.f32 %v6693_v41, %v6693_v41 }
 0x346   :  { %v11701_v49 = vpop.f32.mrf.mxu1  ;;  %v7329_v47 = vadd.f32 %v7328_v59, %v7266_v4  ;;  %v8185_v19 = vpack.c.bf16 %v6685_v20, %v6682_v40  ;;  %v7196_v48 = vadd.f32 %v7195_v32, %v6685_v20  ;;  %v7267_v24 = vmul.f32 %v6685_v20, %v6685_v20  ;;  %8333 = vst [vmem:[%s11868_s5 + $0x58] sm:$0xff] %v8190_v62   ;;  %v12141_v62 = vld [vmem:[#allocation70_spill] sm:$0xff] }
 0x347   :  { %v6697_v38 = vpop.f32.mrf.mxu0  ;;  %v6706_v5 = vadd.f32 %v8436_v28, %v11585_v45  ;;  %v6436_v28 = vadd.f32 %v11617_v61, %v12141_v62 }
 0x348   :  { %v6490_v8 = vpop.f32.mrf.mxu1  ;;  %8332 = vst [vmem:[%s11868_s5 + $0x50] sm:$0xff] %v8185_v19   ;;  %v7197_v44 = vadd.f32 %v7196_v48, %v6690_v21  ;;  %v7330_v1 = vadd.f32 %v7329_v47, %v7267_v24  ;;  %v6698_v18 = vadd.f32 %v6697_v38, %v11571_v23 }
 0x349   :  { %v8437_v33 = vpop.f32.mrf.mxu0 }
 0x34a   :  { %v11710_v39 = vpop.f32.mrf.mxu1  ;;  %v7331_v27 = vadd.f32 %v7330_v1, %v7268_v42  ;;  %v7198_v57 = vadd.f32 %v7197_v44, %v6693_v41  ;;  %v6709_v54 = vadd.f32 %v8437_v33, %v11592_v11  ;;  %v7270_v17 = vmul.f32 %v6698_v18, %v6698_v18 }
 0x34b   :  { %v6700_v6 = vpop.f32.mrf.mxu0  ;;  %v7272_v41 = vmul.f32 %v6706_v5, %v6706_v5 }
 0x34c   :  { %v6493_v52 = vpop.f32.mrf.mxu1  ;;  %v7199_v40 = vadd.f32 %v7198_v57, %v6698_v18  ;;  %v7332_v15 = vadd.f32 %v7331_v27, %v7269_v0  ;;  %v6701_v22 = vadd.f32 %v6700_v6, %v11578_v25  ;;  %v8200_v14 = vpack.c.bf16 %v6709_v54, %v6706_v5 }
 0x34d   :  { %v8440_v23 = vpop.f32.mrf.mxu0  ;;  %v7273_v48 = vmul.f32 %v6709_v54, %v6709_v54 }
 0x34e   :  { %v11715_v21 = vpop.f32.mrf.mxu1  ;;  %v7333_v12 = vadd.f32 %v7332_v15, %v7270_v17  ;;  %v8195_v36 = vpack.c.bf16 %v6701_v22, %v6698_v18  ;;  %v7200_v32 = vadd.f32 %v7199_v40, %v6701_v22  ;;  %v7271_v4 = vmul.f32 %v6701_v22, %v6701_v22  ;;  %8335 = vst [vmem:[%s11868_s5 + $0x68] sm:$0xff] %v8200_v14   ;;  %v12142_v14 = vld [vmem:[#allocation73_spill] sm:$0xff] }
 0x34f   :  { %v6713_v11 = vpop.f32.mrf.mxu0  ;;  %v6722_v38 = vadd.f32 %v8440_v23, %v11613_v60  ;;  %v6449_v23 = vadd.f32 %v11631_v9, %v12142_v14  ;;  %v6457_v9 = vadd.f32 %v11645_v2, %v11374_v55 }
 0x350   :  { %v6498_v45 = vpop.f32.mrf.mxu1  ;;  %8334 = vst [vmem:[%s11868_s5 + $0x60] sm:$0xff] %v8195_v36   ;;  %v7201_v25 = vadd.f32 %v7200_v32, %v6706_v5  ;;  %v7334_v59 = vadd.f32 %v7333_v12, %v7271_v4  ;;  %v6714_v20 = vadd.f32 %v6713_v11, %v11599_v56  ;;  %v12143_v12 = vld [vmem:[#allocation72_spill] sm:$0xff] }
 0x351   :  { %v8441_v19 = vpop.f32.mrf.mxu0  ;;  %v7276_v17 = vmul.f32 %v6722_v38, %v6722_v38  ;;  %v6452_v36 = vadd.f32 %v11640_v7, %v12143_v12 }
 0x352   :  { %v11726_v47 = vpop.f32.mrf.mxu1  ;;  %v7335_v24 = vadd.f32 %v7334_v59, %v7272_v41  ;;  %v7202_v8 = vadd.f32 %v7201_v25, %v6709_v54  ;;  %v6725_v42 = vadd.f32 %v8441_v19, %v6436_v28  ;;  %v7274_v33 = vmul.f32 %v6714_v20, %v6714_v20 }
 0x353   :  { %v6716_v1 = vpop.f32.mrf.mxu0 }
 0x354   :  { %v6501_v44 = vpop.f32.mrf.mxu1  ;;  %v7203_v18 = vadd.f32 %v7202_v8, %v6714_v20  ;;  %v7336_v0 = vadd.f32 %v7335_v24, %v7273_v48  ;;  %v6717_v27 = vadd.f32 %v6716_v1, %v11606_v13  ;;  %v8210_v56 = vpack.c.bf16 %v6725_v42, %v6722_v38 }
 0x355   :  { %v8444_v61 = vpop.f32.mrf.mxu0  ;;  %v7277_v45 = vmul.f32 %v6725_v42, %v6725_v42 }
 0x356   :  { %v11730_v57 = vpop.f32.mrf.mxu1  ;;  %v7337_v5 = vadd.f32 %v7336_v0, %v7274_v33  ;;  %v8205_v52 = vpack.c.bf16 %v6717_v27, %v6714_v20  ;;  %v7204_v6 = vadd.f32 %v7203_v18, %v6717_v27  ;;  %v7275_v40 = vmul.f32 %v6717_v27, %v6717_v27  ;;  %8337 = vst [vmem:[%s11868_s5 + $0x78] sm:$0xff] %v8210_v56   ;;  %v12144_v27 = vld [vmem:[#allocation54_spill] sm:$0xff] }
 0x357   :  { %v6729_v54 = vpop.f32.mrf.mxu0  ;;  %v6738_v25 = vadd.f32 %v8444_v61, %v6449_v23  ;;  %v6465_v56 = vadd.f32 %v11659_v31, %v12144_v27  ;;  %v12145_v61 = vld [vmem:[#allocation3_spill] sm:$0xff] }
 0x358   :  { %v6506_v60 = vpop.f32.mrf.mxu1  ;;  %8336 = vst [vmem:[%s11868_s5 + $0x70] sm:$0xff] %v8205_v52   ;;  %v7205_v13 = vadd.f32 %v7204_v6, %v6722_v38  ;;  %v7338_v15 = vadd.f32 %v7337_v5, %v7275_v40  ;;  %v6730_v22 = vadd.f32 %v6729_v54, %v11622_v51  ;;  %v6468_v5 = vadd.f32 %v11668_v35, %v12145_v61  ;;  %v12146_v40 = vld [vmem:[#allocation74_spill] sm:$0xff] }
 0x359   :  { %v8445_v4 = vpop.f32.mrf.mxu0  ;;  %v7280_v0 = vmul.f32 %v6738_v25, %v6738_v25  ;;  %v6460_v60 = vadd.f32 %v11654_v58, %v12146_v40  ;;  %v6473_v35 = vadd.f32 %v11673_v10, %v11438_v30 }
 0x35a   :  { %v11743_v32 = vpop.f32.mrf.mxu1  ;;  %v7339_v11 = vadd.f32 %v7338_v15, %v7276_v17  ;;  %v7206_v41 = vadd.f32 %v7205_v13, %v6725_v42  ;;  %v6741_v59 = vadd.f32 %v8445_v4, %v6452_v36  ;;  %v7278_v19 = vmul.f32 %v6730_v22, %v6730_v22 }
 0x35b   :  { %v6732_v62 = vpop.f32.mrf.mxu0 }
 0x35c   :  { %v6509_v20 = vpop.f32.mrf.mxu1  ;;  %v7207_v28 = vadd.f32 %v7206_v41, %v6730_v22  ;;  %v7340_v48 = vadd.f32 %v7339_v11, %v7277_v45  ;;  %v6733_v51 = vadd.f32 %v6732_v62, %v11627_v53  ;;  %v8220_v24 = vpack.c.bf16 %v6741_v59, %v6738_v25 }
 0x35d   :  { %v8448_v8 = vpop.f32.mrf.mxu0  ;;  %v7281_v54 = vmul.f32 %v6741_v59, %v6741_v59 }
 0x35e   :  { %v11748_v7 = vpop.f32.mrf.mxu1  ;;  %v7341_v38 = vadd.f32 %v7340_v48, %v7278_v19  ;;  %v8215_v44 = vpack.c.bf16 %v6733_v51, %v6730_v22  ;;  %v7208_v1 = vadd.f32 %v7207_v28, %v6733_v51  ;;  %v7279_v42 = vmul.f32 %v6733_v51, %v6733_v51  ;;  %8339 = vst [vmem:[%s11868_s5 + $0x88] sm:$0xff] %v8220_v24  }
 0x35f   :  { %v6745_v33 = vpop.f32.mrf.mxu0  ;;  %v6754_v15 = vadd.f32 %v8448_v8, %v6465_v56  ;;  %v6481_v51 = vadd.f32 %v11687_v37, %v11464_v34 }
 0x360   :  { %v6514_v18 = vpop.f32.mrf.mxu1  ;;  %8338 = vst [vmem:[%s11868_s5 + $0x80] sm:$0xff] %v8215_v44   ;;  %v7209_v55 = vadd.f32 %v7208_v1, %v6738_v25  ;;  %v7342_v53 = vadd.f32 %v7341_v38, %v7279_v42  ;;  %v6746_v2 = vadd.f32 %v6745_v33, %v6457_v9  ;;  %v6484_v9 = vadd.f32 %v11696_v16, %v11473_v3 }
 0x361   :  { %v8449_v6 = vpop.f32.mrf.mxu0  ;;  %v7284_v19 = vmul.f32 %v6754_v15, %v6754_v15  ;;  %v6476_v38 = vadd.f32 %v11682_v50, %v11451_v46  ;;  %v6489_v3 = vadd.f32 %v11701_v49, %v11484_v43 }
 0x362   :  { %v11760_v52 = vpop.f32.mrf.mxu1  ;;  %v7343_v17 = vadd.f32 %v7342_v53, %v7280_v0  ;;  %v7210_v13 = vadd.f32 %v7209_v55, %v6741_v59  ;;  %v6757_v22 = vadd.f32 %v8449_v6, %v6468_v5  ;;  %v7282_v36 = vmul.f32 %v6746_v2, %v6746_v2 }
 0x363   :  { %v6748_v23 = vpop.f32.mrf.mxu0 }
 0x364   :  { %v6517_v14 = vpop.f32.mrf.mxu1  ;;  %v7211_v12 = vadd.f32 %v7210_v13, %v6746_v2  ;;  %v7344_v4 = vadd.f32 %v7343_v17, %v7281_v54  ;;  %v6749_v31 = vadd.f32 %v6748_v23, %v6460_v60  ;;  %v8230_v45 = vpack.c.bf16 %v6757_v22, %v6754_v15 }
 0x365   :  { %v8452_v41 = vpop.f32.mrf.mxu0  ;;  %v7285_v44 = vmul.f32 %v6757_v22, %v6757_v22  ;;  %v6497_v17 = vadd.f32 %v11715_v21, %v11499_v29  ;;  %v6500_v13 = vadd.f32 %v11726_v47, %v11505_v26  ;;  %v6492_v14 = vadd.f32 %v11710_v39, %v11491_v63  ;;  %v12147_v21 = vld [vmem:[#allocation75_spill] sm:$0xff] }
 0x366   :  { %v11766_v11 = vpop.f32.mrf.mxu1  ;;  %v7345_v25 = vadd.f32 %v7344_v4, %v7282_v36  ;;  %v8225_v58 = vpack.c.bf16 %v6749_v31, %v6746_v2  ;;  %v7212_v20 = vadd.f32 %v7211_v12, %v6749_v31  ;;  %v7283_v62 = vmul.f32 %v6749_v31, %v6749_v31  ;;  %8341 = vst [vmem:[%s11868_s5 + $0x98] sm:$0xff] %v8230_v45  }
 0x367   :  { %v6761_v28 = vpop.f32.mrf.mxu0  ;;  %v6770_v18 = vadd.f32 %v8452_v41, %v6481_v51  ;;  %v6505_v26 = vadd.f32 %v11730_v57, %v12147_v21 }
 0x368   :  { %v6522_v59 = vpop.f32.mrf.mxu1  ;;  %8340 = vst [vmem:[%s11868_s5 + $0x90] sm:$0xff] %v8225_v58   ;;  %v7213_v30 = vadd.f32 %v7212_v20, %v6754_v15  ;;  %v7346_v10 = vadd.f32 %v7345_v25, %v7283_v62  ;;  %v6762_v48 = vadd.f32 %v6761_v28, %v6473_v35 }
 0x369   :  { %v8453_v8 = vpop.f32.mrf.mxu0  ;;  %v7288_v60 = vmul.f32 %v6770_v18, %v6770_v18 }
 0x36a   :  { %v11778_v24 = vpop.f32.mrf.mxu1  ;;  %v7347_v1 = vadd.f32 %v7346_v10, %v7284_v19  ;;  %v7214_v42 = vadd.f32 %v7213_v30, %v6757_v22  ;;  %v6773_v33 = vadd.f32 %v8453_v8, %v6484_v9  ;;  %v7286_v2 = vmul.f32 %v6762_v48, %v6762_v48  ;;  %v12148_v9 = vld [vmem:[#allocation5_spill] sm:$0xff] }
 0x36b   :  { %v6764_v55 = vpop.f32.mrf.mxu0  ;;  %v6513_v8 = vadd.f32 %v11748_v7, %v12148_v9 }
 0x36c   :  { %v6525_v0 = vpop.f32.mrf.mxu1  ;;  %v7215_v53 = vadd.f32 %v7214_v42, %v6762_v48  ;;  %v7348_v27 = vadd.f32 %v7347_v1, %v7285_v44  ;;  %v6765_v34 = vadd.f32 %v6764_v55, %v6476_v38  ;;  %v8240_v37 = vpack.c.bf16 %v6773_v33, %v6770_v18  ;;  %v12149_v38 = vld [vmem:[#allocation76_spill] sm:$0xff] }
 0x36d   :  { %v8456_v56 = vpop.f32.mrf.mxu0  ;;  %v7289_v23 = vmul.f32 %v6773_v33, %v6773_v33  ;;  %v6516_v44 = vadd.f32 %v11760_v52, %v12149_v38 }
 0x36e   :  { %v11784_v16 = vpop.f32.mrf.mxu1  ;;  %v7349_v61 = vadd.f32 %v7348_v27, %v7286_v2  ;;  %v8235_v46 = vpack.c.bf16 %v6765_v34, %v6762_v48  ;;  %v7216_v50 = vadd.f32 %v7215_v53, %v6765_v34  ;;  %v7287_v5 = vmul.f32 %v6765_v34, %v6765_v34  ;;  %8343 = vst [vmem:[%s11868_s5 + $0xa8] sm:$0xff] %v8240_v37  }
 0x36f   :  { %v6777_v40 = vpop.f32.mrf.mxu0  ;;  %v6786_v4 = vadd.f32 %v8456_v56, %v6497_v17 }
 0x370   :  { %v6530_v6 = vpop.f32.mrf.mxu1  ;;  %8342 = vst [vmem:[%s11868_s5 + $0xa0] sm:$0xff] %v8235_v46   ;;  %v7217_v43 = vadd.f32 %v7216_v50, %v6770_v18  ;;  %v7350_v49 = vadd.f32 %v7349_v61, %v7287_v5  ;;  %v6778_v54 = vadd.f32 %v6777_v40, %v6489_v3  ;;  %v12150_v18 = vld [vmem:[#allocation55_spill] sm:$0xff]  ;;  %v12151_v46 = vld [vmem:[#allocation56_spill] sm:$0xff] }
 0x371   :  { %v8457_v22 = vpop.f32.mrf.mxu0  ;;  %v7292_v10 = vmul.f32 %v6786_v4, %v6786_v4  ;;  %v6521_v52 = vadd.f32 %v11766_v11, %v12151_v46 }
 0x372   :  { %v11796_v15 = vpop.f32.mrf.mxu1  ;;  %v7351_v12 = vadd.f32 %v7350_v49, %v7288_v60  ;;  %v7218_v36 = vadd.f32 %v7217_v43, %v6773_v33  ;;  %v6789_v31 = vadd.f32 %v8457_v22, %v6500_v13  ;;  %v7290_v25 = vmul.f32 %v6778_v54, %v6778_v54 }
 0x373   :  { %v6780_v45 = vpop.f32.mrf.mxu0  ;;  %v6508_v33 = vadd.f32 %v11743_v32, %v12150_v18 }
 0x374   :  { %v6533_v35 = vpop.f32.mrf.mxu1  ;;  %v7219_v41 = vadd.f32 %v7218_v36, %v6778_v54  ;;  %v7352_v58 = vadd.f32 %v7351_v12, %v7289_v23  ;;  %v6781_v29 = vadd.f32 %v6780_v45, %v6492_v14  ;;  %v8250_v47 = vpack.c.bf16 %v6789_v31, %v6786_v4  ;;  %v12152_v14 = vld [vmem:[#allocation77_spill] sm:$0xff] }
 0x375   :  { %v8460_v62 = vpop.f32.mrf.mxu0  ;;  %v7293_v0 = vmul.f32 %v6789_v31, %v6789_v31  ;;  %v6529_v23 = vadd.f32 %v11784_v16, %v12152_v14  ;;  %v12153_v12 = vld [vmem:[#allocation57_spill] sm:$0xff]  ;;  %v12154_v35 = vld [vmem:[#allocation7_spill] sm:$0xff] }
 0x376   :  { %v6536_v20 = vpop.f32.mrf.mxu1  ;;  %v7353_v59 = vadd.f32 %v7352_v58, %v7290_v25  ;;  %v8245_v28 = vpack.c.bf16 %v6781_v29, %v6778_v54  ;;  %v7220_v63 = vadd.f32 %v7219_v41, %v6781_v29  ;;  %v7291_v39 = vmul.f32 %v6781_v29, %v6781_v29  ;;  %8345 = vst [vmem:[%s11868_s5 + $0xb8] sm:$0xff] %v8250_v47   ;;  %v12155_v16 = vld [vmem:[#allocation9_spill] sm:$0xff] }
 0x377   :  { %v6793_v30 = vpop.f32.mrf.mxu0  ;;  %v6802_v2 = vadd.f32 %v8460_v62, %v6513_v8  ;;  %v6532_v36 = vadd.f32 %v11796_v15, %v12153_v12  ;;  %v6524_v45 = vadd.f32 %v11778_v24, %v12154_v35  ;;  %v12161_v35 = vld [vmem:[#allocation59_spill] sm:$0xff] }
 0x378   :  { %v6538_v19 = vpop.f32.mrf.mxu1  ;;  %8344 = vst [vmem:[%s11868_s5 + $0xb0] sm:$0xff] %v8245_v28   ;;  %v7221_v48 = vadd.f32 %v7220_v63, %v6786_v4  ;;  %v7354_v57 = vadd.f32 %v7353_v59, %v7291_v39  ;;  %v6794_v51 = vadd.f32 %v6793_v30, %v6505_v26  ;;  %v6537_v39 = vadd.f32 %v6536_v20, %v12155_v16 }
 0x379   :  { %v8461_v42 = vpop.f32.mrf.mxu0  ;;  %v7296_v17 = vmul.f32 %v6802_v2, %v6802_v2 }
 0x37a   :  { %v11812_v1 = vpop.f32.mrf.mxu1  ;;  %v7355_v55 = vadd.f32 %v7354_v57, %v7292_v10  ;;  %v7222_v53 = vadd.f32 %v7221_v48, %v6789_v31  ;;  %v6805_v27 = vadd.f32 %v8461_v42, %v6516_v44  ;;  %v7294_v56 = vmul.f32 %v6794_v51, %v6794_v51  ;;  %v12156_v42 = vld [vmem:[#allocation58_spill] sm:$0xff] }
 0x37b   :  { %v6796_v3 = vpop.f32.mrf.mxu0 }
 0x37c   :  { %v6541_v34 = vpop.f32.mrf.mxu1  ;;  %v7223_v37 = vadd.f32 %v7222_v53, %v6794_v51  ;;  %v7356_v61 = vadd.f32 %v7355_v55, %v7293_v0  ;;  %v6797_v7 = vadd.f32 %v6796_v3, %v6508_v33  ;;  %v8260_v50 = vpack.c.bf16 %v6805_v27, %v6802_v2  ;;  %v12157_v33 = vld [vmem:[#allocation11_spill] sm:$0xff] }
 0x37d   :  { %v8464_v6 = vpop.f32.mrf.mxu0  ;;  %v7297_v41 = vmul.f32 %v6805_v27, %v6805_v27 }
 0x37e   :  { %v6544_v5 = vpop.f32.mrf.mxu1  ;;  %v7357_v40 = vadd.f32 %v7356_v61, %v7294_v56  ;;  %v8255_v60 = vpack.c.bf16 %v6797_v7, %v6794_v51  ;;  %v7224_v32 = vadd.f32 %v7223_v37, %v6797_v7  ;;  %v7295_v43 = vmul.f32 %v6797_v7, %v6797_v7  ;;  %8347 = vst [vmem:[%s11868_s5 + $0xc8] sm:$0xff] %v8260_v50  }
 0x37f   :  { %v6809_v54 = vpop.f32.mrf.mxu0  ;;  %v6818_v29 = vadd.f32 %v8464_v6, %v6529_v23  ;;  %v6545_v18 = vadd.f32 %v6544_v5, %v12156_v42 }
 0x380   :  { %v6546_v49 = vpop.f32.mrf.mxu1  ;;  %8346 = vst [vmem:[%s11868_s5 + $0xc0] sm:$0xff] %v8255_v60   ;;  %v7225_v13 = vadd.f32 %v7224_v32, %v6802_v2  ;;  %v7358_v11 = vadd.f32 %v7357_v40, %v7295_v43  ;;  %v6810_v22 = vadd.f32 %v6809_v54, %v6521_v52  ;;  %v12158_v2 = vld [vmem:[#allocation43_spill] sm:$0xff]  ;;  %v12159_v60 = vld [vmem:[#allocation34_spill] sm:$0xff] }
 0x381   :  { %v8465_v31 = vpop.f32.mrf.mxu0  ;;  %v7300_v8 = vmul.f32 %v6818_v29, %v6818_v29 }
 0x382   :  { %v6547_v4 = vpop.f32.mrf.mxu1  ;;  %v7359_v25 = vadd.f32 %v7358_v11, %v7296_v17  ;;  %v7226_v58 = vadd.f32 %v7225_v13, %v6805_v27  ;;  %v6821_v21 = vadd.f32 %v8465_v31, %v6532_v36  ;;  %v7298_v59 = vmul.f32 %v6810_v22, %v6810_v22  ;;  %v12160_v11 = vld [vmem:[#allocation14_spill] sm:$0xff] }
 0x383   :  { %v6812_v47 = vpop.f32.mrf.mxu0  ;;  %v6548_v0 = vadd.f32 %v6547_v4, %v12157_v33  ;;  %v6540_v27 = vadd.f32 %v11812_v1, %v12158_v2 }
 0x384   :  { %v6549_v26 = vpop.f32.mrf.mxu1  ;;  %v7227_v62 = vadd.f32 %v7226_v58, %v6810_v22  ;;  %v7360_v28 = vadd.f32 %v7359_v25, %v7297_v41  ;;  %v6813_v63 = vadd.f32 %v6812_v47, %v6524_v45  ;;  %v8270_v19 = vpack.c.bf16 %v6821_v21, %v6818_v29 }
 0x385   :  { %v8468_v30 = vpop.f32.mrf.mxu0  ;;  %v7301_v34 = vmul.f32 %v6821_v21, %v6821_v21  ;;  %v12162_v26 = vld [vmem:[#allocation61_spill] sm:$0xff] }
 0x386   :  { %v6552_v15 = vpop.f32.mrf.mxu1  ;;  %v7361_v10 = vadd.f32 %v7360_v28, %v7298_v59  ;;  %v8265_v48 = vpack.c.bf16 %v6813_v63, %v6810_v22  ;;  %v7228_v57 = vadd.f32 %v7227_v62, %v6813_v63  ;;  %v7299_v24 = vmul.f32 %v6813_v63, %v6813_v63  ;;  %8349 = vst [vmem:[%s11868_s5 + $0xd8] sm:$0xff] %v8270_v19  }
 0x387   :  { %v6825_v9 = vpop.f32.mrf.mxu0  ;;  %v6834_v56 = vadd.f32 %v8468_v30, %v6545_v18  ;;  %v6553_v5 = vadd.f32 %v6552_v15, %v12159_v60 }
 0x388   :  { %v6554_v51 = vpop.f32.mrf.mxu1  ;;  %8348 = vst [vmem:[%s11868_s5 + $0xd0] sm:$0xff] %v8265_v48   ;;  %v7229_v38 = vadd.f32 %v7228_v57, %v6818_v29  ;;  %v7362_v20 = vadd.f32 %v7361_v10, %v7299_v24  ;;  %v6826_v44 = vadd.f32 %v6825_v9, %v6537_v39 }
 0x389   :  { %v8469_v53 = vpop.f32.mrf.mxu0  ;;  %v7304_v12 = vmul.f32 %v6834_v56, %v6834_v56 }
 0x38a   :  { %v6555_v55 = vpop.f32.mrf.mxu1  ;;  %v7363_v3 = vadd.f32 %v7362_v20, %v7300_v8  ;;  %v7230_v37 = vadd.f32 %v7229_v38, %v6821_v21  ;;  %v6837_v61 = vadd.f32 %v8469_v53, %v6548_v0  ;;  %v7302_v50 = vmul.f32 %v6826_v44, %v6826_v44 }
 0x38b   :  { %v6828_v46 = vpop.f32.mrf.mxu0  ;;  %v6556_v45 = vadd.f32 %v6555_v55, %v12161_v35 }
 0x38c   :  { %v6557_v7 = vpop.f32.mrf.mxu1  ;;  %v7231_v52 = vadd.f32 %v7230_v37, %v6826_v44  ;;  %v7364_v6 = vadd.f32 %v7363_v3, %v7301_v34  ;;  %v6829_v40 = vadd.f32 %v6828_v46, %v6540_v27  ;;  %v8280_v32 = vpack.c.bf16 %v6837_v61, %v6834_v56 }
 0x38d   :  { %v8472_v49 = vpop.f32.mrf.mxu0  ;;  %v7305_v58 = vmul.f32 %v6837_v61, %v6837_v61 }
 0x38e   :  { %v6560_v43 = vpop.f32.mrf.mxu1  ;;  %v7365_v54 = vadd.f32 %v7364_v6, %v7302_v50  ;;  %v8275_v17 = vpack.c.bf16 %v6829_v40, %v6826_v44  ;;  %v7232_v13 = vadd.f32 %v7231_v52, %v6829_v40  ;;  %v7303_v1 = vmul.f32 %v6829_v40, %v6829_v40  ;;  %8351 = vst [vmem:[%s11868_s5 + $0xe8] sm:$0xff] %v8280_v32  }
 0x38f   :  { %v6561_v22 = vadd.f32 %v6560_v43, %v12160_v11  ;;  %v6841_v23 = vpop.f32.mrf.mxu0 }
 0x390   :  { %v6562_v14 = vpop.f32.mrf.mxu1  ;;  %8350 = vst [vmem:[%s11868_s5 + $0xe0] sm:$0xff] %v8275_v17   ;;  %v7233_v36 = vadd.f32 %v7232_v13, %v6834_v56  ;;  %v7366_v4 = vadd.f32 %v7365_v54, %v7303_v1  ;;  %v6842_v31 = vadd.f32 %v6841_v23, %v6553_v5 }
 0x391   :  { %v8473_v25 = vpop.f32.mrf.mxu0  ;;  %v6850_v62 = vadd.f32 %v8472_v49, %v6561_v22 }
 0x392   :  { %v6563_v41 = vpop.f32.mrf.mxu1  ;;  %v7367_v29 = vadd.f32 %v7366_v4, %v7304_v12  ;;  %v7234_v21 = vadd.f32 %v7233_v36, %v6837_v61  ;;  %v7306_v59 = vmul.f32 %v6842_v31, %v6842_v31 }
 0x393   :  { %v6564_v47 = vadd.f32 %v6563_v41, %v12162_v26  ;;  %v6844_v63 = vpop.f32.mrf.mxu0  ;;  %v7308_v51 = vmul.f32 %v6850_v62, %v6850_v62 }
 0x394   :  { %v6565_v28 = vpop.f32.mrf.mxu1  ;;  %v7235_v16 = vadd.f32 %v7234_v21, %v6842_v31  ;;  %v7368_v39 = vadd.f32 %v7367_v29, %v7305_v58  ;;  %v6845_v15 = vadd.f32 %v6844_v63, %v6556_v45 }
 0x395   :  { %v6853_v19 = vadd.f32 %v8473_v25, %v6564_v47 }
 0x396   :  { %v7369_v30 = vadd.f32 %v7368_v39, %v7306_v59  ;;  %v8285_v48 = vpack.c.bf16 %v6845_v15, %v6842_v31  ;;  %v7236_v57 = vadd.f32 %v7235_v16, %v6845_v15  ;;  %v7307_v24 = vmul.f32 %v6845_v15, %v6845_v15 }
 0x397   :  { %v8290_v10 = vpack.c.bf16 %v6853_v19, %v6850_v62  ;;  %v7309_v38 = vmul.f32 %v6853_v19, %v6853_v19 }
 0x398   :  { %8352 = vst [vmem:[%s11868_s5 + $0xf0] sm:$0xff] %v8285_v48   ;;  %v7237_v9 = vadd.f32 %v7236_v57, %v6850_v62  ;;  %v7370_v8 = vadd.f32 %v7369_v30, %v7307_v24 }
 0x399   :  { %8353 = vst [vmem:[%s11868_s5 + $0xf8] sm:$0xff] %v8290_v10  }
 0x39a   :  { %v7238_v20 = vadd.f32 %v7237_v9, %v6853_v19  ;;  %v7371_v44 = vadd.f32 %v7370_v8, %v7308_v51 }
 0x39c   :  { %v7239_v42 = vrot.slane %v7238_v20, 4  ;;  %v7372_v18 = vadd.f32 %v7371_v44, %v7309_v38 }
 0x39e   :  { %v7240_v33 = vadd.f32 %v7239_v42, %v7238_v20  ;;  %v7373_v0 = vrot.slane %v7372_v18, 4 }
 0x3a0   :  { %v7241_v55 = vrot.slane %v7240_v33, 2  ;;  %v7374_v53 = vadd.f32 %v7373_v0, %v7372_v18 }
 0x3a2   :  { %v7242_v2 = vadd.f32 %v7241_v55, %v7240_v33  ;;  %v7375_v27 = vrot.slane %v7374_v53, 2 }
 0x3a4   :  { %v7243_v34 = vrot.slane %v7242_v2, 1  ;;  %v7376_v3 = vadd.f32 %v7375_v27, %v7374_v53 }
 0x3a6   :  { %v7244_v37 = vadd.f32 %v7243_v34, %v7242_v2  ;;  %v7377_v56 = vrot.slane %v7376_v3, 1 }
 0x3a8   :  { %7245 = vst [vmem:[%s11869_s6] sm:$0x1] %v7244_v37  ;;  %v7378_v61 = vadd.f32 %v7377_v56, %v7376_v3 }
 0x3aa   :  { %7379 = vst [vmem:[%s11869_s6 + $0x1] sm:$0x1] %v7378_v61 }

</bundles_post_ra>
